<compile_context>
chip_gen: v7x
topology: tpu7x:2x2x1
jax: 0.10.0
libtpu: 0.0.40
codegen_flags: <defaults>
</compile_context>

<pallas_src>
import functools

import jax
import jax.numpy as jnp
from jax import lax
from jax.experimental import pallas as pl
from jax.experimental.pallas import tpu as pltpu

EPS = 1e-5
KSIZE = 4
STRIDE = 2
LANE = 128


# --------------------------- compiler parameters ----------------------------

@functools.lru_cache(maxsize=None)
def _vmem_limit_bytes():
    # v5e/v6e: 128 MiB VMEM per TensorCore, v7x: 64 MiB.  Use 3/4 of the
    # reported capacity (96 MiB cap); fall back to a value that is safe on
    # every generation if the query is unavailable.
    try:
        cap = int(pltpu.get_tpu_info().vmem_capacity_bytes)
    except Exception:
        return 48 << 20
    return int(min((cap * 3) // 4, 96 << 20))


def _cparams(dimension_semantics):
    return pltpu.CompilerParams(
        dimension_semantics=dimension_semantics,
        vmem_limit_bytes=_vmem_limit_bytes())


def _row_tile(m, cap):
    """Largest row tile <= cap that divides m (multiple of 8 when tiling)."""
    if m <= cap:
        return m
    for t in range((cap // 8) * 8, 0, -8):
        if m % t == 0:
            return t
    return m


# ------------------------------ Pallas kernels ------------------------------

def _matmul_cols_kernel(x_ref, w_ref, o_ref):
    # x: (tm, C_in) f32, w: (C_in, Ncols) bf16, o: (tm, Ncols) f32
    x = x_ref[...].astype(jnp.bfloat16)
    o_ref[...] = jnp.dot(x, w_ref[...], preferred_element_type=jnp.float32)


def _bn_relu_matmul_cols_kernel(x_ref, s_ref, t_ref, w_ref, o_ref):
    # Fused BN(prev layer, folded scale/shift) + ReLU + cols matmul.
    # x: (tm, C_in) f32, s/t: (1, C_in) f32, w: (C_in, Ncols) bf16.
    x = jnp.maximum(x_ref[...] * s_ref[...] + t_ref[...], 0.0)
    o_ref[...] = jnp.dot(x.astype(jnp.bfloat16), w_ref[...],
                         preferred_element_type=jnp.float32)


def _bn_stats_kernel(x_ref, s_ref, ss_ref):
    # Accumulate per-lane sum and sum-of-squares over M tiles (P3 pattern).
    @pl.when(pl.program_id(0) == 0)
    def _():
        s_ref[...] = jnp.zeros_like(s_ref)
        ss_ref[...] = jnp.zeros_like(ss_ref)
    x = x_ref[...]
    s_ref[...] += jnp.sum(x, axis=0, keepdims=True)
    ss_ref[...] += jnp.sum(x * x, axis=0, keepdims=True)


def _bias_tanh_kernel(x_ref, b_ref, o_ref):
    o_ref[...] = jnp.tanh(x_ref[...] + b_ref[...])


# ------------------------------ call wrappers --------------------------------

def matmul_cols(x, wcols, tm_cap=512):
    m, kdim = x.shape
    ncols = wcols.shape[1]
    tm = _row_tile(m, tm_cap)
    return pl.pallas_call(
        _matmul_cols_kernel,
        out_shape=jax.ShapeDtypeStruct((m, ncols), jnp.float32),
        grid=(m // tm,),
        in_specs=[pl.BlockSpec((tm, kdim), lambda i: (i, 0)),
                  pl.BlockSpec((kdim, ncols), lambda i: (0, 0))],
        out_specs=pl.BlockSpec((tm, ncols), lambda i: (i, 0)),
        compiler_params=_cparams(("parallel",)),
    )(x, wcols)


def bn_relu_matmul_cols(x, scale, shift, wcols, tm_cap=512):
    m, kdim = x.shape
    ncols = wcols.shape[1]
    tm = _row_tile(m, tm_cap)
    return pl.pallas_call(
        _bn_relu_matmul_cols_kernel,
        out_shape=jax.ShapeDtypeStruct((m, ncols), jnp.float32),
        grid=(m // tm,),
        in_specs=[pl.BlockSpec((tm, kdim), lambda i: (i, 0)),
                  pl.BlockSpec((1, kdim), lambda i: (0, 0)),
                  pl.BlockSpec((1, kdim), lambda i: (0, 0)),
                  pl.BlockSpec((kdim, ncols), lambda i: (0, 0))],
        out_specs=pl.BlockSpec((tm, ncols), lambda i: (i, 0)),
        compiler_params=_cparams(("parallel",)),
    )(x, scale, shift, wcols)


def bn_stats(x, tm_cap=512):
    """x: (rows, lanes) lane-dense view of the activation -> (sum, sumsq)."""
    m, l = x.shape
    tm = _row_tile(m, tm_cap)
    return pl.pallas_call(
        _bn_stats_kernel,
        out_shape=(jax.ShapeDtypeStruct((1, l), jnp.float32),
                   jax.ShapeDtypeStruct((1, l), jnp.float32)),
        grid=(m // tm,),
        in_specs=[pl.BlockSpec((tm, l), lambda i: (i, 0))],
        out_specs=[pl.BlockSpec((1, l), lambda i: (0, 0)),
                   pl.BlockSpec((1, l), lambda i: (0, 0))],
        compiler_params=_cparams(("arbitrary",)),
    )(x)


def bias_tanh(x, bias_tiled, tm_cap=1024):
    m, l = x.shape
    tm = _row_tile(m, tm_cap)
    return pl.pallas_call(
        _bias_tanh_kernel,
        out_shape=jax.ShapeDtypeStruct((m, l), jnp.float32),
        grid=(m // tm,),
        in_specs=[pl.BlockSpec((tm, l), lambda i: (i, 0)),
                  pl.BlockSpec((1, l), lambda i: (0, 0))],
        out_specs=pl.BlockSpec((tm, l), lambda i: (i, 0)),
        compiler_params=_cparams(("parallel",)),
    )(x, bias_tiled)


# ---------------------- JAX glue: col2im overlap-add -------------------------

def _col2im(cols, n, h, w, c_out, k, stride, pad):
    """Overlap-add of per-input-pixel k*k*C_out columns == ConvTranspose2d.

    cols: (n*h*w, k*k*c_out) with column order (kh, kw, c).
    Returns ((n, ho, wo, c_out), (ho, wo)).  Kept in XLA: it is a pure
    activation-sized scatter-add (no 16x patch inflation).
    """
    ho = (h - 1) * stride - 2 * pad + k
    wo = (w - 1) * stride - 2 * pad + k
    y = cols.reshape(n, h, w, k, k, c_out)
    if h == 1 and w == 1 and pad == 0:          # layer 0: no overlap at all
        return y.reshape(n, k, k, c_out), (ho, wo)
    hp = h + k // stride - 1                    # buffer size in stride-pairs
    wp = w + k // stride - 1
    buf = jnp.zeros((n, hp, stride, wp, stride, c_out), cols.dtype)
    for kh in range(k):
        for kw in range(k):
            buf = buf.at[:, kh // stride: kh // stride + h, kh % stride,
                         kw // stride: kw // stride + w, kw % stride, :].add(
                             y[:, :, :, kh, kw, :])
    buf = buf.reshape(n, hp * stride, wp * stride, c_out)
    return buf[:, pad:pad + ho, pad:pad + wo, :], (ho, wo)


# -------------------------------- parameters ---------------------------------

def init_params(key, z_dim, channels, conv_dim):
    dims = [z_dim, conv_dim * 8, conv_dim * 4, conv_dim * 2, conv_dim, channels]
    layers = []
    for i in range(5):
        key, kw_, kg = jax.random.split(key, 3)
        c_in, c_out = dims[i], dims[i + 1]
        w = 0.02 * jax.random.normal(kw_, (c_in, c_out, KSIZE, KSIZE), jnp.float32)
        if i < 4:
            layers.append(dict(
                w=w, bn=True,
                gamma=1.0 + 0.02 * jax.random.normal(kg, (c_out,), jnp.float32),
                beta=jnp.zeros((c_out,), jnp.float32)))
        else:
            layers.append(dict(
                w=w, bn=False,
                bias=0.02 * jax.random.normal(kg, (c_out,), jnp.float32)))
    return {"layers": layers}


def prepare_params(params):
    """Precompute bf16 (C_in, k*k*C_out) weight matrices, lane-padded to 128."""
    layers = []
    for layer in params["layers"]:
        w = layer["w"]
        c_in, c_out, k, _ = w.shape
        ncols = k * k * c_out
        wcols = jnp.transpose(w, (0, 2, 3, 1)).reshape(c_in, ncols)   # (kh,kw,c)
        ncols_pad = ((ncols + LANE - 1) // LANE) * LANE
        if ncols_pad != ncols:
            wcols = jnp.pad(wcols, ((0, 0), (0, ncols_pad - ncols)))
        entry = dict(layer)
        entry["wcols"] = wcols.astype(jnp.bfloat16)
        entry["ncols"] = ncols
        layers.append(entry)
    return {"layers": layers}


# --------------------------------- forward -----------------------------------

def generator_forward(z, params):
    n = z.shape[0]
    z2 = z.reshape(n, -1).astype(jnp.float32)
    layers = params["layers"]
    k, s = KSIZE, STRIDE

    act = None                    # pre-BN activation of current layer (NHWC f32)
    h = w = 1
    scale = shift = None          # folded BN scale/shift of the previous layer

    for idx, layer in enumerate(layers):
        pad = 0 if idx == 0 else 1
        c_in, c_out = layer["w"].shape[0], layer["w"].shape[1]
        wcols, ncols = layer["wcols"], layer["ncols"]

        if idx == 0:
            cols = matmul_cols(z2, wcols)                       # (N, 16*c_out)
        else:
            x_rows = act.reshape(n * h * w, c_in)
            cols = bn_relu_matmul_cols(x_rows, scale, shift, wcols)

        if wcols.shape[1] != ncols:                             # drop lane padding
            cols = cols[:, :ncols]

        act, (h, w) = _col2im(cols, n, h, w, c_out, k, s, pad)

        if layer["bn"]:
            # Batch statistics over N*H*W rows, lane-dense (N*Ho, Wo*C) view.
            ssum, ssq = bn_stats(act.reshape(n * h, w * c_out))
            m_total = n * h * w
            mean = ssum.reshape(w, c_out).sum(axis=0) / m_total
            var = ssq.reshape(w, c_out).sum(axis=0) / m_total - mean * mean
            sc = layer["gamma"] * lax.rsqrt(var + EPS)
            scale = sc.reshape(1, c_out)
            shift = (layer["beta"] - mean * sc).reshape(1, c_out)
        else:
            # Final layer: bias + tanh on a lane-dense view (lane = 512*C).
            group = 512 if (h * w) % 512 == 0 else h * w
            lane = c_out * group
            rows = (n * h * w) // group
            b_tiled = jnp.tile(layer["bias"], group).reshape(1, lane)
            out = bias_tanh(act.reshape(rows, lane), b_tiled)
            act = out.reshape(n, h, w, c_out)

    return jnp.transpose(act, (0, 3, 1, 2))                     # NHWC -> NCHW


# ----------------------------- pure-JAX reference ----------------------------

def _ref_generator(z, params):
    """Reference with matching numerics: bf16 conv inputs, f32 accumulation,
    f32 batch-stat BatchNorm (folded scale/shift), f32 ReLU / tanh."""
    x = z.reshape(z.shape[0], -1, 1, 1).astype(jnp.float32)
    for idx, layer in enumerate(params["layers"]):
        pad = 0 if idx == 0 else 1
        wt = layer["w"]
        k = wt.shape[2]
        wl = jnp.transpose(wt[:, :, ::-1, ::-1], (1, 0, 2, 3))      # OIHW, flipped
        y = lax.conv_general_dilated(
            x.astype(jnp.bfloat16), wl.astype(jnp.bfloat16),
            window_strides=(1, 1),
            padding=[(k - 1 - pad, k - 1 - pad)] * 2,
            lhs_dilation=(STRIDE, STRIDE),
            dimension_numbers=("NCHW", "OIHW", "NCHW"),
            preferred_element_type=jnp.float32)
        if layer["bn"]:
            mean = jnp.mean(y, axis=(0, 2, 3), keepdims=True)
            var = jnp.mean(jnp.square(y - mean), axis=(0, 2, 3), keepdims=True)
            sc = layer["gamma"].reshape(1, -1, 1, 1) * lax.rsqrt(var + EPS)
            x = jnp.maximum(
                y * sc + layer["beta"].reshape(1, -1, 1, 1) - mean * sc, 0.0)
        else:
            x = jnp.tanh(y + layer["bias"].reshape(1, -1, 1, 1))
    return x


# ------------------------------------ main ------------------------------------

if __name__ == "__main__":
    Z_DIM, CHANNELS, CONV_DIM, BATCH = 16, 3, 8, 2
    key = jax.random.PRNGKey(0)
    k_param, k_z = jax.random.split(key)
    params = init_params(k_param, Z_DIM, CHANNELS, CONV_DIM)
    prepped = prepare_params(params)
    z = jax.random.normal(k_z, (BATCH, Z_DIM), jnp.float32)

    fwd = jax.jit(lambda zz: generator_forward(zz, prepped))
    out = jax.block_until_ready(fwd(z))
    assert out.shape == (BATCH, CHANNELS, 64, 64), out.shape

    ref = jax.block_until_ready(jax.jit(lambda zz: _ref_generator(zz, params))(z))
    max_err = float(jnp.max(jnp.abs(out - ref)))
    assert max_err < 2e-2, f"mismatch vs reference: max abs err = {max_err}"

    print("KERNEL_OK")
</pallas_src>

<mosaic_0001>
module attributes {stable_mosaic.version = 11 : i64} {
  func.func @_bn_stats_kernel(%arg0: i32, %arg1: memref<8x256xf32, #tpu.memory_space<vmem>>, %arg2: memref<1x256xf32, #tpu.memory_space<vmem>>, %arg3: memref<1x256xf32, #tpu.memory_space<vmem>>) attributes {dimension_semantics = [#tpu.dimension_semantics<arbitrary>], iteration_bounds = array<i64: 1>, scalar_prefetch = 0 : i64, scratch_operands = 0 : i64, tpu.core_type = #tpu.core_type<tc>, window_params = [{transform_indices = @transform_0, window_bounds = array<i64: 8, 256>}, {pipeline_mode = #tpu.pipeline_mode<synchronous>, transform_indices = @transform_1, window_bounds = array<i64: 1, 256>}, {pipeline_mode = #tpu.pipeline_mode<synchronous>, transform_indices = @transform_2, window_bounds = array<i64: 1, 256>}]} {
    %c0_i32 = arith.constant 0 : i32
    %0 = arith.cmpi eq, %arg0, %c0_i32 : i32
    %1 = arith.extui %0 : i1 to i32
    %c0_i32_0 = arith.constant 0 : i32
    %2 = arith.cmpi ne, %1, %c0_i32_0 : i32
    scf.if %2 {
      %cst_11 = arith.constant 0.000000e+00 : f32
      %15 = vector.broadcast %cst_11 : f32 to vector<1x256xf32>
      %c0_12 = arith.constant 0 : index
      %c0_13 = arith.constant 0 : index
      %16 = vector.load %arg2[%c0_12, %c0_13] : memref<1x256xf32, #tpu.memory_space<vmem>>, vector<1x256xf32>
      tpu.vector_store %arg2[%c0_12, %c0_13], %15 {strides = array<i32>} : memref<1x256xf32, #tpu.memory_space<vmem>>, vector<1x256xf32>,
      %cst_14 = arith.constant 0.000000e+00 : f32
      %17 = vector.broadcast %cst_14 : f32 to vector<1x256xf32>
      %c0_15 = arith.constant 0 : index
      %c0_16 = arith.constant 0 : index
      %18 = vector.load %arg3[%c0_15, %c0_16] : memref<1x256xf32, #tpu.memory_space<vmem>>, vector<1x256xf32>
      tpu.vector_store %arg3[%c0_15, %c0_16], %17 {strides = array<i32>} : memref<1x256xf32, #tpu.memory_space<vmem>>, vector<1x256xf32>,
    } else {
    }
    %c0 = arith.constant 0 : index
    %c0_1 = arith.constant 0 : index
    %3 = vector.load %arg1[%c0, %c0_1] : memref<8x256xf32, #tpu.memory_space<vmem>>, vector<8x256xf32>
    %c0_2 = arith.constant 0 : index
    %c0_3 = arith.constant 0 : index
    %4 = vector.load %arg2[%c0_2, %c0_3] : memref<1x256xf32, #tpu.memory_space<vmem>>, vector<1x256xf32>
    %cst = arith.constant dense<0.000000e+00> : vector<256xf32>
    %5 = vector.multi_reduction <add>, %3, %cst [0] : vector<8x256xf32> to vector<256xf32>
    %6 = vector.shape_cast %5 : vector<256xf32> to vector<1x256xf32>
    %7 = arith.addf %4, %6 : vector<1x256xf32>
    %c0_4 = arith.constant 0 : index
    %c0_5 = arith.constant 0 : index
    %8 = vector.load %arg2[%c0_4, %c0_5] : memref<1x256xf32, #tpu.memory_space<vmem>>, vector<1x256xf32>
    tpu.vector_store %arg2[%c0_4, %c0_5], %7 {strides = array<i32>} : memref<1x256xf32, #tpu.memory_space<vmem>>, vector<1x256xf32>,
    %c0_6 = arith.constant 0 : index
    %c0_7 = arith.constant 0 : index
    %9 = vector.load %arg3[%c0_6, %c0_7] : memref<1x256xf32, #tpu.memory_space<vmem>>, vector<1x256xf32>
    %10 = arith.mulf %3, %3 : vector<8x256xf32>
    %cst_8 = arith.constant dense<0.000000e+00> : vector<256xf32>
    %11 = vector.multi_reduction <add>, %10, %cst_8 [0] : vector<8x256xf32> to vector<256xf32>
    %12 = vector.shape_cast %11 : vector<256xf32> to vector<1x256xf32>
    %13 = arith.addf %9, %12 : vector<1x256xf32>
    %c0_9 = arith.constant 0 : index
    %c0_10 = arith.constant 0 : index
    %14 = vector.load %arg3[%c0_9, %c0_10] : memref<1x256xf32, #tpu.memory_space<vmem>>, vector<1x256xf32>
    tpu.vector_store %arg3[%c0_9, %c0_10], %13 {strides = array<i32>} : memref<1x256xf32, #tpu.memory_space<vmem>>, vector<1x256xf32>,
    return
  }
  func.func @transform_0(%arg0: i32) -> (i32, i32) {
    %c0_i32 = arith.constant 0 : i32
    %c0_i32_0 = arith.constant 0 : i32
    return %arg0, %c0_i32 : i32, i32
  }
  func.func @transform_1(%arg0: i32) -> (i32, i32) {
    %c0_i32 = arith.constant 0 : i32
    %c0_i32_0 = arith.constant 0 : i32
    %c0_i32_1 = arith.constant 0 : i32
    return %c0_i32, %c0_i32_0 : i32, i32
  }
  func.func @transform_2(%arg0: i32) -> (i32, i32) {
    %c0_i32 = arith.constant 0 : i32
    %c0_i32_0 = arith.constant 0 : i32
    %c0_i32_1 = arith.constant 0 : i32
    return %c0_i32, %c0_i32_0 : i32, i32
  }
}

module attributes {stable_mosaic.version = 11 : i64} {
  func.func @_matmul_cols_kernel(%arg0: i32, %arg1: memref<2x16xf32, #tpu.memory_space<vmem>>, %arg2: memref<16x1024xbf16, #tpu.memory_space<vmem>>, %arg3: memref<2x1024xf32, #tpu.memory_space<vmem>>) attributes {dimension_semantics = [#tpu.dimension_semantics<parallel>], iteration_bounds = array<i64: 1>, scalar_prefetch = 0 : i64, scratch_operands = 0 : i64, tpu.core_type = #tpu.core_type<tc>, window_params = [{transform_indices = @transform_0, window_bounds = array<i64: 2, 16>}, {pipeline_mode = #tpu.pipeline_mode<synchronous>, transform_indices = @transform_1, window_bounds = array<i64: 16, 1024>}, {transform_indices = @transform_2, window_bounds = array<i64: 2, 1024>}]} {
    %c0 = arith.constant 0 : index
    %c0_0 = arith.constant 0 : index
    %0 = vector.load %arg1[%c0, %c0_0] : memref<2x16xf32, #tpu.memory_space<vmem>>, vector<2x16xf32>
    %1 = arith.truncf %0 : vector<2x16xf32> to vector<2x16xbf16>
    %c0_1 = arith.constant 0 : index
    %c0_2 = arith.constant 0 : index
    %2 = vector.load %arg2[%c0_1, %c0_2] : memref<16x1024xbf16, #tpu.memory_space<vmem>>, vector<16x1024xbf16>
    %cst = arith.constant dense<0.000000e+00> : vector<2x1024xf32>
    %3 = tpu.matmul %1, %2, %cst {dimension_numbers = #tpu.dot_dimension_numbers<[1], [0], [0], [1], [0, 0, 1, 1], [], []>} : vector<2x16xbf16>, vector<16x1024xbf16>, vector<2x1024xf32> -> vector<2x1024xf32>
    %c0_3 = arith.constant 0 : index
    %c0_4 = arith.constant 0 : index
    %4 = vector.load %arg3[%c0_3, %c0_4] : memref<2x1024xf32, #tpu.memory_space<vmem>>, vector<2x1024xf32>
    tpu.vector_store %arg3[%c0_3, %c0_4], %3 {strides = array<i32>} : memref<2x1024xf32, #tpu.memory_space<vmem>>, vector<2x1024xf32>,
    return
  }
  func.func @transform_0(%arg0: i32) -> (i32, i32) {
    %c0_i32 = arith.constant 0 : i32
    %c0_i32_0 = arith.constant 0 : i32
    return %arg0, %c0_i32 : i32, i32
  }
  func.func @transform_1(%arg0: i32) -> (i32, i32) {
    %c0_i32 = arith.constant 0 : i32
    %c0_i32_0 = arith.constant 0 : i32
    %c0_i32_1 = arith.constant 0 : i32
    return %c0_i32, %c0_i32_0 : i32, i32
  }
  func.func @transform_2(%arg0: i32) -> (i32, i32) {
    %c0_i32 = arith.constant 0 : i32
    %c0_i32_0 = arith.constant 0 : i32
    return %arg0, %c0_i32 : i32, i32
  }
}

module attributes {stable_mosaic.version = 11 : i64} {
  func.func @_bn_relu_matmul_cols_kernel(%arg0: i32, %arg1: memref<32x64xf32, #tpu.memory_space<vmem>>, %arg2: memref<1x64xf32, #tpu.memory_space<vmem>>, %arg3: memref<1x64xf32, #tpu.memory_space<vmem>>, %arg4: memref<64x512xbf16, #tpu.memory_space<vmem>>, %arg5: memref<32x512xf32, #tpu.memory_space<vmem>>) attributes {dimension_semantics = [#tpu.dimension_semantics<parallel>], iteration_bounds = array<i64: 1>, scalar_prefetch = 0 : i64, scratch_operands = 0 : i64, tpu.core_type = #tpu.core_type<tc>, window_params = [{transform_indices = @transform_0, window_bounds = array<i64: 32, 64>}, {pipeline_mode = #tpu.pipeline_mode<synchronous>, transform_indices = @transform_1, window_bounds = array<i64: 1, 64>}, {pipeline_mode = #tpu.pipeline_mode<synchronous>, transform_indices = @transform_2, window_bounds = array<i64: 1, 64>}, {pipeline_mode = #tpu.pipeline_mode<synchronous>, transform_indices = @transform_3, window_bounds = array<i64: 64, 512>}, {transform_indices = @transform_4, window_bounds = array<i64: 32, 512>}]} {
    %c0 = arith.constant 0 : index
    %c0_0 = arith.constant 0 : index
    %0 = vector.load %arg1[%c0, %c0_0] : memref<32x64xf32, #tpu.memory_space<vmem>>, vector<32x64xf32>
    %c0_1 = arith.constant 0 : index
    %c0_2 = arith.constant 0 : index
    %1 = vector.load %arg2[%c0_1, %c0_2] : memref<1x64xf32, #tpu.memory_space<vmem>>, vector<1x64xf32>
    %2 = vector.broadcast %1 : vector<1x64xf32> to vector<32x64xf32>
    %3 = arith.mulf %0, %2 : vector<32x64xf32>
    %c0_3 = arith.constant 0 : index
    %c0_4 = arith.constant 0 : index
    %4 = vector.load %arg3[%c0_3, %c0_4] : memref<1x64xf32, #tpu.memory_space<vmem>>, vector<1x64xf32>
    %5 = vector.broadcast %4 : vector<1x64xf32> to vector<32x64xf32>
    %6 = arith.addf %3, %5 : vector<32x64xf32>
    %cst = arith.constant 0.000000e+00 : f32
    %7 = vector.broadcast %cst : f32 to vector<32x64xf32>
    %8 = arith.maximumf %6, %7 : vector<32x64xf32>
    %9 = arith.truncf %8 : vector<32x64xf32> to vector<32x64xbf16>
    %c0_5 = arith.constant 0 : index
    %c0_6 = arith.constant 0 : index
    %10 = vector.load %arg4[%c0_5, %c0_6] : memref<64x512xbf16, #tpu.memory_space<vmem>>, vector<64x512xbf16>
    %cst_7 = arith.constant dense<0.000000e+00> : vector<32x512xf32>
    %11 = tpu.matmul %9, %10, %cst_7 {dimension_numbers = #tpu.dot_dimension_numbers<[1], [0], [0], [1], [0, 0, 1, 1], [], []>} : vector<32x64xbf16>, vector<64x512xbf16>, vector<32x512xf32> -> vector<32x512xf32>
    %c0_8 = arith.constant 0 : index
    %c0_9 = arith.constant 0 : index
    %12 = vector.load %arg5[%c0_8, %c0_9] : memref<32x512xf32, #tpu.memory_space<vmem>>, vector<32x512xf32>
    tpu.vector_store %arg5[%c0_8, %c0_9], %11 {strides = array<i32>} : memref<32x512xf32, #tpu.memory_space<vmem>>, vector<32x512xf32>,
    return
  }
  func.func @transform_0(%arg0: i32) -> (i32, i32) {
    %c0_i32 = arith.constant 0 : i32
    %c0_i32_0 = arith.constant 0 : i32
    return %arg0, %c0_i32 : i32, i32
  }
  func.func @transform_1(%arg0: i32) -> (i32, i32) {
    %c0_i32 = arith.constant 0 : i32
    %c0_i32_0 = arith.constant 0 : i32
    %c0_i32_1 = arith.constant 0 : i32
    return %c0_i32, %c0_i32_0 : i32, i32
  }
  func.func @transform_2(%arg0: i32) -> (i32, i32) {
    %c0_i32 = arith.constant 0 : i32
    %c0_i32_0 = arith.constant 0 : i32
    %c0_i32_1 = arith.constant 0 : i32
    return %c0_i32, %c0_i32_0 : i32, i32
  }
  func.func @transform_3(%arg0: i32) -> (i32, i32) {
    %c0_i32 = arith.constant 0 : i32
    %c0_i32_0 = arith.constant 0 : i32
    %c0_i32_1 = arith.constant 0 : i32
    return %c0_i32, %c0_i32_0 : i32, i32
  }
  func.func @transform_4(%arg0: i32) -> (i32, i32) {
    %c0_i32 = arith.constant 0 : i32
    %c0_i32_0 = arith.constant 0 : i32
    return %arg0, %c0_i32 : i32, i32
  }
}

module attributes {stable_mosaic.version = 11 : i64} {
  func.func @_bn_stats_kernel(%arg0: i32, %arg1: memref<16x256xf32, #tpu.memory_space<vmem>>, %arg2: memref<1x256xf32, #tpu.memory_space<vmem>>, %arg3: memref<1x256xf32, #tpu.memory_space<vmem>>) attributes {dimension_semantics = [#tpu.dimension_semantics<arbitrary>], iteration_bounds = array<i64: 1>, scalar_prefetch = 0 : i64, scratch_operands = 0 : i64, tpu.core_type = #tpu.core_type<tc>, window_params = [{transform_indices = @transform_0, window_bounds = array<i64: 16, 256>}, {pipeline_mode = #tpu.pipeline_mode<synchronous>, transform_indices = @transform_1, window_bounds = array<i64: 1, 256>}, {pipeline_mode = #tpu.pipeline_mode<synchronous>, transform_indices = @transform_2, window_bounds = array<i64: 1, 256>}]} {
    %c0_i32 = arith.constant 0 : i32
    %0 = arith.cmpi eq, %arg0, %c0_i32 : i32
    %1 = arith.extui %0 : i1 to i32
    %c0_i32_0 = arith.constant 0 : i32
    %2 = arith.cmpi ne, %1, %c0_i32_0 : i32
    scf.if %2 {
      %cst_11 = arith.constant 0.000000e+00 : f32
      %15 = vector.broadcast %cst_11 : f32 to vector<1x256xf32>
      %c0_12 = arith.constant 0 : index
      %c0_13 = arith.constant 0 : index
      %16 = vector.load %arg2[%c0_12, %c0_13] : memref<1x256xf32, #tpu.memory_space<vmem>>, vector<1x256xf32>
      tpu.vector_store %arg2[%c0_12, %c0_13], %15 {strides = array<i32>} : memref<1x256xf32, #tpu.memory_space<vmem>>, vector<1x256xf32>,
      %cst_14 = arith.constant 0.000000e+00 : f32
      %17 = vector.broadcast %cst_14 : f32 to vector<1x256xf32>
      %c0_15 = arith.constant 0 : index
      %c0_16 = arith.constant 0 : index
      %18 = vector.load %arg3[%c0_15, %c0_16] : memref<1x256xf32, #tpu.memory_space<vmem>>, vector<1x256xf32>
      tpu.vector_store %arg3[%c0_15, %c0_16], %17 {strides = array<i32>} : memref<1x256xf32, #tpu.memory_space<vmem>>, vector<1x256xf32>,
    } else {
    }
    %c0 = arith.constant 0 : index
    %c0_1 = arith.constant 0 : index
    %3 = vector.load %arg1[%c0, %c0_1] : memref<16x256xf32, #tpu.memory_space<vmem>>, vector<16x256xf32>
    %c0_2 = arith.constant 0 : index
    %c0_3 = arith.constant 0 : index
    %4 = vector.load %arg2[%c0_2, %c0_3] : memref<1x256xf32, #tpu.memory_space<vmem>>, vector<1x256xf32>
    %cst = arith.constant dense<0.000000e+00> : vector<256xf32>
    %5 = vector.multi_reduction <add>, %3, %cst [0] : vector<16x256xf32> to vector<256xf32>
    %6 = vector.shape_cast %5 : vector<256xf32> to vector<1x256xf32>
    %7 = arith.addf %4, %6 : vector<1x256xf32>
    %c0_4 = arith.constant 0 : index
    %c0_5 = arith.constant 0 : index
    %8 = vector.load %arg2[%c0_4, %c0_5] : memref<1x256xf32, #tpu.memory_space<vmem>>, vector<1x256xf32>
    tpu.vector_store %arg2[%c0_4, %c0_5], %7 {strides = array<i32>} : memref<1x256xf32, #tpu.memory_space<vmem>>, vector<1x256xf32>,
    %c0_6 = arith.constant 0 : index
    %c0_7 = arith.constant 0 : index
    %9 = vector.load %arg3[%c0_6, %c0_7] : memref<1x256xf32, #tpu.memory_space<vmem>>, vector<1x256xf32>
    %10 = arith.mulf %3, %3 : vector<16x256xf32>
    %cst_8 = arith.constant dense<0.000000e+00> : vector<256xf32>
    %11 = vector.multi_reduction <add>, %10, %cst_8 [0] : vector<16x256xf32> to vector<256xf32>
    %12 = vector.shape_cast %11 : vector<256xf32> to vector<1x256xf32>
    %13 = arith.addf %9, %12 : vector<1x256xf32>
    %c0_9 = arith.constant 0 : index
    %c0_10 = arith.constant 0 : index
    %14 = vector.load %arg3[%c0_9, %c0_10] : memref<1x256xf32, #tpu.memory_space<vmem>>, vector<1x256xf32>
    tpu.vector_store %arg3[%c0_9, %c0_10], %13 {strides = array<i32>} : memref<1x256xf32, #tpu.memory_space<vmem>>, vector<1x256xf32>,
    return
  }
  func.func @transform_0(%arg0: i32) -> (i32, i32) {
    %c0_i32 = arith.constant 0 : i32
    %c0_i32_0 = arith.constant 0 : i32
    return %arg0, %c0_i32 : i32, i32
  }
  func.func @transform_1(%arg0: i32) -> (i32, i32) {
    %c0_i32 = arith.constant 0 : i32
    %c0_i32_0 = arith.constant 0 : i32
    %c0_i32_1 = arith.constant 0 : i32
    return %c0_i32, %c0_i32_0 : i32, i32
  }
  func.func @transform_2(%arg0: i32) -> (i32, i32) {
    %c0_i32 = arith.constant 0 : i32
    %c0_i32_0 = arith.constant 0 : i32
    %c0_i32_1 = arith.constant 0 : i32
    return %c0_i32, %c0_i32_0 : i32, i32
  }
}

module attributes {stable_mosaic.version = 11 : i64} {
  func.func @_bn_relu_matmul_cols_kernel(%arg0: i32, %arg1: memref<128x32xf32, #tpu.memory_space<vmem>>, %arg2: memref<1x32xf32, #tpu.memory_space<vmem>>, %arg3: memref<1x32xf32, #tpu.memory_space<vmem>>, %arg4: memref<32x256xbf16, #tpu.memory_space<vmem>>, %arg5: memref<128x256xf32, #tpu.memory_space<vmem>>) attributes {dimension_semantics = [#tpu.dimension_semantics<parallel>], iteration_bounds = array<i64: 1>, scalar_prefetch = 0 : i64, scratch_operands = 0 : i64, tpu.core_type = #tpu.core_type<tc>, window_params = [{transform_indices = @transform_0, window_bounds = array<i64: 128, 32>}, {pipeline_mode = #tpu.pipeline_mode<synchronous>, transform_indices = @transform_1, window_bounds = array<i64: 1, 32>}, {pipeline_mode = #tpu.pipeline_mode<synchronous>, transform_indices = @transform_2, window_bounds = array<i64: 1, 32>}, {pipeline_mode = #tpu.pipeline_mode<synchronous>, transform_indices = @transform_3, window_bounds = array<i64: 32, 256>}, {transform_indices = @transform_4, window_bounds = array<i64: 128, 256>}]} {
    %c0 = arith.constant 0 : index
    %c0_0 = arith.constant 0 : index
    %0 = vector.load %arg1[%c0, %c0_0] : memref<128x32xf32, #tpu.memory_space<vmem>>, vector<128x32xf32>
    %c0_1 = arith.constant 0 : index
    %c0_2 = arith.constant 0 : index
    %1 = vector.load %arg2[%c0_1, %c0_2] : memref<1x32xf32, #tpu.memory_space<vmem>>, vector<1x32xf32>
    %2 = vector.broadcast %1 : vector<1x32xf32> to vector<128x32xf32>
    %3 = arith.mulf %0, %2 : vector<128x32xf32>
    %c0_3 = arith.constant 0 : index
    %c0_4 = arith.constant 0 : index
    %4 = vector.load %arg3[%c0_3, %c0_4] : memref<1x32xf32, #tpu.memory_space<vmem>>, vector<1x32xf32>
    %5 = vector.broadcast %4 : vector<1x32xf32> to vector<128x32xf32>
    %6 = arith.addf %3, %5 : vector<128x32xf32>
    %cst = arith.constant 0.000000e+00 : f32
    %7 = vector.broadcast %cst : f32 to vector<128x32xf32>
    %8 = arith.maximumf %6, %7 : vector<128x32xf32>
    %9 = arith.truncf %8 : vector<128x32xf32> to vector<128x32xbf16>
    %c0_5 = arith.constant 0 : index
    %c0_6 = arith.constant 0 : index
    %10 = vector.load %arg4[%c0_5, %c0_6] : memref<32x256xbf16, #tpu.memory_space<vmem>>, vector<32x256xbf16>
    %cst_7 = arith.constant dense<0.000000e+00> : vector<128x256xf32>
    %11 = tpu.matmul %9, %10, %cst_7 {dimension_numbers = #tpu.dot_dimension_numbers<[1], [0], [0], [1], [0, 0, 1, 1], [], []>} : vector<128x32xbf16>, vector<32x256xbf16>, vector<128x256xf32> -> vector<128x256xf32>
    %c0_8 = arith.constant 0 : index
    %c0_9 = arith.constant 0 : index
    %12 = vector.load %arg5[%c0_8, %c0_9] : memref<128x256xf32, #tpu.memory_space<vmem>>, vector<128x256xf32>
    tpu.vector_store %arg5[%c0_8, %c0_9], %11 {strides = array<i32>} : memref<128x256xf32, #tpu.memory_space<vmem>>, vector<128x256xf32>,
    return
  }
  func.func @transform_0(%arg0: i32) -> (i32, i32) {
    %c0_i32 = arith.constant 0 : i32
    %c0_i32_0 = arith.constant 0 : i32
    return %arg0, %c0_i32 : i32, i32
  }
  func.func @transform_1(%arg0: i32) -> (i32, i32) {
    %c0_i32 = arith.constant 0 : i32
    %c0_i32_0 = arith.constant 0 : i32
    %c0_i32_1 = arith.constant 0 : i32
    return %c0_i32, %c0_i32_0 : i32, i32
  }
  func.func @transform_2(%arg0: i32) -> (i32, i32) {
    %c0_i32 = arith.constant 0 : i32
    %c0_i32_0 = arith.constant 0 : i32
    %c0_i32_1 = arith.constant 0 : i32
    return %c0_i32, %c0_i32_0 : i32, i32
  }
  func.func @transform_3(%arg0: i32) -> (i32, i32) {
    %c0_i32 = arith.constant 0 : i32
    %c0_i32_0 = arith.constant 0 : i32
    %c0_i32_1 = arith.constant 0 : i32
    return %c0_i32, %c0_i32_0 : i32, i32
  }
  func.func @transform_4(%arg0: i32) -> (i32, i32) {
    %c0_i32 = arith.constant 0 : i32
    %c0_i32_0 = arith.constant 0 : i32
    return %arg0, %c0_i32 : i32, i32
  }
}

module attributes {stable_mosaic.version = 11 : i64} {
  func.func @_bn_stats_kernel(%arg0: i32, %arg1: memref<32x256xf32, #tpu.memory_space<vmem>>, %arg2: memref<1x256xf32, #tpu.memory_space<vmem>>, %arg3: memref<1x256xf32, #tpu.memory_space<vmem>>) attributes {dimension_semantics = [#tpu.dimension_semantics<arbitrary>], iteration_bounds = array<i64: 1>, scalar_prefetch = 0 : i64, scratch_operands = 0 : i64, tpu.core_type = #tpu.core_type<tc>, window_params = [{transform_indices = @transform_0, window_bounds = array<i64: 32, 256>}, {pipeline_mode = #tpu.pipeline_mode<synchronous>, transform_indices = @transform_1, window_bounds = array<i64: 1, 256>}, {pipeline_mode = #tpu.pipeline_mode<synchronous>, transform_indices = @transform_2, window_bounds = array<i64: 1, 256>}]} {
    %c0_i32 = arith.constant 0 : i32
    %0 = arith.cmpi eq, %arg0, %c0_i32 : i32
    %1 = arith.extui %0 : i1 to i32
    %c0_i32_0 = arith.constant 0 : i32
    %2 = arith.cmpi ne, %1, %c0_i32_0 : i32
    scf.if %2 {
      %cst_11 = arith.constant 0.000000e+00 : f32
      %15 = vector.broadcast %cst_11 : f32 to vector<1x256xf32>
      %c0_12 = arith.constant 0 : index
      %c0_13 = arith.constant 0 : index
      %16 = vector.load %arg2[%c0_12, %c0_13] : memref<1x256xf32, #tpu.memory_space<vmem>>, vector<1x256xf32>
      tpu.vector_store %arg2[%c0_12, %c0_13], %15 {strides = array<i32>} : memref<1x256xf32, #tpu.memory_space<vmem>>, vector<1x256xf32>,
      %cst_14 = arith.constant 0.000000e+00 : f32
      %17 = vector.broadcast %cst_14 : f32 to vector<1x256xf32>
      %c0_15 = arith.constant 0 : index
      %c0_16 = arith.constant 0 : index
      %18 = vector.load %arg3[%c0_15, %c0_16] : memref<1x256xf32, #tpu.memory_space<vmem>>, vector<1x256xf32>
      tpu.vector_store %arg3[%c0_15, %c0_16], %17 {strides = array<i32>} : memref<1x256xf32, #tpu.memory_space<vmem>>, vector<1x256xf32>,
    } else {
    }
    %c0 = arith.constant 0 : index
    %c0_1 = arith.constant 0 : index
    %3 = vector.load %arg1[%c0, %c0_1] : memref<32x256xf32, #tpu.memory_space<vmem>>, vector<32x256xf32>
    %c0_2 = arith.constant 0 : index
    %c0_3 = arith.constant 0 : index
    %4 = vector.load %arg2[%c0_2, %c0_3] : memref<1x256xf32, #tpu.memory_space<vmem>>, vector<1x256xf32>
    %cst = arith.constant dense<0.000000e+00> : vector<256xf32>
    %5 = vector.multi_reduction <add>, %3, %cst [0] : vector<32x256xf32> to vector<256xf32>
    %6 = vector.shape_cast %5 : vector<256xf32> to vector<1x256xf32>
    %7 = arith.addf %4, %6 : vector<1x256xf32>
    %c0_4 = arith.constant 0 : index
    %c0_5 = arith.constant 0 : index
    %8 = vector.load %arg2[%c0_4, %c0_5] : memref<1x256xf32, #tpu.memory_space<vmem>>, vector<1x256xf32>
    tpu.vector_store %arg2[%c0_4, %c0_5], %7 {strides = array<i32>} : memref<1x256xf32, #tpu.memory_space<vmem>>, vector<1x256xf32>,
    %c0_6 = arith.constant 0 : index
    %c0_7 = arith.constant 0 : index
    %9 = vector.load %arg3[%c0_6, %c0_7] : memref<1x256xf32, #tpu.memory_space<vmem>>, vector<1x256xf32>
    %10 = arith.mulf %3, %3 : vector<32x256xf32>
    %cst_8 = arith.constant dense<0.000000e+00> : vector<256xf32>
    %11 = vector.multi_reduction <add>, %10, %cst_8 [0] : vector<32x256xf32> to vector<256xf32>
    %12 = vector.shape_cast %11 : vector<256xf32> to vector<1x256xf32>
    %13 = arith.addf %9, %12 : vector<1x256xf32>
    %c0_9 = arith.constant 0 : index
    %c0_10 = arith.constant 0 : index
    %14 = vector.load %arg3[%c0_9, %c0_10] : memref<1x256xf32, #tpu.memory_space<vmem>>, vector<1x256xf32>
    tpu.vector_store %arg3[%c0_9, %c0_10], %13 {strides = array<i32>} : memref<1x256xf32, #tpu.memory_space<vmem>>, vector<1x256xf32>,
    return
  }
  func.func @transform_0(%arg0: i32) -> (i32, i32) {
    %c0_i32 = arith.constant 0 : i32
    %c0_i32_0 = arith.constant 0 : i32
    return %arg0, %c0_i32 : i32, i32
  }
  func.func @transform_1(%arg0: i32) -> (i32, i32) {
    %c0_i32 = arith.constant 0 : i32
    %c0_i32_0 = arith.constant 0 : i32
    %c0_i32_1 = arith.constant 0 : i32
    return %c0_i32, %c0_i32_0 : i32, i32
  }
  func.func @transform_2(%arg0: i32) -> (i32, i32) {
    %c0_i32 = arith.constant 0 : i32
    %c0_i32_0 = arith.constant 0 : i32
    %c0_i32_1 = arith.constant 0 : i32
    return %c0_i32, %c0_i32_0 : i32, i32
  }
}

module attributes {stable_mosaic.version = 11 : i64} {
  func.func @_bn_relu_matmul_cols_kernel(%arg0: i32, %arg1: memref<512x16xf32, #tpu.memory_space<vmem>>, %arg2: memref<1x16xf32, #tpu.memory_space<vmem>>, %arg3: memref<1x16xf32, #tpu.memory_space<vmem>>, %arg4: memref<16x128xbf16, #tpu.memory_space<vmem>>, %arg5: memref<512x128xf32, #tpu.memory_space<vmem>>) attributes {dimension_semantics = [#tpu.dimension_semantics<parallel>], iteration_bounds = array<i64: 1>, scalar_prefetch = 0 : i64, scratch_operands = 0 : i64, tpu.core_type = #tpu.core_type<tc>, window_params = [{transform_indices = @transform_0, window_bounds = array<i64: 512, 16>}, {pipeline_mode = #tpu.pipeline_mode<synchronous>, transform_indices = @transform_1, window_bounds = array<i64: 1, 16>}, {pipeline_mode = #tpu.pipeline_mode<synchronous>, transform_indices = @transform_2, window_bounds = array<i64: 1, 16>}, {pipeline_mode = #tpu.pipeline_mode<synchronous>, transform_indices = @transform_3, window_bounds = array<i64: 16, 128>}, {transform_indices = @transform_4, window_bounds = array<i64: 512, 128>}]} {
    %c0 = arith.constant 0 : index
    %c0_0 = arith.constant 0 : index
    %0 = vector.load %arg1[%c0, %c0_0] : memref<512x16xf32, #tpu.memory_space<vmem>>, vector<512x16xf32>
    %c0_1 = arith.constant 0 : index
    %c0_2 = arith.constant 0 : index
    %1 = vector.load %arg2[%c0_1, %c0_2] : memref<1x16xf32, #tpu.memory_space<vmem>>, vector<1x16xf32>
    %2 = vector.broadcast %1 : vector<1x16xf32> to vector<512x16xf32>
    %3 = arith.mulf %0, %2 : vector<512x16xf32>
    %c0_3 = arith.constant 0 : index
    %c0_4 = arith.constant 0 : index
    %4 = vector.load %arg3[%c0_3, %c0_4] : memref<1x16xf32, #tpu.memory_space<vmem>>, vector<1x16xf32>
    %5 = vector.broadcast %4 : vector<1x16xf32> to vector<512x16xf32>
    %6 = arith.addf %3, %5 : vector<512x16xf32>
    %cst = arith.constant 0.000000e+00 : f32
    %7 = vector.broadcast %cst : f32 to vector<512x16xf32>
    %8 = arith.maximumf %6, %7 : vector<512x16xf32>
    %9 = arith.truncf %8 : vector<512x16xf32> to vector<512x16xbf16>
    %c0_5 = arith.constant 0 : index
    %c0_6 = arith.constant 0 : index
    %10 = vector.load %arg4[%c0_5, %c0_6] : memref<16x128xbf16, #tpu.memory_space<vmem>>, vector<16x128xbf16>
    %cst_7 = arith.constant dense<0.000000e+00> : vector<512x128xf32>
    %11 = tpu.matmul %9, %10, %cst_7 {dimension_numbers = #tpu.dot_dimension_numbers<[1], [0], [0], [1], [0, 0, 1, 1], [], []>} : vector<512x16xbf16>, vector<16x128xbf16>, vector<512x128xf32> -> vector<512x128xf32>
    %c0_8 = arith.constant 0 : index
    %c0_9 = arith.constant 0 : index
    %12 = vector.load %arg5[%c0_8, %c0_9] : memref<512x128xf32, #tpu.memory_space<vmem>>, vector<512x128xf32>
    tpu.vector_store %arg5[%c0_8, %c0_9], %11 {strides = array<i32>} : memref<512x128xf32, #tpu.memory_space<vmem>>, vector<512x128xf32>,
    return
  }
  func.func @transform_0(%arg0: i32) -> (i32, i32) {
    %c0_i32 = arith.constant 0 : i32
    %c0_i32_0 = arith.constant 0 : i32
    return %arg0, %c0_i32 : i32, i32
  }
  func.func @transform_1(%arg0: i32) -> (i32, i32) {
    %c0_i32 = arith.constant 0 : i32
    %c0_i32_0 = arith.constant 0 : i32
    %c0_i32_1 = arith.constant 0 : i32
    return %c0_i32, %c0_i32_0 : i32, i32
  }
  func.func @transform_2(%arg0: i32) -> (i32, i32) {
    %c0_i32 = arith.constant 0 : i32
    %c0_i32_0 = arith.constant 0 : i32
    %c0_i32_1 = arith.constant 0 : i32
    return %c0_i32, %c0_i32_0 : i32, i32
  }
  func.func @transform_3(%arg0: i32) -> (i32, i32) {
    %c0_i32 = arith.constant 0 : i32
    %c0_i32_0 = arith.constant 0 : i32
    %c0_i32_1 = arith.constant 0 : i32
    return %c0_i32, %c0_i32_0 : i32, i32
  }
  func.func @transform_4(%arg0: i32) -> (i32, i32) {
    %c0_i32 = arith.constant 0 : i32
    %c0_i32_0 = arith.constant 0 : i32
    return %arg0, %c0_i32 : i32, i32
  }
}

module attributes {stable_mosaic.version = 11 : i64} {
  func.func @_bn_stats_kernel(%arg0: i32, %arg1: memref<64x256xf32, #tpu.memory_space<vmem>>, %arg2: memref<1x256xf32, #tpu.memory_space<vmem>>, %arg3: memref<1x256xf32, #tpu.memory_space<vmem>>) attributes {dimension_semantics = [#tpu.dimension_semantics<arbitrary>], iteration_bounds = array<i64: 1>, scalar_prefetch = 0 : i64, scratch_operands = 0 : i64, tpu.core_type = #tpu.core_type<tc>, window_params = [{transform_indices = @transform_0, window_bounds = array<i64: 64, 256>}, {pipeline_mode = #tpu.pipeline_mode<synchronous>, transform_indices = @transform_1, window_bounds = array<i64: 1, 256>}, {pipeline_mode = #tpu.pipeline_mode<synchronous>, transform_indices = @transform_2, window_bounds = array<i64: 1, 256>}]} {
    %c0_i32 = arith.constant 0 : i32
    %0 = arith.cmpi eq, %arg0, %c0_i32 : i32
    %1 = arith.extui %0 : i1 to i32
    %c0_i32_0 = arith.constant 0 : i32
    %2 = arith.cmpi ne, %1, %c0_i32_0 : i32
    scf.if %2 {
      %cst_11 = arith.constant 0.000000e+00 : f32
      %15 = vector.broadcast %cst_11 : f32 to vector<1x256xf32>
      %c0_12 = arith.constant 0 : index
      %c0_13 = arith.constant 0 : index
      %16 = vector.load %arg2[%c0_12, %c0_13] : memref<1x256xf32, #tpu.memory_space<vmem>>, vector<1x256xf32>
      tpu.vector_store %arg2[%c0_12, %c0_13], %15 {strides = array<i32>} : memref<1x256xf32, #tpu.memory_space<vmem>>, vector<1x256xf32>,
      %cst_14 = arith.constant 0.000000e+00 : f32
      %17 = vector.broadcast %cst_14 : f32 to vector<1x256xf32>
      %c0_15 = arith.constant 0 : index
      %c0_16 = arith.constant 0 : index
      %18 = vector.load %arg3[%c0_15, %c0_16] : memref<1x256xf32, #tpu.memory_space<vmem>>, vector<1x256xf32>
      tpu.vector_store %arg3[%c0_15, %c0_16], %17 {strides = array<i32>} : memref<1x256xf32, #tpu.memory_space<vmem>>, vector<1x256xf32>,
    } else {
    }
    %c0 = arith.constant 0 : index
    %c0_1 = arith.constant 0 : index
    %3 = vector.load %arg1[%c0, %c0_1] : memref<64x256xf32, #tpu.memory_space<vmem>>, vector<64x256xf32>
    %c0_2 = arith.constant 0 : index
    %c0_3 = arith.constant 0 : index
    %4 = vector.load %arg2[%c0_2, %c0_3] : memref<1x256xf32, #tpu.memory_space<vmem>>, vector<1x256xf32>
    %cst = arith.constant dense<0.000000e+00> : vector<256xf32>
    %5 = vector.multi_reduction <add>, %3, %cst [0] : vector<64x256xf32> to vector<256xf32>
    %6 = vector.shape_cast %5 : vector<256xf32> to vector<1x256xf32>
    %7 = arith.addf %4, %6 : vector<1x256xf32>
    %c0_4 = arith.constant 0 : index
    %c0_5 = arith.constant 0 : index
    %8 = vector.load %arg2[%c0_4, %c0_5] : memref<1x256xf32, #tpu.memory_space<vmem>>, vector<1x256xf32>
    tpu.vector_store %arg2[%c0_4, %c0_5], %7 {strides = array<i32>} : memref<1x256xf32, #tpu.memory_space<vmem>>, vector<1x256xf32>,
    %c0_6 = arith.constant 0 : index
    %c0_7 = arith.constant 0 : index
    %9 = vector.load %arg3[%c0_6, %c0_7] : memref<1x256xf32, #tpu.memory_space<vmem>>, vector<1x256xf32>
    %10 = arith.mulf %3, %3 : vector<64x256xf32>
    %cst_8 = arith.constant dense<0.000000e+00> : vector<256xf32>
    %11 = vector.multi_reduction <add>, %10, %cst_8 [0] : vector<64x256xf32> to vector<256xf32>
    %12 = vector.shape_cast %11 : vector<256xf32> to vector<1x256xf32>
    %13 = arith.addf %9, %12 : vector<1x256xf32>
    %c0_9 = arith.constant 0 : index
    %c0_10 = arith.constant 0 : index
    %14 = vector.load %arg3[%c0_9, %c0_10] : memref<1x256xf32, #tpu.memory_space<vmem>>, vector<1x256xf32>
    tpu.vector_store %arg3[%c0_9, %c0_10], %13 {strides = array<i32>} : memref<1x256xf32, #tpu.memory_space<vmem>>, vector<1x256xf32>,
    return
  }
  func.func @transform_0(%arg0: i32) -> (i32, i32) {
    %c0_i32 = arith.constant 0 : i32
    %c0_i32_0 = arith.constant 0 : i32
    return %arg0, %c0_i32 : i32, i32
  }
  func.func @transform_1(%arg0: i32) -> (i32, i32) {
    %c0_i32 = arith.constant 0 : i32
    %c0_i32_0 = arith.constant 0 : i32
    %c0_i32_1 = arith.constant 0 : i32
    return %c0_i32, %c0_i32_0 : i32, i32
  }
  func.func @transform_2(%arg0: i32) -> (i32, i32) {
    %c0_i32 = arith.constant 0 : i32
    %c0_i32_0 = arith.constant 0 : i32
    %c0_i32_1 = arith.constant 0 : i32
    return %c0_i32, %c0_i32_0 : i32, i32
  }
}

module attributes {stable_mosaic.version = 11 : i64} {
  func.func @_bn_relu_matmul_cols_kernel(%arg0: i32, %arg1: memref<512x8xf32, #tpu.memory_space<vmem>>, %arg2: memref<1x8xf32, #tpu.memory_space<vmem>>, %arg3: memref<1x8xf32, #tpu.memory_space<vmem>>, %arg4: memref<8x128xbf16, #tpu.memory_space<vmem>>, %arg5: memref<512x128xf32, #tpu.memory_space<vmem>>) attributes {dimension_semantics = [#tpu.dimension_semantics<parallel>], iteration_bounds = array<i64: 4>, scalar_prefetch = 0 : i64, scratch_operands = 0 : i64, tpu.core_type = #tpu.core_type<tc>, window_params = [{transform_indices = @transform_0, window_bounds = array<i64: 512, 8>}, {pipeline_mode = #tpu.pipeline_mode<synchronous>, transform_indices = @transform_1, window_bounds = array<i64: 1, 8>}, {pipeline_mode = #tpu.pipeline_mode<synchronous>, transform_indices = @transform_2, window_bounds = array<i64: 1, 8>}, {pipeline_mode = #tpu.pipeline_mode<synchronous>, transform_indices = @transform_3, window_bounds = array<i64: 8, 128>}, {transform_indices = @transform_4, window_bounds = array<i64: 512, 128>}]} {
    %c0 = arith.constant 0 : index
    %c0_0 = arith.constant 0 : index
    %0 = vector.load %arg1[%c0, %c0_0] : memref<512x8xf32, #tpu.memory_space<vmem>>, vector<512x8xf32>
    %c0_1 = arith.constant 0 : index
    %c0_2 = arith.constant 0 : index
    %1 = vector.load %arg2[%c0_1, %c0_2] : memref<1x8xf32, #tpu.memory_space<vmem>>, vector<1x8xf32>
    %2 = vector.broadcast %1 : vector<1x8xf32> to vector<512x8xf32>
    %3 = arith.mulf %0, %2 : vector<512x8xf32>
    %c0_3 = arith.constant 0 : index
    %c0_4 = arith.constant 0 : index
    %4 = vector.load %arg3[%c0_3, %c0_4] : memref<1x8xf32, #tpu.memory_space<vmem>>, vector<1x8xf32>
    %5 = vector.broadcast %4 : vector<1x8xf32> to vector<512x8xf32>
    %6 = arith.addf %3, %5 : vector<512x8xf32>
    %cst = arith.constant 0.000000e+00 : f32
    %7 = vector.broadcast %cst : f32 to vector<512x8xf32>
    %8 = arith.maximumf %6, %7 : vector<512x8xf32>
    %9 = arith.truncf %8 : vector<512x8xf32> to vector<512x8xbf16>
    %c0_5 = arith.constant 0 : index
    %c0_6 = arith.constant 0 : index
    %10 = vector.load %arg4[%c0_5, %c0_6] : memref<8x128xbf16, #tpu.memory_space<vmem>>, vector<8x128xbf16>
    %cst_7 = arith.constant dense<0.000000e+00> : vector<512x128xf32>
    %11 = tpu.matmul %9, %10, %cst_7 {dimension_numbers = #tpu.dot_dimension_numbers<[1], [0], [0], [1], [0, 0, 1, 1], [], []>} : vector<512x8xbf16>, vector<8x128xbf16>, vector<512x128xf32> -> vector<512x128xf32>
    %c0_8 = arith.constant 0 : index
    %c0_9 = arith.constant 0 : index
    %12 = vector.load %arg5[%c0_8, %c0_9] : memref<512x128xf32, #tpu.memory_space<vmem>>, vector<512x128xf32>
    tpu.vector_store %arg5[%c0_8, %c0_9], %11 {strides = array<i32>} : memref<512x128xf32, #tpu.memory_space<vmem>>, vector<512x128xf32>,
    return
  }
  func.func @transform_0(%arg0: i32) -> (i32, i32) {
    %c0_i32 = arith.constant 0 : i32
    %c0_i32_0 = arith.constant 0 : i32
    return %arg0, %c0_i32 : i32, i32
  }
  func.func @transform_1(%arg0: i32) -> (i32, i32) {
    %c0_i32 = arith.constant 0 : i32
    %c0_i32_0 = arith.constant 0 : i32
    %c0_i32_1 = arith.constant 0 : i32
    return %c0_i32, %c0_i32_0 : i32, i32
  }
  func.func @transform_2(%arg0: i32) -> (i32, i32) {
    %c0_i32 = arith.constant 0 : i32
    %c0_i32_0 = arith.constant 0 : i32
    %c0_i32_1 = arith.constant 0 : i32
    return %c0_i32, %c0_i32_0 : i32, i32
  }
  func.func @transform_3(%arg0: i32) -> (i32, i32) {
    %c0_i32 = arith.constant 0 : i32
    %c0_i32_0 = arith.constant 0 : i32
    %c0_i32_1 = arith.constant 0 : i32
    return %c0_i32, %c0_i32_0 : i32, i32
  }
  func.func @transform_4(%arg0: i32) -> (i32, i32) {
    %c0_i32 = arith.constant 0 : i32
    %c0_i32_0 = arith.constant 0 : i32
    return %arg0, %c0_i32 : i32, i32
  }
}

module attributes {stable_mosaic.version = 11 : i64} {
  func.func @_bias_tanh_kernel(%arg0: i32, %arg1: memref<16x1536xf32, #tpu.memory_space<vmem>>, %arg2: memref<1x1536xf32, #tpu.memory_space<vmem>>, %arg3: memref<16x1536xf32, #tpu.memory_space<vmem>>) attributes {dimension_semantics = [#tpu.dimension_semantics<parallel>], iteration_bounds = array<i64: 1>, scalar_prefetch = 0 : i64, scratch_operands = 0 : i64, tpu.core_type = #tpu.core_type<tc>, window_params = [{transform_indices = @transform_0, window_bounds = array<i64: 16, 1536>}, {pipeline_mode = #tpu.pipeline_mode<synchronous>, transform_indices = @transform_1, window_bounds = array<i64: 1, 1536>}, {transform_indices = @transform_2, window_bounds = array<i64: 16, 1536>}]} {
    %c0 = arith.constant 0 : index
    %c0_0 = arith.constant 0 : index
    %0 = vector.load %arg1[%c0, %c0_0] : memref<16x1536xf32, #tpu.memory_space<vmem>>, vector<16x1536xf32>
    %c0_1 = arith.constant 0 : index
    %c0_2 = arith.constant 0 : index
    %1 = vector.load %arg2[%c0_1, %c0_2] : memref<1x1536xf32, #tpu.memory_space<vmem>>, vector<1x1536xf32>
    %2 = vector.broadcast %1 : vector<1x1536xf32> to vector<16x1536xf32>
    %3 = arith.addf %0, %2 : vector<16x1536xf32>
    %4 = math.tanh %3 : vector<16x1536xf32>
    %c0_3 = arith.constant 0 : index
    %c0_4 = arith.constant 0 : index
    %5 = vector.load %arg3[%c0_3, %c0_4] : memref<16x1536xf32, #tpu.memory_space<vmem>>, vector<16x1536xf32>
    tpu.vector_store %arg3[%c0_3, %c0_4], %4 {strides = array<i32>} : memref<16x1536xf32, #tpu.memory_space<vmem>>, vector<16x1536xf32>,
    return
  }
  func.func @transform_0(%arg0: i32) -> (i32, i32) {
    %c0_i32 = arith.constant 0 : i32
    %c0_i32_0 = arith.constant 0 : i32
    return %arg0, %c0_i32 : i32, i32
  }
  func.func @transform_1(%arg0: i32) -> (i32, i32) {
    %c0_i32 = arith.constant 0 : i32
    %c0_i32_0 = arith.constant 0 : i32
    %c0_i32_1 = arith.constant 0 : i32
    return %c0_i32, %c0_i32_0 : i32, i32
  }
  func.func @transform_2(%arg0: i32) -> (i32, i32) {
    %c0_i32 = arith.constant 0 : i32
    %c0_i32_0 = arith.constant 0 : i32
    return %arg0, %c0_i32 : i32, i32
  }
}

</mosaic_0001>

<bundles_post_ra>
// kernel: _lambda_.11
= control target key start
LH: loop header
LB: loop body
LE: loop exit
PB: predicated region body
PF: predicated region fallthrough
CT: control target
= control target key end

     0   :  { %v14_v0 = vlaneseq  ;;  %v104_v6 = vmov 0.0   ;;  %v105_v11 = vmov 1966171168   ;;  %s157_s0 = inlined_call_operand.vmem [shape: f32[8,256], index: 0, kind: input, shape index: {}]   ;;  %s158_s1 = inlined_call_operand.vmem [shape: f32[1,256], index: 1, kind: output, shape index: {0}]   ;;  %s159_s2 = inlined_call_operand.vmem [shape: f32[1,256], index: 2, kind: output, shape index: {1}]  }
   0x1   :  { %v20_v1 = vld [vmem:[%s157_s0] sm:$0xff]  ;;  %v21_v2 = vld [vmem:[%s157_s0 + $0x8] sm:$0xff]  ;;  %v39_v12 = vunpack.c.l.s4 %v105_v11 }
   0x2   :  { %vm127_vm0 = vcmp.lt.s32.totalorder %v14_v0, 256  ;;  %v23_v4 = vrot.slane %v20_v1, 4  ;;  %v29_v5 = vrot.slane %v21_v2, 4  ;;  %v60_v7 = vmul.f32 %v20_v1, %v20_v1 }
   0x3   :  { %18 = vst.msk [vmem:[%s158_s1] sm:$0x3] %vm127_vm0, %v104_v6  ;;  %19 = vst.msk [vmem:[%s159_s2] sm:$0x3] %vm127_vm0, %v104_v6  ;;  %v61_v8 = vmul.f32 %v21_v2, %v21_v2  ;;  %v40_v21 = vunpack.c.0.s8 %v39_v12  ;;  %v42_v22 = vshrl.u32 %v14_v0, 7 }
   0x4   :  { %v24_v9 = vadd.f32 %v23_v4, %v20_v1  ;;  %v30_v10 = vadd.f32 %v29_v5, %v21_v2  ;;  %v62_v13 = vrot.slane %v60_v7, 4 }
   0x5   :  { %v68_v14 = vrot.slane %v61_v8, 4  ;;  %v43_v31 = vsub.s32 %v40_v21, %v42_v22 }
   0x6   :  { %v25_v15 = vrot.slane %v24_v9, 2  ;;  %v31_v16 = vrot.slane %v30_v10, 2  ;;  %v63_v17 = vadd.f32 %v62_v13, %v60_v7 }
   0x7   :  { %v69_v18 = vadd.f32 %v68_v14, %v61_v8 }
   0x8   :  { %v26_v19 = vadd.f32 %v25_v15, %v24_v9  ;;  %v32_v20 = vadd.f32 %v31_v16, %v30_v10  ;;  %v64_v23 = vrot.slane %v63_v17, 2 }
   0x9   :  { %v70_v24 = vrot.slane %v69_v18, 2 }
   0xa   :  { %v27_v25 = vrot.slane %v26_v19, 1  ;;  %v33_v26 = vrot.slane %v32_v20, 1  ;;  %v65_v27 = vadd.f32 %v64_v23, %v63_v17  ;;  %v22_v38 = vld [vmem:[%s158_s1] sm:$0x3] }
   0xb   :  { %v71_v28 = vadd.f32 %v70_v24, %v69_v18  ;;  %v59_v43 = vld [vmem:[%s159_s2] sm:$0x3] }
   0xc   :  { %v28_v29 = vadd.f32 %v27_v25, %v26_v19  ;;  %v34_v30 = vadd.f32 %v33_v26, %v32_v20  ;;  %v66_v32 = vrot.slane %v65_v27, 1 }
   0xd   :  { %v72_v33 = vrot.slane %v71_v28, 1 }
   0xe   :  { %v37_v34 = vcombine.low %v28_v29, %v34_v30  ;;  %v67_v35 = vadd.f32 %v66_v32, %v65_v27 }
   0xf   :  { %v73_v36 = vadd.f32 %v72_v33, %v71_v28 }
  0x10   :  { %v44_v37 = vrot.slane %v37_v34, %v43_v31 }
  0x11   :  { %v76_v39 = vcombine.low %v67_v35, %v73_v36 }
  0x12   :  { %v51_v40 = vrot.slane %v44_v37, %v43_v31 }
  0x13   :  { %v83_v41 = vrot.slane %v76_v39, %v43_v31 }
  0x14   :  { %v53_v42 = vadd.f32 %v51_v40, %v22_v38 }
  0x15   :  { %v90_v44 = vrot.slane %v83_v41, %v43_v31 }
  0x16   :  { %58 = vst.msk [vmem:[%s158_s1] sm:$0x3] %vm127_vm0, %v53_v42 }
  0x17   :  { %v92_v45 = vadd.f32 %v90_v44, %v59_v43 }
  0x19   :  { %93 = vst.msk [vmem:[%s159_s2] sm:$0x3] %vm127_vm0, %v92_v45 }

// kernel: _lambda_.10
= control target key start
LH: loop header
LB: loop body
LE: loop exit
PB: predicated region body
PF: predicated region fallthrough
CT: control target
= control target key end

     0   :  { %7 = vsyncpa [#allocation3], 0  ;;  %s332_s9 = smov [#allocation2]   ;;  %s392_s0 = inlined_call_operand.hbm [shape: f32[2,16], index: 0, kind: input, shape index: {}]   ;;  %s393_s1 = inlined_call_operand.vmem [shape: bf16[16,1024], index: 1, kind: input, shape index: {}]   ;;  %s394_s2 = inlined_call_operand.vmem [shape: f32[2,1024], index: 2, kind: output, shape index: {}]  }
   0x1   :  { %s14_s10 = sshll.u32 %s332_s9, 4  ;;  %s308_s13 = scalar_lea.hbm %s392_s0, 32  ;;  %s15_s10 = int_to_ptr.vmem [resolvable:$true] %s14_s10 }
   0x2   :  { %p309_p0 = scmp.ne.s32.totalorder %s392_s0, %s308_s13  ;;  %p312_p1 = scmp.lt.u32.totalorder %s308_s13, %s392_s0 }
   0x4   :  { %p314_p2 = pnand %p312_p1, %p309_p0 }
   0x6   :  { %317 = shalt.err (!%p314_p2)
}
   0x7   :  { %s318_s18 = scalar_lea.vmem %s15_s10, 32  ;;  %p323_p4 = scmp.lt.s32.totalorder %s15_s10, %s15_s10 }
   0x8   :  { %p319_p3 = scmp.ne.s32.totalorder %s15_s10, %s318_s18  ;;  %p324_p5 = scmp.lt.s32.totalorder %s318_s18, %s318_s18 }
   0xa   :  { %p325_p6 = por %p324_p5, %p323_p4 }
   0xc   :  { %p326_p7 = pnand %p325_p6, %p319_p3 }
   0xe   :  { %329 = shalt.err (!%p326_p7)
}
   0xf   :  { %17 = dma.hbm_to_vmem [thread:$0]  %s392_s0, 32, %s15_s10, [#allocation3]  }
  0x10   :  { %330 = dma.done.wait [#allocation3], 32  }
  0x11   :  { %331 = vsyncadd [#allocation3], 4294967264  ;;  %v333_v0 = vmov 0   ;;  %v26_v1 = vld [vmem:[%s393_s1] sm:$0xff]  ;;  %v27_v3 = vld [vmem:[%s393_s1 + $0x8] sm:$0xff]  ;;  %vm74_vm0 = vcmask 130048   ;;  %v255_v21 = vlaneseq }
  0x12   :  { %110 = vmatprep.mubr.bf16.mxu0 %v333_v0  ;;  %151 = vmatprep.mubr.bf16.mxu1 %v333_v0  ;;  %v30_v2 = vld [vmem:[%s393_s1 + $0x20] sm:$0xff]  ;;  %v31_v5 = vld [vmem:[%s393_s1 + $0x28] sm:$0xff]  ;;  %v28_v8 = vld [vmem:[%s393_s1 + $0x10] sm:$0xff]  ;;  %v334_v19 = vmov 1983009808  }
  0x13   :  { %v294_v4 = vcombine.high %v26_v1, %v30_v2  ;;  %v293_v6 = vcombine.low %v26_v1, %v30_v2  ;;  %v24_v7 = vld [vmem:[#allocation2] sm:$0x3]  ;;  %v296_v9 = vcombine.high %v27_v3, %v31_v5  ;;  %v295_v10 = vcombine.low %v27_v3, %v31_v5  ;;  %v32_v11 = vld [vmem:[%s393_s1 + $0x30] sm:$0xff]  ;;  %v29_v12 = vld [vmem:[%s393_s1 + $0x18] sm:$0xff] }
  0x14   :  { %v33_v13 = vld [vmem:[%s393_s1 + $0x38] sm:$0xff]  ;;  %v25_v14 = vpack.c.bf16 %v24_v7, %v24_v7  ;;  %v298_v15 = vcombine.high %v28_v8, %v32_v11  ;;  %v297_v17 = vcombine.low %v28_v8, %v32_v11  ;;  %v253_v20 = vunpack.c.l.s4 %v334_v19 }
  0x15   :  { %78 = vmatprep.subr.bf16.mxu0 %v294_v4  ;;  %v300_v16 = vcombine.high %v29_v12, %v33_v13  ;;  %119 = vmatprep.subr.bf16.mxu1 %v296_v9  ;;  %v299_v18 = vcombine.low %v29_v12, %v33_v13  ;;  %v256_v23 = vshrl.u32 %v255_v21, 7 }
  0x16   :  { %79 = vmatpush1.bf16.msra.mxu0 %v293_v6  ;;  %120 = vmatpush1.bf16.msra.mxu1 %v295_v10  ;;  %v254_v22 = vunpack.c.0.s8 %v253_v20 }
  0x17   :  { %160 = vmatprep.subr.bf16.mxu0 %v298_v15  ;;  %201 = vmatprep.subr.bf16.mxu1 %v300_v16 }
  0x18   :  { %v257_v25 = vsub.s32 %v254_v22, %v256_v23 }
  0x19   :  { %301 = vmatmul.mubr.msk.bf16.vlgmr.msra.gmra.mrb[0].mxu0 %vm74_vm0, %v25_v14  ;;  %302 = vmatmul.mubr.msk.bf16.vlgmr.msra.gmra.mrb[0].mxu1 %vm74_vm0, %v25_v14 }
  0x1a   :  { %161 = vmatpush1.bf16.msra.mxu0 %v297_v17  ;;  %202 = vmatpush1.bf16.msra.mxu1 %v299_v18 }
  0x1b   :  { %192 = vmatprep.mubr.bf16.mxu0 %v333_v0  ;;  %233 = vmatprep.mubr.bf16.mxu1 %v333_v0 }
  0x21   :  { %303 = vmatmul.mubr.msk.bf16.vlgmr.msra.gmra.mrb[4].mxu0 %vm74_vm0, %v25_v14  ;;  %304 = vmatmul.mubr.msk.bf16.vlgmr.msra.gmra.mrb[4].mxu1 %vm74_vm0, %v25_v14 }
  0xec   :  { %v112_v24 = vpop.f32.mrb[0].mxu0  ;;  %v153_v26 = vpop.f32.mrb[0].mxu1 }
  0xed   :  { %v114_v27 = vpop.f32.mrb[1].mxu0  ;;  %v155_v29 = vpop.f32.mrb[1].mxu1 }
  0xee   :  { %v250_v28 = vcombine.low %v112_v24, %v114_v27  ;;  %v116_v30 = vpop.f32.mrb[2].mxu0  ;;  %v251_v31 = vcombine.low %v153_v26, %v155_v29  ;;  %v157_v32 = vpop.f32.mrb[2].mxu1 }
  0xef   :  { %v117_v33 = vpop.f32.mrb[3].mxu0  ;;  %v158_v35 = vpop.f32.mrb[3].mxu1 }
  0xf0   :  { %v258_v34 = vrot.slane %v250_v28, %v257_v25  ;;  %v265_v36 = vrot.slane %v251_v31, %v257_v25 }
  0xf2   :  { %v266_v37 = vcombine.low %v258_v34, %v265_v36 }
  0xf4   :  { %v194_v38 = vpop.f32.mrb[4].mxu0  ;;  %286 = vst [vmem:[%s394_s2] sm:$0xff] %v266_v37  ;;  %v235_v39 = vpop.f32.mrb[4].mxu1 }
  0xf5   :  { %v196_v40 = vpop.f32.mrb[5].mxu0  ;;  %v237_v42 = vpop.f32.mrb[5].mxu1 }
  0xf6   :  { %v267_v41 = vcombine.low %v194_v38, %v196_v40  ;;  %v198_v43 = vpop.f32.mrb[6].mxu0  ;;  %v268_v44 = vcombine.low %v235_v39, %v237_v42  ;;  %v239_v45 = vpop.f32.mrb[6].mxu1 }
  0xf7   :  { %v199_v46 = vpop.f32.mrb[7].mxu0  ;;  %v240_v48 = vpop.f32.mrb[7].mxu1 }
  0xf8   :  { %v275_v47 = vrot.slane %v267_v41, %v257_v25  ;;  %v282_v49 = vrot.slane %v268_v44, %v257_v25 }
  0xfa   :  { %v283_v50 = vcombine.low %v275_v47, %v282_v49 }
  0xfc   :  { %287 = vst [vmem:[%s394_s2 + $0x8] sm:$0xff] %v283_v50 }
  0xfd   :  { %292 = vsyncpa [#allocation3], 1 }

// kernel: _lambda_.12
= control target key start
LH: loop header
LB: loop body
LE: loop exit
PB: predicated region body
PF: predicated region fallthrough
CT: control target
= control target key end

     0   :  { %v326_v1 = vmov 0   ;;  %vm146_vm0 = vcmask 523264   ;;  %s466_s3 = inlined_call_operand.vmem [shape: bf16[64,512], index: 3, kind: input, shape index: {}]   ;;  %s467_s0 = inlined_call_operand.vmem [shape: f32[32,64], index: 0, kind: input, shape index: {}]   ;;  %s468_s1 = inlined_call_operand.vmem [shape: f32[1,64], index: 1, kind: input, shape index: {}]   ;;  %s469_s2 = inlined_call_operand.vmem [shape: f32[1,64], index: 2, kind: input, shape index: {}]   ;;  %s470_s4 = inlined_call_operand.vmem [shape: f32[32,512], index: 4, kind: output, shape index: {}]  }
   0x1   :  { %v302_v0 = vld [vmem:[%s466_s3 + $0x4] ss:$16 sps:$4 sm:$0xff]   ;;  %185 = vmatprep.mubr.bf16.mxu0 %v326_v1  ;;  %238 = vmatprep.mubr.bf16.mxu1 %v326_v1  ;;  %v304_v2 = vld [vmem:[%s466_s3 + $0xc] ss:$16 sps:$4 sm:$0xff]   ;;  %v306_v3 = vld [vmem:[%s466_s3] ss:$16 sps:$4 sm:$0xff]  }
   0x2   :  { %153 = vmatprep.subr.bf16.mxu0 %v302_v0  ;;  %v307_v4 = vld [vmem:[%s466_s3 + $0x8] ss:$16 sps:$4 sm:$0xff]   ;;  %206 = vmatprep.subr.bf16.mxu1 %v304_v2  ;;  %v308_v5 = vld [vmem:[%s466_s3 + $0x24] ss:$16 sps:$4 sm:$0xff]   ;;  %v310_v6 = vld [vmem:[%s466_s3 + $0x2c] ss:$16 sps:$4 sm:$0xff]  }
   0x3   :  { %154 = vmatpush1.bf16.msra.mxu0 %v306_v3  ;;  %207 = vmatpush1.bf16.msra.mxu1 %v307_v4  ;;  %v312_v7 = vld [vmem:[%s466_s3 + $0x20] ss:$16 sps:$4 sm:$0xff]   ;;  %v313_v8 = vld [vmem:[%s466_s3 + $0x28] ss:$16 sps:$4 sm:$0xff]   ;;  %v314_v9 = vld [vmem:[%s466_s3 + $0x44] ss:$16 sps:$4 sm:$0xff]  }
   0x4   :  { %155 = vmatprep.subr.bf16.mxu0 %v308_v5  ;;  %208 = vmatprep.subr.bf16.mxu1 %v310_v6  ;;  %v316_v10 = vld [vmem:[%s466_s3 + $0x4c] ss:$16 sps:$4 sm:$0xff]   ;;  %v318_v11 = vld [vmem:[%s466_s3 + $0x40] ss:$16 sps:$4 sm:$0xff]   ;;  %v319_v12 = vld [vmem:[%s466_s3 + $0x48] ss:$16 sps:$4 sm:$0xff]  }
   0x5   :  { %v320_v13 = vld [vmem:[%s466_s3 + $0x64] ss:$16 sps:$4 sm:$0xff]   ;;  %v322_v14 = vld [vmem:[%s466_s3 + $0x6c] ss:$16 sps:$4 sm:$0xff]   ;;  %v324_v15 = vld [vmem:[%s466_s3 + $0x60] ss:$16 sps:$4 sm:$0xff]  }
   0x6   :  { %v18_v16 = vld [vmem:[%s467_s0] sm:$0xff]  ;;  %v19_v17 = vld [vmem:[%s467_s0 + $0x8] sm:$0xff]  ;;  %v20_v23 = vld [vmem:[%s467_s0 + $0x10] sm:$0xff] }
   0x7   :  { %156 = vmatpush1.bf16.msra.mxu0 %v312_v7  ;;  %209 = vmatpush1.bf16.msra.mxu1 %v313_v8  ;;  %v279_v18 = vld [vmem:[%s468_s1] ss:$0 sm:$0xff]  ;;  %v325_v20 = vld [vmem:[%s466_s3 + $0x68] ss:$16 sps:$4 sm:$0xff]  }
   0x8   :  { %157 = vmatprep.subr.bf16.mxu0 %v314_v9  ;;  %210 = vmatprep.subr.bf16.mxu1 %v316_v10  ;;  %v280_v19 = vld [vmem:[%s469_s2] ss:$0 sm:$0xff]  ;;  %v29_v21 = vmul.f32 %v279_v18, %v18_v16  ;;  %v30_v22 = vmul.f32 %v279_v18, %v19_v17  ;;  %v21_v24 = vld [vmem:[%s467_s0 + $0x18] sm:$0xff]  ;;  %v31_v25 = vmul.f32 %v279_v18, %v20_v23 }
   0x9   :  { %v32_v26 = vmul.f32 %v279_v18, %v21_v24 }
   0xa   :  { %v40_v27 = vadd.f32 %v280_v19, %v29_v21  ;;  %v41_v28 = vadd.f32 %v280_v19, %v30_v22  ;;  %v42_v31 = vadd.f32 %v280_v19, %v31_v25 }
   0xb   :  { %158 = vmatpush1.bf16.msra.mxu0 %v318_v11  ;;  %211 = vmatpush1.bf16.msra.mxu1 %v319_v12  ;;  %v43_v32 = vadd.f32 %v280_v19, %v32_v26 }
   0xc   :  { %159 = vmatprep.subr.bf16.mxu0 %v320_v13  ;;  %212 = vmatprep.subr.bf16.mxu1 %v322_v14  ;;  %v44_v29 = vmax.f32 %v40_v27, 0.0  ;;  %v45_v30 = vmax.f32 %v41_v28, 0.0  ;;  %v46_v34 = vmax.f32 %v42_v31, 0.0 }
   0xd   :  { %v47_v35 = vmax.f32 %v43_v32, 0.0 }
   0xe   :  { %v48_v33 = vpack.c.bf16 %v45_v30, %v44_v29 }
   0xf   :  { %160 = vmatpush1.bf16.msra.mxu0 %v324_v15  ;;  %213 = vmatpush1.bf16.msra.mxu1 %v325_v20  ;;  %v49_v36 = vpack.c.bf16 %v47_v35, %v46_v34 }
  0x12   :  { %297 = vmatmul.mubr.msk.bf16.vlgmr.msra.gmra.mrb[0].mxu0 %vm146_vm0, %v48_v33  ;;  %299 = vmatmul.mubr.msk.bf16.vlgmr.msra.gmra.mrb[0].mxu1 %vm146_vm0, %v48_v33 }
  0x13   :  { %195 = vmatprep.mubr.bf16.mxu0 %v326_v1  ;;  %248 = vmatprep.mubr.bf16.mxu1 %v326_v1 }
  0x1a   :  { %298 = vmatmul.mubr.msk.bf16.gmra.mrb[4].mxu0 %vm146_vm0, %v49_v36  ;;  %300 = vmatmul.mubr.msk.bf16.gmra.mrb[4].mxu1 %vm146_vm0, %v49_v36 }
  0xe5   :  { %v187_v37 = vpop.f32.mrb[0].mxu0  ;;  %v240_v38 = vpop.f32.mrb[0].mxu1 }
  0xe6   :  { %259 = vst [vmem:[%s470_s4] sm:$0xff] %v187_v37  ;;  %261 = vst [vmem:[%s470_s4 + $0x10] sm:$0xff] %v240_v38  ;;  %v189_v39 = vpop.f32.mrb[1].mxu0  ;;  %v242_v40 = vpop.f32.mrb[1].mxu1 }
  0xe7   :  { %260 = vst [vmem:[%s470_s4 + $0x8] sm:$0xff] %v189_v39  ;;  %262 = vst [vmem:[%s470_s4 + $0x18] sm:$0xff] %v242_v40  ;;  %v191_v41 = vpop.f32.mrb[2].mxu0  ;;  %v244_v42 = vpop.f32.mrb[2].mxu1 }
  0xe8   :  { %263 = vst [vmem:[%s470_s4 + $0x20] sm:$0xff] %v191_v41  ;;  %265 = vst [vmem:[%s470_s4 + $0x30] sm:$0xff] %v244_v42  ;;  %v193_v43 = vpop.f32.mrb[3].mxu0  ;;  %v246_v44 = vpop.f32.mrb[3].mxu1 }
  0xe9   :  { %264 = vst [vmem:[%s470_s4 + $0x28] sm:$0xff] %v193_v43  ;;  %266 = vst [vmem:[%s470_s4 + $0x38] sm:$0xff] %v246_v44 }
  0xed   :  { %v197_v45 = vpop.f32.mrb[4].mxu0  ;;  %v250_v46 = vpop.f32.mrb[4].mxu1 }
  0xee   :  { %267 = vst [vmem:[%s470_s4 + $0x40] sm:$0xff] %v197_v45  ;;  %269 = vst [vmem:[%s470_s4 + $0x50] sm:$0xff] %v250_v46  ;;  %v199_v47 = vpop.f32.mrb[5].mxu0  ;;  %v252_v48 = vpop.f32.mrb[5].mxu1 }
  0xef   :  { %268 = vst [vmem:[%s470_s4 + $0x48] sm:$0xff] %v199_v47  ;;  %270 = vst [vmem:[%s470_s4 + $0x58] sm:$0xff] %v252_v48  ;;  %v201_v49 = vpop.f32.mrb[6].mxu0  ;;  %v254_v50 = vpop.f32.mrb[6].mxu1 }
  0xf0   :  { %271 = vst [vmem:[%s470_s4 + $0x60] sm:$0xff] %v201_v49  ;;  %273 = vst [vmem:[%s470_s4 + $0x70] sm:$0xff] %v254_v50  ;;  %v203_v51 = vpop.f32.mrb[7].mxu0  ;;  %v256_v52 = vpop.f32.mrb[7].mxu1 }
  0xf1   :  { %272 = vst [vmem:[%s470_s4 + $0x68] sm:$0xff] %v203_v51  ;;  %274 = vst [vmem:[%s470_s4 + $0x78] sm:$0xff] %v256_v52 }

// kernel: _lambda_.13
= control target key start
LH: loop header
LB: loop body
LE: loop exit
PB: predicated region body
PF: predicated region fallthrough
CT: control target
= control target key end

     0   :  { %v14_v0 = vlaneseq  ;;  %v112_v8 = vmov 0.0   ;;  %v113_v19 = vmov 1966171168   ;;  %s171_s0 = inlined_call_operand.vmem [shape: f32[16,256], index: 0, kind: input, shape index: {}]   ;;  %s172_s1 = inlined_call_operand.vmem [shape: f32[1,256], index: 1, kind: output, shape index: {0}]   ;;  %s173_s2 = inlined_call_operand.vmem [shape: f32[1,256], index: 2, kind: output, shape index: {1}]  }
   0x1   :  { %v20_v1 = vld [vmem:[%s171_s0] sm:$0xff]  ;;  %v21_v2 = vld [vmem:[%s171_s0 + $0x8] sm:$0xff]  ;;  %v22_v3 = vld [vmem:[%s171_s0 + $0x10] sm:$0xff]  ;;  %v43_v20 = vunpack.c.l.s4 %v113_v19 }
   0x2   :  { %vm138_vm0 = vcmp.lt.s32.totalorder %v14_v0, 256  ;;  %v23_v5 = vld [vmem:[%s171_s0 + $0x18] sm:$0xff]  ;;  %v25_v6 = vadd.f32 %v22_v3, %v20_v1  ;;  %v64_v7 = vmul.f32 %v20_v1, %v20_v1  ;;  %v65_v10 = vmul.f32 %v21_v2, %v21_v2 }
   0x3   :  { %18 = vst.msk [vmem:[%s172_s1] sm:$0x3] %vm138_vm0, %v112_v8  ;;  %v32_v9 = vadd.f32 %v23_v5, %v21_v2  ;;  %19 = vst.msk [vmem:[%s173_s2] sm:$0x3] %vm138_vm0, %v112_v8  ;;  %v66_v11 = vmul.f32 %v22_v3, %v22_v3  ;;  %v67_v13 = vmul.f32 %v23_v5, %v23_v5  ;;  %v44_v29 = vunpack.c.0.s8 %v43_v20 }
   0x4   :  { %v26_v12 = vrot.slane %v25_v6, 4  ;;  %v46_v30 = vshrl.u32 %v14_v0, 7 }
   0x5   :  { %v33_v14 = vrot.slane %v32_v9, 4  ;;  %v68_v15 = vadd.f32 %v66_v11, %v64_v7  ;;  %v75_v17 = vadd.f32 %v67_v13, %v65_v10 }
   0x6   :  { %v27_v16 = vadd.f32 %v26_v12, %v25_v6  ;;  %v47_v39 = vsub.s32 %v44_v29, %v46_v30 }
   0x7   :  { %v34_v18 = vadd.f32 %v33_v14, %v32_v9  ;;  %v69_v21 = vrot.slane %v68_v15, 4  ;;  %v76_v23 = vrot.slane %v75_v17, 4 }
   0x8   :  { %v28_v22 = vrot.slane %v27_v16, 2 }
   0x9   :  { %v35_v24 = vrot.slane %v34_v18, 2  ;;  %v70_v25 = vadd.f32 %v69_v21, %v68_v15  ;;  %v77_v27 = vadd.f32 %v76_v23, %v75_v17 }
   0xa   :  { %v29_v26 = vadd.f32 %v28_v22, %v27_v16  ;;  %v24_v46 = vld [vmem:[%s172_s1] sm:$0x3] }
   0xb   :  { %v36_v28 = vadd.f32 %v35_v24, %v34_v18  ;;  %v71_v31 = vrot.slane %v70_v25, 2  ;;  %v78_v33 = vrot.slane %v77_v27, 2  ;;  %v63_v51 = vld [vmem:[%s173_s2] sm:$0x3] }
   0xc   :  { %v30_v32 = vrot.slane %v29_v26, 1 }
   0xd   :  { %v37_v34 = vrot.slane %v36_v28, 1  ;;  %v72_v35 = vadd.f32 %v71_v31, %v70_v25  ;;  %v79_v37 = vadd.f32 %v78_v33, %v77_v27 }
   0xe   :  { %v31_v36 = vadd.f32 %v30_v32, %v29_v26 }
   0xf   :  { %v38_v38 = vadd.f32 %v37_v34, %v36_v28  ;;  %v73_v40 = vrot.slane %v72_v35, 1  ;;  %v80_v41 = vrot.slane %v79_v37, 1 }
  0x11   :  { %v41_v42 = vcombine.low %v31_v36, %v38_v38  ;;  %v74_v43 = vadd.f32 %v73_v40, %v72_v35  ;;  %v81_v44 = vadd.f32 %v80_v41, %v79_v37 }
  0x13   :  { %v48_v45 = vrot.slane %v41_v42, %v47_v39  ;;  %v84_v47 = vcombine.low %v74_v43, %v81_v44 }
  0x15   :  { %v55_v48 = vrot.slane %v48_v45, %v47_v39  ;;  %v91_v49 = vrot.slane %v84_v47, %v47_v39 }
  0x17   :  { %v57_v50 = vadd.f32 %v55_v48, %v24_v46  ;;  %v98_v52 = vrot.slane %v91_v49, %v47_v39 }
  0x19   :  { %62 = vst.msk [vmem:[%s172_s1] sm:$0x3] %vm138_vm0, %v57_v50  ;;  %v100_v53 = vadd.f32 %v98_v52, %v63_v51 }
  0x1b   :  { %101 = vst.msk [vmem:[%s173_s2] sm:$0x3] %vm138_vm0, %v100_v53 }

// kernel: _lambda_.14
= control target key start
LH: loop header
LB: loop body
LE: loop exit
PB: predicated region body
PF: predicated region fallthrough
CT: control target
= control target key end

     0   :  { %v327_v1 = vmov 0   ;;  %vm128_vm0 = vcmask 261120   ;;  %s567_s3 = inlined_call_operand.vmem [shape: bf16[32,256], index: 3, kind: input, shape index: {}]   ;;  %s568_s0 = inlined_call_operand.vmem [shape: f32[128,32], index: 0, kind: input, shape index: {}]   ;;  %s569_s1 = inlined_call_operand.vmem [shape: f32[1,32], index: 1, kind: input, shape index: {}]   ;;  %s570_s2 = inlined_call_operand.vmem [shape: f32[1,32], index: 2, kind: input, shape index: {}]   ;;  %s571_s4 = inlined_call_operand.vmem [shape: f32[128,256], index: 4, kind: output, shape index: {}]  }
   0x1   :  { %v321_v0 = vld [vmem:[%s567_s3 + $0x4] ss:$8 sps:$4 sm:$0xff]   ;;  %185 = vmatprep.mubr.bf16.mxu0 %v327_v1  ;;  %225 = vmatprep.mubr.bf16.mxu1 %v327_v1  ;;  %v323_v2 = vld [vmem:[%s567_s3] ss:$8 sps:$4 sm:$0xff]   ;;  %v324_v3 = vld [vmem:[%s567_s3 + $0x14] ss:$8 sps:$4 sm:$0xff]  }
   0x2   :  { %153 = vmatprep.subr.bf16.mxu0 %v321_v0  ;;  %316 = vmatprep.subr.bf16.mxu1 %v321_v0  ;;  %v326_v4 = vld [vmem:[%s567_s3 + $0x10] ss:$8 sps:$4 sm:$0xff]   ;;  %v18_v5 = vld [vmem:[%s568_s0] sm:$0xff]  ;;  %v19_v6 = vld [vmem:[%s568_s0 + $0x8] sm:$0xff] }
   0x3   :  { %154 = vmatpush1.bf16.msra.mxu0 %v323_v2  ;;  %318 = vmatpush1.bf16.msra.mxu1 %v323_v2  ;;  %v376_v7 = vld [vmem:[%s569_s1] ss:$0 sm:$0xff]  ;;  %v27_v12 = vld [vmem:[%s568_s0 + $0x48] sm:$0xff]  ;;  %v20_v13 = vld [vmem:[%s568_s0 + $0x10] sm:$0xff] }
   0x4   :  { %v381_v8 = vld [vmem:[%s570_s2] ss:$0 sm:$0xff]  ;;  %155 = vmatprep.subr.bf16.mxu0 %v324_v3  ;;  %317 = vmatprep.subr.bf16.mxu1 %v324_v3  ;;  %v41_v9 = vmul.f32 %v376_v7, %v18_v5  ;;  %v42_v10 = vmul.f32 %v376_v7, %v19_v6  ;;  %v50_v15 = vmul.f32 %v376_v7, %v27_v12  ;;  %v21_v16 = vld [vmem:[%s568_s0 + $0x18] sm:$0xff]  ;;  %v28_v18 = vld [vmem:[%s568_s0 + $0x50] sm:$0xff] }
   0x5   :  { %v26_v11 = vld [vmem:[%s568_s0 + $0x40] sm:$0xff]  ;;  %v43_v17 = vmul.f32 %v376_v7, %v20_v13  ;;  %v29_v19 = vld [vmem:[%s568_s0 + $0x58] sm:$0xff]  ;;  %v44_v22 = vmul.f32 %v376_v7, %v21_v16  ;;  %v51_v23 = vmul.f32 %v376_v7, %v28_v18  ;;  %v23_v35 = vld [vmem:[%s568_s0 + $0x28] sm:$0xff] }
   0x6   :  { %v49_v14 = vmul.f32 %v376_v7, %v26_v11  ;;  %v64_v20 = vadd.f32 %v381_v8, %v41_v9  ;;  %v65_v21 = vadd.f32 %v381_v8, %v42_v10  ;;  %v73_v25 = vadd.f32 %v381_v8, %v50_v15  ;;  %v22_v34 = vld [vmem:[%s568_s0 + $0x20] sm:$0xff]  ;;  %v31_v39 = vld [vmem:[%s568_s0 + $0x68] sm:$0xff]  ;;  %v24_v55 = vld [vmem:[%s568_s0 + $0x30] sm:$0xff] }
   0x7   :  { %156 = vmatpush1.bf16.msra.mxu0 %v326_v4  ;;  %319 = vmatpush1.bf16.msra.mxu1 %v326_v4  ;;  %v66_v26 = vadd.f32 %v381_v8, %v43_v17  ;;  %v67_v29 = vadd.f32 %v381_v8, %v44_v22  ;;  %v52_v30 = vmul.f32 %v376_v7, %v29_v19  ;;  %v30_v38 = vld [vmem:[%s568_s0 + $0x60] sm:$0xff]  ;;  %v25_v56 = vld [vmem:[%s568_s0 + $0x38] sm:$0xff]  ;;  %v32_v57 = vld [vmem:[%s568_s0 + $0x70] sm:$0xff] }
   0x8   :  { %v72_v24 = vadd.f32 %v381_v8, %v49_v14  ;;  %v80_v27 = vmax.f32 %v64_v20, 0.0  ;;  %v81_v28 = vmax.f32 %v65_v21, 0.0  ;;  %v89_v32 = vmax.f32 %v73_v25, 0.0  ;;  %v33_v58 = vld [vmem:[%s568_s0 + $0x78] sm:$0xff] }
   0x9   :  { %v74_v33 = vadd.f32 %v381_v8, %v51_v23  ;;  %v75_v37 = vadd.f32 %v381_v8, %v52_v30  ;;  %v82_v41 = vmax.f32 %v66_v26, 0.0  ;;  %v83_v42 = vmax.f32 %v67_v29, 0.0 }
   0xa   :  { %v88_v31 = vmax.f32 %v72_v24, 0.0  ;;  %v96_v36 = vpack.c.bf16 %v81_v28, %v80_v27  ;;  %v45_v43 = vmul.f32 %v376_v7, %v22_v34  ;;  %v46_v44 = vmul.f32 %v376_v7, %v23_v35 }
   0xb   :  { %v90_v45 = vmax.f32 %v74_v33, 0.0  ;;  %v91_v46 = vmax.f32 %v75_v37, 0.0  ;;  %v53_v47 = vmul.f32 %v376_v7, %v30_v38  ;;  %v54_v48 = vmul.f32 %v376_v7, %v31_v39 }
   0xc   :  { %v100_v40 = vpack.c.bf16 %v89_v32, %v88_v31  ;;  %308 = vmatmul.mubr.msk.bf16.vlgmr.msra.gmra.mrb[0].mxu0 %vm128_vm0, %v96_v36  ;;  %v97_v49 = vpack.c.bf16 %v83_v42, %v82_v41  ;;  %v68_v50 = vadd.f32 %v381_v8, %v45_v43  ;;  %v69_v51 = vadd.f32 %v381_v8, %v46_v44 }
   0xd   :  { %195 = vmatprep.mubr.bf16.mxu0 %v327_v1  ;;  %v101_v52 = vpack.c.bf16 %v91_v46, %v90_v45  ;;  %v76_v53 = vadd.f32 %v381_v8, %v53_v47  ;;  %v77_v54 = vadd.f32 %v381_v8, %v54_v48  ;;  %v47_v61 = vmul.f32 %v376_v7, %v24_v55 }
   0xe   :  { %312 = vmatmul.mubr.msk.bf16.vlgmr.msra.gmra.mrb[0].mxu1 %vm128_vm0, %v100_v40  ;;  %v84_v59 = vmax.f32 %v68_v50, 0.0  ;;  %v85_v60 = vmax.f32 %v69_v51, 0.0  ;;  %v48_v62 = vmul.f32 %v376_v7, %v25_v56  ;;  %v55_v2 = vmul.f32 %v376_v7, %v32_v57 }
   0xf   :  { %235 = vmatprep.mubr.bf16.mxu1 %v327_v1  ;;  %v92_v63 = vmax.f32 %v76_v53, 0.0  ;;  %v93_v0 = vmax.f32 %v77_v54, 0.0  ;;  %v56_v3 = vmul.f32 %v376_v7, %v33_v58  ;;  %v70_v5 = vadd.f32 %v381_v8, %v47_v61 }
  0x10   :  { %v98_v4 = vpack.c.bf16 %v85_v60, %v84_v59  ;;  %v71_v6 = vadd.f32 %v381_v8, %v48_v62  ;;  %v78_v10 = vadd.f32 %v381_v8, %v55_v2 }
  0x11   :  { %v102_v9 = vpack.c.bf16 %v93_v0, %v92_v63  ;;  %v79_v11 = vadd.f32 %v381_v8, %v56_v3  ;;  %v86_v12 = vmax.f32 %v70_v5, 0.0 }
  0x12   :  { %v87_v13 = vmax.f32 %v71_v6, 0.0  ;;  %v94_v7 = vmax.f32 %v78_v10, 0.0 }
  0x13   :  { %v95_v14 = vmax.f32 %v79_v11, 0.0 }
  0x14   :  { %309 = vmatmul.mubr.msk.bf16.gmra.mrb[4].mxu0 %vm128_vm0, %v97_v49  ;;  %v99_v15 = vpack.c.bf16 %v87_v13, %v86_v12 }
  0x15   :  { %205 = vmatprep.mubr.bf16.mxu0 %v327_v1  ;;  %v103_v16 = vpack.c.bf16 %v95_v14, %v94_v7 }
  0x16   :  { %313 = vmatmul.mubr.msk.bf16.gmra.mrb[4].mxu1 %vm128_vm0, %v101_v52 }
  0x17   :  { %245 = vmatprep.mubr.bf16.mxu1 %v327_v1 }
  0x1c   :  { %310 = vmatmul.mubr.msk.bf16.gmra.mrb[8].mxu0 %vm128_vm0, %v98_v4 }
  0x1d   :  { %215 = vmatprep.mubr.bf16.mxu0 %v327_v1 }
  0x1e   :  { %314 = vmatmul.mubr.msk.bf16.gmra.mrb[8].mxu1 %vm128_vm0, %v102_v9 }
  0x1f   :  { %255 = vmatprep.mubr.bf16.mxu1 %v327_v1 }
  0x24   :  { %311 = vmatmul.mubr.msk.bf16.gmra.mrb[12].mxu0 %vm128_vm0, %v99_v15 }
  0x26   :  { %315 = vmatmul.mubr.msk.bf16.gmra.mrb[12].mxu1 %vm128_vm0, %v103_v16 }
  0xdf   :  { %v187_v17 = vpop.f32.mrb[0].mxu0 }
  0xe0   :  { %266 = vst [vmem:[%s571_s4] sm:$0xff] %v187_v17  ;;  %v189_v18 = vpop.f32.mrb[1].mxu0 }
  0xe1   :  { %v227_v8 = vpop.f32.mrb[0].mxu1  ;;  %267 = vst [vmem:[%s571_s4 + $0x8] sm:$0xff] %v189_v18  ;;  %v191_v19 = vpop.f32.mrb[2].mxu0 }
  0xe2   :  { %282 = vst [vmem:[%s571_s4 + $0x80] sm:$0xff] %v227_v8  ;;  %v229_v1 = vpop.f32.mrb[1].mxu1  ;;  %268 = vst [vmem:[%s571_s4 + $0x10] sm:$0xff] %v191_v19  ;;  %v193_v21 = vpop.f32.mrb[3].mxu0 }
  0xe3   :  { %283 = vst [vmem:[%s571_s4 + $0x88] sm:$0xff] %v229_v1  ;;  %v231_v20 = vpop.f32.mrb[2].mxu1  ;;  %269 = vst [vmem:[%s571_s4 + $0x18] sm:$0xff] %v193_v21 }
  0xe4   :  { %284 = vst [vmem:[%s571_s4 + $0x90] sm:$0xff] %v231_v20  ;;  %v233_v22 = vpop.f32.mrb[3].mxu1 }
  0xe5   :  { %285 = vst [vmem:[%s571_s4 + $0x98] sm:$0xff] %v233_v22 }
  0xe7   :  { %v197_v23 = vpop.f32.mrb[4].mxu0 }
  0xe8   :  { %270 = vst [vmem:[%s571_s4 + $0x20] sm:$0xff] %v197_v23  ;;  %v199_v25 = vpop.f32.mrb[5].mxu0 }
  0xe9   :  { %v237_v24 = vpop.f32.mrb[4].mxu1  ;;  %271 = vst [vmem:[%s571_s4 + $0x28] sm:$0xff] %v199_v25  ;;  %v201_v27 = vpop.f32.mrb[6].mxu0 }
  0xea   :  { %286 = vst [vmem:[%s571_s4 + $0xa0] sm:$0xff] %v237_v24  ;;  %v239_v26 = vpop.f32.mrb[5].mxu1  ;;  %272 = vst [vmem:[%s571_s4 + $0x30] sm:$0xff] %v201_v27  ;;  %v203_v29 = vpop.f32.mrb[7].mxu0 }
  0xeb   :  { %287 = vst [vmem:[%s571_s4 + $0xa8] sm:$0xff] %v239_v26  ;;  %v241_v28 = vpop.f32.mrb[6].mxu1  ;;  %273 = vst [vmem:[%s571_s4 + $0x38] sm:$0xff] %v203_v29 }
  0xec   :  { %288 = vst [vmem:[%s571_s4 + $0xb0] sm:$0xff] %v241_v28  ;;  %v243_v30 = vpop.f32.mrb[7].mxu1 }
  0xed   :  { %289 = vst [vmem:[%s571_s4 + $0xb8] sm:$0xff] %v243_v30 }
  0xef   :  { %v207_v31 = vpop.f32.mrb[8].mxu0 }
  0xf0   :  { %274 = vst [vmem:[%s571_s4 + $0x40] sm:$0xff] %v207_v31  ;;  %v209_v33 = vpop.f32.mrb[9].mxu0 }
  0xf1   :  { %v247_v32 = vpop.f32.mrb[8].mxu1  ;;  %275 = vst [vmem:[%s571_s4 + $0x48] sm:$0xff] %v209_v33  ;;  %v211_v35 = vpop.f32.mrb[10].mxu0 }
  0xf2   :  { %290 = vst [vmem:[%s571_s4 + $0xc0] sm:$0xff] %v247_v32  ;;  %v249_v34 = vpop.f32.mrb[9].mxu1  ;;  %276 = vst [vmem:[%s571_s4 + $0x50] sm:$0xff] %v211_v35  ;;  %v213_v37 = vpop.f32.mrb[11].mxu0 }
  0xf3   :  { %291 = vst [vmem:[%s571_s4 + $0xc8] sm:$0xff] %v249_v34  ;;  %v251_v36 = vpop.f32.mrb[10].mxu1  ;;  %277 = vst [vmem:[%s571_s4 + $0x58] sm:$0xff] %v213_v37 }
  0xf4   :  { %292 = vst [vmem:[%s571_s4 + $0xd0] sm:$0xff] %v251_v36  ;;  %v253_v38 = vpop.f32.mrb[11].mxu1 }
  0xf5   :  { %293 = vst [vmem:[%s571_s4 + $0xd8] sm:$0xff] %v253_v38 }
  0xf7   :  { %v217_v39 = vpop.f32.mrb[12].mxu0 }
  0xf8   :  { %278 = vst [vmem:[%s571_s4 + $0x60] sm:$0xff] %v217_v39  ;;  %v219_v41 = vpop.f32.mrb[13].mxu0 }
  0xf9   :  { %v257_v40 = vpop.f32.mrb[12].mxu1  ;;  %279 = vst [vmem:[%s571_s4 + $0x68] sm:$0xff] %v219_v41  ;;  %v221_v43 = vpop.f32.mrb[14].mxu0 }
  0xfa   :  { %294 = vst [vmem:[%s571_s4 + $0xe0] sm:$0xff] %v257_v40  ;;  %v259_v42 = vpop.f32.mrb[13].mxu1  ;;  %280 = vst [vmem:[%s571_s4 + $0x70] sm:$0xff] %v221_v43  ;;  %v223_v45 = vpop.f32.mrb[15].mxu0 }
  0xfb   :  { %295 = vst [vmem:[%s571_s4 + $0xe8] sm:$0xff] %v259_v42  ;;  %v261_v44 = vpop.f32.mrb[14].mxu1  ;;  %281 = vst [vmem:[%s571_s4 + $0x78] sm:$0xff] %v223_v45 }
  0xfc   :  { %296 = vst [vmem:[%s571_s4 + $0xf0] sm:$0xff] %v261_v44  ;;  %v263_v46 = vpop.f32.mrb[15].mxu1 }
  0xfd   :  { %297 = vst [vmem:[%s571_s4 + $0xf8] sm:$0xff] %v263_v46 }

// kernel: _lambda_.15
= control target key start
LH: loop header
LB: loop body
LE: loop exit
PB: predicated region body
PF: predicated region fallthrough
CT: control target
= control target key end

     0   :  { %v14_v0 = vlaneseq  ;;  %v128_v10 = vmov 0.0   ;;  %v129_v35 = vmov 1966171168   ;;  %s199_s0 = inlined_call_operand.vmem [shape: f32[32,256], index: 0, kind: input, shape index: {}]   ;;  %s200_s1 = inlined_call_operand.vmem [shape: f32[1,256], index: 1, kind: output, shape index: {0}]   ;;  %s201_s2 = inlined_call_operand.vmem [shape: f32[1,256], index: 2, kind: output, shape index: {1}]  }
   0x1   :  { %v20_v1 = vld [vmem:[%s199_s0] sm:$0xff]  ;;  %v21_v2 = vld [vmem:[%s199_s0 + $0x8] sm:$0xff]  ;;  %v22_v3 = vld [vmem:[%s199_s0 + $0x10] sm:$0xff]  ;;  %v51_v36 = vunpack.c.l.s4 %v129_v35 }
   0x2   :  { %vm154_vm0 = vcmp.lt.s32.totalorder %v14_v0, 256  ;;  %v23_v5 = vld [vmem:[%s199_s0 + $0x18] sm:$0xff]  ;;  %v24_v6 = vld [vmem:[%s199_s0 + $0x20] sm:$0xff]  ;;  %v25_v7 = vld [vmem:[%s199_s0 + $0x28] sm:$0xff]  ;;  %v29_v8 = vadd.f32 %v22_v3, %v20_v1  ;;  %v72_v9 = vmul.f32 %v20_v1, %v20_v1  ;;  %v73_v14 = vmul.f32 %v21_v2, %v21_v2 }
   0x3   :  { %18 = vst.msk [vmem:[%s200_s1] sm:$0x3] %vm154_vm0, %v128_v10  ;;  %v26_v11 = vld [vmem:[%s199_s0 + $0x30] sm:$0xff]  ;;  %v27_v12 = vld [vmem:[%s199_s0 + $0x38] sm:$0xff]  ;;  %v38_v13 = vadd.f32 %v23_v5, %v21_v2  ;;  %19 = vst.msk [vmem:[%s201_s2] sm:$0x3] %vm154_vm0, %v128_v10  ;;  %v74_v15 = vmul.f32 %v22_v3, %v22_v3  ;;  %v75_v17 = vmul.f32 %v23_v5, %v23_v5  ;;  %v52_v45 = vunpack.c.0.s8 %v51_v36 }
   0x4   :  { %v30_v16 = vadd.f32 %v29_v8, %v24_v6  ;;  %v76_v18 = vmul.f32 %v24_v6, %v24_v6  ;;  %v77_v19 = vmul.f32 %v25_v7, %v25_v7  ;;  %v78_v21 = vmul.f32 %v26_v11, %v26_v11 }
   0x5   :  { %v39_v20 = vadd.f32 %v38_v13, %v25_v7  ;;  %v79_v23 = vmul.f32 %v27_v12, %v27_v12  ;;  %v80_v24 = vadd.f32 %v74_v15, %v72_v9  ;;  %v89_v25 = vadd.f32 %v75_v17, %v73_v14 }
   0x6   :  { %v31_v22 = vadd.f32 %v30_v16, %v26_v11  ;;  %v54_v46 = vshrl.u32 %v14_v0, 7 }
   0x7   :  { %v40_v26 = vadd.f32 %v39_v20, %v27_v12  ;;  %v81_v28 = vadd.f32 %v80_v24, %v76_v18  ;;  %v90_v29 = vadd.f32 %v89_v25, %v77_v19 }
   0x8   :  { %v32_v27 = vrot.slane %v31_v22, 4  ;;  %v55_v55 = vsub.s32 %v52_v45, %v54_v46 }
   0x9   :  { %v41_v30 = vrot.slane %v40_v26, 4  ;;  %v82_v32 = vadd.f32 %v81_v28, %v78_v21  ;;  %v91_v33 = vadd.f32 %v90_v29, %v79_v23 }
   0xa   :  { %v33_v31 = vadd.f32 %v32_v27, %v31_v22  ;;  %v28_v62 = vld [vmem:[%s200_s1] sm:$0x3] }
   0xb   :  { %v42_v34 = vadd.f32 %v41_v30, %v40_v26  ;;  %v83_v38 = vrot.slane %v82_v32, 4  ;;  %v92_v39 = vrot.slane %v91_v33, 4  ;;  %v71_v3 = vld [vmem:[%s201_s2] sm:$0x3] }
   0xc   :  { %v34_v37 = vrot.slane %v33_v31, 2 }
   0xd   :  { %v43_v40 = vrot.slane %v42_v34, 2  ;;  %v84_v42 = vadd.f32 %v83_v38, %v82_v32  ;;  %v93_v43 = vadd.f32 %v92_v39, %v91_v33 }
   0xe   :  { %v35_v41 = vadd.f32 %v34_v37, %v33_v31 }
   0xf   :  { %v44_v44 = vadd.f32 %v43_v40, %v42_v34  ;;  %v85_v48 = vrot.slane %v84_v42, 2  ;;  %v94_v49 = vrot.slane %v93_v43, 2 }
  0x10   :  { %v36_v47 = vrot.slane %v35_v41, 1 }
  0x11   :  { %v45_v50 = vrot.slane %v44_v44, 1  ;;  %v86_v52 = vadd.f32 %v85_v48, %v84_v42  ;;  %v95_v53 = vadd.f32 %v94_v49, %v93_v43 }
  0x12   :  { %v37_v51 = vadd.f32 %v36_v47, %v35_v41 }
  0x13   :  { %v46_v54 = vadd.f32 %v45_v50, %v44_v44  ;;  %v87_v56 = vrot.slane %v86_v52, 1  ;;  %v96_v57 = vrot.slane %v95_v53, 1 }
  0x15   :  { %v49_v58 = vcombine.low %v37_v51, %v46_v54  ;;  %v88_v59 = vadd.f32 %v87_v56, %v86_v52  ;;  %v97_v60 = vadd.f32 %v96_v57, %v95_v53 }
  0x17   :  { %v56_v61 = vrot.slane %v49_v58, %v55_v55  ;;  %v100_v63 = vcombine.low %v88_v59, %v97_v60 }
  0x19   :  { %v63_v0 = vrot.slane %v56_v61, %v55_v55  ;;  %v107_v1 = vrot.slane %v100_v63, %v55_v55 }
  0x1b   :  { %v65_v2 = vadd.f32 %v63_v0, %v28_v62  ;;  %v114_v5 = vrot.slane %v107_v1, %v55_v55 }
  0x1d   :  { %70 = vst.msk [vmem:[%s200_s1] sm:$0x3] %vm154_vm0, %v65_v2  ;;  %v116_v6 = vadd.f32 %v114_v5, %v71_v3 }
  0x1f   :  { %117 = vst.msk [vmem:[%s201_s2] sm:$0x3] %vm154_vm0, %v116_v6 }

// kernel: _lambda_.16
= control target key start
LH: loop header
LB: loop body
LE: loop exit
PB: predicated region body
PF: predicated region fallthrough
CT: control target
= control target key end

     0   :  { %vm328_vm0 = vcmask 130048   ;;  %s1501_s3 = inlined_call_operand.vmem [shape: bf16[16,128], index: 3, kind: input, shape index: {}]   ;;  %s1502_s0 = inlined_call_operand.vmem [shape: f32[512,16], index: 0, kind: input, shape index: {}]   ;;  %s1503_s1 = inlined_call_operand.vmem [shape: f32[1,16], index: 1, kind: input, shape index: {}]   ;;  %s1504_s2 = inlined_call_operand.vmem [shape: f32[1,16], index: 2, kind: input, shape index: {}]   ;;  %s1505_s4 = inlined_call_operand.vmem [shape: f32[512,128], index: 4, kind: output, shape index: {}]  }
   0x1   :  { %v918_v0 = vld [vmem:[%s1501_s3] sm:$0xff]   ;;  %v19_v2 = vld [vmem:[%s1502_s0 + $0x8] sm:$0xff]  ;;  %v20_v11 = vld [vmem:[%s1502_s0 + $0x10] sm:$0xff] }
   0x2   :  { %v18_v1 = vld [vmem:[%s1502_s0] sm:$0xff]  ;;  %850 = vmatprep.subr.bf16.mxu0 %v918_v0  ;;  %916 = vmatprep.subr.bf16.mxu1 %v918_v0  ;;  %v51_v8 = vld [vmem:[%s1502_s0 + $0x108] sm:$0xff]  ;;  %v21_v12 = vld [vmem:[%s1502_s0 + $0x18] sm:$0xff] }
   0x3   :  { %v956_v3 = vld [vmem:[%s1503_s1] ss:$0 sm:$0xff]  ;;  %851 = vmatpush3.bf16.msra.mxu0 %v918_v0  ;;  %917 = vmatpush3.bf16.msra.mxu1 %v918_v0  ;;  %v52_v13 = vld [vmem:[%s1502_s0 + $0x110] sm:$0xff]  ;;  %v53_v18 = vld [vmem:[%s1502_s0 + $0x118] sm:$0xff] }
   0x4   :  { %v89_v4 = vmul.f32 %v956_v3, %v18_v1  ;;  %v90_v5 = vmul.f32 %v956_v3, %v19_v2  ;;  %v963_v6 = vld [vmem:[%s1504_s2] ss:$0 sm:$0xff]  ;;  %v122_v10 = vmul.f32 %v956_v3, %v51_v8  ;;  %v91_v16 = vmul.f32 %v956_v3, %v20_v11  ;;  %v23_v28 = vld [vmem:[%s1502_s0 + $0x28] sm:$0xff]  ;;  %v24_v39 = vld [vmem:[%s1502_s0 + $0x30] sm:$0xff] }
   0x5   :  { %v50_v7 = vld [vmem:[%s1502_s0 + $0x100] sm:$0xff]  ;;  %v92_v17 = vmul.f32 %v956_v3, %v21_v12  ;;  %v123_v21 = vmul.f32 %v956_v3, %v52_v13  ;;  %v124_v22 = vmul.f32 %v956_v3, %v53_v18  ;;  %v55_v34 = vld [vmem:[%s1502_s0 + $0x128] sm:$0xff]  ;;  %v25_v40 = vld [vmem:[%s1502_s0 + $0x38] sm:$0xff]  ;;  %v94_v44 = vmul.f32 %v956_v3, %v23_v28 }
   0x6   :  { %v121_v9 = vmul.f32 %v956_v3, %v50_v7  ;;  %v160_v14 = vadd.f32 %v963_v6, %v89_v4  ;;  %v161_v15 = vadd.f32 %v963_v6, %v90_v5  ;;  %v193_v20 = vadd.f32 %v963_v6, %v122_v10  ;;  %v22_v23 = vld [vmem:[%s1502_s0 + $0x20] sm:$0xff]  ;;  %v56_v45 = vld [vmem:[%s1502_s0 + $0x130] sm:$0xff]  ;;  %v57_v50 = vld [vmem:[%s1502_s0 + $0x138] sm:$0xff] }
   0x7   :  { %v162_v26 = vadd.f32 %v963_v6, %v91_v16  ;;  %v163_v27 = vadd.f32 %v963_v6, %v92_v17  ;;  %v194_v31 = vadd.f32 %v963_v6, %v123_v21  ;;  %v195_v32 = vadd.f32 %v963_v6, %v124_v22  ;;  %v54_v33 = vld [vmem:[%s1502_s0 + $0x120] sm:$0xff]  ;;  %v27_v0 = vld [vmem:[%s1502_s0 + $0x48] sm:$0xff]  ;;  %v28_v13 = vld [vmem:[%s1502_s0 + $0x50] sm:$0xff] }
   0x8   :  { %v192_v19 = vadd.f32 %v963_v6, %v121_v9  ;;  %v224_v24 = vmax.f32 %v160_v14, 0.0  ;;  %v225_v25 = vmax.f32 %v161_v15, 0.0  ;;  %v257_v30 = vmax.f32 %v193_v20, 0.0  ;;  %v26_v55 = vld [vmem:[%s1502_s0 + $0x40] sm:$0xff]  ;;  %v59_v8 = vld [vmem:[%s1502_s0 + $0x148] sm:$0xff]  ;;  %v29_v14 = vld [vmem:[%s1502_s0 + $0x58] sm:$0xff] }
   0x9   :  { %v226_v36 = vmax.f32 %v162_v26, 0.0  ;;  %v227_v37 = vmax.f32 %v163_v27, 0.0  ;;  %v93_v38 = vmul.f32 %v956_v3, %v22_v23  ;;  %v258_v42 = vmax.f32 %v194_v31, 0.0  ;;  %v58_v7 = vld [vmem:[%s1502_s0 + $0x140] sm:$0xff] }
   0xa   :  { %v256_v29 = vmax.f32 %v192_v19, 0.0  ;;  %v288_v35 = vpack.c.bf16 %v225_v25, %v224_v24  ;;  %v259_v43 = vmax.f32 %v195_v32, 0.0  ;;  %v125_v48 = vmul.f32 %v956_v3, %v54_v33  ;;  %v60_v19 = vld [vmem:[%s1502_s0 + $0x150] sm:$0xff]  ;;  %v61_v24 = vld [vmem:[%s1502_s0 + $0x158] sm:$0xff] }
   0xb   :  { %v289_v46 = vpack.c.bf16 %v227_v37, %v226_v36  ;;  %v164_v47 = vadd.f32 %v963_v6, %v93_v38  ;;  %v126_v49 = vmul.f32 %v956_v3, %v55_v34  ;;  %v165_v52 = vadd.f32 %v963_v6, %v94_v44  ;;  %v31_v38 = vld [vmem:[%s1502_s0 + $0x68] sm:$0xff] }
   0xc   :  { %v304_v41 = vpack.c.bf16 %v257_v30, %v256_v29  ;;  %852 = vmatprep.mubr.msk.bf16.mxu0 %vm328_vm0, %v288_v35  ;;  %v305_v51 = vpack.c.bf16 %v259_v43, %v258_v42  ;;  %v95_v53 = vmul.f32 %v956_v3, %v24_v39  ;;  %v96_v54 = vmul.f32 %v956_v3, %v25_v40  ;;  %v30_v29 = vld [vmem:[%s1502_s0 + $0x60] sm:$0xff]  ;;  %v63_v44 = vld [vmem:[%s1502_s0 + $0x168] sm:$0xff] }
   0xd   :  { %853 = vmatmul.mubr.msk.bf16.vlgmr.msra.gmra.mrb[0].mxu0 %vm328_vm0, %v289_v46  ;;  %v228_v56 = vmax.f32 %v164_v47, 0.0  ;;  %v196_v57 = vadd.f32 %v963_v6, %v125_v48  ;;  %v197_v58 = vadd.f32 %v963_v6, %v126_v49  ;;  %v127_v59 = vmul.f32 %v956_v3, %v56_v45  ;;  %v62_v43 = vld [vmem:[%s1502_s0 + $0x160] sm:$0xff]  ;;  %v32_v49 = vld [vmem:[%s1502_s0 + $0x70] sm:$0xff] }
   0xe   :  { %884 = vmatprep.mubr.msk.bf16.mxu1 %vm328_vm0, %v304_v41  ;;  %v229_v60 = vmax.f32 %v165_v52, 0.0  ;;  %v166_v61 = vadd.f32 %v963_v6, %v95_v53  ;;  %v167_v62 = vadd.f32 %v963_v6, %v96_v54  ;;  %v128_v63 = vmul.f32 %v956_v3, %v57_v50  ;;  %v33_v50 = vld [vmem:[%s1502_s0 + $0x78] sm:$0xff] }
   0xf   :  { %885 = vmatmul.mubr.msk.bf16.vlgmr.msra.gmra.mrb[0].mxu1 %vm328_vm0, %v305_v51  ;;  %v260_v1 = vmax.f32 %v196_v57, 0.0  ;;  %v261_v2 = vmax.f32 %v197_v58, 0.0  ;;  %v198_v4 = vadd.f32 %v963_v6, %v127_v59  ;;  %v97_v5 = vmul.f32 %v956_v3, %v26_v55  ;;  %v64_v55 = vld [vmem:[%s1502_s0 + $0x170] sm:$0xff] }
  0x10   :  { %v290_v9 = vpack.c.bf16 %v229_v60, %v228_v56  ;;  %v230_v10 = vmax.f32 %v166_v61, 0.0  ;;  %v231_v11 = vmax.f32 %v167_v62, 0.0  ;;  %v199_v12 = vadd.f32 %v963_v6, %v128_v63  ;;  %v65_v60 = vld [vmem:[%s1502_s0 + $0x178] sm:$0xff] }
  0x11   :  { %v306_v15 = vpack.c.bf16 %v261_v2, %v260_v1  ;;  %v262_v16 = vmax.f32 %v198_v4, 0.0  ;;  %v98_v17 = vmul.f32 %v956_v3, %v27_v0  ;;  %v168_v18 = vadd.f32 %v963_v6, %v97_v5  ;;  %v34_v1 = vld [vmem:[%s1502_s0 + $0x80] sm:$0xff] }
  0x12   :  { %856 = vmatprep.mubr.msk.bf16.mxu0 %vm328_vm0, %v290_v9  ;;  %v291_v20 = vpack.c.bf16 %v231_v11, %v230_v10  ;;  %v263_v21 = vmax.f32 %v199_v12, 0.0  ;;  %v129_v22 = vmul.f32 %v956_v3, %v58_v7  ;;  %v130_v23 = vmul.f32 %v956_v3, %v59_v8  ;;  %v35_v12 = vld [vmem:[%s1502_s0 + $0x88] sm:$0xff] }
  0x13   :  { %888 = vmatprep.mubr.msk.bf16.mxu1 %vm328_vm0, %v306_v15  ;;  %v169_v25 = vadd.f32 %v963_v6, %v98_v17  ;;  %v232_v26 = vmax.f32 %v168_v18, 0.0  ;;  %v99_v27 = vmul.f32 %v956_v3, %v28_v13  ;;  %v100_v28 = vmul.f32 %v956_v3, %v29_v14  ;;  %v66_v17 = vld [vmem:[%s1502_s0 + $0x180] sm:$0xff]  ;;  %v67_v18 = vld [vmem:[%s1502_s0 + $0x188] sm:$0xff] }
  0x14   :  { %v307_v30 = vpack.c.bf16 %v263_v21, %v262_v16  ;;  %v200_v31 = vadd.f32 %v963_v6, %v129_v22  ;;  %v201_v32 = vadd.f32 %v963_v6, %v130_v23  ;;  %v131_v33 = vmul.f32 %v956_v3, %v60_v19  ;;  %v36_v23 = vld [vmem:[%s1502_s0 + $0x90] sm:$0xff] }
  0x15   :  { %857 = vmatmul.mubr.msk.bf16.gmra.mrb[4].mxu0 %vm328_vm0, %v291_v20  ;;  %v233_v34 = vmax.f32 %v169_v25, 0.0  ;;  %v170_v35 = vadd.f32 %v963_v6, %v99_v27  ;;  %v171_v36 = vadd.f32 %v963_v6, %v100_v28  ;;  %v132_v37 = vmul.f32 %v956_v3, %v61_v24  ;;  %v37_v24 = vld [vmem:[%s1502_s0 + $0x98] sm:$0xff] }
  0x16   :  { %v264_v39 = vmax.f32 %v200_v31, 0.0  ;;  %v265_v40 = vmax.f32 %v201_v32, 0.0  ;;  %v202_v41 = vadd.f32 %v963_v6, %v131_v33  ;;  %v101_v42 = vmul.f32 %v956_v3, %v30_v29  ;;  %v68_v29 = vld [vmem:[%s1502_s0 + $0x190] sm:$0xff] }
  0x17   :  { %889 = vmatmul.mubr.msk.bf16.gmra.mrb[4].mxu1 %vm328_vm0, %v307_v30  ;;  %v292_v45 = vpack.c.bf16 %v233_v34, %v232_v26  ;;  %v234_v46 = vmax.f32 %v170_v35, 0.0  ;;  %v235_v47 = vmax.f32 %v171_v36, 0.0  ;;  %v203_v48 = vadd.f32 %v963_v6, %v132_v37  ;;  %v69_v34 = vld [vmem:[%s1502_s0 + $0x198] sm:$0xff] }
  0x18   :  { %v308_v51 = vpack.c.bf16 %v265_v40, %v264_v39  ;;  %v266_v52 = vmax.f32 %v202_v41, 0.0  ;;  %v102_v53 = vmul.f32 %v956_v3, %v31_v38  ;;  %v172_v54 = vadd.f32 %v963_v6, %v101_v42  ;;  %v38_v39 = vld [vmem:[%s1502_s0 + $0xa0] sm:$0xff] }
  0x19   :  { %860 = vmatprep.mubr.msk.bf16.mxu0 %vm328_vm0, %v292_v45  ;;  %v293_v56 = vpack.c.bf16 %v235_v47, %v234_v46  ;;  %v267_v57 = vmax.f32 %v203_v48, 0.0  ;;  %v133_v58 = vmul.f32 %v956_v3, %v62_v43  ;;  %v134_v59 = vmul.f32 %v956_v3, %v63_v44  ;;  %v39_v48 = vld [vmem:[%s1502_s0 + $0xa8] sm:$0xff] }
  0x1a   :  { %892 = vmatprep.mubr.msk.bf16.mxu1 %vm328_vm0, %v308_v51  ;;  %v173_v61 = vadd.f32 %v963_v6, %v102_v53  ;;  %v236_v62 = vmax.f32 %v172_v54, 0.0  ;;  %v103_v63 = vmul.f32 %v956_v3, %v32_v49  ;;  %v104_v0 = vmul.f32 %v956_v3, %v33_v50  ;;  %v70_v53 = vld [vmem:[%s1502_s0 + $0x1a0] sm:$0xff]  ;;  %v71_v54 = vld [vmem:[%s1502_s0 + $0x1a8] sm:$0xff] }
  0x1b   :  { %v309_v2 = vpack.c.bf16 %v267_v57, %v266_v52  ;;  %v204_v4 = vadd.f32 %v963_v6, %v133_v58  ;;  %v205_v5 = vadd.f32 %v963_v6, %v134_v59  ;;  %v135_v7 = vmul.f32 %v956_v3, %v64_v55  ;;  %v40_v59 = vld [vmem:[%s1502_s0 + $0xb0] sm:$0xff] }
  0x1c   :  { %v237_v8 = vmax.f32 %v173_v61, 0.0  ;;  %v174_v9 = vadd.f32 %v963_v6, %v103_v63  ;;  %v175_v10 = vadd.f32 %v963_v6, %v104_v0  ;;  %v136_v11 = vmul.f32 %v956_v3, %v65_v60  ;;  %v41_v60 = vld [vmem:[%s1502_s0 + $0xb8] sm:$0xff] }
  0x1d   :  { %861 = vmatmul.mubr.msk.bf16.gmra.mrb[8].mxu0 %vm328_vm0, %v293_v56  ;;  %v268_v13 = vmax.f32 %v204_v4, 0.0  ;;  %v269_v14 = vmax.f32 %v205_v5, 0.0  ;;  %v206_v15 = vadd.f32 %v963_v6, %v135_v7  ;;  %v105_v16 = vmul.f32 %v956_v3, %v34_v1  ;;  %v72_v1 = vld [vmem:[%s1502_s0 + $0x1b0] sm:$0xff] }
  0x1e   :  { %v294_v19 = vpack.c.bf16 %v237_v8, %v236_v62  ;;  %v238_v20 = vmax.f32 %v174_v9, 0.0  ;;  %v239_v21 = vmax.f32 %v175_v10, 0.0  ;;  %v207_v22 = vadd.f32 %v963_v6, %v136_v11  ;;  %v73_v8 = vld [vmem:[%s1502_s0 + $0x1b8] sm:$0xff] }
  0x1f   :  { %893 = vmatmul.mubr.msk.bf16.gmra.mrb[8].mxu1 %vm328_vm0, %v309_v2  ;;  %v310_v25 = vpack.c.bf16 %v269_v14, %v268_v13  ;;  %v270_v26 = vmax.f32 %v206_v15, 0.0  ;;  %v106_v27 = vmul.f32 %v956_v3, %v35_v12  ;;  %v176_v28 = vadd.f32 %v963_v6, %v105_v16  ;;  %v42_v13 = vld [vmem:[%s1502_s0 + $0xc0] sm:$0xff] }
  0x20   :  { %864 = vmatprep.mubr.msk.bf16.mxu0 %vm328_vm0, %v294_v19  ;;  %v295_v30 = vpack.c.bf16 %v239_v21, %v238_v20  ;;  %v271_v31 = vmax.f32 %v207_v22, 0.0  ;;  %v137_v32 = vmul.f32 %v956_v3, %v66_v17  ;;  %v138_v33 = vmul.f32 %v956_v3, %v67_v18  ;;  %v43_v22 = vld [vmem:[%s1502_s0 + $0xc8] sm:$0xff] }
  0x21   :  { %896 = vmatprep.mubr.msk.bf16.mxu1 %vm328_vm0, %v310_v25  ;;  %v177_v35 = vadd.f32 %v963_v6, %v106_v27  ;;  %v240_v36 = vmax.f32 %v176_v28, 0.0  ;;  %v107_v37 = vmul.f32 %v956_v3, %v36_v23  ;;  %v108_v38 = vmul.f32 %v956_v3, %v37_v24  ;;  %v74_v27 = vld [vmem:[%s1502_s0 + $0x1c0] sm:$0xff]  ;;  %v75_v28 = vld [vmem:[%s1502_s0 + $0x1c8] sm:$0xff] }
  0x22   :  { %v311_v40 = vpack.c.bf16 %v271_v31, %v270_v26  ;;  %v208_v41 = vadd.f32 %v963_v6, %v137_v32  ;;  %v209_v42 = vadd.f32 %v963_v6, %v138_v33  ;;  %v139_v43 = vmul.f32 %v956_v3, %v68_v29  ;;  %v44_v33 = vld [vmem:[%s1502_s0 + $0xd0] sm:$0xff] }
  0x23   :  { %v241_v44 = vmax.f32 %v177_v35, 0.0  ;;  %v178_v45 = vadd.f32 %v963_v6, %v107_v37  ;;  %v179_v46 = vadd.f32 %v963_v6, %v108_v38  ;;  %v140_v47 = vmul.f32 %v956_v3, %v69_v34  ;;  %v45_v34 = vld [vmem:[%s1502_s0 + $0xd8] sm:$0xff] }
  0x24   :  { %v272_v49 = vmax.f32 %v208_v41, 0.0  ;;  %v273_v50 = vmax.f32 %v209_v42, 0.0  ;;  %v210_v51 = vadd.f32 %v963_v6, %v139_v43  ;;  %v109_v52 = vmul.f32 %v956_v3, %v38_v39  ;;  %v76_v39 = vld [vmem:[%s1502_s0 + $0x1d0] sm:$0xff] }
  0x25   :  { %865 = vmatmul.mubr.msk.bf16.gmra.mrb[12].mxu0 %vm328_vm0, %v295_v30  ;;  %v296_v55 = vpack.c.bf16 %v241_v44, %v240_v36  ;;  %v242_v56 = vmax.f32 %v178_v45, 0.0  ;;  %v243_v57 = vmax.f32 %v179_v46, 0.0  ;;  %v211_v58 = vadd.f32 %v963_v6, %v140_v47  ;;  %v77_v44 = vld [vmem:[%s1502_s0 + $0x1d8] sm:$0xff] }
  0x26   :  { %v312_v61 = vpack.c.bf16 %v273_v50, %v272_v49  ;;  %v274_v62 = vmax.f32 %v210_v51, 0.0  ;;  %v110_v63 = vmul.f32 %v956_v3, %v39_v48  ;;  %v180_v0 = vadd.f32 %v963_v6, %v109_v52  ;;  %v46_v49 = vld [vmem:[%s1502_s0 + $0xe0] sm:$0xff] }
  0x27   :  { %897 = vmatmul.mubr.msk.bf16.gmra.mrb[12].mxu1 %vm328_vm0, %v311_v40  ;;  %868 = vmatprep.mubr.msk.bf16.mxu0 %vm328_vm0, %v296_v55  ;;  %v297_v2 = vpack.c.bf16 %v243_v57, %v242_v56  ;;  %v275_v4 = vmax.f32 %v211_v58, 0.0  ;;  %v141_v5 = vmul.f32 %v956_v3, %v70_v53  ;;  %v142_v7 = vmul.f32 %v956_v3, %v71_v54  ;;  %v47_v58 = vld [vmem:[%s1502_s0 + $0xe8] sm:$0xff] }
  0x28   :  { %900 = vmatprep.mubr.msk.bf16.mxu1 %vm328_vm0, %v312_v61  ;;  %v181_v9 = vadd.f32 %v963_v6, %v110_v63  ;;  %v244_v10 = vmax.f32 %v180_v0, 0.0  ;;  %v111_v11 = vmul.f32 %v956_v3, %v40_v59  ;;  %v112_v12 = vmul.f32 %v956_v3, %v41_v60  ;;  %v78_v63 = vld [vmem:[%s1502_s0 + $0x1e0] sm:$0xff]  ;;  %v79_v0 = vld [vmem:[%s1502_s0 + $0x1e8] sm:$0xff] }
  0x29   :  { %v313_v14 = vpack.c.bf16 %v275_v4, %v274_v62  ;;  %v212_v15 = vadd.f32 %v963_v6, %v141_v5  ;;  %v213_v16 = vadd.f32 %v963_v6, %v142_v7  ;;  %v143_v17 = vmul.f32 %v956_v3, %v72_v1  ;;  %v48_v5 = vld [vmem:[%s1502_s0 + $0xf0] sm:$0xff]  ;;  %v49_v7 = vld [vmem:[%s1502_s0 + $0xf8] sm:$0xff] }
  0x2a   :  { %v245_v18 = vmax.f32 %v181_v9, 0.0  ;;  %v182_v19 = vadd.f32 %v963_v6, %v111_v11  ;;  %v183_v20 = vadd.f32 %v963_v6, %v112_v12  ;;  %v144_v21 = vmul.f32 %v956_v3, %v73_v8  ;;  %v80_v12 = vld [vmem:[%s1502_s0 + $0x1f0] sm:$0xff] }
  0x2b   :  { %v276_v23 = vmax.f32 %v212_v15, 0.0  ;;  %v277_v24 = vmax.f32 %v213_v16, 0.0  ;;  %v214_v25 = vadd.f32 %v963_v6, %v143_v17  ;;  %v113_v26 = vmul.f32 %v956_v3, %v42_v13  ;;  %v81_v17 = vld [vmem:[%s1502_s0 + $0x1f8] sm:$0xff] }
  0x2c   :  { %v298_v29 = vpack.c.bf16 %v245_v18, %v244_v10  ;;  %v246_v30 = vmax.f32 %v182_v19, 0.0  ;;  %v247_v31 = vmax.f32 %v183_v20, 0.0  ;;  %v215_v32 = vadd.f32 %v963_v6, %v144_v21 }
  0x2d   :  { %869 = vmatmul.mubr.msk.bf16.gmra.mrb[16].mxu0 %vm328_vm0, %v297_v2  ;;  %v314_v35 = vpack.c.bf16 %v277_v24, %v276_v23  ;;  %v278_v36 = vmax.f32 %v214_v25, 0.0  ;;  %v114_v37 = vmul.f32 %v956_v3, %v43_v22  ;;  %v184_v38 = vadd.f32 %v963_v6, %v113_v26 }
  0x2e   :  { %872 = vmatprep.mubr.msk.bf16.mxu0 %vm328_vm0, %v298_v29  ;;  %v299_v40 = vpack.c.bf16 %v247_v31, %v246_v30  ;;  %v279_v41 = vmax.f32 %v215_v32, 0.0  ;;  %v145_v42 = vmul.f32 %v956_v3, %v74_v27  ;;  %v146_v43 = vmul.f32 %v956_v3, %v75_v28 }
  0x2f   :  { %901 = vmatmul.mubr.msk.bf16.gmra.mrb[16].mxu1 %vm328_vm0, %v313_v14  ;;  %v185_v45 = vadd.f32 %v963_v6, %v114_v37  ;;  %v248_v46 = vmax.f32 %v184_v38, 0.0  ;;  %v115_v47 = vmul.f32 %v956_v3, %v44_v33  ;;  %v116_v48 = vmul.f32 %v956_v3, %v45_v34 }
  0x30   :  { %904 = vmatprep.mubr.msk.bf16.mxu1 %vm328_vm0, %v314_v35  ;;  %v315_v50 = vpack.c.bf16 %v279_v41, %v278_v36  ;;  %v216_v51 = vadd.f32 %v963_v6, %v145_v42  ;;  %v217_v52 = vadd.f32 %v963_v6, %v146_v43  ;;  %v147_v53 = vmul.f32 %v956_v3, %v76_v39 }
  0x31   :  { %v249_v54 = vmax.f32 %v185_v45, 0.0  ;;  %v186_v55 = vadd.f32 %v963_v6, %v115_v47  ;;  %v187_v56 = vadd.f32 %v963_v6, %v116_v48  ;;  %v148_v57 = vmul.f32 %v956_v3, %v77_v44 }
  0x32   :  { %v280_v59 = vmax.f32 %v216_v51, 0.0  ;;  %v281_v60 = vmax.f32 %v217_v52, 0.0  ;;  %v218_v61 = vadd.f32 %v963_v6, %v147_v53  ;;  %v117_v62 = vmul.f32 %v956_v3, %v46_v49 }
  0x33   :  { %v300_v1 = vpack.c.bf16 %v249_v54, %v248_v46  ;;  %v250_v2 = vmax.f32 %v186_v55, 0.0  ;;  %v219_v4 = vadd.f32 %v963_v6, %v148_v57  ;;  %v251_v9 = vmax.f32 %v187_v56, 0.0 }
  0x34   :  { %v316_v8 = vpack.c.bf16 %v281_v60, %v280_v59  ;;  %v118_v10 = vmul.f32 %v956_v3, %v47_v58  ;;  %v188_v11 = vadd.f32 %v963_v6, %v117_v62  ;;  %v282_v13 = vmax.f32 %v218_v61, 0.0 }
  0x35   :  { %873 = vmatmul.mubr.msk.bf16.gmra.mrb[20].mxu0 %vm328_vm0, %v299_v40  ;;  %v283_v14 = vmax.f32 %v219_v4, 0.0  ;;  %v149_v15 = vmul.f32 %v956_v3, %v78_v63  ;;  %v150_v16 = vmul.f32 %v956_v3, %v79_v0  ;;  %v119_v20 = vmul.f32 %v956_v3, %v48_v5 }
  0x36   :  { %876 = vmatprep.mubr.msk.bf16.mxu0 %vm328_vm0, %v300_v1  ;;  %v189_v18 = vadd.f32 %v963_v6, %v118_v10  ;;  %v252_v19 = vmax.f32 %v188_v11, 0.0  ;;  %v120_v21 = vmul.f32 %v956_v3, %v49_v7  ;;  %v151_v24 = vmul.f32 %v956_v3, %v80_v12 }
  0x37   :  { %905 = vmatmul.mubr.msk.bf16.gmra.mrb[20].mxu1 %vm328_vm0, %v315_v50  ;;  %v220_v22 = vadd.f32 %v963_v6, %v149_v15  ;;  %v221_v23 = vadd.f32 %v963_v6, %v150_v16  ;;  %v301_v25 = vpack.c.bf16 %v251_v9, %v250_v2  ;;  %v152_v27 = vmul.f32 %v956_v3, %v81_v17 }
  0x38   :  { %908 = vmatprep.mubr.msk.bf16.mxu1 %vm328_vm0, %v316_v8  ;;  %v253_v26 = vmax.f32 %v189_v18, 0.0  ;;  %v190_v30 = vadd.f32 %v963_v6, %v119_v20  ;;  %v191_v31 = vadd.f32 %v963_v6, %v120_v21  ;;  %v317_v32 = vpack.c.bf16 %v283_v14, %v282_v13 }
  0x39   :  { %v284_v28 = vmax.f32 %v220_v22, 0.0  ;;  %v285_v29 = vmax.f32 %v221_v23, 0.0  ;;  %v222_v34 = vadd.f32 %v963_v6, %v151_v24  ;;  %v223_v35 = vadd.f32 %v963_v6, %v152_v27 }
  0x3a   :  { %v302_v33 = vpack.c.bf16 %v253_v26, %v252_v19  ;;  %v254_v37 = vmax.f32 %v190_v30, 0.0  ;;  %v255_v38 = vmax.f32 %v191_v31, 0.0 }
  0x3b   :  { %v318_v36 = vpack.c.bf16 %v285_v29, %v284_v28  ;;  %v286_v3 = vmax.f32 %v222_v34, 0.0  ;;  %v287_v39 = vmax.f32 %v223_v35, 0.0 }
  0x3c   :  { %v303_v40 = vpack.c.bf16 %v255_v38, %v254_v37 }
  0x3d   :  { %877 = vmatmul.mubr.msk.bf16.gmra.mrb[24].mxu0 %vm328_vm0, %v301_v25  ;;  %v319_v41 = vpack.c.bf16 %v287_v39, %v286_v3 }
  0x3e   :  { %880 = vmatprep.mubr.msk.bf16.mxu0 %vm328_vm0, %v302_v33 }
  0x3f   :  { %909 = vmatmul.mubr.msk.bf16.gmra.mrb[24].mxu1 %vm328_vm0, %v317_v32 }
  0x40   :  { %912 = vmatprep.mubr.msk.bf16.mxu1 %vm328_vm0, %v318_v36 }
  0x45   :  { %881 = vmatmul.mubr.msk.bf16.gmra.mrb[28].mxu0 %vm328_vm0, %v303_v40 }
  0x47   :  { %913 = vmatmul.mubr.msk.bf16.gmra.mrb[28].mxu1 %vm328_vm0, %v319_v41 }
  0xe0   :  { %v854_v6 = vpop.f32.mrb[0].mxu0 }
  0xe1   :  { %716 = vst [vmem:[%s1505_s4 + $0x10] sm:$0xff] %v854_v6  ;;  %v459_v43 = vpop.f32.mrb[1].mxu0 }
  0xe2   :  { %v886_v42 = vpop.f32.mrb[0].mxu1  ;;  %714 = vst [vmem:[%s1505_s4] sm:$0xff] %v459_v43  ;;  %v855_v45 = vpop.f32.mrb[2].mxu0 }
  0xe3   :  { %748 = vst [vmem:[%s1505_s4 + $0x110] sm:$0xff] %v886_v42  ;;  %v587_v44 = vpop.f32.mrb[1].mxu1  ;;  %717 = vst [vmem:[%s1505_s4 + $0x18] sm:$0xff] %v855_v45  ;;  %v462_v47 = vpop.f32.mrb[3].mxu0 }
  0xe4   :  { %746 = vst [vmem:[%s1505_s4 + $0x100] sm:$0xff] %v587_v44  ;;  %v887_v46 = vpop.f32.mrb[2].mxu1  ;;  %715 = vst [vmem:[%s1505_s4 + $0x8] sm:$0xff] %v462_v47 }
  0xe5   :  { %749 = vst [vmem:[%s1505_s4 + $0x118] sm:$0xff] %v887_v46  ;;  %v590_v48 = vpop.f32.mrb[3].mxu1 }
  0xe6   :  { %747 = vst [vmem:[%s1505_s4 + $0x108] sm:$0xff] %v590_v48 }
  0xe8   :  { %v858_v49 = vpop.f32.mrb[4].mxu0 }
  0xe9   :  { %720 = vst [vmem:[%s1505_s4 + $0x30] sm:$0xff] %v858_v49  ;;  %v475_v51 = vpop.f32.mrb[5].mxu0 }
  0xea   :  { %v890_v50 = vpop.f32.mrb[4].mxu1  ;;  %718 = vst [vmem:[%s1505_s4 + $0x20] sm:$0xff] %v475_v51  ;;  %v859_v53 = vpop.f32.mrb[6].mxu0 }
  0xeb   :  { %752 = vst [vmem:[%s1505_s4 + $0x130] sm:$0xff] %v890_v50  ;;  %v603_v52 = vpop.f32.mrb[5].mxu1  ;;  %721 = vst [vmem:[%s1505_s4 + $0x38] sm:$0xff] %v859_v53  ;;  %v478_v55 = vpop.f32.mrb[7].mxu0 }
  0xec   :  { %750 = vst [vmem:[%s1505_s4 + $0x120] sm:$0xff] %v603_v52  ;;  %v891_v54 = vpop.f32.mrb[6].mxu1  ;;  %719 = vst [vmem:[%s1505_s4 + $0x28] sm:$0xff] %v478_v55 }
  0xed   :  { %753 = vst [vmem:[%s1505_s4 + $0x138] sm:$0xff] %v891_v54  ;;  %v606_v56 = vpop.f32.mrb[7].mxu1 }
  0xee   :  { %751 = vst [vmem:[%s1505_s4 + $0x128] sm:$0xff] %v606_v56 }
  0xf0   :  { %v862_v57 = vpop.f32.mrb[8].mxu0 }
  0xf1   :  { %724 = vst [vmem:[%s1505_s4 + $0x50] sm:$0xff] %v862_v57  ;;  %v491_v59 = vpop.f32.mrb[9].mxu0 }
  0xf2   :  { %v894_v58 = vpop.f32.mrb[8].mxu1  ;;  %722 = vst [vmem:[%s1505_s4 + $0x40] sm:$0xff] %v491_v59  ;;  %v863_v61 = vpop.f32.mrb[10].mxu0 }
  0xf3   :  { %756 = vst [vmem:[%s1505_s4 + $0x150] sm:$0xff] %v894_v58  ;;  %v619_v60 = vpop.f32.mrb[9].mxu1  ;;  %725 = vst [vmem:[%s1505_s4 + $0x58] sm:$0xff] %v863_v61  ;;  %v494_v63 = vpop.f32.mrb[11].mxu0 }
  0xf4   :  { %754 = vst [vmem:[%s1505_s4 + $0x140] sm:$0xff] %v619_v60  ;;  %v895_v62 = vpop.f32.mrb[10].mxu1  ;;  %723 = vst [vmem:[%s1505_s4 + $0x48] sm:$0xff] %v494_v63 }
  0xf5   :  { %757 = vst [vmem:[%s1505_s4 + $0x158] sm:$0xff] %v895_v62  ;;  %v622_v0 = vpop.f32.mrb[11].mxu1 }
  0xf6   :  { %755 = vst [vmem:[%s1505_s4 + $0x148] sm:$0xff] %v622_v0 }
  0xf8   :  { %v866_v1 = vpop.f32.mrb[12].mxu0 }
  0xf9   :  { %728 = vst [vmem:[%s1505_s4 + $0x70] sm:$0xff] %v866_v1  ;;  %v507_v4 = vpop.f32.mrb[13].mxu0 }
  0xfa   :  { %v898_v2 = vpop.f32.mrb[12].mxu1  ;;  %726 = vst [vmem:[%s1505_s4 + $0x60] sm:$0xff] %v507_v4  ;;  %v867_v7 = vpop.f32.mrb[14].mxu0 }
  0xfb   :  { %760 = vst [vmem:[%s1505_s4 + $0x170] sm:$0xff] %v898_v2  ;;  %v635_v5 = vpop.f32.mrb[13].mxu1  ;;  %729 = vst [vmem:[%s1505_s4 + $0x78] sm:$0xff] %v867_v7  ;;  %v510_v9 = vpop.f32.mrb[15].mxu0 }
  0xfc   :  { %758 = vst [vmem:[%s1505_s4 + $0x160] sm:$0xff] %v635_v5  ;;  %v899_v8 = vpop.f32.mrb[14].mxu1  ;;  %727 = vst [vmem:[%s1505_s4 + $0x68] sm:$0xff] %v510_v9 }
  0xfd   :  { %761 = vst [vmem:[%s1505_s4 + $0x178] sm:$0xff] %v899_v8  ;;  %v638_v10 = vpop.f32.mrb[15].mxu1 }
  0xfe   :  { %759 = vst [vmem:[%s1505_s4 + $0x168] sm:$0xff] %v638_v10 }
 0x100   :  { %v870_v11 = vpop.f32.mrb[16].mxu0 }
 0x101   :  { %732 = vst [vmem:[%s1505_s4 + $0x90] sm:$0xff] %v870_v11  ;;  %v523_v13 = vpop.f32.mrb[17].mxu0 }
 0x102   :  { %v902_v12 = vpop.f32.mrb[16].mxu1  ;;  %730 = vst [vmem:[%s1505_s4 + $0x80] sm:$0xff] %v523_v13  ;;  %v871_v15 = vpop.f32.mrb[18].mxu0 }
 0x103   :  { %764 = vst [vmem:[%s1505_s4 + $0x190] sm:$0xff] %v902_v12  ;;  %v651_v14 = vpop.f32.mrb[17].mxu1  ;;  %733 = vst [vmem:[%s1505_s4 + $0x98] sm:$0xff] %v871_v15  ;;  %v526_v17 = vpop.f32.mrb[19].mxu0 }
 0x104   :  { %762 = vst [vmem:[%s1505_s4 + $0x180] sm:$0xff] %v651_v14  ;;  %v903_v16 = vpop.f32.mrb[18].mxu1  ;;  %731 = vst [vmem:[%s1505_s4 + $0x88] sm:$0xff] %v526_v17 }
 0x105   :  { %765 = vst [vmem:[%s1505_s4 + $0x198] sm:$0xff] %v903_v16  ;;  %v654_v18 = vpop.f32.mrb[19].mxu1 }
 0x106   :  { %763 = vst [vmem:[%s1505_s4 + $0x188] sm:$0xff] %v654_v18 }
 0x108   :  { %v874_v19 = vpop.f32.mrb[20].mxu0 }
 0x109   :  { %736 = vst [vmem:[%s1505_s4 + $0xb0] sm:$0xff] %v874_v19  ;;  %v539_v21 = vpop.f32.mrb[21].mxu0 }
 0x10a   :  { %v906_v20 = vpop.f32.mrb[20].mxu1  ;;  %734 = vst [vmem:[%s1505_s4 + $0xa0] sm:$0xff] %v539_v21  ;;  %v875_v23 = vpop.f32.mrb[22].mxu0 }
 0x10b   :  { %768 = vst [vmem:[%s1505_s4 + $0x1b0] sm:$0xff] %v906_v20  ;;  %v667_v22 = vpop.f32.mrb[21].mxu1  ;;  %737 = vst [vmem:[%s1505_s4 + $0xb8] sm:$0xff] %v875_v23  ;;  %v542_v25 = vpop.f32.mrb[23].mxu0 }
 0x10c   :  { %766 = vst [vmem:[%s1505_s4 + $0x1a0] sm:$0xff] %v667_v22  ;;  %v907_v24 = vpop.f32.mrb[22].mxu1  ;;  %735 = vst [vmem:[%s1505_s4 + $0xa8] sm:$0xff] %v542_v25 }
 0x10d   :  { %769 = vst [vmem:[%s1505_s4 + $0x1b8] sm:$0xff] %v907_v24  ;;  %v670_v26 = vpop.f32.mrb[23].mxu1 }
 0x10e   :  { %767 = vst [vmem:[%s1505_s4 + $0x1a8] sm:$0xff] %v670_v26 }
 0x110   :  { %v878_v27 = vpop.f32.mrb[24].mxu0 }
 0x111   :  { %740 = vst [vmem:[%s1505_s4 + $0xd0] sm:$0xff] %v878_v27  ;;  %v555_v29 = vpop.f32.mrb[25].mxu0 }
 0x112   :  { %v910_v28 = vpop.f32.mrb[24].mxu1  ;;  %738 = vst [vmem:[%s1505_s4 + $0xc0] sm:$0xff] %v555_v29  ;;  %v879_v31 = vpop.f32.mrb[26].mxu0 }
 0x113   :  { %772 = vst [vmem:[%s1505_s4 + $0x1d0] sm:$0xff] %v910_v28  ;;  %v683_v30 = vpop.f32.mrb[25].mxu1  ;;  %741 = vst [vmem:[%s1505_s4 + $0xd8] sm:$0xff] %v879_v31  ;;  %v558_v33 = vpop.f32.mrb[27].mxu0 }
 0x114   :  { %770 = vst [vmem:[%s1505_s4 + $0x1c0] sm:$0xff] %v683_v30  ;;  %v911_v32 = vpop.f32.mrb[26].mxu1  ;;  %739 = vst [vmem:[%s1505_s4 + $0xc8] sm:$0xff] %v558_v33 }
 0x115   :  { %773 = vst [vmem:[%s1505_s4 + $0x1d8] sm:$0xff] %v911_v32  ;;  %v686_v34 = vpop.f32.mrb[27].mxu1 }
 0x116   :  { %771 = vst [vmem:[%s1505_s4 + $0x1c8] sm:$0xff] %v686_v34 }
 0x118   :  { %v882_v35 = vpop.f32.mrb[28].mxu0 }
 0x119   :  { %744 = vst [vmem:[%s1505_s4 + $0xf0] sm:$0xff] %v882_v35  ;;  %v571_v37 = vpop.f32.mrb[29].mxu0 }
 0x11a   :  { %v914_v36 = vpop.f32.mrb[28].mxu1  ;;  %742 = vst [vmem:[%s1505_s4 + $0xe0] sm:$0xff] %v571_v37  ;;  %v883_v3 = vpop.f32.mrb[30].mxu0 }
 0x11b   :  { %776 = vst [vmem:[%s1505_s4 + $0x1f0] sm:$0xff] %v914_v36  ;;  %v699_v38 = vpop.f32.mrb[29].mxu1  ;;  %745 = vst [vmem:[%s1505_s4 + $0xf8] sm:$0xff] %v883_v3  ;;  %v574_v40 = vpop.f32.mrb[31].mxu0 }
 0x11c   :  { %774 = vst [vmem:[%s1505_s4 + $0x1e0] sm:$0xff] %v699_v38  ;;  %v915_v39 = vpop.f32.mrb[30].mxu1  ;;  %743 = vst [vmem:[%s1505_s4 + $0xe8] sm:$0xff] %v574_v40 }
 0x11d   :  { %777 = vst [vmem:[%s1505_s4 + $0x1f8] sm:$0xff] %v915_v39  ;;  %v702_v41 = vpop.f32.mrb[31].mxu1 }
 0x11e   :  { %775 = vst [vmem:[%s1505_s4 + $0x1e8] sm:$0xff] %v702_v41 }

// kernel: _lambda_.17
= control target key start
LH: loop header
LB: loop body
LE: loop exit
PB: predicated region body
PF: predicated region fallthrough
CT: control target
= control target key end

     0   :  { %v14_v0 = vlaneseq  ;;  %v160_v7 = vmov 0.0   ;;  %s257_s0 = inlined_call_operand.vmem [shape: f32[64,256], index: 0, kind: input, shape index: {}]   ;;  %s258_s1 = inlined_call_operand.vmem [shape: f32[1,256], index: 1, kind: output, shape index: {0}]   ;;  %s259_s2 = inlined_call_operand.vmem [shape: f32[1,256], index: 2, kind: output, shape index: {1}]  }
   0x1   :  { %v20_v1 = vld [vmem:[%s257_s0] sm:$0xff]  ;;  %v22_v2 = vld [vmem:[%s257_s0 + $0x10] sm:$0xff]  ;;  %v21_v4 = vld [vmem:[%s257_s0 + $0x8] sm:$0xff] }
   0x2   :  { %vm184_vm0 = vcmp.lt.s32.totalorder %v14_v0, 256  ;;  %v23_v5 = vld [vmem:[%s257_s0 + $0x18] sm:$0xff]  ;;  %v37_v6 = vadd.f32 %v22_v2, %v20_v1  ;;  %v24_v8 = vld [vmem:[%s257_s0 + $0x20] sm:$0xff]  ;;  %v25_v10 = vld [vmem:[%s257_s0 + $0x28] sm:$0xff]  ;;  %v88_v12 = vmul.f32 %v20_v1, %v20_v1  ;;  %v90_v13 = vmul.f32 %v22_v2, %v22_v2 }
   0x3   :  { %18 = vst.msk [vmem:[%s258_s1] sm:$0x3] %vm184_vm0, %v160_v7  ;;  %v50_v9 = vadd.f32 %v23_v5, %v21_v4  ;;  %19 = vst.msk [vmem:[%s259_s2] sm:$0x3] %vm184_vm0, %v160_v7  ;;  %v26_v14 = vld [vmem:[%s257_s0 + $0x30] sm:$0xff]  ;;  %v89_v16 = vmul.f32 %v21_v4, %v21_v4  ;;  %v91_v17 = vmul.f32 %v23_v5, %v23_v5  ;;  %v27_v18 = vld [vmem:[%s257_s0 + $0x38] sm:$0xff] }
   0x4   :  { %v38_v11 = vadd.f32 %v37_v6, %v24_v8  ;;  %v92_v20 = vmul.f32 %v24_v8, %v24_v8  ;;  %v28_v21 = vld [vmem:[%s257_s0 + $0x40] sm:$0xff]  ;;  %v93_v23 = vmul.f32 %v25_v10, %v25_v10  ;;  %v29_v24 = vld [vmem:[%s257_s0 + $0x48] sm:$0xff]  ;;  %v94_v26 = vmul.f32 %v26_v14, %v26_v14  ;;  %v30_v28 = vld [vmem:[%s257_s0 + $0x50] sm:$0xff] }
   0x5   :  { %v51_v15 = vadd.f32 %v50_v9, %v25_v10  ;;  %v104_v27 = vadd.f32 %v90_v13, %v88_v12  ;;  %v95_v30 = vmul.f32 %v27_v18, %v27_v18  ;;  %v117_v31 = vadd.f32 %v91_v17, %v89_v16  ;;  %v31_v32 = vld [vmem:[%s257_s0 + $0x58] sm:$0xff]  ;;  %v32_v36 = vld [vmem:[%s257_s0 + $0x60] sm:$0xff]  ;;  %v33_v40 = vld [vmem:[%s257_s0 + $0x68] sm:$0xff] }
   0x6   :  { %v39_v19 = vadd.f32 %v38_v11, %v26_v14  ;;  %v96_v34 = vmul.f32 %v28_v21, %v28_v21  ;;  %v97_v38 = vmul.f32 %v29_v24, %v29_v24  ;;  %v98_v42 = vmul.f32 %v30_v28, %v30_v28  ;;  %v34_v44 = vld [vmem:[%s257_s0 + $0x70] sm:$0xff]  ;;  %v35_v48 = vld [vmem:[%s257_s0 + $0x78] sm:$0xff] }
   0x7   :  { %v52_v22 = vadd.f32 %v51_v15, %v27_v18  ;;  %v105_v35 = vadd.f32 %v104_v27, %v92_v20  ;;  %v118_v39 = vadd.f32 %v117_v31, %v93_v23  ;;  %v99_v46 = vmul.f32 %v31_v32, %v31_v32 }
   0x8   :  { %v40_v25 = vadd.f32 %v39_v19, %v28_v21  ;;  %v100_v50 = vmul.f32 %v32_v36, %v32_v36  ;;  %v101_v53 = vmul.f32 %v33_v40, %v33_v40  ;;  %v102_v56 = vmul.f32 %v34_v44, %v34_v44 }
   0x9   :  { %v53_v29 = vadd.f32 %v52_v22, %v29_v24  ;;  %v106_v43 = vadd.f32 %v105_v35, %v94_v26  ;;  %v119_v47 = vadd.f32 %v118_v39, %v95_v30  ;;  %v103_v59 = vmul.f32 %v35_v48, %v35_v48 }
   0xa   :  { %v41_v33 = vadd.f32 %v40_v25, %v30_v28  ;;  %v161_v1 = vmov 1966171168   ;;  %v70_v13 = vshrl.u32 %v14_v0, 7  ;;  %v36_v0 = vld [vmem:[%s258_s1] sm:$0x3] }
   0xb   :  { %v54_v37 = vadd.f32 %v53_v29, %v31_v32  ;;  %v107_v51 = vadd.f32 %v106_v43, %v96_v34  ;;  %v120_v54 = vadd.f32 %v119_v47, %v97_v38  ;;  %v67_v2 = vunpack.c.l.s4 %v161_v1 }
   0xc   :  { %v42_v41 = vadd.f32 %v41_v33, %v32_v36  ;;  %v87_v36 = vld [vmem:[%s259_s2] sm:$0x3] }
   0xd   :  { %v55_v45 = vadd.f32 %v54_v37, %v33_v40  ;;  %v108_v57 = vadd.f32 %v107_v51, %v98_v42  ;;  %v121_v60 = vadd.f32 %v120_v54, %v99_v46  ;;  %v68_v12 = vunpack.c.0.s8 %v67_v2 }
   0xe   :  { %v43_v49 = vadd.f32 %v42_v41, %v34_v44 }
   0xf   :  { %v56_v52 = vadd.f32 %v55_v45, %v35_v48  ;;  %v109_v62 = vadd.f32 %v108_v57, %v100_v50  ;;  %v122_v4 = vadd.f32 %v121_v60, %v101_v53  ;;  %v71_v22 = vsub.s32 %v68_v12, %v70_v13 }
  0x10   :  { %v44_v55 = vrot.slane %v43_v49, 4 }
  0x11   :  { %v57_v58 = vrot.slane %v56_v52, 4  ;;  %v110_v6 = vadd.f32 %v109_v62, %v102_v56  ;;  %v123_v8 = vadd.f32 %v122_v4, %v103_v59 }
  0x12   :  { %v45_v61 = vadd.f32 %v44_v55, %v43_v49 }
  0x13   :  { %v58_v63 = vadd.f32 %v57_v58, %v56_v52  ;;  %v111_v10 = vrot.slane %v110_v6, 4  ;;  %v124_v14 = vrot.slane %v123_v8, 4 }
  0x14   :  { %v46_v5 = vrot.slane %v45_v61, 2 }
  0x15   :  { %v59_v7 = vrot.slane %v58_v63, 2  ;;  %v112_v16 = vadd.f32 %v111_v10, %v110_v6  ;;  %v125_v18 = vadd.f32 %v124_v14, %v123_v8 }
  0x16   :  { %v47_v9 = vadd.f32 %v46_v5, %v45_v61 }
  0x17   :  { %v60_v11 = vadd.f32 %v59_v7, %v58_v63  ;;  %v113_v20 = vrot.slane %v112_v16, 2  ;;  %v126_v23 = vrot.slane %v125_v18, 2 }
  0x18   :  { %v48_v15 = vrot.slane %v47_v9, 1 }
  0x19   :  { %v61_v17 = vrot.slane %v60_v11, 1  ;;  %v114_v24 = vadd.f32 %v113_v20, %v112_v16  ;;  %v127_v26 = vadd.f32 %v126_v23, %v125_v18 }
  0x1a   :  { %v49_v19 = vadd.f32 %v48_v15, %v47_v9 }
  0x1b   :  { %v62_v21 = vadd.f32 %v61_v17, %v60_v11  ;;  %v115_v27 = vrot.slane %v114_v24, 1  ;;  %v128_v29 = vrot.slane %v127_v26, 1 }
  0x1d   :  { %v65_v25 = vcombine.low %v49_v19, %v62_v21  ;;  %v116_v30 = vadd.f32 %v115_v27, %v114_v24  ;;  %v129_v32 = vadd.f32 %v128_v29, %v127_v26 }
  0x1f   :  { %v72_v28 = vrot.slane %v65_v25, %v71_v22  ;;  %v132_v34 = vcombine.low %v116_v30, %v129_v32 }
  0x21   :  { %v79_v31 = vrot.slane %v72_v28, %v71_v22  ;;  %v139_v35 = vrot.slane %v132_v34, %v71_v22 }
  0x23   :  { %v81_v33 = vadd.f32 %v79_v31, %v36_v0  ;;  %v146_v37 = vrot.slane %v139_v35, %v71_v22 }
  0x25   :  { %86 = vst.msk [vmem:[%s258_s1] sm:$0x3] %vm184_vm0, %v81_v33  ;;  %v148_v38 = vadd.f32 %v146_v37, %v87_v36 }
  0x27   :  { %149 = vst.msk [vmem:[%s259_s2] sm:$0x3] %vm184_vm0, %v148_v38 }

// kernel: _lambda_.18
= control target key start
LH: loop header
LB: loop body
LE: loop exit
PB: predicated region body
PF: predicated region fallthrough
CT: control target
= control target key end

     0   :  { %s1204_s15 = smov 0   ;;  %s1533_s0 = inlined_call_operand.vmem [shape: f32[2048,8], index: 0, kind: input, shape index: {}]   ;;  %s1534_s1 = inlined_call_operand.vmem [shape: f32[1,8], index: 1, kind: input, shape index: {}]   ;;  %s1535_s2 = inlined_call_operand.vmem [shape: f32[1,8], index: 2, kind: input, shape index: {}]   ;;  %s1536_s3 = inlined_call_operand.vmem [shape: bf16[8,128], index: 3, kind: input, shape index: {}]   ;;  %s1537_s4 = inlined_call_operand.vmem [shape: f32[2048,128], index: 4, kind: output, shape index: {}]  }
   0x1 LB: > { %s1015_s16 = sadd.s32 4294967295, %s1177_s15   ;;  %p1019_p0 = scmp.ge.s32.totalorder %s1177_s15, 1  ;;  %s1177_s15 = sphi %s1204_s15, %s14_s15  }
   0x2   : > { %p163_p1 = scmp.lt.s32.totalorder %s1177_s15, 5 }
   0x4   : > { %p164_p2 = pnand %p1019_p0, %p163_p1 }
   0x5   : > { %v504_v0 = vld [vmem:[%s1536_s3] sm:$0xf] (!%p164_p2)  ;;  %vm602_vm0 = vcmask (!%p164_p2), 1043456   ;;  %s1020_s19 = sshll.u32 (!%p164_p2), %s1015_s16, 6  ;;  %vm505_vm1 = vcmask (!%p164_p2), 64512  }
   0x6   : > { %167 = sbr.rel (%p164_p2) target bundleno = 300 (0x12c), region = 36  ;;  %1161 = vmatprep.subr.msk.bf16.mxu0 (!%p164_p2), %vm602_vm0, %v504_v0  ;;  %1162 = vmatprep.subr.msk.bf16.mxu1 (!%p164_p2), %vm602_vm0, %v504_v0  ;;  %v604_v1 = vsel (!%p164_p2), %vm602_vm0, %v504_v0, 0  ;;  %p190_p3 = scmp.lt.s32.totalorder (!%p164_p2), %s1020_s19, 255  ;;  %v1221_v2 = vld [vmem:[%s1534_s1] ss:$0 sm:$0xff] (!%p164_p2) }
   0x7   : > { %1094 = vmatpush3.bf16.msra.mxu0 (!%p164_p2), %v604_v1  ;;  %1160 = vmatpush3.bf16.msra.mxu1 (!%p164_p2), %v604_v1  ;;  %v1233_v3 = vld [vmem:[%s1535_s2] ss:$0 sm:$0xff] (!%p164_p2) }
   0xd   : > { %s1539_s19 = smov (!%p190_p3, %s1020_s19), 255 }
   0xe   : > { %s1021_s20 = sshll.u32 %s1539_s19, 3 }
   0xf   : > { %s1228_s25 = scalar_lea.vmem %s1533_s0, %s1021_s20  ;;  %s1464_s30 = scalar_lea.vmem %s1537_s4, %s1021_s20 }
  0x10   : > { %v202_v4 = vld [vmem:[%s1228_s25] sm:$0xff]  ;;  %v203_v5 = vld [vmem:[%s1228_s25 + $0x8] sm:$0xff]  ;;  %v204_v11 = vld [vmem:[%s1228_s25 + $0x10] sm:$0xff] }
  0x11   : > { %v234_v6 = vld [vmem:[%s1228_s25 + $0x100] sm:$0xff]  ;;  %v273_v7 = vmul.f32 %v1221_v2, %v202_v4  ;;  %v274_v8 = vmul.f32 %v1221_v2, %v203_v5  ;;  %v235_v9 = vld [vmem:[%s1228_s25 + $0x108] sm:$0xff]  ;;  %v205_v12 = vld [vmem:[%s1228_s25 + $0x18] sm:$0xff]  ;;  %v275_v14 = vmul.f32 %v1221_v2, %v204_v11 }
  0x12   : > { %v305_v10 = vmul.f32 %v1221_v2, %v234_v6  ;;  %v306_v13 = vmul.f32 %v1221_v2, %v235_v9  ;;  %v276_v15 = vmul.f32 %v1221_v2, %v205_v12  ;;  %v236_v16 = vld [vmem:[%s1228_s25 + $0x110] sm:$0xff]  ;;  %v237_v17 = vld [vmem:[%s1228_s25 + $0x118] sm:$0xff]  ;;  %v206_v26 = vld [vmem:[%s1228_s25 + $0x20] sm:$0xff] }
  0x13   : > { %v344_v18 = vadd.f32 %v1233_v3, %v273_v7  ;;  %v345_v19 = vadd.f32 %v1233_v3, %v274_v8  ;;  %v307_v21 = vmul.f32 %v1221_v2, %v236_v16  ;;  %v346_v23 = vadd.f32 %v1233_v3, %v275_v14  ;;  %v207_v27 = vld [vmem:[%s1228_s25 + $0x28] sm:$0xff]  ;;  %v238_v32 = vld [vmem:[%s1228_s25 + $0x120] sm:$0xff]  ;;  %v208_v38 = vld [vmem:[%s1228_s25 + $0x30] sm:$0xff] }
  0x14   : > { %v376_v20 = vadd.f32 %v1233_v3, %v305_v10  ;;  %v377_v22 = vadd.f32 %v1233_v3, %v306_v13  ;;  %v347_v24 = vadd.f32 %v1233_v3, %v276_v15  ;;  %v308_v25 = vmul.f32 %v1221_v2, %v237_v17  ;;  %v239_v37 = vld [vmem:[%s1228_s25 + $0x128] sm:$0xff]  ;;  %v209_v43 = vld [vmem:[%s1228_s25 + $0x38] sm:$0xff]  ;;  %v240_v52 = vld [vmem:[%s1228_s25 + $0x130] sm:$0xff] }
  0x15   : > { %v408_v28 = vmax.f32 %v344_v18, 0.0  ;;  %v409_v29 = vmax.f32 %v345_v19, 0.0  ;;  %v378_v31 = vadd.f32 %v1233_v3, %v307_v21  ;;  %v410_v34 = vmax.f32 %v346_v23, 0.0  ;;  %v241_v53 = vld [vmem:[%s1228_s25 + $0x138] sm:$0xff]  ;;  %v210_v57 = vld [vmem:[%s1228_s25 + $0x40] sm:$0xff]  ;;  %v211_v62 = vld [vmem:[%s1228_s25 + $0x48] sm:$0xff] }
  0x16   : > { %v440_v30 = vmax.f32 %v376_v20, 0.0  ;;  %v441_v33 = vmax.f32 %v377_v22, 0.0  ;;  %v411_v35 = vmax.f32 %v347_v24, 0.0  ;;  %v379_v36 = vadd.f32 %v1233_v3, %v308_v25  ;;  %v242_v5 = vld [vmem:[%s1228_s25 + $0x140] sm:$0xff]  ;;  %v243_v6 = vld [vmem:[%s1228_s25 + $0x148] sm:$0xff]  ;;  %v212_v15 = vld [vmem:[%s1228_s25 + $0x50] sm:$0xff] }
  0x17   : > { %v472_v39 = vpack.c.bf16 %v409_v29, %v408_v28  ;;  %v442_v40 = vmax.f32 %v378_v31, 0.0  ;;  %v277_v41 = vmul.f32 %v1221_v2, %v206_v26  ;;  %v278_v42 = vmul.f32 %v1221_v2, %v207_v27  ;;  %v213_v20 = vld [vmem:[%s1228_s25 + $0x58] sm:$0xff]  ;;  %v244_v21 = vld [vmem:[%s1228_s25 + $0x150] sm:$0xff]  ;;  %v214_v31 = vld [vmem:[%s1228_s25 + $0x60] sm:$0xff] }
  0x18   : > { %v488_v44 = vpack.c.bf16 %v441_v33, %v440_v30  ;;  %v473_v45 = vpack.c.bf16 %v411_v35, %v410_v34  ;;  %v443_v46 = vmax.f32 %v379_v36, 0.0  ;;  %v309_v47 = vmul.f32 %v1221_v2, %v238_v32  ;;  %v245_v26 = vld [vmem:[%s1228_s25 + $0x158] sm:$0xff]  ;;  %v215_v36 = vld [vmem:[%s1228_s25 + $0x68] sm:$0xff] }
  0x19   : > { %1095 = vmatprep.mubr.msk.bf16.mxu0 %vm505_vm1, %v472_v39  ;;  %v348_v48 = vadd.f32 %v1233_v3, %v277_v41  ;;  %v349_v49 = vadd.f32 %v1233_v3, %v278_v42  ;;  %v310_v50 = vmul.f32 %v1221_v2, %v239_v37  ;;  %v279_v51 = vmul.f32 %v1221_v2, %v208_v38  ;;  %v246_v41 = vld [vmem:[%s1228_s25 + $0x160] sm:$0xff] }
  0x1a   : > { %1127 = vmatprep.mubr.msk.bf16.mxu1 %vm505_vm1, %v488_v44  ;;  %1096 = vmatmul.mubr.msk.bf16.vlgmr.msra.gmra.mrb[0].mxu0 %vm505_vm1, %v473_v45  ;;  %v489_v54 = vpack.c.bf16 %v443_v46, %v442_v40  ;;  %v380_v55 = vadd.f32 %v1233_v3, %v309_v47  ;;  %v280_v56 = vmul.f32 %v1221_v2, %v209_v43  ;;  %v247_v46 = vld [vmem:[%s1228_s25 + $0x168] sm:$0xff]  ;;  %v216_v47 = vld [vmem:[%s1228_s25 + $0x70] sm:$0xff] }
  0x1b   : > { %v412_v58 = vmax.f32 %v348_v48, 0.0  ;;  %v413_v59 = vmax.f32 %v349_v49, 0.0  ;;  %v381_v60 = vadd.f32 %v1233_v3, %v310_v50  ;;  %v350_v61 = vadd.f32 %v1233_v3, %v279_v51 }
  0x1c   : > { %1128 = vmatmul.mubr.msk.bf16.vlgmr.msra.gmra.mrb[0].mxu1 %vm505_vm1, %v489_v54  ;;  %v444_v63 = vmax.f32 %v380_v55, 0.0  ;;  %v351_v0 = vadd.f32 %v1233_v3, %v280_v56  ;;  %v311_v1 = vmul.f32 %v1221_v2, %v240_v52  ;;  %v312_v4 = vmul.f32 %v1221_v2, %v241_v53  ;;  %v217_v52 = vld [vmem:[%s1228_s25 + $0x78] sm:$0xff] }
  0x1d   : > { %v474_v7 = vpack.c.bf16 %v413_v59, %v412_v58  ;;  %v445_v8 = vmax.f32 %v381_v60, 0.0  ;;  %v414_v9 = vmax.f32 %v350_v61, 0.0  ;;  %v281_v10 = vmul.f32 %v1221_v2, %v210_v57  ;;  %v248_v61 = vld [vmem:[%s1228_s25 + $0x170] sm:$0xff] }
  0x1e   : > { %v415_v11 = vmax.f32 %v351_v0, 0.0  ;;  %v382_v12 = vadd.f32 %v1233_v3, %v311_v1  ;;  %v383_v13 = vadd.f32 %v1233_v3, %v312_v4  ;;  %v282_v14 = vmul.f32 %v1221_v2, %v211_v62  ;;  %v249_v62 = vld [vmem:[%s1228_s25 + $0x178] sm:$0xff] }
  0x1f   : > { %1099 = vmatprep.mubr.msk.bf16.mxu0 %vm505_vm1, %v474_v7  ;;  %v490_v16 = vpack.c.bf16 %v445_v8, %v444_v63  ;;  %v352_v17 = vadd.f32 %v1233_v3, %v281_v10  ;;  %v313_v18 = vmul.f32 %v1221_v2, %v242_v5  ;;  %v314_v19 = vmul.f32 %v1221_v2, %v243_v6  ;;  %v218_v5 = vld [vmem:[%s1228_s25 + $0x80] sm:$0xff]  ;;  %v219_v10 = vld [vmem:[%s1228_s25 + $0x88] sm:$0xff] }
  0x20   : > { %v475_v22 = vpack.c.bf16 %v415_v11, %v414_v9  ;;  %v446_v23 = vmax.f32 %v382_v12, 0.0  ;;  %v447_v24 = vmax.f32 %v383_v13, 0.0  ;;  %v353_v25 = vadd.f32 %v1233_v3, %v282_v14 }
  0x21   : > { %1131 = vmatprep.mubr.msk.bf16.mxu1 %vm505_vm1, %v490_v16  ;;  %v416_v27 = vmax.f32 %v352_v17, 0.0  ;;  %v384_v28 = vadd.f32 %v1233_v3, %v313_v18  ;;  %v385_v29 = vadd.f32 %v1233_v3, %v314_v19  ;;  %v283_v30 = vmul.f32 %v1221_v2, %v212_v15  ;;  %v250_v15 = vld [vmem:[%s1228_s25 + $0x180] sm:$0xff]  ;;  %v251_v16 = vld [vmem:[%s1228_s25 + $0x188] sm:$0xff] }
  0x22   : > { %1100 = vmatmul.mubr.msk.bf16.gmra.mrb[4].mxu0 %vm505_vm1, %v475_v22  ;;  %v491_v32 = vpack.c.bf16 %v447_v24, %v446_v23  ;;  %v417_v33 = vmax.f32 %v353_v25, 0.0  ;;  %v284_v34 = vmul.f32 %v1221_v2, %v213_v20  ;;  %v315_v35 = vmul.f32 %v1221_v2, %v244_v21  ;;  %v220_v25 = vld [vmem:[%s1228_s25 + $0x90] sm:$0xff] }
  0x23   : > { %v448_v37 = vmax.f32 %v384_v28, 0.0  ;;  %v449_v38 = vmax.f32 %v385_v29, 0.0  ;;  %v354_v39 = vadd.f32 %v1233_v3, %v283_v30  ;;  %v316_v40 = vmul.f32 %v1221_v2, %v245_v26  ;;  %v221_v30 = vld [vmem:[%s1228_s25 + $0x98] sm:$0xff] }
  0x24   : > { %1132 = vmatmul.mubr.msk.bf16.gmra.mrb[4].mxu1 %vm505_vm1, %v491_v32  ;;  %v476_v42 = vpack.c.bf16 %v417_v33, %v416_v27  ;;  %v355_v43 = vadd.f32 %v1233_v3, %v284_v34  ;;  %v386_v44 = vadd.f32 %v1233_v3, %v315_v35  ;;  %v285_v45 = vmul.f32 %v1221_v2, %v214_v31  ;;  %v252_v31 = vld [vmem:[%s1228_s25 + $0x190] sm:$0xff] }
  0x25   : > { %v492_v48 = vpack.c.bf16 %v449_v38, %v448_v37  ;;  %v418_v49 = vmax.f32 %v354_v39, 0.0  ;;  %v387_v50 = vadd.f32 %v1233_v3, %v316_v40  ;;  %v286_v51 = vmul.f32 %v1221_v2, %v215_v36  ;;  %v253_v36 = vld [vmem:[%s1228_s25 + $0x198] sm:$0xff] }
  0x26   : > { %1103 = vmatprep.mubr.msk.bf16.mxu0 %vm505_vm1, %v476_v42  ;;  %v419_v53 = vmax.f32 %v355_v43, 0.0  ;;  %v450_v54 = vmax.f32 %v386_v44, 0.0  ;;  %v356_v55 = vadd.f32 %v1233_v3, %v285_v45  ;;  %v317_v56 = vmul.f32 %v1221_v2, %v246_v41  ;;  %v222_v41 = vld [vmem:[%s1228_s25 + $0xa0] sm:$0xff] }
  0x27   : > { %1135 = vmatprep.mubr.msk.bf16.mxu1 %vm505_vm1, %v492_v48  ;;  %v451_v57 = vmax.f32 %v387_v50, 0.0  ;;  %v357_v58 = vadd.f32 %v1233_v3, %v286_v51  ;;  %v318_v59 = vmul.f32 %v1221_v2, %v247_v46  ;;  %v287_v60 = vmul.f32 %v1221_v2, %v216_v47  ;;  %v223_v46 = vld [vmem:[%s1228_s25 + $0xa8] sm:$0xff]  ;;  %v254_v51 = vld [vmem:[%s1228_s25 + $0x1a0] sm:$0xff] }
  0x28   : > { %v477_v63 = vpack.c.bf16 %v419_v53, %v418_v49  ;;  %v420_v0 = vmax.f32 %v356_v55, 0.0  ;;  %v388_v1 = vadd.f32 %v1233_v3, %v317_v56  ;;  %v288_v4 = vmul.f32 %v1221_v2, %v217_v52  ;;  %v255_v56 = vld [vmem:[%s1228_s25 + $0x1a8] sm:$0xff] }
  0x29   : > { %v493_v6 = vpack.c.bf16 %v451_v57, %v450_v54  ;;  %v421_v7 = vmax.f32 %v357_v58, 0.0  ;;  %v389_v8 = vadd.f32 %v1233_v3, %v318_v59  ;;  %v358_v9 = vadd.f32 %v1233_v3, %v287_v60  ;;  %v224_v57 = vld [vmem:[%s1228_s25 + $0xb0] sm:$0xff] }
  0x2a   : > { %1104 = vmatmul.mubr.msk.bf16.gmra.mrb[8].mxu0 %vm505_vm1, %v477_v63  ;;  %v452_v11 = vmax.f32 %v388_v1, 0.0  ;;  %v359_v12 = vadd.f32 %v1233_v3, %v288_v4  ;;  %v319_v13 = vmul.f32 %v1221_v2, %v248_v61  ;;  %v320_v14 = vmul.f32 %v1221_v2, %v249_v62  ;;  %v225_v62 = vld [vmem:[%s1228_s25 + $0xb8] sm:$0xff] }
  0x2b   : > { %v478_v17 = vpack.c.bf16 %v421_v7, %v420_v0  ;;  %v453_v18 = vmax.f32 %v389_v8, 0.0  ;;  %v422_v19 = vmax.f32 %v358_v9, 0.0  ;;  %v289_v20 = vmul.f32 %v1221_v2, %v218_v5  ;;  %v256_v9 = vld [vmem:[%s1228_s25 + $0x1b0] sm:$0xff] }
  0x2c   : > { %1136 = vmatmul.mubr.msk.bf16.gmra.mrb[8].mxu1 %vm505_vm1, %v493_v6  ;;  %v423_v21 = vmax.f32 %v359_v12, 0.0  ;;  %v390_v22 = vadd.f32 %v1233_v3, %v319_v13  ;;  %v391_v23 = vadd.f32 %v1233_v3, %v320_v14  ;;  %v290_v24 = vmul.f32 %v1221_v2, %v219_v10  ;;  %v257_v10 = vld [vmem:[%s1228_s25 + $0x1b8] sm:$0xff] }
  0x2d   : > { %1107 = vmatprep.mubr.msk.bf16.mxu0 %vm505_vm1, %v478_v17  ;;  %v494_v26 = vpack.c.bf16 %v453_v18, %v452_v11  ;;  %v360_v27 = vadd.f32 %v1233_v3, %v289_v20  ;;  %v321_v28 = vmul.f32 %v1221_v2, %v250_v15  ;;  %v322_v29 = vmul.f32 %v1221_v2, %v251_v16  ;;  %v226_v15 = vld [vmem:[%s1228_s25 + $0xc0] sm:$0xff]  ;;  %v227_v20 = vld [vmem:[%s1228_s25 + $0xc8] sm:$0xff] }
  0x2e   : > { %v479_v32 = vpack.c.bf16 %v423_v21, %v422_v19  ;;  %v454_v33 = vmax.f32 %v390_v22, 0.0  ;;  %v455_v34 = vmax.f32 %v391_v23, 0.0  ;;  %v361_v35 = vadd.f32 %v1233_v3, %v290_v24 }
  0x2f   : > { %1139 = vmatprep.mubr.msk.bf16.mxu1 %vm505_vm1, %v494_v26  ;;  %v424_v37 = vmax.f32 %v360_v27, 0.0  ;;  %v392_v38 = vadd.f32 %v1233_v3, %v321_v28  ;;  %v393_v39 = vadd.f32 %v1233_v3, %v322_v29  ;;  %v291_v40 = vmul.f32 %v1221_v2, %v220_v25  ;;  %v258_v25 = vld [vmem:[%s1228_s25 + $0x1c0] sm:$0xff]  ;;  %v259_v26 = vld [vmem:[%s1228_s25 + $0x1c8] sm:$0xff] }
  0x30   : > { %v495_v42 = vpack.c.bf16 %v455_v34, %v454_v33  ;;  %v425_v43 = vmax.f32 %v361_v35, 0.0  ;;  %v292_v44 = vmul.f32 %v1221_v2, %v221_v30  ;;  %v323_v45 = vmul.f32 %v1221_v2, %v252_v31  ;;  %v228_v35 = vld [vmem:[%s1228_s25 + $0xd0] sm:$0xff] }
  0x31   : > { %v456_v47 = vmax.f32 %v392_v38, 0.0  ;;  %v457_v48 = vmax.f32 %v393_v39, 0.0  ;;  %v362_v49 = vadd.f32 %v1233_v3, %v291_v40  ;;  %v324_v50 = vmul.f32 %v1221_v2, %v253_v36  ;;  %v229_v40 = vld [vmem:[%s1228_s25 + $0xd8] sm:$0xff] }
  0x32   : > { %1108 = vmatmul.mubr.msk.bf16.gmra.mrb[12].mxu0 %vm505_vm1, %v479_v32  ;;  %v480_v52 = vpack.c.bf16 %v425_v43, %v424_v37  ;;  %v363_v53 = vadd.f32 %v1233_v3, %v292_v44  ;;  %v394_v54 = vadd.f32 %v1233_v3, %v323_v45  ;;  %v293_v55 = vmul.f32 %v1221_v2, %v222_v41  ;;  %v260_v41 = vld [vmem:[%s1228_s25 + $0x1d0] sm:$0xff] }
  0x33   : > { %v496_v58 = vpack.c.bf16 %v457_v48, %v456_v47  ;;  %v426_v59 = vmax.f32 %v362_v49, 0.0  ;;  %v395_v60 = vadd.f32 %v1233_v3, %v324_v50  ;;  %v294_v61 = vmul.f32 %v1221_v2, %v223_v46  ;;  %v261_v46 = vld [vmem:[%s1228_s25 + $0x1d8] sm:$0xff] }
  0x34   : > { %1140 = vmatmul.mubr.msk.bf16.gmra.mrb[12].mxu1 %vm505_vm1, %v495_v42  ;;  %1111 = vmatprep.mubr.msk.bf16.mxu0 %vm505_vm1, %v480_v52  ;;  %v427_v63 = vmax.f32 %v363_v53, 0.0  ;;  %v458_v0 = vmax.f32 %v394_v54, 0.0  ;;  %v364_v1 = vadd.f32 %v1233_v3, %v293_v55  ;;  %v325_v4 = vmul.f32 %v1221_v2, %v254_v51  ;;  %v230_v51 = vld [vmem:[%s1228_s25 + $0xe0] sm:$0xff] }
  0x35   : > { %1143 = vmatprep.mubr.msk.bf16.mxu1 %vm505_vm1, %v496_v58  ;;  %v459_v5 = vmax.f32 %v395_v60, 0.0  ;;  %v365_v6 = vadd.f32 %v1233_v3, %v294_v61  ;;  %v326_v7 = vmul.f32 %v1221_v2, %v255_v56  ;;  %v295_v8 = vmul.f32 %v1221_v2, %v224_v57  ;;  %v231_v56 = vld [vmem:[%s1228_s25 + $0xe8] sm:$0xff]  ;;  %v262_v61 = vld [vmem:[%s1228_s25 + $0x1e0] sm:$0xff] }
  0x36   : > { %v481_v11 = vpack.c.bf16 %v427_v63, %v426_v59  ;;  %v428_v12 = vmax.f32 %v364_v1, 0.0  ;;  %v396_v13 = vadd.f32 %v1233_v3, %v325_v4  ;;  %v296_v14 = vmul.f32 %v1221_v2, %v225_v62  ;;  %v263_v4 = vld [vmem:[%s1228_s25 + $0x1e8] sm:$0xff] }
  0x37   : > { %v497_v16 = vpack.c.bf16 %v459_v5, %v458_v0  ;;  %v429_v17 = vmax.f32 %v365_v6, 0.0  ;;  %v397_v18 = vadd.f32 %v1233_v3, %v326_v7  ;;  %v366_v19 = vadd.f32 %v1233_v3, %v295_v8  ;;  %v232_v5 = vld [vmem:[%s1228_s25 + $0xf0] sm:$0xff] }
  0x38   : > { %v460_v21 = vmax.f32 %v396_v13, 0.0  ;;  %v367_v22 = vadd.f32 %v1233_v3, %v296_v14  ;;  %v327_v23 = vmul.f32 %v1221_v2, %v256_v9  ;;  %v328_v24 = vmul.f32 %v1221_v2, %v257_v10  ;;  %v233_v10 = vld [vmem:[%s1228_s25 + $0xf8] sm:$0xff] }
  0x39   : > { %v482_v27 = vpack.c.bf16 %v429_v17, %v428_v12  ;;  %v461_v28 = vmax.f32 %v397_v18, 0.0  ;;  %v430_v29 = vmax.f32 %v366_v19, 0.0  ;;  %v297_v30 = vmul.f32 %v1221_v2, %v226_v15  ;;  %v264_v18 = vld [vmem:[%s1228_s25 + $0x1f0] sm:$0xff]  ;;  %v265_v19 = vld [vmem:[%s1228_s25 + $0x1f8] sm:$0xff] }
  0x3a   : > { %1112 = vmatmul.mubr.msk.bf16.gmra.mrb[16].mxu0 %vm505_vm1, %v481_v11  ;;  %v431_v31 = vmax.f32 %v367_v22, 0.0  ;;  %v398_v32 = vadd.f32 %v1233_v3, %v327_v23  ;;  %v399_v33 = vadd.f32 %v1233_v3, %v328_v24  ;;  %v298_v34 = vmul.f32 %v1221_v2, %v227_v20 }
  0x3b   : > { %1115 = vmatprep.mubr.msk.bf16.mxu0 %vm505_vm1, %v482_v27  ;;  %v498_v36 = vpack.c.bf16 %v461_v28, %v460_v21  ;;  %v368_v37 = vadd.f32 %v1233_v3, %v297_v30  ;;  %v329_v38 = vmul.f32 %v1221_v2, %v258_v25  ;;  %v330_v39 = vmul.f32 %v1221_v2, %v259_v26 }
  0x3c   : > { %1144 = vmatmul.mubr.msk.bf16.gmra.mrb[16].mxu1 %vm505_vm1, %v497_v16  ;;  %v483_v42 = vpack.c.bf16 %v431_v31, %v430_v29  ;;  %v462_v43 = vmax.f32 %v398_v32, 0.0  ;;  %v463_v44 = vmax.f32 %v399_v33, 0.0  ;;  %v369_v45 = vadd.f32 %v1233_v3, %v298_v34 }
  0x3d   : > { %1147 = vmatprep.mubr.msk.bf16.mxu1 %vm505_vm1, %v498_v36  ;;  %v432_v47 = vmax.f32 %v368_v37, 0.0  ;;  %v400_v48 = vadd.f32 %v1233_v3, %v329_v38  ;;  %v401_v49 = vadd.f32 %v1233_v3, %v330_v39  ;;  %v299_v50 = vmul.f32 %v1221_v2, %v228_v35 }
  0x3e   : > { %v499_v52 = vpack.c.bf16 %v463_v44, %v462_v43  ;;  %v433_v53 = vmax.f32 %v369_v45, 0.0  ;;  %v300_v54 = vmul.f32 %v1221_v2, %v229_v40  ;;  %v331_v55 = vmul.f32 %v1221_v2, %v260_v41 }
  0x3f   : > { %v464_v57 = vmax.f32 %v400_v48, 0.0  ;;  %v465_v58 = vmax.f32 %v401_v49, 0.0  ;;  %v370_v59 = vadd.f32 %v1233_v3, %v299_v50  ;;  %v332_v60 = vmul.f32 %v1221_v2, %v261_v46 }
  0x40   : > { %v484_v62 = vpack.c.bf16 %v433_v53, %v432_v47  ;;  %v371_v63 = vadd.f32 %v1233_v3, %v300_v54  ;;  %v402_v0 = vadd.f32 %v1233_v3, %v331_v55  ;;  %v301_v1 = vmul.f32 %v1221_v2, %v230_v51 }
  0x41   : > { %v500_v6 = vpack.c.bf16 %v465_v58, %v464_v57  ;;  %v434_v7 = vmax.f32 %v370_v59, 0.0  ;;  %v403_v8 = vadd.f32 %v1233_v3, %v332_v60  ;;  %v302_v9 = vmul.f32 %v1221_v2, %v231_v56 }
  0x42   : > { %1116 = vmatmul.mubr.msk.bf16.gmra.mrb[20].mxu0 %vm505_vm1, %v483_v42  ;;  %v435_v11 = vmax.f32 %v371_v63, 0.0  ;;  %v372_v12 = vadd.f32 %v1233_v3, %v301_v1  ;;  %v333_v13 = vmul.f32 %v1221_v2, %v262_v61  ;;  %v466_v14 = vmax.f32 %v402_v0, 0.0 }
  0x43   : > { %1119 = vmatprep.mubr.msk.bf16.mxu0 %vm505_vm1, %v484_v62  ;;  %v373_v15 = vadd.f32 %v1233_v3, %v302_v9  ;;  %v334_v16 = vmul.f32 %v1221_v2, %v263_v4  ;;  %v303_v17 = vmul.f32 %v1221_v2, %v232_v5  ;;  %v467_v20 = vmax.f32 %v403_v8, 0.0 }
  0x44   : > { %1148 = vmatmul.mubr.msk.bf16.gmra.mrb[20].mxu1 %vm505_vm1, %v499_v52  ;;  %v436_v21 = vmax.f32 %v372_v12, 0.0  ;;  %v404_v22 = vadd.f32 %v1233_v3, %v333_v13  ;;  %v304_v23 = vmul.f32 %v1221_v2, %v233_v10  ;;  %v485_v24 = vpack.c.bf16 %v435_v11, %v434_v7 }
  0x45   : > { %1151 = vmatprep.mubr.msk.bf16.mxu1 %vm505_vm1, %v500_v6  ;;  %v437_v25 = vmax.f32 %v373_v15, 0.0  ;;  %v405_v26 = vadd.f32 %v1233_v3, %v334_v16  ;;  %v374_v27 = vadd.f32 %v1233_v3, %v303_v17  ;;  %v335_v30 = vmul.f32 %v1221_v2, %v264_v18 }
  0x46   : > { %v468_v28 = vmax.f32 %v404_v22, 0.0  ;;  %v375_v29 = vadd.f32 %v1233_v3, %v304_v23  ;;  %v336_v31 = vmul.f32 %v1221_v2, %v265_v19  ;;  %v501_v34 = vpack.c.bf16 %v467_v20, %v466_v14 }
  0x47   : > { %v486_v32 = vpack.c.bf16 %v437_v25, %v436_v21  ;;  %v469_v33 = vmax.f32 %v405_v26, 0.0  ;;  %v406_v35 = vadd.f32 %v1233_v3, %v335_v30  ;;  %v438_v38 = vmax.f32 %v374_v27, 0.0 }
  0x48   : > { %v407_v36 = vadd.f32 %v1233_v3, %v336_v31  ;;  %v439_v39 = vmax.f32 %v375_v29, 0.0 }
  0x49   : > { %v502_v37 = vpack.c.bf16 %v469_v33, %v468_v28  ;;  %v470_v40 = vmax.f32 %v406_v35, 0.0 }
  0x4a   : > { %1120 = vmatmul.mubr.msk.bf16.gmra.mrb[24].mxu0 %vm505_vm1, %v485_v24  ;;  %v471_v41 = vmax.f32 %v407_v36, 0.0  ;;  %v487_v2 = vpack.c.bf16 %v439_v39, %v438_v38 }
  0x4b   : > { %1123 = vmatprep.mubr.msk.bf16.mxu0 %vm505_vm1, %v486_v32 }
  0x4c   : > { %1152 = vmatmul.mubr.msk.bf16.gmra.mrb[24].mxu1 %vm505_vm1, %v501_v34  ;;  %v503_v42 = vpack.c.bf16 %v471_v41, %v470_v40 }
  0x4d   : > { %1155 = vmatprep.mubr.msk.bf16.mxu1 %vm505_vm1, %v502_v37 }
  0x52   : > { %1124 = vmatmul.mubr.msk.bf16.gmra.mrb[28].mxu0 %vm505_vm1, %v487_v2 }
  0x54   : > { %1156 = vmatmul.mubr.msk.bf16.gmra.mrb[28].mxu1 %vm505_vm1, %v503_v42 }
  0xed   : > { %v1097_v3 = vpop.f32.mrb[0].mxu0 }
  0xee   : > { %897 = vst [vmem:[%s1464_s30 + $0x10] sm:$0xff] %v1097_v3  ;;  %v640_v43 = vpop.f32.mrb[1].mxu0 }
  0xef   : > { %v1129_v44 = vpop.f32.mrb[0].mxu1  ;;  %895 = vst [vmem:[%s1464_s30] sm:$0xff] %v640_v43  ;;  %v1098_v45 = vpop.f32.mrb[2].mxu0 }
  0xf0   : > { %929 = vst [vmem:[%s1464_s30 + $0x110] sm:$0xff] %v1129_v44  ;;  %v768_v46 = vpop.f32.mrb[1].mxu1  ;;  %898 = vst [vmem:[%s1464_s30 + $0x18] sm:$0xff] %v1098_v45  ;;  %v643_v47 = vpop.f32.mrb[3].mxu0 }
  0xf1   : > { %927 = vst [vmem:[%s1464_s30 + $0x100] sm:$0xff] %v768_v46  ;;  %v1130_v48 = vpop.f32.mrb[2].mxu1  ;;  %896 = vst [vmem:[%s1464_s30 + $0x8] sm:$0xff] %v643_v47 }
  0xf2   : > { %930 = vst [vmem:[%s1464_s30 + $0x118] sm:$0xff] %v1130_v48  ;;  %v771_v49 = vpop.f32.mrb[3].mxu1 }
  0xf3   : > { %928 = vst [vmem:[%s1464_s30 + $0x108] sm:$0xff] %v771_v49 }
  0xf5   : > { %v1101_v50 = vpop.f32.mrb[4].mxu0 }
  0xf6   : > { %901 = vst [vmem:[%s1464_s30 + $0x30] sm:$0xff] %v1101_v50  ;;  %v656_v51 = vpop.f32.mrb[5].mxu0 }
  0xf7   : > { %v1133_v52 = vpop.f32.mrb[4].mxu1  ;;  %899 = vst [vmem:[%s1464_s30 + $0x20] sm:$0xff] %v656_v51  ;;  %v1102_v53 = vpop.f32.mrb[6].mxu0 }
  0xf8   : > { %933 = vst [vmem:[%s1464_s30 + $0x130] sm:$0xff] %v1133_v52  ;;  %v784_v54 = vpop.f32.mrb[5].mxu1  ;;  %902 = vst [vmem:[%s1464_s30 + $0x38] sm:$0xff] %v1102_v53  ;;  %v659_v55 = vpop.f32.mrb[7].mxu0 }
  0xf9   : > { %931 = vst [vmem:[%s1464_s30 + $0x120] sm:$0xff] %v784_v54  ;;  %v1134_v56 = vpop.f32.mrb[6].mxu1  ;;  %900 = vst [vmem:[%s1464_s30 + $0x28] sm:$0xff] %v659_v55 }
  0xfa   : > { %934 = vst [vmem:[%s1464_s30 + $0x138] sm:$0xff] %v1134_v56  ;;  %v787_v57 = vpop.f32.mrb[7].mxu1 }
  0xfb   : > { %932 = vst [vmem:[%s1464_s30 + $0x128] sm:$0xff] %v787_v57 }
  0xfd   : > { %v1105_v58 = vpop.f32.mrb[8].mxu0 }
  0xfe   : > { %905 = vst [vmem:[%s1464_s30 + $0x50] sm:$0xff] %v1105_v58  ;;  %v672_v59 = vpop.f32.mrb[9].mxu0 }
  0xff   : > { %v1137_v60 = vpop.f32.mrb[8].mxu1  ;;  %903 = vst [vmem:[%s1464_s30 + $0x40] sm:$0xff] %v672_v59  ;;  %v1106_v61 = vpop.f32.mrb[10].mxu0 }
 0x100   : > { %937 = vst [vmem:[%s1464_s30 + $0x150] sm:$0xff] %v1137_v60  ;;  %v800_v62 = vpop.f32.mrb[9].mxu1  ;;  %906 = vst [vmem:[%s1464_s30 + $0x58] sm:$0xff] %v1106_v61  ;;  %v675_v63 = vpop.f32.mrb[11].mxu0 }
 0x101   : > { %935 = vst [vmem:[%s1464_s30 + $0x140] sm:$0xff] %v800_v62  ;;  %v1138_v0 = vpop.f32.mrb[10].mxu1  ;;  %904 = vst [vmem:[%s1464_s30 + $0x48] sm:$0xff] %v675_v63 }
 0x102   : > { %938 = vst [vmem:[%s1464_s30 + $0x158] sm:$0xff] %v1138_v0  ;;  %v803_v1 = vpop.f32.mrb[11].mxu1 }
 0x103   : > { %936 = vst [vmem:[%s1464_s30 + $0x148] sm:$0xff] %v803_v1 }
 0x105   : > { %v1109_v4 = vpop.f32.mrb[12].mxu0 }
 0x106   : > { %909 = vst [vmem:[%s1464_s30 + $0x70] sm:$0xff] %v1109_v4  ;;  %v688_v5 = vpop.f32.mrb[13].mxu0 }
 0x107   : > { %v1141_v6 = vpop.f32.mrb[12].mxu1  ;;  %907 = vst [vmem:[%s1464_s30 + $0x60] sm:$0xff] %v688_v5  ;;  %v1110_v7 = vpop.f32.mrb[14].mxu0 }
 0x108   : > { %941 = vst [vmem:[%s1464_s30 + $0x170] sm:$0xff] %v1141_v6  ;;  %v816_v8 = vpop.f32.mrb[13].mxu1  ;;  %910 = vst [vmem:[%s1464_s30 + $0x78] sm:$0xff] %v1110_v7  ;;  %v691_v9 = vpop.f32.mrb[15].mxu0 }
 0x109   : > { %939 = vst [vmem:[%s1464_s30 + $0x160] sm:$0xff] %v816_v8  ;;  %v1142_v10 = vpop.f32.mrb[14].mxu1  ;;  %908 = vst [vmem:[%s1464_s30 + $0x68] sm:$0xff] %v691_v9 }
 0x10a   : > { %942 = vst [vmem:[%s1464_s30 + $0x178] sm:$0xff] %v1142_v10  ;;  %v819_v11 = vpop.f32.mrb[15].mxu1 }
 0x10b   : > { %940 = vst [vmem:[%s1464_s30 + $0x168] sm:$0xff] %v819_v11 }
 0x10d   : > { %v1113_v12 = vpop.f32.mrb[16].mxu0 }
 0x10e   : > { %913 = vst [vmem:[%s1464_s30 + $0x90] sm:$0xff] %v1113_v12  ;;  %v704_v13 = vpop.f32.mrb[17].mxu0 }
 0x10f   : > { %v1145_v14 = vpop.f32.mrb[16].mxu1  ;;  %911 = vst [vmem:[%s1464_s30 + $0x80] sm:$0xff] %v704_v13  ;;  %v1114_v15 = vpop.f32.mrb[18].mxu0 }
 0x110   : > { %945 = vst [vmem:[%s1464_s30 + $0x190] sm:$0xff] %v1145_v14  ;;  %v832_v16 = vpop.f32.mrb[17].mxu1  ;;  %914 = vst [vmem:[%s1464_s30 + $0x98] sm:$0xff] %v1114_v15  ;;  %v707_v17 = vpop.f32.mrb[19].mxu0 }
 0x111   : > { %943 = vst [vmem:[%s1464_s30 + $0x180] sm:$0xff] %v832_v16  ;;  %v1146_v18 = vpop.f32.mrb[18].mxu1  ;;  %912 = vst [vmem:[%s1464_s30 + $0x88] sm:$0xff] %v707_v17 }
 0x112   : > { %946 = vst [vmem:[%s1464_s30 + $0x198] sm:$0xff] %v1146_v18  ;;  %v835_v19 = vpop.f32.mrb[19].mxu1 }
 0x113   : > { %944 = vst [vmem:[%s1464_s30 + $0x188] sm:$0xff] %v835_v19 }
 0x115   : > { %v1117_v20 = vpop.f32.mrb[20].mxu0 }
 0x116   : > { %917 = vst [vmem:[%s1464_s30 + $0xb0] sm:$0xff] %v1117_v20  ;;  %v720_v21 = vpop.f32.mrb[21].mxu0 }
 0x117   : > { %v1149_v22 = vpop.f32.mrb[20].mxu1  ;;  %915 = vst [vmem:[%s1464_s30 + $0xa0] sm:$0xff] %v720_v21  ;;  %v1118_v23 = vpop.f32.mrb[22].mxu0 }
 0x118   : > { %949 = vst [vmem:[%s1464_s30 + $0x1b0] sm:$0xff] %v1149_v22  ;;  %v848_v24 = vpop.f32.mrb[21].mxu1  ;;  %918 = vst [vmem:[%s1464_s30 + $0xb8] sm:$0xff] %v1118_v23  ;;  %v723_v25 = vpop.f32.mrb[23].mxu0 }
 0x119   : > { %947 = vst [vmem:[%s1464_s30 + $0x1a0] sm:$0xff] %v848_v24  ;;  %v1150_v26 = vpop.f32.mrb[22].mxu1  ;;  %916 = vst [vmem:[%s1464_s30 + $0xa8] sm:$0xff] %v723_v25 }
 0x11a   : > { %950 = vst [vmem:[%s1464_s30 + $0x1b8] sm:$0xff] %v1150_v26  ;;  %v851_v27 = vpop.f32.mrb[23].mxu1 }
 0x11b   : > { %948 = vst [vmem:[%s1464_s30 + $0x1a8] sm:$0xff] %v851_v27 }
 0x11d   : > { %v1121_v28 = vpop.f32.mrb[24].mxu0 }
 0x11e   : > { %921 = vst [vmem:[%s1464_s30 + $0xd0] sm:$0xff] %v1121_v28  ;;  %v736_v29 = vpop.f32.mrb[25].mxu0 }
 0x11f   : > { %v1153_v30 = vpop.f32.mrb[24].mxu1  ;;  %919 = vst [vmem:[%s1464_s30 + $0xc0] sm:$0xff] %v736_v29  ;;  %v1122_v31 = vpop.f32.mrb[26].mxu0 }
 0x120   : > { %953 = vst [vmem:[%s1464_s30 + $0x1d0] sm:$0xff] %v1153_v30  ;;  %v864_v32 = vpop.f32.mrb[25].mxu1  ;;  %922 = vst [vmem:[%s1464_s30 + $0xd8] sm:$0xff] %v1122_v31  ;;  %v739_v33 = vpop.f32.mrb[27].mxu0 }
 0x121   : > { %951 = vst [vmem:[%s1464_s30 + $0x1c0] sm:$0xff] %v864_v32  ;;  %v1154_v34 = vpop.f32.mrb[26].mxu1  ;;  %920 = vst [vmem:[%s1464_s30 + $0xc8] sm:$0xff] %v739_v33 }
 0x122   : > { %954 = vst [vmem:[%s1464_s30 + $0x1d8] sm:$0xff] %v1154_v34  ;;  %v867_v35 = vpop.f32.mrb[27].mxu1 }
 0x123   : > { %952 = vst [vmem:[%s1464_s30 + $0x1c8] sm:$0xff] %v867_v35 }
 0x125   : > { %v1125_v36 = vpop.f32.mrb[28].mxu0 }
 0x126   : > { %925 = vst [vmem:[%s1464_s30 + $0xf0] sm:$0xff] %v1125_v36  ;;  %v752_v37 = vpop.f32.mrb[29].mxu0 }
 0x127   : > { %v1157_v38 = vpop.f32.mrb[28].mxu1  ;;  %923 = vst [vmem:[%s1464_s30 + $0xe0] sm:$0xff] %v752_v37  ;;  %v1126_v39 = vpop.f32.mrb[30].mxu0 }
 0x128   : > { %957 = vst [vmem:[%s1464_s30 + $0x1f0] sm:$0xff] %v1157_v38  ;;  %v880_v40 = vpop.f32.mrb[29].mxu1  ;;  %926 = vst [vmem:[%s1464_s30 + $0xf8] sm:$0xff] %v1126_v39  ;;  %v755_v41 = vpop.f32.mrb[31].mxu0 }
 0x129   : > { %955 = vst [vmem:[%s1464_s30 + $0x1e0] sm:$0xff] %v880_v40  ;;  %v1158_v2 = vpop.f32.mrb[30].mxu1  ;;  %924 = vst [vmem:[%s1464_s30 + $0xe8] sm:$0xff] %v755_v41 }
 0x12a   : > { %958 = vst [vmem:[%s1464_s30 + $0x1f8] sm:$0xff] %v1158_v2  ;;  %v883_v42 = vpop.f32.mrb[31].mxu1 }
 0x12b   : > { %956 = vst [vmem:[%s1464_s30 + $0x1e8] sm:$0xff] %v883_v42 }
 0x12c PF: > { %s14_s15 = sadd.s32 1, %s1177_s15  }
 0x12d   : > { %p11_p4 = scmp.ge.s32.totalorder %s14_s15, 6  }
 0x12f   :  { %13 = sbr.rel (!%p11_p4) target bundleno = 1 (0x1), region = 66 }

// kernel: tile.6
= control target key start
LH: loop header
LB: loop body
LE: loop exit
PB: predicated region body
PF: predicated region fallthrough
CT: control target
= control target key end

     0   :  { %s466_s0 = inlined_call_operand.vmem [shape: f32[3], index: 0, kind: input, shape index: {}]   ;;  %s467_s1 = inlined_call_operand.vmem [shape: f32[512,3], index: 1, kind: output, shape index: {}]  }
   0x1   :  { %v208_v0 = vld [vmem:[%s466_s0] ss:$0 sm:$0xff] }
   0x2   :  { %5 = vst [vmem:[%s467_s1] sm:$0xff] %v208_v0  ;;  %132 = vst [vmem:[%s467_s1 + $0x8] sm:$0xff] %v208_v0 }
   0x3   :  { %133 = vst [vmem:[%s467_s1 + $0x10] sm:$0xff] %v208_v0  ;;  %134 = vst [vmem:[%s467_s1 + $0x18] sm:$0xff] %v208_v0 }
   0x4   :  { %135 = vst [vmem:[%s467_s1 + $0x20] sm:$0xff] %v208_v0  ;;  %136 = vst [vmem:[%s467_s1 + $0x28] sm:$0xff] %v208_v0 }
   0x5   :  { %137 = vst [vmem:[%s467_s1 + $0x30] sm:$0xff] %v208_v0  ;;  %138 = vst [vmem:[%s467_s1 + $0x38] sm:$0xff] %v208_v0 }
   0x6   :  { %139 = vst [vmem:[%s467_s1 + $0x40] sm:$0xff] %v208_v0  ;;  %140 = vst [vmem:[%s467_s1 + $0x48] sm:$0xff] %v208_v0 }
   0x7   :  { %141 = vst [vmem:[%s467_s1 + $0x50] sm:$0xff] %v208_v0  ;;  %142 = vst [vmem:[%s467_s1 + $0x58] sm:$0xff] %v208_v0 }
   0x8   :  { %143 = vst [vmem:[%s467_s1 + $0x60] sm:$0xff] %v208_v0  ;;  %144 = vst [vmem:[%s467_s1 + $0x68] sm:$0xff] %v208_v0 }
   0x9   :  { %145 = vst [vmem:[%s467_s1 + $0x70] sm:$0xff] %v208_v0  ;;  %146 = vst [vmem:[%s467_s1 + $0x78] sm:$0xff] %v208_v0 }
   0xa   :  { %147 = vst [vmem:[%s467_s1 + $0x80] sm:$0xff] %v208_v0  ;;  %148 = vst [vmem:[%s467_s1 + $0x88] sm:$0xff] %v208_v0 }
   0xb   :  { %149 = vst [vmem:[%s467_s1 + $0x90] sm:$0xff] %v208_v0  ;;  %150 = vst [vmem:[%s467_s1 + $0x98] sm:$0xff] %v208_v0 }
   0xc   :  { %151 = vst [vmem:[%s467_s1 + $0xa0] sm:$0xff] %v208_v0  ;;  %152 = vst [vmem:[%s467_s1 + $0xa8] sm:$0xff] %v208_v0 }
   0xd   :  { %153 = vst [vmem:[%s467_s1 + $0xb0] sm:$0xff] %v208_v0  ;;  %154 = vst [vmem:[%s467_s1 + $0xb8] sm:$0xff] %v208_v0 }
   0xe   :  { %155 = vst [vmem:[%s467_s1 + $0xc0] sm:$0xff] %v208_v0  ;;  %156 = vst [vmem:[%s467_s1 + $0xc8] sm:$0xff] %v208_v0 }
   0xf   :  { %157 = vst [vmem:[%s467_s1 + $0xd0] sm:$0xff] %v208_v0  ;;  %158 = vst [vmem:[%s467_s1 + $0xd8] sm:$0xff] %v208_v0 }
  0x10   :  { %159 = vst [vmem:[%s467_s1 + $0xe0] sm:$0xff] %v208_v0  ;;  %160 = vst [vmem:[%s467_s1 + $0xe8] sm:$0xff] %v208_v0 }
  0x11   :  { %161 = vst [vmem:[%s467_s1 + $0xf0] sm:$0xff] %v208_v0  ;;  %162 = vst [vmem:[%s467_s1 + $0xf8] sm:$0xff] %v208_v0 }
  0x12   :  { %163 = vst [vmem:[%s467_s1 + $0x100] sm:$0xff] %v208_v0  ;;  %164 = vst [vmem:[%s467_s1 + $0x108] sm:$0xff] %v208_v0 }
  0x13   :  { %165 = vst [vmem:[%s467_s1 + $0x110] sm:$0xff] %v208_v0  ;;  %166 = vst [vmem:[%s467_s1 + $0x118] sm:$0xff] %v208_v0 }
  0x14   :  { %167 = vst [vmem:[%s467_s1 + $0x120] sm:$0xff] %v208_v0  ;;  %168 = vst [vmem:[%s467_s1 + $0x128] sm:$0xff] %v208_v0 }
  0x15   :  { %169 = vst [vmem:[%s467_s1 + $0x130] sm:$0xff] %v208_v0  ;;  %170 = vst [vmem:[%s467_s1 + $0x138] sm:$0xff] %v208_v0 }
  0x16   :  { %171 = vst [vmem:[%s467_s1 + $0x140] sm:$0xff] %v208_v0  ;;  %172 = vst [vmem:[%s467_s1 + $0x148] sm:$0xff] %v208_v0 }
  0x17   :  { %173 = vst [vmem:[%s467_s1 + $0x150] sm:$0xff] %v208_v0  ;;  %174 = vst [vmem:[%s467_s1 + $0x158] sm:$0xff] %v208_v0 }
  0x18   :  { %175 = vst [vmem:[%s467_s1 + $0x160] sm:$0xff] %v208_v0  ;;  %176 = vst [vmem:[%s467_s1 + $0x168] sm:$0xff] %v208_v0 }
  0x19   :  { %177 = vst [vmem:[%s467_s1 + $0x170] sm:$0xff] %v208_v0  ;;  %178 = vst [vmem:[%s467_s1 + $0x178] sm:$0xff] %v208_v0 }
  0x1a   :  { %179 = vst [vmem:[%s467_s1 + $0x180] sm:$0xff] %v208_v0  ;;  %180 = vst [vmem:[%s467_s1 + $0x188] sm:$0xff] %v208_v0 }
  0x1b   :  { %181 = vst [vmem:[%s467_s1 + $0x190] sm:$0xff] %v208_v0  ;;  %182 = vst [vmem:[%s467_s1 + $0x198] sm:$0xff] %v208_v0 }
  0x1c   :  { %183 = vst [vmem:[%s467_s1 + $0x1a0] sm:$0xff] %v208_v0  ;;  %184 = vst [vmem:[%s467_s1 + $0x1a8] sm:$0xff] %v208_v0 }
  0x1d   :  { %185 = vst [vmem:[%s467_s1 + $0x1b0] sm:$0xff] %v208_v0  ;;  %186 = vst [vmem:[%s467_s1 + $0x1b8] sm:$0xff] %v208_v0 }
  0x1e   :  { %187 = vst [vmem:[%s467_s1 + $0x1c0] sm:$0xff] %v208_v0  ;;  %188 = vst [vmem:[%s467_s1 + $0x1c8] sm:$0xff] %v208_v0 }
  0x1f   :  { %189 = vst [vmem:[%s467_s1 + $0x1d0] sm:$0xff] %v208_v0  ;;  %190 = vst [vmem:[%s467_s1 + $0x1d8] sm:$0xff] %v208_v0 }
  0x20   :  { %191 = vst [vmem:[%s467_s1 + $0x1e0] sm:$0xff] %v208_v0  ;;  %192 = vst [vmem:[%s467_s1 + $0x1e8] sm:$0xff] %v208_v0 }
  0x21   :  { %193 = vst [vmem:[%s467_s1 + $0x1f0] sm:$0xff] %v208_v0  ;;  %194 = vst [vmem:[%s467_s1 + $0x1f8] sm:$0xff] %v208_v0 }

// kernel: tile.7
= control target key start
LH: loop header
LB: loop body
LE: loop exit
PB: predicated region body
PF: predicated region fallthrough
CT: control target
= control target key end

     0   :  { %vm5_vm0 = vcmask 1041409   ;;  %vm9_vm1 = vcmask 1042434   ;;  %vm13_vm2 = vcmask 1043459   ;;  %vm45_vm3 = vcmask 7168   ;;  %s3422_s11 = smov 127   ;;  %s3423_s18 = smov 125   ;;  %s5618_s0 = inlined_call_operand.vmem [shape: f32[512,3], index: 0, kind: input, shape index: {}]   ;;  %s5619_s1 = inlined_call_operand.vmem [shape: f32[1,1536], index: 1, kind: output, shape index: {}]  }
   0x1   :  { %v2768_v0 = vld [vmem:[%s5618_s0 + $0x155] sm:$0x1]   ;;  %v2784_v11 = vld [vmem:[%s5618_s0 + $0x17f] sm:$0x1]   ;;  %vm49_vm4 = vcmask 15360   ;;  %s3424_s10 = smov 126  }
   0x2   :  { %v2769_v1 = vld [vmem:[%s5618_s0 + $0xd4] sm:$0x2]   ;;  %v2785_v14 = vld [vmem:[%s5618_s0 + $0xfe] sm:$0x2]   ;;  %v2776_v19 = vld [vmem:[%s5618_s0 + $0xaa] sm:$0x1]  }
   0x3   :  { %v2770_v2 = vld [vmem:[%s5618_s0 + $0x53] sm:$0x4]   ;;  %v22_v4 = vsel %vm5_vm0, %v2769_v1, %v2768_v0  ;;  %v2786_v15 = vld [vmem:[%s5618_s0 + $0x7d] sm:$0x4]   ;;  %v105_v18 = vsel %vm5_vm0, %v2785_v14, %v2784_v11  ;;  %v2777_v20 = vld [vmem:[%s5618_s0 + $0x29] sm:$0x2]  }
   0x4   :  { %v2771_v3 = vld [vmem:[%s5618_s0 + $0x1d2] sm:$0x8]   ;;  %v26_v8 = vsel %vm9_vm1, %v2770_v2, %v22_v4  ;;  %v2787_v16 = vld [vmem:[%s5618_s0 + $0x1fc] sm:$0x8]   ;;  %v109_v22 = vsel %vm9_vm1, %v2786_v15, %v105_v18  ;;  %v64_v23 = vsel %vm5_vm0, %v2777_v20, %v2776_v19  ;;  %v2778_v24 = vld [vmem:[%s5618_s0 + $0x1a8] sm:$0x4]  }
   0x5   :  { %v2772_v5 = vld [vmem:[%s5618_s0 + $0xd5] sm:$0x1]   ;;  %v30_v12 = vsel %vm13_vm2, %v2771_v3, %v26_v8  ;;  %v2779_v25 = vld [vmem:[%s5618_s0 + $0x127] sm:$0x8]   ;;  %v113_v27 = vsel %vm13_vm2, %v2787_v16, %v109_v22  ;;  %v68_v28 = vsel %vm9_vm1, %v2778_v24, %v64_v23  ;;  %v2788_v34 = vld [vmem:[%s5618_s0 + $0xd4] sm:$0x1]  }
   0x6   :  { %v2773_v6 = vld [vmem:[%s5618_s0 + $0x54] sm:$0x2]   ;;  %v2780_v26 = vld [vmem:[%s5618_s0 + $0x2a] sm:$0x1]   ;;  %114 = vrot.lane.b32.xlu1 %v113_v27, %s3423_s18  ;;  %v72_v32 = vsel %vm13_vm2, %v2779_v25, %v68_v28  ;;  %v2789_v35 = vld [vmem:[%s5618_s0 + $0x53] sm:$0x2]  }
   0x7   :  { %v2774_v7 = vld [vmem:[%s5618_s0 + $0x1d3] sm:$0x4]   ;;  %v36_v9 = vsel %vm5_vm0, %v2773_v6, %v2772_v5  ;;  %v2781_v29 = vld [vmem:[%s5618_s0 + $0x1a9] sm:$0x2]   ;;  %v126_v37 = vsel %vm5_vm0, %v2789_v35, %v2788_v34  ;;  %v2790_v38 = vld [vmem:[%s5618_s0 + $0x1d2] sm:$0x4]  }
   0x8   :  { %v2775_v10 = vld [vmem:[%s5618_s0 + $0x152] sm:$0x8]   ;;  %v40_v13 = vsel %vm9_vm1, %v2774_v7, %v36_v9  ;;  %v2782_v30 = vld [vmem:[%s5618_s0 + $0x128] sm:$0x4]   ;;  %v78_v33 = vsel %vm5_vm0, %v2781_v29, %v2780_v26  ;;  %v2791_v39 = vld [vmem:[%s5618_s0 + $0x151] sm:$0x8]   ;;  %v130_v42 = vsel %vm9_vm1, %v2790_v38, %v126_v37 }
   0x9   :  { %v44_v17 = vsel %vm13_vm2, %v2775_v10, %v40_v13  ;;  %v2783_v31 = vld [vmem:[%s5618_s0 + $0xa7] sm:$0x8]   ;;  %v82_v36 = vsel %vm9_vm1, %v2782_v30, %v78_v33  ;;  %v2792_v40 = vld [vmem:[%s5618_s0 + $0x29] sm:$0x1]   ;;  %v134_v47 = vsel %vm13_vm2, %v2791_v39, %v130_v42  ;;  %v2796_v49 = vld [vmem:[%s5618_s0 + $0x17e] sm:$0x1]  }
   0xa   :  { %v46_v21 = vsel %vm45_vm3, %v44_v17, %v30_v12  ;;  %v86_v41 = vsel %vm13_vm2, %v2783_v31, %v82_v36  ;;  %v2793_v43 = vld [vmem:[%s5618_s0 + $0x1a8] sm:$0x2]   ;;  %v2797_v50 = vld [vmem:[%s5618_s0 + $0xfd] sm:$0x2]   ;;  %v2800_v57 = vld [vmem:[%s5618_s0 + $0xd3] sm:$0x1]  }
   0xb   :  { %47 = vrot.lane.b32.xlu0 %v46_v21, %s3422_s11  ;;  %v2794_v44 = vld [vmem:[%s5618_s0 + $0x127] sm:$0x4]   ;;  %v88_v46 = vsel %vm49_vm4, %v86_v41, %v72_v32  ;;  %v147_v48 = vsel %vm5_vm0, %v2793_v43, %v2792_v40  ;;  %s3425_s11 = smov 124   ;;  %v167_v52 = vsel %vm5_vm0, %v2797_v50, %v2796_v49  ;;  %v2798_v53 = vld [vmem:[%s5618_s0 + $0x7c] sm:$0x4]   ;;  %s3426_s5 = smov 123  }
   0xc   :  { %v2795_v45 = vld [vmem:[%s5618_s0 + $0xa6] sm:$0x8]   ;;  %135 = vrot.lane.b32.xlu1 %v134_v47, %s3425_s11  ;;  %v151_v51 = vsel %vm9_vm1, %v2794_v44, %v147_v48  ;;  %v2799_v54 = vld [vmem:[%s5618_s0 + $0x1fb] sm:$0x8]   ;;  %v171_v56 = vsel %vm9_vm1, %v2798_v53, %v167_v52  ;;  %v2801_v58 = vld [vmem:[%s5618_s0 + $0x52] sm:$0x2]  }
   0xd   :  { %v155_v55 = vsel %vm13_vm2, %v2795_v45, %v151_v51  ;;  %v2802_v59 = vld [vmem:[%s5618_s0 + $0x1d1] sm:$0x4]   ;;  %v175_v60 = vsel %vm13_vm2, %v2799_v54, %v171_v56  ;;  %v188_v61 = vsel %vm5_vm0, %v2801_v58, %v2800_v57  ;;  %v2804_v63 = vld [vmem:[%s5618_s0 + $0x28] sm:$0x1]   ;;  %v2808_v5 = vld [vmem:[%s5618_s0 + $0x17d] sm:$0x1]  }
   0xe   :  { %v2803_v62 = vld [vmem:[%s5618_s0 + $0x150] sm:$0x8]   ;;  %v2805_v0 = vld [vmem:[%s5618_s0 + $0x1a7] sm:$0x2]   ;;  %v192_v1 = vsel %vm9_vm1, %v2802_v59, %v188_v61  ;;  %s3427_s6 = smov 122   ;;  %s3428_s27 = smov 121  }
   0xf   :  { %89 = vrot.lane.b32.xlu0 %v88_v46, %s3424_s10  ;;  %v209_v2 = vsel %vm5_vm0, %v2805_v0, %v2804_v63  ;;  %v2806_v3 = vld [vmem:[%s5618_s0 + $0x126] sm:$0x4]   ;;  %v2809_v7 = vld [vmem:[%s5618_s0 + $0xfc] sm:$0x2]   ;;  %v196_v9 = vsel %vm13_vm2, %v2803_v62, %v192_v1  ;;  %v2812_v13 = vld [vmem:[%s5618_s0 + $0xd2] sm:$0x1]  }
  0x10   :  { %v2807_v4 = vld [vmem:[%s5618_s0 + $0xa5] sm:$0x8]   ;;  %176 = vrot.lane.b32.xlu1 %v175_v60, %s3427_s6  ;;  %v213_v6 = vsel %vm9_vm1, %v2806_v3, %v209_v2  ;;  %v2810_v8 = vld [vmem:[%s5618_s0 + $0x7b] sm:$0x4]   ;;  %v229_v11 = vsel %vm5_vm0, %v2809_v7, %v2808_v5  ;;  %v2813_v14 = vld [vmem:[%s5618_s0 + $0x51] sm:$0x2]  }
  0x11   :  { %v217_v10 = vsel %vm13_vm2, %v2807_v4, %v213_v6  ;;  %v2811_v12 = vld [vmem:[%s5618_s0 + $0x1fa] sm:$0x8]   ;;  %v233_v15 = vsel %vm9_vm1, %v2810_v8, %v229_v11  ;;  %v250_v16 = vsel %vm5_vm0, %v2813_v14, %v2812_v13  ;;  %v2814_v17 = vld [vmem:[%s5618_s0 + $0x1d0] sm:$0x4]   ;;  %v2816_v19 = vld [vmem:[%s5618_s0 + $0x27] sm:$0x1]  }
  0x12   :  { %v2815_v18 = vld [vmem:[%s5618_s0 + $0x14f] sm:$0x8]   ;;  %v254_v20 = vsel %vm9_vm1, %v2814_v17, %v250_v16  ;;  %v2817_v21 = vld [vmem:[%s5618_s0 + $0x1a6] sm:$0x2]   ;;  %s3429_s28 = smov 120   ;;  %v237_v26 = vsel %vm13_vm2, %v2811_v12, %v233_v15  ;;  %s3430_s20 = smov 119  }
  0x13   :  { %156 = vrot.lane.b32.xlu0 %v155_v55, %s3426_s5  ;;  %v2818_v22 = vld [vmem:[%s5618_s0 + $0x125] sm:$0x4]   ;;  %v271_v23 = vsel %vm5_vm0, %v2817_v21, %v2816_v19  ;;  %v2820_v24 = vld [vmem:[%s5618_s0 + $0x17c] sm:$0x1]   ;;  %v258_v27 = vsel %vm13_vm2, %v2815_v18, %v254_v20  ;;  %v2824_v30 = vld [vmem:[%s5618_s0 + $0xd1] sm:$0x1]  }
  0x14   :  { %218 = vrot.lane.b32.xlu1 %v217_v10, %s3429_s28  ;;  %v2821_v25 = vld [vmem:[%s5618_s0 + $0xfb] sm:$0x2]   ;;  %v275_v31 = vsel %vm9_vm1, %v2818_v22, %v271_v23  ;;  %v2819_v32 = vld [vmem:[%s5618_s0 + $0xa4] sm:$0x8]   ;;  %v2825_v35 = vld [vmem:[%s5618_s0 + $0x50] sm:$0x2]  }
  0x15   :  { %v291_v28 = vsel %vm5_vm0, %v2821_v25, %v2820_v24  ;;  %v2822_v29 = vld [vmem:[%s5618_s0 + $0x7a] sm:$0x4]   ;;  %v312_v36 = vsel %vm5_vm0, %v2825_v35, %v2824_v30  ;;  %v2826_v37 = vld [vmem:[%s5618_s0 + $0x1cf] sm:$0x4]   ;;  %v2828_v38 = vld [vmem:[%s5618_s0 + $0x26] sm:$0x1]   ;;  %v279_v42 = vsel %vm13_vm2, %v2819_v32, %v275_v31 }
  0x16   :  { %v295_v33 = vsel %vm9_vm1, %v2822_v29, %v291_v28  ;;  %v2823_v34 = vld [vmem:[%s5618_s0 + $0x1f9] sm:$0x8]   ;;  %v2829_v39 = vld [vmem:[%s5618_s0 + $0x1a5] sm:$0x2]   ;;  %s3431_s21 = smov 118   ;;  %v316_v47 = vsel %vm9_vm1, %v2826_v37, %v312_v36  ;;  %s3432_s11 = smov 117  }
  0x17   :  { %197 = vrot.lane.b32.xlu0 %v196_v9, %s3428_s27  ;;  %v333_v40 = vsel %vm5_vm0, %v2829_v39, %v2828_v38  ;;  %v2830_v41 = vld [vmem:[%s5618_s0 + $0x124] sm:$0x4]   ;;  %v299_v43 = vsel %vm13_vm2, %v2823_v34, %v295_v33  ;;  %v2827_v44 = vld [vmem:[%s5618_s0 + $0x14e] sm:$0x8]   ;;  %v2832_v45 = vld [vmem:[%s5618_s0 + $0x17b] sm:$0x1]  }
  0x18   :  { %259 = vrot.lane.b32.xlu1 %v258_v27, %s3431_s21  ;;  %v2833_v46 = vld [vmem:[%s5618_s0 + $0xfa] sm:$0x2]   ;;  %v337_v48 = vsel %vm9_vm1, %v2830_v41, %v333_v40  ;;  %v2831_v49 = vld [vmem:[%s5618_s0 + $0xa3] sm:$0x8]   ;;  %v2836_v50 = vld [vmem:[%s5618_s0 + $0xd0] sm:$0x1]   ;;  %v320_v58 = vsel %vm13_vm2, %v2827_v44, %v316_v47 }
  0x19   :  { %v2837_v51 = vld [vmem:[%s5618_s0 + $0x4f] sm:$0x2]   ;;  %v353_v52 = vsel %vm5_vm0, %v2833_v46, %v2832_v45  ;;  %v2834_v53 = vld [vmem:[%s5618_s0 + $0x79] sm:$0x4]   ;;  %s3433_s12 = smov 116   ;;  %v341_v59 = vsel %vm13_vm2, %v2831_v49, %v337_v48  ;;  %s3434_s4 = smov 115  }
  0x1a   :  { %v374_v54 = vsel %vm5_vm0, %v2837_v51, %v2836_v50  ;;  %v2838_v55 = vld [vmem:[%s5618_s0 + $0x1ce] sm:$0x4]   ;;  %v2840_v56 = vld [vmem:[%s5618_s0 + $0x25] sm:$0x1]   ;;  %v2844_v60 = vld [vmem:[%s5618_s0 + $0x17a] sm:$0x1]   ;;  %v357_v62 = vsel %vm9_vm1, %v2834_v53, %v353_v52 }
  0x1b   :  { %238 = vrot.lane.b32.xlu0 %v237_v26, %s3430_s20  ;;  %v2841_v57 = vld [vmem:[%s5618_s0 + $0x1a4] sm:$0x2]   ;;  %v2845_v61 = vld [vmem:[%s5618_s0 + $0xf9] sm:$0x2]   ;;  %v2835_v63 = vld [vmem:[%s5618_s0 + $0x1f8] sm:$0x8]   ;;  %v378_v0 = vsel %vm9_vm1, %v2838_v55, %v374_v54 }
  0x1c   :  { %300 = vrot.lane.b32.xlu1 %v299_v43, %s3433_s12  ;;  %v2839_v1 = vld [vmem:[%s5618_s0 + $0x14d] sm:$0x8]   ;;  %v2842_v2 = vld [vmem:[%s5618_s0 + $0x123] sm:$0x4]   ;;  %v395_v3 = vsel %vm5_vm0, %v2841_v57, %v2840_v56  ;;  %v415_v4 = vsel %vm5_vm0, %v2845_v61, %v2844_v60  ;;  %v2846_v5 = vld [vmem:[%s5618_s0 + $0x78] sm:$0x4]   ;;  %v361_v10 = vsel %vm13_vm2, %v2835_v63, %v357_v62 }
  0x1d   :  { %v2848_v6 = vld [vmem:[%s5618_s0 + $0xcf] sm:$0x1]   ;;  %s3435_s5 = smov 114   ;;  %v2852_v8 = vld [vmem:[%s5618_s0 + $0x24] sm:$0x1]   ;;  %v382_v11 = vsel %vm13_vm2, %v2839_v1, %v378_v0  ;;  %v399_v12 = vsel %vm9_vm1, %v2842_v2, %v395_v3  ;;  %v419_v14 = vsel %vm9_vm1, %v2846_v5, %v415_v4  ;;  %s3436_s22 = smov 113  }
  0x1e   :  { %v2849_v7 = vld [vmem:[%s5618_s0 + $0x4e] sm:$0x2]   ;;  %v2853_v9 = vld [vmem:[%s5618_s0 + $0x1a3] sm:$0x2]   ;;  %v2843_v13 = vld [vmem:[%s5618_s0 + $0xa2] sm:$0x8]  }
  0x1f   :  { %280 = vrot.lane.b32.xlu0 %v279_v42, %s3432_s11  ;;  %v2847_v15 = vld [vmem:[%s5618_s0 + $0x1f7] sm:$0x8]   ;;  %v2850_v16 = vld [vmem:[%s5618_s0 + $0x1cd] sm:$0x4]   ;;  %v436_v17 = vsel %vm5_vm0, %v2849_v7, %v2848_v6  ;;  %v457_v18 = vsel %vm5_vm0, %v2853_v9, %v2852_v8  ;;  %v2854_v19 = vld [vmem:[%s5618_s0 + $0x122] sm:$0x4]   ;;  %v403_v24 = vsel %vm13_vm2, %v2843_v13, %v399_v12 }
  0x20   :  { %342 = vrot.lane.b32.xlu1 %v341_v59, %s3435_s5  ;;  %v2856_v20 = vld [vmem:[%s5618_s0 + $0x179] sm:$0x1]   ;;  %s3437_s23 = smov 112   ;;  %v2860_v22 = vld [vmem:[%s5618_s0 + $0xce] sm:$0x1]   ;;  %v423_v25 = vsel %vm13_vm2, %v2847_v15, %v419_v14  ;;  %v440_v26 = vsel %vm9_vm1, %v2850_v16, %v436_v17  ;;  %v461_v28 = vsel %vm9_vm1, %v2854_v19, %v457_v18  ;;  %s3438_s11 = smov 111  }
  0x21   :  { %v2857_v21 = vld [vmem:[%s5618_s0 + $0xf8] sm:$0x2]   ;;  %v2861_v23 = vld [vmem:[%s5618_s0 + $0x4d] sm:$0x2]   ;;  %v2851_v27 = vld [vmem:[%s5618_s0 + $0x14c] sm:$0x8]  }
  0x22   :  { %v2855_v29 = vld [vmem:[%s5618_s0 + $0xa1] sm:$0x8]   ;;  %v2858_v30 = vld [vmem:[%s5618_s0 + $0x77] sm:$0x4]   ;;  %v477_v31 = vsel %vm5_vm0, %v2857_v21, %v2856_v20  ;;  %v498_v32 = vsel %vm5_vm0, %v2861_v23, %v2860_v22  ;;  %v2862_v33 = vld [vmem:[%s5618_s0 + $0x1cc] sm:$0x4]   ;;  %v444_v38 = vsel %vm13_vm2, %v2851_v27, %v440_v26 }
  0x23   :  { %321 = vrot.lane.b32.xlu0 %v320_v58, %s3434_s4  ;;  %v2864_v34 = vld [vmem:[%s5618_s0 + $0x23] sm:$0x1]   ;;  %s3439_s12 = smov 110   ;;  %v2868_v36 = vld [vmem:[%s5618_s0 + $0x178] sm:$0x1]   ;;  %v465_v39 = vsel %vm13_vm2, %v2855_v29, %v461_v28  ;;  %v481_v40 = vsel %vm9_vm1, %v2858_v30, %v477_v31  ;;  %v502_v42 = vsel %vm9_vm1, %v2862_v33, %v498_v32  ;;  %s3440_s29 = smov 109  }
  0x24   :  { %383 = vrot.lane.b32.xlu1 %v382_v11, %s3437_s23  ;;  %v2865_v35 = vld [vmem:[%s5618_s0 + $0x1a2] sm:$0x2]   ;;  %v2869_v37 = vld [vmem:[%s5618_s0 + $0xf7] sm:$0x2]   ;;  %v2859_v41 = vld [vmem:[%s5618_s0 + $0x1f6] sm:$0x8]  }
  0x25   :  { %v2863_v43 = vld [vmem:[%s5618_s0 + $0x14b] sm:$0x8]   ;;  %v2866_v44 = vld [vmem:[%s5618_s0 + $0x121] sm:$0x4]   ;;  %v519_v45 = vsel %vm5_vm0, %v2865_v35, %v2864_v34  ;;  %v539_v46 = vsel %vm5_vm0, %v2869_v37, %v2868_v36  ;;  %v2870_v47 = vld [vmem:[%s5618_s0 + $0x76] sm:$0x4]   ;;  %v485_v52 = vsel %vm13_vm2, %v2859_v41, %v481_v40 }
  0x26   :  { %v2872_v48 = vld [vmem:[%s5618_s0 + $0xcd] sm:$0x1]   ;;  %s3441_s30 = smov 108   ;;  %v2876_v50 = vld [vmem:[%s5618_s0 + $0x22] sm:$0x1]   ;;  %v506_v53 = vsel %vm13_vm2, %v2863_v43, %v502_v42  ;;  %v523_v54 = vsel %vm9_vm1, %v2866_v44, %v519_v45  ;;  %v543_v56 = vsel %vm9_vm1, %v2870_v47, %v539_v46  ;;  %s3442_s18 = smov 107  }
  0x27   :  { %362 = vrot.lane.b32.xlu0 %v361_v10, %s3436_s22  ;;  %v2873_v49 = vld [vmem:[%s5618_s0 + $0x4c] sm:$0x2]   ;;  %v2877_v51 = vld [vmem:[%s5618_s0 + $0x1a1] sm:$0x2]   ;;  %v2867_v55 = vld [vmem:[%s5618_s0 + $0xa0] sm:$0x8]  }
  0x28   :  { %424 = vrot.lane.b32.xlu1 %v423_v25, %s3439_s12  ;;  %v2871_v57 = vld [vmem:[%s5618_s0 + $0x1f5] sm:$0x8]   ;;  %v2874_v58 = vld [vmem:[%s5618_s0 + $0x1cb] sm:$0x4]   ;;  %v560_v59 = vsel %vm5_vm0, %v2873_v49, %v2872_v48  ;;  %v581_v60 = vsel %vm5_vm0, %v2877_v51, %v2876_v50  ;;  %v2878_v61 = vld [vmem:[%s5618_s0 + $0x120] sm:$0x4]   ;;  %v527_v2 = vsel %vm13_vm2, %v2867_v55, %v523_v54 }
  0x29   :  { %v2880_v62 = vld [vmem:[%s5618_s0 + $0x177] sm:$0x1]   ;;  %s3443_s19 = smov 106   ;;  %v2884_v0 = vld [vmem:[%s5618_s0 + $0xcc] sm:$0x1]   ;;  %v547_v3 = vsel %vm13_vm2, %v2871_v57, %v543_v56  ;;  %v564_v4 = vsel %vm9_vm1, %v2874_v58, %v560_v59  ;;  %v585_v6 = vsel %vm9_vm1, %v2878_v61, %v581_v60  ;;  %s3444_s7 = smov 105  }
  0x2a   :  { %v2881_v63 = vld [vmem:[%s5618_s0 + $0xf6] sm:$0x2]   ;;  %v2885_v1 = vld [vmem:[%s5618_s0 + $0x4b] sm:$0x2]   ;;  %v2875_v5 = vld [vmem:[%s5618_s0 + $0x14a] sm:$0x8]  }
  0x2b   :  { %404 = vrot.lane.b32.xlu0 %v403_v24, %s3438_s11  ;;  %v2879_v7 = vld [vmem:[%s5618_s0 + $0x9f] sm:$0x8]   ;;  %v2882_v8 = vld [vmem:[%s5618_s0 + $0x75] sm:$0x4]   ;;  %v601_v9 = vsel %vm5_vm0, %v2881_v63, %v2880_v62  ;;  %v622_v10 = vsel %vm5_vm0, %v2885_v1, %v2884_v0  ;;  %v2886_v11 = vld [vmem:[%s5618_s0 + $0x1ca] sm:$0x4]   ;;  %v568_v16 = vsel %vm13_vm2, %v2875_v5, %v564_v4 }
  0x2c   :  { %466 = vrot.lane.b32.xlu1 %v465_v39, %s3441_s30  ;;  %v2888_v12 = vld [vmem:[%s5618_s0 + $0x21] sm:$0x1]   ;;  %s3445_s8 = smov 104   ;;  %v2892_v14 = vld [vmem:[%s5618_s0 + $0x176] sm:$0x1]   ;;  %v589_v17 = vsel %vm13_vm2, %v2879_v7, %v585_v6  ;;  %v605_v18 = vsel %vm9_vm1, %v2882_v8, %v601_v9  ;;  %v626_v20 = vsel %vm9_vm1, %v2886_v11, %v622_v10  ;;  %s3446_s25 = smov 103  }
  0x2d   :  { %v2889_v13 = vld [vmem:[%s5618_s0 + $0x1a0] sm:$0x2]   ;;  %v2893_v15 = vld [vmem:[%s5618_s0 + $0xf5] sm:$0x2]   ;;  %v2883_v19 = vld [vmem:[%s5618_s0 + $0x1f4] sm:$0x8]  }
  0x2e   :  { %v2887_v21 = vld [vmem:[%s5618_s0 + $0x149] sm:$0x8]   ;;  %v2890_v22 = vld [vmem:[%s5618_s0 + $0x11f] sm:$0x4]   ;;  %v643_v23 = vsel %vm5_vm0, %v2889_v13, %v2888_v12  ;;  %v663_v24 = vsel %vm5_vm0, %v2893_v15, %v2892_v14  ;;  %v2894_v25 = vld [vmem:[%s5618_s0 + $0x74] sm:$0x4]   ;;  %v609_v30 = vsel %vm13_vm2, %v2883_v19, %v605_v18 }
  0x2f   :  { %445 = vrot.lane.b32.xlu0 %v444_v38, %s3440_s29  ;;  %v2896_v26 = vld [vmem:[%s5618_s0 + $0xcb] sm:$0x1]   ;;  %s3447_s26 = smov 102   ;;  %v2900_v28 = vld [vmem:[%s5618_s0 + $0x20] sm:$0x1]   ;;  %v630_v31 = vsel %vm13_vm2, %v2887_v21, %v626_v20  ;;  %v647_v32 = vsel %vm9_vm1, %v2890_v22, %v643_v23  ;;  %v667_v34 = vsel %vm9_vm1, %v2894_v25, %v663_v24  ;;  %s3448_s14 = smov 101  }
  0x30   :  { %507 = vrot.lane.b32.xlu1 %v506_v53, %s3443_s19  ;;  %v2897_v27 = vld [vmem:[%s5618_s0 + $0x4a] sm:$0x2]   ;;  %v2901_v29 = vld [vmem:[%s5618_s0 + $0x19f] sm:$0x2]   ;;  %v2891_v33 = vld [vmem:[%s5618_s0 + $0x9e] sm:$0x8]  }
  0x31   :  { %v2895_v35 = vld [vmem:[%s5618_s0 + $0x1f3] sm:$0x8]   ;;  %v2898_v36 = vld [vmem:[%s5618_s0 + $0x1c9] sm:$0x4]   ;;  %v684_v37 = vsel %vm5_vm0, %v2897_v27, %v2896_v26  ;;  %v705_v38 = vsel %vm5_vm0, %v2901_v29, %v2900_v28  ;;  %v2902_v39 = vld [vmem:[%s5618_s0 + $0x11e] sm:$0x4]   ;;  %v651_v44 = vsel %vm13_vm2, %v2891_v33, %v647_v32 }
  0x32   :  { %v2904_v40 = vld [vmem:[%s5618_s0 + $0x175] sm:$0x1]   ;;  %s3449_s15 = smov 100   ;;  %v2908_v42 = vld [vmem:[%s5618_s0 + $0xca] sm:$0x1]   ;;  %v671_v45 = vsel %vm13_vm2, %v2895_v35, %v667_v34  ;;  %v688_v46 = vsel %vm9_vm1, %v2898_v36, %v684_v37  ;;  %v709_v48 = vsel %vm9_vm1, %v2902_v39, %v705_v38  ;;  %s3450_s3 = smov 99  }
  0x33   :  { %486 = vrot.lane.b32.xlu0 %v485_v52, %s3442_s18  ;;  %v2905_v41 = vld [vmem:[%s5618_s0 + $0xf4] sm:$0x2]   ;;  %v2909_v43 = vld [vmem:[%s5618_s0 + $0x49] sm:$0x2]   ;;  %v2899_v47 = vld [vmem:[%s5618_s0 + $0x148] sm:$0x8]  }
  0x34   :  { %548 = vrot.lane.b32.xlu1 %v547_v3, %s3445_s8  ;;  %v2903_v49 = vld [vmem:[%s5618_s0 + $0x9d] sm:$0x8]   ;;  %v2906_v50 = vld [vmem:[%s5618_s0 + $0x73] sm:$0x4]   ;;  %v725_v51 = vsel %vm5_vm0, %v2905_v41, %v2904_v40  ;;  %v746_v52 = vsel %vm5_vm0, %v2909_v43, %v2908_v42  ;;  %v2910_v53 = vld [vmem:[%s5618_s0 + $0x1c8] sm:$0x4]   ;;  %v692_v58 = vsel %vm13_vm2, %v2899_v47, %v688_v46 }
  0x35   :  { %v2912_v54 = vld [vmem:[%s5618_s0 + $0x1f] sm:$0x1]   ;;  %s3451_s4 = smov 98   ;;  %v2916_v56 = vld [vmem:[%s5618_s0 + $0x174] sm:$0x1]   ;;  %v713_v59 = vsel %vm13_vm2, %v2903_v49, %v709_v48  ;;  %v729_v60 = vsel %vm9_vm1, %v2906_v50, %v725_v51  ;;  %v750_v62 = vsel %vm9_vm1, %v2910_v53, %v746_v52  ;;  %s3452_s21 = smov 97  }
  0x36   :  { %v2913_v55 = vld [vmem:[%s5618_s0 + $0x19e] sm:$0x2]   ;;  %v2917_v57 = vld [vmem:[%s5618_s0 + $0xf3] sm:$0x2]   ;;  %v2907_v61 = vld [vmem:[%s5618_s0 + $0x1f2] sm:$0x8]  }
  0x37   :  { %528 = vrot.lane.b32.xlu0 %v527_v2, %s3444_s7  ;;  %v2911_v63 = vld [vmem:[%s5618_s0 + $0x147] sm:$0x8]   ;;  %v2914_v0 = vld [vmem:[%s5618_s0 + $0x11d] sm:$0x4]   ;;  %v767_v1 = vsel %vm5_vm0, %v2913_v55, %v2912_v54  ;;  %v787_v2 = vsel %vm5_vm0, %v2917_v57, %v2916_v56  ;;  %v2918_v3 = vld [vmem:[%s5618_s0 + $0x72] sm:$0x4]   ;;  %v733_v8 = vsel %vm13_vm2, %v2907_v61, %v729_v60 }
  0x38   :  { %590 = vrot.lane.b32.xlu1 %v589_v17, %s3447_s26  ;;  %v2920_v4 = vld [vmem:[%s5618_s0 + $0xc9] sm:$0x1]   ;;  %s3453_s22 = smov 96   ;;  %v2924_v6 = vld [vmem:[%s5618_s0 + $0x1e] sm:$0x1]   ;;  %v754_v9 = vsel %vm13_vm2, %v2911_v63, %v750_v62  ;;  %v771_v10 = vsel %vm9_vm1, %v2914_v0, %v767_v1  ;;  %v791_v12 = vsel %vm9_vm1, %v2918_v3, %v787_v2  ;;  %s3454_s10 = smov 95  }
  0x39   :  { %v2921_v5 = vld [vmem:[%s5618_s0 + $0x48] sm:$0x2]   ;;  %v2925_v7 = vld [vmem:[%s5618_s0 + $0x19d] sm:$0x2]   ;;  %v2915_v11 = vld [vmem:[%s5618_s0 + $0x9c] sm:$0x8]  }
  0x3a   :  { %v2919_v13 = vld [vmem:[%s5618_s0 + $0x1f1] sm:$0x8]   ;;  %v2922_v14 = vld [vmem:[%s5618_s0 + $0x1c7] sm:$0x4]   ;;  %v808_v15 = vsel %vm5_vm0, %v2921_v5, %v2920_v4  ;;  %v2926_v17 = vld [vmem:[%s5618_s0 + $0x11c] sm:$0x4]   ;;  %v775_v22 = vsel %vm13_vm2, %v2915_v11, %v771_v10 }
  0x3b   :  { %569 = vrot.lane.b32.xlu0 %v568_v16, %s3446_s25  ;;  %v829_v16 = vsel %vm5_vm0, %v2925_v7, %v2924_v6  ;;  %v2928_v18 = vld [vmem:[%s5618_s0 + $0x173] sm:$0x1]   ;;  %s3455_s11 = smov 94   ;;  %v2932_v20 = vld [vmem:[%s5618_s0 + $0xc8] sm:$0x1]   ;;  %v795_v23 = vsel %vm13_vm2, %v2919_v13, %v791_v12  ;;  %v812_v24 = vsel %vm9_vm1, %v2922_v14, %v808_v15  ;;  %s3456_s28 = smov 93  }
  0x3c   :  { %631 = vrot.lane.b32.xlu1 %v630_v31, %s3449_s15  ;;  %v2929_v19 = vld [vmem:[%s5618_s0 + $0xf2] sm:$0x2]   ;;  %v2933_v21 = vld [vmem:[%s5618_s0 + $0x47] sm:$0x2]   ;;  %v2923_v25 = vld [vmem:[%s5618_s0 + $0x146] sm:$0x8]   ;;  %v833_v26 = vsel %vm9_vm1, %v2926_v17, %v829_v16 }
  0x3d   :  { %v2927_v27 = vld [vmem:[%s5618_s0 + $0x9b] sm:$0x8]   ;;  %v2930_v28 = vld [vmem:[%s5618_s0 + $0x71] sm:$0x4]   ;;  %v849_v29 = vsel %vm5_vm0, %v2929_v19, %v2928_v18  ;;  %v2934_v31 = vld [vmem:[%s5618_s0 + $0x1c6] sm:$0x4]   ;;  %v816_v36 = vsel %vm13_vm2, %v2923_v25, %v812_v24 }
  0x3e   :  { %v2936_v32 = vld [vmem:[%s5618_s0 + $0x1d] sm:$0x1]   ;;  %s3457_s29 = smov 92   ;;  %v2940_v34 = vld [vmem:[%s5618_s0 + $0x172] sm:$0x1]   ;;  %v837_v37 = vsel %vm13_vm2, %v2927_v27, %v833_v26  ;;  %v853_v38 = vsel %vm9_vm1, %v2930_v28, %v849_v29  ;;  %s3458_s17 = smov 91  }
  0x3f   :  { %610 = vrot.lane.b32.xlu0 %v609_v30, %s3448_s14  ;;  %v870_v30 = vsel %vm5_vm0, %v2933_v21, %v2932_v20  ;;  %v2937_v33 = vld [vmem:[%s5618_s0 + $0x19c] sm:$0x2]   ;;  %v2941_v35 = vld [vmem:[%s5618_s0 + $0xf1] sm:$0x2]   ;;  %v2931_v39 = vld [vmem:[%s5618_s0 + $0x1f0] sm:$0x8]  }
  0x40   :  { %672 = vrot.lane.b32.xlu1 %v671_v45, %s3451_s4  ;;  %v874_v40 = vsel %vm9_vm1, %v2934_v31, %v870_v30  ;;  %v2935_v41 = vld [vmem:[%s5618_s0 + $0x145] sm:$0x8]   ;;  %v2938_v42 = vld [vmem:[%s5618_s0 + $0x11b] sm:$0x4]   ;;  %v891_v43 = vsel %vm5_vm0, %v2937_v33, %v2936_v32  ;;  %v2942_v45 = vld [vmem:[%s5618_s0 + $0x70] sm:$0x4]   ;;  %v857_v50 = vsel %vm13_vm2, %v2931_v39, %v853_v38 }
  0x41   :  { %v2944_v46 = vld [vmem:[%s5618_s0 + $0xc7] sm:$0x1]   ;;  %s3459_s18 = smov 90   ;;  %v2948_v48 = vld [vmem:[%s5618_s0 + $0x1c] sm:$0x1]   ;;  %v878_v51 = vsel %vm13_vm2, %v2935_v41, %v874_v40  ;;  %v895_v52 = vsel %vm9_vm1, %v2938_v42, %v891_v43  ;;  %s3460_s6 = smov 89  }
  0x42   :  { %v2945_v47 = vld [vmem:[%s5618_s0 + $0x46] sm:$0x2]   ;;  %v2949_v49 = vld [vmem:[%s5618_s0 + $0x19b] sm:$0x2]   ;;  %v2939_v53 = vld [vmem:[%s5618_s0 + $0x9a] sm:$0x8]  }
  0x43   :  { %652 = vrot.lane.b32.xlu0 %v651_v44, %s3450_s3  ;;  %v911_v44 = vsel %vm5_vm0, %v2941_v35, %v2940_v34  ;;  %v2943_v55 = vld [vmem:[%s5618_s0 + $0x1ef] sm:$0x8]   ;;  %v2946_v56 = vld [vmem:[%s5618_s0 + $0x1c5] sm:$0x4]   ;;  %v932_v57 = vsel %vm5_vm0, %v2945_v47, %v2944_v46  ;;  %v2952_v60 = vld [vmem:[%s5618_s0 + $0x171] sm:$0x1]   ;;  %v899_v0 = vsel %vm13_vm2, %v2939_v53, %v895_v52 }
  0x44   :  { %714 = vrot.lane.b32.xlu1 %v713_v59, %s3453_s22  ;;  %v915_v54 = vsel %vm9_vm1, %v2942_v45, %v911_v44  ;;  %v2950_v59 = vld [vmem:[%s5618_s0 + $0x11a] sm:$0x4]   ;;  %v2953_v61 = vld [vmem:[%s5618_s0 + $0xf0] sm:$0x2]   ;;  %s3461_s7 = smov 88   ;;  %v936_v2 = vsel %vm9_vm1, %v2946_v56, %v932_v57  ;;  %s3462_s24 = smov 87  }
  0x45   :  { %v2956_v62 = vld [vmem:[%s5618_s0 + $0xc6] sm:$0x1]   ;;  %v919_v1 = vsel %vm13_vm2, %v2943_v55, %v915_v54  ;;  %v2947_v3 = vld [vmem:[%s5618_s0 + $0x144] sm:$0x8]   ;;  %v2951_v5 = vld [vmem:[%s5618_s0 + $0x99] sm:$0x8]   ;;  %v973_v7 = vsel %vm5_vm0, %v2953_v61, %v2952_v60 }
  0x46   :  { %v2957_v63 = vld [vmem:[%s5618_s0 + $0x45] sm:$0x2]   ;;  %v2954_v6 = vld [vmem:[%s5618_s0 + $0x6f] sm:$0x4]   ;;  %v2960_v10 = vld [vmem:[%s5618_s0 + $0x1b] sm:$0x1]   ;;  %v940_v14 = vsel %vm13_vm2, %v2947_v3, %v936_v2 }
  0x47   :  { %693 = vrot.lane.b32.xlu0 %v692_v58, %s3452_s21  ;;  %v953_v58 = vsel %vm5_vm0, %v2949_v49, %v2948_v48  ;;  %v2961_v11 = vld [vmem:[%s5618_s0 + $0x19a] sm:$0x2]   ;;  %s3463_s25 = smov 86   ;;  %v2964_v12 = vld [vmem:[%s5618_s0 + $0x170] sm:$0x1]   ;;  %v977_v16 = vsel %vm9_vm1, %v2954_v6, %v973_v7  ;;  %s3464_s13 = smov 85  }
  0x48   :  { %755 = vrot.lane.b32.xlu1 %v754_v9, %s3455_s11  ;;  %v957_v4 = vsel %vm9_vm1, %v2950_v59, %v953_v58  ;;  %v2958_v9 = vld [vmem:[%s5618_s0 + $0x1c4] sm:$0x4]   ;;  %v2965_v13 = vld [vmem:[%s5618_s0 + $0xef] sm:$0x2]   ;;  %v2955_v17 = vld [vmem:[%s5618_s0 + $0x1ee] sm:$0x8]   ;;  %v1015_v21 = vsel %vm5_vm0, %v2961_v11, %v2960_v10 }
  0x49   :  { %v961_v15 = vsel %vm13_vm2, %v2951_v5, %v957_v4  ;;  %v2959_v19 = vld [vmem:[%s5618_s0 + $0x143] sm:$0x8]   ;;  %v2962_v20 = vld [vmem:[%s5618_s0 + $0x119] sm:$0x4]   ;;  %v2968_v24 = vld [vmem:[%s5618_s0 + $0xc5] sm:$0x1]   ;;  %v981_v28 = vsel %vm13_vm2, %v2955_v17, %v977_v16 }
  0x4a   :  { %v2969_v25 = vld [vmem:[%s5618_s0 + $0x44] sm:$0x2]   ;;  %s3465_s14 = smov 84   ;;  %v2972_v26 = vld [vmem:[%s5618_s0 + $0x1a] sm:$0x1]   ;;  %v1019_v32 = vsel %vm9_vm1, %v2962_v20, %v1015_v21  ;;  %vm15_vm5 = vcmask 23552  }
  0x4b   :  { %734 = vrot.lane.b32.xlu0 %v733_v8, %s3454_s10  ;;  %v994_v8 = vsel %vm5_vm0, %v2957_v63, %v2956_v62  ;;  %v2973_v27 = vld [vmem:[%s5618_s0 + $0x199] sm:$0x2]   ;;  %v2963_v30 = vld [vmem:[%s5618_s0 + $0x98] sm:$0x8]   ;;  %v2967_v31 = vld [vmem:[%s5618_s0 + $0x1ed] sm:$0x8]  }
  0x4c   :  { %796 = vrot.lane.b32.xlu1 %v795_v23, %s3457_s29  ;;  %v998_v18 = vsel %vm9_vm1, %v2958_v9, %v994_v8  ;;  %v2966_v23 = vld [vmem:[%s5618_s0 + $0x6e] sm:$0x4]   ;;  %v2970_v34 = vld [vmem:[%s5618_s0 + $0x1c3] sm:$0x4]   ;;  %v2974_v35 = vld [vmem:[%s5618_s0 + $0x118] sm:$0x4]   ;;  %v1077_v38 = vsel %vm5_vm0, %v2973_v27, %v2972_v26  ;;  %v1023_v44 = vsel %vm13_vm2, %v2963_v30, %v1019_v32 }
  0x4d   :  { %v1002_v29 = vsel %vm13_vm2, %v2959_v19, %v998_v18  ;;  %v2977_v39 = vld [vmem:[%s5618_s0 + $0xee] sm:$0x2]   ;;  %v2980_v40 = vld [vmem:[%s5618_s0 + $0xc4] sm:$0x1]   ;;  %v2766_v42 = vld [vmem:[%s5618_s0 + $0xfe] sm:$0x4]  }
  0x4e   :  { %v2981_v41 = vld [vmem:[%s5618_s0 + $0x43] sm:$0x2]   ;;  %v2_v43 = vld [vmem:[%s5618_s0] sm:$0x1]   ;;  %v2971_v46 = vld [vmem:[%s5618_s0 + $0x142] sm:$0x8]  }
  0x4f   :  { %776 = vrot.lane.b32.xlu0 %v775_v22, %s3456_s28  ;;  %v1035_v22 = vsel %vm5_vm0, %v2965_v13, %v2964_v12  ;;  %v2767_v47 = vld [vmem:[%s5618_s0 + $0x17d] sm:$0x8]   ;;  %v2978_v52 = vld [vmem:[%s5618_s0 + $0x6d] sm:$0x4]   ;;  %v1118_v55 = vsel %vm5_vm0, %v2981_v41, %v2980_v40  ;;  %v2982_v56 = vld [vmem:[%s5618_s0 + $0x1c2] sm:$0x4]  }
  0x50   :  { %838 = vrot.lane.b32.xlu1 %v837_v37, %s3459_s18  ;;  %v1039_v33 = vsel %vm9_vm1, %v2966_v23, %v1035_v22  ;;  %v1056_v37 = vsel %vm5_vm0, %v2969_v25, %v2968_v24  ;;  %v2765_v48 = vld [vmem:[%s5618_s0 + $0x7f] sm:$0x2]   ;;  %v2984_v57 = vld [vmem:[%s5618_s0 + $0x19] sm:$0x1]   ;;  %s3468_s28 = smov 81   ;;  %s3469_s29 = smov 80   ;;  %v1122_v3 = vsel %vm9_vm1, %v2982_v56, %v1118_v55 }
  0x51   :  { %v1043_v45 = vsel %vm13_vm2, %v2967_v31, %v1039_v33  ;;  %v1060_v49 = vsel %vm9_vm1, %v2970_v34, %v1056_v37  ;;  %v6_v53 = vsel %vm5_vm0, %v2765_v48, %v2_v43  ;;  %v2985_v58 = vld [vmem:[%s5618_s0 + $0x198] sm:$0x2]   ;;  %v2988_v60 = vld [vmem:[%s5618_s0 + $0x16e] sm:$0x1]   ;;  %v2979_v2 = vld [vmem:[%s5618_s0 + $0x1ec] sm:$0x8]  }
  0x52   :  { %v10_v59 = vsel %vm9_vm1, %v2766_v42, %v6_v53  ;;  %v2989_v61 = vld [vmem:[%s5618_s0 + $0xed] sm:$0x2]   ;;  %v1064_v63 = vsel %vm13_vm2, %v2971_v46, %v1060_v49  ;;  %v2983_v4 = vld [vmem:[%s5618_s0 + $0x141] sm:$0x8]   ;;  %v2986_v5 = vld [vmem:[%s5618_s0 + $0x117] sm:$0x4]   ;;  %v1139_v6 = vsel %vm5_vm0, %v2985_v58, %v2984_v57 }
  0x53   :  { %817 = vrot.lane.b32.xlu0 %v816_v36, %s3458_s17  ;;  %v2976_v36 = vld [vmem:[%s5618_s0 + $0x16f] sm:$0x1]   ;;  %v14_v62 = vsel %vm13_vm2, %v2767_v47, %v10_v59  ;;  %v1159_v7 = vsel %vm5_vm0, %v2989_v61, %v2988_v60  ;;  %v2990_v8 = vld [vmem:[%s5618_s0 + $0x6c] sm:$0x4]   ;;  %v2992_v9 = vld [vmem:[%s5618_s0 + $0xc3] sm:$0x1]  }
  0x54   :  { %879 = vrot.lane.b32.xlu1 %v878_v51, %s3461_s7  ;;  %s3467_s7 = smov 82   ;;  %v2975_v51 = vld [vmem:[%s5618_s0 + $0x97] sm:$0x8]   ;;  %v1097_v54 = vsel %vm5_vm0, %v2977_v39, %v2976_v36  ;;  %16 = vst.msk [vmem:[#allocation0] ss:$24 sm:$0xf] %vm15_vm5, %v14_v62   ;;  %v1163_v17 = vsel %vm9_vm1, %v2990_v8, %v1159_v7 }
  0x55   :  { %v2993_v10 = vld [vmem:[%s5618_s0 + $0x42] sm:$0x2]   ;;  %s3470_s17 = smov 79   ;;  %s3471_s18 = smov 78   ;;  %v2996_v11 = vld [vmem:[%s5618_s0 + $0x18] sm:$0x1]  }
  0x56   :  { %v2997_v12 = vld [vmem:[%s5618_s0 + $0x197] sm:$0x2]   ;;  %v2987_v16 = vld [vmem:[%s5618_s0 + $0x96] sm:$0x8]   ;;  %v2991_v18 = vld [vmem:[%s5618_s0 + $0x1eb] sm:$0x8]   ;;  %v1180_v20 = vsel %vm5_vm0, %v2993_v10, %v2992_v9 }
  0x57   :  { %858 = vrot.lane.b32.xlu0 %v857_v50, %s3460_s6  ;;  %s3466_s6 = smov 83   ;;  %v1081_v50 = vsel %vm9_vm1, %v2974_v35, %v1077_v38  ;;  %v2994_v19 = vld [vmem:[%s5618_s0 + $0x1c1] sm:$0x4]   ;;  %v1201_v21 = vsel %vm5_vm0, %v2997_v12, %v2996_v11  ;;  %v2998_v22 = vld [vmem:[%s5618_s0 + $0x116] sm:$0x4]   ;;  %vm54_vm6 = vcmask 1048568  }
  0x58   :  { %920 = vrot.lane.b32.xlu1 %v919_v1, %s3463_s25  ;;  %v1101_v1 = vsel %vm9_vm1, %v2978_v52, %v1097_v54  ;;  %v3000_v23 = vld [vmem:[%s5618_s0 + $0x16d] sm:$0x1]   ;;  %v3004_v25 = vld [vmem:[%s5618_s0 + $0xc2] sm:$0x1]   ;;  %v2995_v30 = vld [vmem:[%s5618_s0 + $0x140] sm:$0x8]   ;;  %v1205_v31 = vsel %vm9_vm1, %v2998_v22, %v1201_v21 }
  0x59   :  { %v1105_v13 = vsel %vm13_vm2, %v2979_v2, %v1101_v1  ;;  %v3001_v24 = vld [vmem:[%s5618_s0 + $0xec] sm:$0x2]   ;;  %v3005_v26 = vld [vmem:[%s5618_s0 + $0x41] sm:$0x2]   ;;  %v2999_v32 = vld [vmem:[%s5618_s0 + $0x95] sm:$0x8]  }
  0x5a   :  { %v3002_v33 = vld [vmem:[%s5618_s0 + $0x6b] sm:$0x4]   ;;  %v1221_v34 = vsel %vm5_vm0, %v3001_v24, %v3000_v23  ;;  %v1242_v35 = vsel %vm5_vm0, %v3005_v26, %v3004_v25  ;;  %v3006_v36 = vld [vmem:[%s5618_s0 + $0x1c0] sm:$0x4]   ;;  %v3008_v37 = vld [vmem:[%s5618_s0 + $0x17] sm:$0x1]   ;;  %v1209_v42 = vsel %vm13_vm2, %v2999_v32, %v1205_v31 }
  0x5b   :  { %900 = vrot.lane.b32.xlu0 %v899_v0, %s3462_s24  ;;  %v1085_v0 = vsel %vm13_vm2, %v2975_v51, %v1081_v50  ;;  %v3009_v38 = vld [vmem:[%s5618_s0 + $0x196] sm:$0x2]   ;;  %s3474_s24 = smov 75   ;;  %s3475_s25 = smov 74   ;;  %v3012_v39 = vld [vmem:[%s5618_s0 + $0x16c] sm:$0x1]   ;;  %v1225_v43 = vsel %vm9_vm1, %v3002_v33, %v1221_v34 }
  0x5c   :  { %962 = vrot.lane.b32.xlu1 %v961_v15, %s3465_s14  ;;  %v1143_v15 = vsel %vm9_vm1, %v2986_v5, %v1139_v6  ;;  %v3013_v40 = vld [vmem:[%s5618_s0 + $0xeb] sm:$0x2]   ;;  %v3007_v46 = vld [vmem:[%s5618_s0 + $0x13f] sm:$0x8]   ;;  %v3010_v47 = vld [vmem:[%s5618_s0 + $0x115] sm:$0x4]   ;;  %v1263_v48 = vsel %vm5_vm0, %v3009_v38, %v3008_v37 }
  0x5d   :  { %v1147_v27 = vsel %vm13_vm2, %v2987_v16, %v1143_v15  ;;  %v1283_v49 = vsel %vm5_vm0, %v3013_v40, %v3012_v39  ;;  %v3014_v50 = vld [vmem:[%s5618_s0 + $0x6a] sm:$0x4]   ;;  %v3016_v51 = vld [vmem:[%s5618_s0 + $0xc1] sm:$0x1]   ;;  %s3477_s14 = smov 72   ;;  %v1267_v57 = vsel %vm9_vm1, %v3010_v47, %v1263_v48  ;;  %s3478_s2 = smov 71  }
  0x5e   :  { %v3017_v52 = vld [vmem:[%s5618_s0 + $0x40] sm:$0x2]   ;;  %v3020_v53 = vld [vmem:[%s5618_s0 + $0x16] sm:$0x1]   ;;  %v3011_v58 = vld [vmem:[%s5618_s0 + $0x94] sm:$0x8]   ;;  %v1287_v59 = vsel %vm9_vm1, %v3014_v50, %v1283_v49 }
  0x5f   :  { %941 = vrot.lane.b32.xlu0 %v940_v14, %s3464_s13  ;;  %v1126_v14 = vsel %vm13_vm2, %v2983_v4, %v1122_v3  ;;  %s3476_s13 = smov 73   ;;  %v3021_v54 = vld [vmem:[%s5618_s0 + $0x195] sm:$0x2]   ;;  %v3015_v60 = vld [vmem:[%s5618_s0 + $0x1e9] sm:$0x8]   ;;  %v1304_v62 = vsel %vm5_vm0, %v3017_v52, %v3016_v51  ;;  %s3479_s3 = smov 70   ;;  %v1271_v6 = vsel %vm13_vm2, %v3011_v58, %v1267_v57 }
  0x60   :  { %1003 = vrot.lane.b32.xlu1 %v1002_v29, %s3467_s7  ;;  %s3473_s7 = smov 76   ;;  %v1184_v29 = vsel %vm9_vm1, %v2994_v19, %v1180_v20  ;;  %v3018_v61 = vld [vmem:[%s5618_s0 + $0x1bf] sm:$0x4]   ;;  %v3024_v1 = vld [vmem:[%s5618_s0 + $0x16b] sm:$0x1]   ;;  %vm116_vm7 = vcmask 1048552   ;;  %v1291_v7 = vsel %vm13_vm2, %v3015_v60, %v1287_v59 }
  0x61   :  { %v1188_v41 = vsel %vm13_vm2, %v2995_v30, %v1184_v29  ;;  %v3025_v2 = vld [vmem:[%s5618_s0 + $0xea] sm:$0x2]   ;;  %v3028_v3 = vld [vmem:[%s5618_s0 + $0xc0] sm:$0x1]   ;;  %v1308_v9 = vsel %vm9_vm1, %v3018_v61, %v1304_v62  ;;  %v3019_v10 = vld [vmem:[%s5618_s0 + $0x13e] sm:$0x8]  }
  0x62   :  { %v3029_v4 = vld [vmem:[%s5618_s0 + $0x3f] sm:$0x2]   ;;  %v3023_v12 = vld [vmem:[%s5618_s0 + $0x93] sm:$0x8]   ;;  %s3480_s20 = smov 69   ;;  %s3481_s21 = smov 68   ;;  %v1312_v21 = vsel %vm13_vm2, %v3019_v10, %v1308_v9 }
  0x63   :  { %982 = vrot.lane.b32.xlu0 %v981_v28, %s3466_s6  ;;  %s3472_s6 = smov 77   ;;  %v1167_v28 = vsel %vm13_vm2, %v2991_v18, %v1163_v17  ;;  %v1366_v15 = vsel %vm5_vm0, %v3029_v4, %v3028_v3  ;;  %v3030_v16 = vld [vmem:[%s5618_s0 + $0x1be] sm:$0x4]   ;;  %v3032_v17 = vld [vmem:[%s5618_s0 + $0x15] sm:$0x1]   ;;  %vm96_vm8 = vcmask 1048560  }
  0x64   :  { %1044 = vrot.lane.b32.xlu1 %v1043_v45, %s3469_s29  ;;  %v1246_v45 = vsel %vm9_vm1, %v3006_v36, %v1242_v35  ;;  %v3033_v18 = vld [vmem:[%s5618_s0 + $0x194] sm:$0x2]   ;;  %v3036_v19 = vld [vmem:[%s5618_s0 + $0x16a] sm:$0x1]   ;;  %vm137_vm9 = vcmask 1040352   ;;  %s3482_s9 = smov 67  }
  0x65   :  { %v1250_v56 = vsel %vm13_vm2, %v3007_v46, %v1246_v45  ;;  %v3037_v20 = vld [vmem:[%s5618_s0 + $0xe9] sm:$0x2]   ;;  %v3027_v26 = vld [vmem:[%s5618_s0 + $0x1e8] sm:$0x8]   ;;  %v3034_v29 = vld [vmem:[%s5618_s0 + $0x113] sm:$0x4]   ;;  %v1387_v30 = vsel %vm5_vm0, %v3033_v18, %v3032_v17 }
  0x66   :  { %v1407_v31 = vsel %vm5_vm0, %v3037_v20, %v3036_v19  ;;  %v3038_v32 = vld [vmem:[%s5618_s0 + $0x68] sm:$0x4]   ;;  %v3040_v33 = vld [vmem:[%s5618_s0 + $0xbf] sm:$0x1]   ;;  %vm158_vm10 = vcmask 1032152   ;;  %s3483_s10 = smov 66  }
  0x67   :  { %1024 = vrot.lane.b32.xlu0 %v1023_v44, %s3468_s28  ;;  %v3003_v44 = vld [vmem:[%s5618_s0 + $0x1ea] sm:$0x8]   ;;  %v3041_v34 = vld [vmem:[%s5618_s0 + $0x3e] sm:$0x2]   ;;  %vm178_vm11 = vcmask 1023952   ;;  %s3484_s27 = smov 65  }
  0x68   :  { %1086 = vrot.lane.b32.xlu1 %v1085_v0, %s3471_s18  ;;  %v1229_v55 = vsel %vm13_vm2, %v3003_v44, %v1225_v43  ;;  %v3022_v0 = vld [vmem:[%s5618_s0 + $0x114] sm:$0x4]   ;;  %v3044_v35 = vld [vmem:[%s5618_s0 + $0x14] sm:$0x1]   ;;  %v1411_v43 = vsel %vm9_vm1, %v3038_v32, %v1407_v31  ;;  %v3039_v44 = vld [vmem:[%s5618_s0 + $0x1e7] sm:$0x8]   ;;  %v1428_v46 = vsel %vm5_vm0, %v3041_v34, %v3040_v33 }
  0x69   :  { %v3045_v36 = vld [vmem:[%s5618_s0 + $0x193] sm:$0x2]   ;;  %v3042_v45 = vld [vmem:[%s5618_s0 + $0x1bd] sm:$0x4]   ;;  %v3048_v49 = vld [vmem:[%s5618_s0 + $0x169] sm:$0x1]  }
  0x6a   :  { %v1449_v47 = vsel %vm5_vm0, %v3045_v36, %v3044_v35  ;;  %v3046_v48 = vld [vmem:[%s5618_s0 + $0x112] sm:$0x4]   ;;  %v3049_v50 = vld [vmem:[%s5618_s0 + $0xe8] sm:$0x2]   ;;  %vm199_vm12 = vcmask 1015752   ;;  %s3485_s28 = smov 64   ;;  %v1432_v57 = vsel %vm9_vm1, %v3042_v45, %v1428_v46 }
  0x6b   :  { %1065 = vrot.lane.b32.xlu0 %v1064_v63, %s3470_s17  ;;  %v1325_v63 = vsel %vm5_vm0, %v3021_v54, %v3020_v53  ;;  %vm220_vm13 = vcmask 1007552   ;;  %v3052_v51 = vld [vmem:[%s5618_s0 + $0xbe] sm:$0x1]   ;;  %v1415_v54 = vsel %vm13_vm2, %v3039_v44, %v1411_v43  ;;  %v3043_v58 = vld [vmem:[%s5618_s0 + $0x13c] sm:$0x8]   ;;  %v1453_v59 = vsel %vm9_vm1, %v3046_v48, %v1449_v47  ;;  %s3486_s16 = smov 63  }
  0x6c   :  { %1127 = vrot.lane.b32.xlu1 %v1126_v14, %s3473_s7  ;;  %v1329_v11 = vsel %vm9_vm1, %v3022_v0, %v1325_v63  ;;  %v1345_v14 = vsel %vm5_vm0, %v3025_v2, %v3024_v1  ;;  %v3053_v52 = vld [vmem:[%s5618_s0 + $0x3d] sm:$0x2]   ;;  %v3047_v60 = vld [vmem:[%s5618_s0 + $0x91] sm:$0x8]   ;;  %v3050_v61 = vld [vmem:[%s5618_s0 + $0x67] sm:$0x4]   ;;  %v1469_v62 = vsel %vm5_vm0, %v3049_v50, %v3048_v49 }
  0x6d   :  { %v1333_v22 = vsel %vm13_vm2, %v3023_v12, %v1329_v11  ;;  %v1490_v63 = vsel %vm5_vm0, %v3053_v52, %v3052_v51  ;;  %v3054_v0 = vld [vmem:[%s5618_s0 + $0x1bc] sm:$0x4]   ;;  %v3056_v1 = vld [vmem:[%s5618_s0 + $0x13] sm:$0x1]   ;;  %vm240_vm14 = vcmask 999352   ;;  %s3487_s17 = smov 62   ;;  %v1473_v9 = vsel %vm9_vm1, %v3050_v61, %v1469_v62 }
  0x6e   :  { %v3057_v2 = vld [vmem:[%s5618_s0 + $0x192] sm:$0x2]   ;;  %vm261_vm15 = vcmask 991152   ;;  %v3060_v3 = vld [vmem:[%s5618_s0 + $0x168] sm:$0x1]   ;;  %v1494_v11 = vsel %vm9_vm1, %v3054_v0, %v1490_v63  ;;  %s3488_s5 = smov 61  }
  0x6f   :  { %1106 = vrot.lane.b32.xlu0 %v1105_v13, %s3472_s6  ;;  %v3026_v13 = vld [vmem:[%s5618_s0 + $0x69] sm:$0x4]   ;;  %v3061_v4 = vld [vmem:[%s5618_s0 + $0xe7] sm:$0x2]   ;;  %v3051_v10 = vld [vmem:[%s5618_s0 + $0x1e6] sm:$0x8]  }
  0x70   :  { %1168 = vrot.lane.b32.xlu1 %v1167_v28, %s3475_s25  ;;  %v1349_v25 = vsel %vm9_vm1, %v3026_v13, %v1345_v14  ;;  %v3031_v28 = vld [vmem:[%s5618_s0 + $0x13d] sm:$0x8]   ;;  %v3055_v12 = vld [vmem:[%s5618_s0 + $0x13b] sm:$0x8]   ;;  %v3058_v13 = vld [vmem:[%s5618_s0 + $0x111] sm:$0x4]   ;;  %v1511_v14 = vsel %vm5_vm0, %v3057_v2, %v3056_v1 }
  0x71   :  { %v1353_v37 = vsel %vm13_vm2, %v3027_v26, %v1349_v25  ;;  %v3064_v17 = vld [vmem:[%s5618_s0 + $0xbd] sm:$0x1]   ;;  %s3489_s6 = smov 60   ;;  %v3068_v19 = vld [vmem:[%s5618_s0 + $0x12] sm:$0x1]   ;;  %v1515_v25 = vsel %vm9_vm1, %v3058_v13, %v1511_v14  ;;  %s3490_s23 = smov 59  }
  0x72   :  { %v3065_v18 = vld [vmem:[%s5618_s0 + $0x3c] sm:$0x2]   ;;  %v3069_v20 = vld [vmem:[%s5618_s0 + $0x191] sm:$0x2]   ;;  %v3059_v26 = vld [vmem:[%s5618_s0 + $0x90] sm:$0x8]  }
  0x73   :  { %1148 = vrot.lane.b32.xlu0 %v1147_v27, %s3474_s24  ;;  %v1370_v27 = vsel %vm9_vm1, %v3030_v16, %v1366_v15  ;;  %v1531_v15 = vsel %vm5_vm0, %v3061_v4, %v3060_v3  ;;  %v3062_v16 = vld [vmem:[%s5618_s0 + $0x66] sm:$0x4]   ;;  %v1573_v31 = vsel %vm5_vm0, %v3069_v20, %v3068_v19  ;;  %v3070_v32 = vld [vmem:[%s5618_s0 + $0x110] sm:$0x4]   ;;  %v3072_v33 = vld [vmem:[%s5618_s0 + $0x167] sm:$0x1]  }
  0x74   :  { %1210 = vrot.lane.b32.xlu1 %v1209_v42, %s3477_s14  ;;  %v1374_v38 = vsel %vm13_vm2, %v3031_v28, %v1370_v27  ;;  %v3035_v42 = vld [vmem:[%s5618_s0 + $0x92] sm:$0x8]   ;;  %v1535_v27 = vsel %vm9_vm1, %v3062_v16, %v1531_v15  ;;  %v3063_v28 = vld [vmem:[%s5618_s0 + $0x1e5] sm:$0x8]   ;;  %v3073_v34 = vld [vmem:[%s5618_s0 + $0xe6] sm:$0x2]   ;;  %v1577_v43 = vsel %vm9_vm1, %v3070_v32, %v1573_v31 }
  0x75   :  { %vm323_vm5 = vcmask 966552   ;;  %s3491_s24 = smov 58   ;;  %v3076_v35 = vld [vmem:[%s5618_s0 + $0xbc] sm:$0x1]   ;;  %v3071_v44 = vld [vmem:[%s5618_s0 + $0x8f] sm:$0x8]   ;;  %v1593_v46 = vsel %vm5_vm0, %v3073_v34, %v3072_v33 }
  0x76   :  { %v3077_v36 = vld [vmem:[%s5618_s0 + $0x3b] sm:$0x2]   ;;  %v3074_v45 = vld [vmem:[%s5618_s0 + $0x65] sm:$0x4]   ;;  %v3080_v49 = vld [vmem:[%s5618_s0 + $0x11] sm:$0x1]  }
  0x77   :  { %1189 = vrot.lane.b32.xlu0 %v1188_v41, %s3476_s13  ;;  %v1391_v41 = vsel %vm9_vm1, %v3034_v29, %v1387_v30  ;;  %v3066_v29 = vld [vmem:[%s5618_s0 + $0x1bb] sm:$0x4]   ;;  %v1552_v30 = vsel %vm5_vm0, %v3065_v18, %v3064_v17  ;;  %v1614_v47 = vsel %vm5_vm0, %v3077_v36, %v3076_v35  ;;  %v3078_v48 = vld [vmem:[%s5618_s0 + $0x1ba] sm:$0x4]   ;;  %v3081_v50 = vld [vmem:[%s5618_s0 + $0x190] sm:$0x2]  }
  0x78   :  { %1251 = vrot.lane.b32.xlu1 %v1250_v56, %s3479_s3  ;;  %v115_v8 = vpop.permute.xlu1 %114   ;;  %v1395_v53 = vsel %vm13_vm2, %v3035_v42, %v1391_v41  ;;  %v1556_v41 = vsel %vm9_vm1, %v3066_v29, %v1552_v30  ;;  %v3067_v42 = vld [vmem:[%s5618_s0 + $0x13a] sm:$0x8]   ;;  %s3492_s12 = smov 57   ;;  %s3493_s13 = smov 56   ;;  %v3084_v51 = vld [vmem:[%s5618_s0 + $0x166] sm:$0x1]   ;;  %v1635_v62 = vsel %vm5_vm0, %v3081_v50, %v3080_v49 }
  0x79   :  { %v3085_v52 = vld [vmem:[%s5618_s0 + $0xe5] sm:$0x2]   ;;  %v3082_v61 = vld [vmem:[%s5618_s0 + $0x10f] sm:$0x4]   ;;  %v3088_v1 = vld [vmem:[%s5618_s0 + $0xbb] sm:$0x1]  }
  0x7a   :  { %v1655_v63 = vsel %vm5_vm0, %v3085_v52, %v3084_v51  ;;  %v3086_v0 = vld [vmem:[%s5618_s0 + $0x64] sm:$0x4]   ;;  %v3089_v2 = vld [vmem:[%s5618_s0 + $0x3a] sm:$0x2]   ;;  %s3494_s30 = smov 55   ;;  %s3496_s19 = smov 53  }
  0x7b   :  { %1230 = vrot.lane.b32.xlu0 %v1229_v55, %s3478_s2  ;;  %s3495_s2 = smov 54   ;;  %v3092_v3 = vld [vmem:[%s5618_s0 + $0x10] sm:$0x1]   ;;  %v3090_v13 = vld [vmem:[%s5618_s0 + $0x1b9] sm:$0x4]   ;;  %v1676_v14 = vsel %vm5_vm0, %v3089_v2, %v3088_v1  ;;  %s3498_s8 = smov 51  }
  0x7c   :  { %1292 = vrot.lane.b32.xlu1 %v1291_v7, %s3481_s21  ;;  %v3093_v4 = vld [vmem:[%s5618_s0 + $0x18f] sm:$0x2]   ;;  %v3096_v17 = vld [vmem:[%s5618_s0 + $0x165] sm:$0x1]   ;;  %v3100_v19 = vld [vmem:[%s5618_s0 + $0xba] sm:$0x1]  }
  0x7d   :  { %v48_v5 = vpop.permute.xlu0 %47   ;;  %v1697_v15 = vsel %vm5_vm0, %v3093_v4, %v3092_v3  ;;  %v3094_v16 = vld [vmem:[%s5618_s0 + $0x10e] sm:$0x4]   ;;  %v3097_v18 = vld [vmem:[%s5618_s0 + $0xe4] sm:$0x2]   ;;  %v3101_v20 = vld [vmem:[%s5618_s0 + $0x39] sm:$0x2]  }
  0x7e   :  { %51 = vst.msk [vmem:[#allocation0 + $0x40] ss:$-24 sm:$0x7] %vm49_vm4, %v48_v5   ;;  %53 = vst.msk [vmem:[#allocation0 + $0x55] sm:$0x8] %vm49_vm4, %v48_v5   ;;  %v136_v24 = vpop.permute.xlu1 %135   ;;  %vm302_vm4 = vcmask 974752   ;;  %v1717_v30 = vsel %vm5_vm0, %v3097_v18, %v3096_v17  ;;  %v1738_v31 = vsel %vm5_vm0, %v3101_v20, %v3100_v19 }
  0x7f   :  { %56 = vst.msk [vmem:[#allocation0 + $0x20] ss:$-24 sm:$0x3] %vm54_vm6, %v48_v5   ;;  %58 = vst.msk [vmem:[#allocation0 + $0x80] ss:$-24 sm:$0xc] %vm54_vm6, %v48_v5   ;;  %1272 = vrot.lane.b32.xlu0 %v1271_v6, %s3480_s20  ;;  %v1436_v5 = vsel %vm13_vm2, %v3043_v58, %v1432_v57  ;;  %v1457_v6 = vsel %vm13_vm2, %v3047_v60, %v1453_v59  ;;  %v1597_v57 = vsel %vm9_vm1, %v3074_v45, %v1593_v46 }
  0x80   :  { %118 = vst.msk [vmem:[#allocation0 + $0x40] ss:$-24 sm:$0x7] %vm116_vm7, %v115_v8   ;;  %120 = vst.msk [vmem:[#allocation0 + $0x55] sm:$0x8] %vm116_vm7, %v115_v8   ;;  %1334 = vrot.lane.b32.xlu1 %v1333_v22, %s3483_s10  ;;  %v1498_v22 = vsel %vm13_vm2, %v3055_v12, %v1494_v11  ;;  %vm344_vm6 = vcmask 958352   ;;  %v1618_v59 = vsel %vm9_vm1, %v3078_v48, %v1614_v47  ;;  %v1659_v11 = vsel %vm9_vm1, %v3086_v0, %v1655_v63 }
  0x81   :  { %v90_v23 = vpop.permute.xlu0 %89   ;;  %vm364_vm7 = vcmask 950152   ;;  %v3075_v58 = vld [vmem:[%s5618_s0 + $0x1e4] sm:$0x8]   ;;  %v3079_v60 = vld [vmem:[%s5618_s0 + $0x139] sm:$0x8]   ;;  %s3497_s20 = smov 52  }
  0x82   :  { %93 = vst.msk [vmem:[#allocation0 + $0x20] ss:$-24 sm:$0x3] %vm45_vm3, %v90_v23   ;;  %95 = vst.msk [vmem:[#allocation0 + $0x80] ss:$-24 sm:$0xc] %vm45_vm3, %v90_v23   ;;  %v177_v40 = vpop.permute.xlu1 %176  }
  0x83   :  { %97 = vst.msk [vmem:[#allocation0] ss:$72 sm:$0x3] %vm96_vm8, %v90_v23   ;;  %99 = vst.msk [vmem:[#allocation0 + $0x60] ss:$-24 sm:$0xc] %vm96_vm8, %v90_v23   ;;  %1313 = vrot.lane.b32.xlu0 %v1312_v21, %s3482_s9  ;;  %v1477_v21 = vsel %vm13_vm2, %v3051_v10, %v1473_v9  ;;  %v1639_v9 = vsel %vm9_vm1, %v3082_v61, %v1635_v62 }
  0x84   :  { %139 = vst.msk [vmem:[#allocation0 + $0x20] ss:$-24 sm:$0x3] %vm137_vm9, %v136_v24   ;;  %141 = vst.msk [vmem:[#allocation0 + $0x80] ss:$-24 sm:$0xc] %vm137_vm9, %v136_v24   ;;  %1375 = vrot.lane.b32.xlu1 %v1374_v38, %s3485_s28  ;;  %v1539_v38 = vsel %vm13_vm2, %v3063_v28, %v1535_v27  ;;  %v1701_v27 = vsel %vm9_vm1, %v3094_v16, %v1697_v15 }
  0x85   :  { %v157_v39 = vpop.permute.xlu0 %156   ;;  %180 = vst.msk [vmem:[#allocation0 + $0x40] ss:$-24 sm:$0x7] %vm178_vm11, %v177_v40   ;;  %182 = vst.msk [vmem:[#allocation0 + $0x55] sm:$0x8] %vm178_vm11, %v177_v40   ;;  %vm282_vm3 = vcmask 982952  }
  0x86   :  { %159 = vst.msk [vmem:[#allocation0] ss:$72 sm:$0x3] %vm158_vm10, %v157_v39   ;;  %161 = vst.msk [vmem:[#allocation0 + $0x60] ss:$-24 sm:$0xc] %vm158_vm10, %v157_v39   ;;  %v219_v56 = vpop.permute.xlu1 %218  }
  0x87   :  { %1354 = vrot.lane.b32.xlu0 %v1353_v37, %s3484_s27  ;;  %221 = vst.msk [vmem:[#allocation0] ss:$72 sm:$0x3] %vm220_vm13, %v219_v56   ;;  %223 = vst.msk [vmem:[#allocation0 + $0x60] ss:$-24 sm:$0xc] %vm220_vm13, %v219_v56   ;;  %v1519_v37 = vsel %vm13_vm2, %v3059_v26, %v1515_v25  ;;  %v1680_v25 = vsel %vm9_vm1, %v3090_v13, %v1676_v14 }
  0x88   :  { %1416 = vrot.lane.b32.xlu1 %v1415_v54, %s3487_s17  ;;  %vm385_vm8 = vcmask 941952   ;;  %v1581_v54 = vsel %vm13_vm2, %v3071_v44, %v1577_v43  ;;  %vm406_vm9 = vcmask 933752   ;;  %vm426_vm10 = vcmask 925552   ;;  %v3083_v10 = vld [vmem:[%s5618_s0 + $0x8e] sm:$0x8]   ;;  %s3499_s9 = smov 50  }
  0x89   :  { %v198_v55 = vpop.permute.xlu0 %197   ;;  %v3087_v12 = vld [vmem:[%s5618_s0 + $0x1e3] sm:$0x8]   ;;  %vm447_vm11 = vcmask 917352   ;;  %v3091_v26 = vld [vmem:[%s5618_s0 + $0x138] sm:$0x8]   ;;  %vm488_vm13 = vcmask 900952  }
  0x8a   :  { %201 = vst.msk [vmem:[#allocation0 + $0x20] ss:$-24 sm:$0x3] %vm199_vm12, %v198_v55   ;;  %203 = vst.msk [vmem:[#allocation0 + $0x80] ss:$-24 sm:$0xc] %vm199_vm12, %v198_v55   ;;  %v260_v8 = vpop.permute.xlu1 %259  }
  0x8b   :  { %1396 = vrot.lane.b32.xlu0 %v1395_v53, %s3486_s16  ;;  %263 = vst.msk [vmem:[#allocation0 + $0x20] ss:$-24 sm:$0x3] %vm261_vm15, %v260_v8   ;;  %265 = vst.msk [vmem:[#allocation0 + $0x80] ss:$-24 sm:$0xc] %vm261_vm15, %v260_v8   ;;  %v1560_v53 = vsel %vm13_vm2, %v3067_v42, %v1556_v41 }
  0x8c   :  { %1458 = vrot.lane.b32.xlu1 %v1457_v6, %s3489_s6  ;;  %v1622_v6 = vsel %vm13_vm2, %v3079_v60, %v1618_v59  ;;  %vm468_vm12 = vcmask 909152   ;;  %v3095_v28 = vld [vmem:[%s5618_s0 + $0x8d] sm:$0x8]   ;;  %v3098_v29 = vld [vmem:[%s5618_s0 + $0x63] sm:$0x4]   ;;  %s3500_s26 = smov 49  }
  0x8d   :  { %v239_v7 = vpop.permute.xlu0 %238   ;;  %v3102_v32 = vld [vmem:[%s5618_s0 + $0x1b8] sm:$0x4]   ;;  %v3104_v33 = vld [vmem:[%s5618_s0 + $0xf] sm:$0x1]   ;;  %v3108_v35 = vld [vmem:[%s5618_s0 + $0x164] sm:$0x1]   ;;  %v1721_v41 = vsel %vm9_vm1, %v3098_v29, %v1717_v30 }
  0x8e   :  { %242 = vst.msk [vmem:[#allocation0 + $0x40] ss:$-24 sm:$0x7] %vm240_vm14, %v239_v7   ;;  %244 = vst.msk [vmem:[#allocation0 + $0x55] sm:$0x8] %vm240_vm14, %v239_v7   ;;  %v301_v24 = vpop.permute.xlu1 %300   ;;  %vm509_vm14 = vcmask 892752   ;;  %v1742_v43 = vsel %vm9_vm1, %v3102_v32, %v1738_v31 }
  0x8f   :  { %1437 = vrot.lane.b32.xlu0 %v1436_v5, %s3488_s5  ;;  %304 = vst.msk [vmem:[#allocation0 + $0x40] ss:$-24 sm:$0x7] %vm302_vm4, %v301_v24   ;;  %306 = vst.msk [vmem:[#allocation0 + $0x55] sm:$0x8] %vm302_vm4, %v301_v24   ;;  %v1601_v5 = vsel %vm13_vm2, %v3075_v58, %v1597_v57  ;;  %vm530_vm15 = vcmask 884552  }
  0x90   :  { %1499 = vrot.lane.b32.xlu1 %v1498_v22, %s3491_s24  ;;  %v1663_v22 = vsel %vm13_vm2, %v3087_v12, %v1659_v11  ;;  %v3105_v34 = vld [vmem:[%s5618_s0 + $0x18e] sm:$0x2]   ;;  %v3109_v36 = vld [vmem:[%s5618_s0 + $0xe3] sm:$0x2]   ;;  %v3099_v42 = vld [vmem:[%s5618_s0 + $0x1e2] sm:$0x8]  }
  0x91   :  { %v281_v23 = vpop.permute.xlu0 %280   ;;  %v3103_v44 = vld [vmem:[%s5618_s0 + $0x137] sm:$0x8]   ;;  %v3106_v45 = vld [vmem:[%s5618_s0 + $0x10d] sm:$0x4]   ;;  %v1759_v46 = vsel %vm5_vm0, %v3105_v34, %v3104_v33  ;;  %v1779_v47 = vsel %vm5_vm0, %v3109_v36, %v3108_v35  ;;  %v3110_v48 = vld [vmem:[%s5618_s0 + $0x62] sm:$0x4]  }
  0x92   :  { %283 = vst.msk [vmem:[#allocation0] ss:$72 sm:$0x3] %vm282_vm3, %v281_v23   ;;  %285 = vst.msk [vmem:[#allocation0 + $0x60] ss:$-24 sm:$0xc] %vm282_vm3, %v281_v23   ;;  %v343_v40 = vpop.permute.xlu1 %342   ;;  %v1763_v57 = vsel %vm9_vm1, %v3106_v45, %v1759_v46  ;;  %v1783_v59 = vsel %vm9_vm1, %v3110_v48, %v1779_v47 }
  0x93   :  { %1478 = vrot.lane.b32.xlu0 %v1477_v21, %s3490_s23  ;;  %345 = vst.msk [vmem:[#allocation0] ss:$72 sm:$0x3] %vm344_vm6, %v343_v40   ;;  %347 = vst.msk [vmem:[#allocation0 + $0x60] ss:$-24 sm:$0xc] %vm344_vm6, %v343_v40   ;;  %v1643_v21 = vsel %vm13_vm2, %v3083_v10, %v1639_v9 }
  0x94   :  { %1540 = vrot.lane.b32.xlu1 %v1539_v38, %s3493_s13  ;;  %v1705_v38 = vsel %vm13_vm2, %v3095_v28, %v1701_v27  ;;  %v3112_v49 = vld [vmem:[%s5618_s0 + $0xb9] sm:$0x1]   ;;  %s3501_s27 = smov 48   ;;  %vm550_vm3 = vcmask 876352   ;;  %v3116_v51 = vld [vmem:[%s5618_s0 + $0xe] sm:$0x1]  }
  0x95   :  { %v322_v39 = vpop.permute.xlu0 %321   ;;  %v3113_v50 = vld [vmem:[%s5618_s0 + $0x38] sm:$0x2]   ;;  %v3117_v52 = vld [vmem:[%s5618_s0 + $0x18d] sm:$0x2]   ;;  %v3107_v58 = vld [vmem:[%s5618_s0 + $0x8c] sm:$0x8]  }
  0x96   :  { %325 = vst.msk [vmem:[#allocation0 + $0x20] ss:$-24 sm:$0x3] %vm323_vm5, %v322_v39   ;;  %327 = vst.msk [vmem:[#allocation0 + $0x80] ss:$-24 sm:$0xc] %vm323_vm5, %v322_v39   ;;  %v384_v56 = vpop.permute.xlu1 %383   ;;  %v1800_v62 = vsel %vm5_vm0, %v3113_v50, %v3112_v49  ;;  %v1821_v63 = vsel %vm5_vm0, %v3117_v52, %v3116_v51 }
  0x97   :  { %1520 = vrot.lane.b32.xlu0 %v1519_v37, %s3492_s12  ;;  %387 = vst.msk [vmem:[#allocation0 + $0x20] ss:$-24 sm:$0x3] %vm385_vm8, %v384_v56   ;;  %389 = vst.msk [vmem:[#allocation0 + $0x80] ss:$-24 sm:$0xc] %vm385_vm8, %v384_v56   ;;  %v1684_v37 = vsel %vm13_vm2, %v3091_v26, %v1680_v25 }
  0x98   :  { %1582 = vrot.lane.b32.xlu1 %v1581_v54, %s3495_s2  ;;  %v1746_v54 = vsel %vm13_vm2, %v3103_v44, %v1742_v43  ;;  %v3111_v60 = vld [vmem:[%s5618_s0 + $0x1e1] sm:$0x8]   ;;  %v3114_v61 = vld [vmem:[%s5618_s0 + $0x1b7] sm:$0x4]   ;;  %v3118_v0 = vld [vmem:[%s5618_s0 + $0x10c] sm:$0x4]  }
  0x99   :  { %v363_v55 = vpop.permute.xlu0 %362   ;;  %v3120_v1 = vld [vmem:[%s5618_s0 + $0x163] sm:$0x1]   ;;  %s3502_s15 = smov 47   ;;  %vm571_vm4 = vcmask 868152   ;;  %s3503_s16 = smov 46   ;;  %vm592_vm5 = vcmask 859952   ;;  %v1804_v9 = vsel %vm9_vm1, %v3114_v61, %v1800_v62  ;;  %v1825_v11 = vsel %vm9_vm1, %v3118_v0, %v1821_v63 }
  0x9a   :  { %366 = vst.msk [vmem:[#allocation0 + $0x40] ss:$-24 sm:$0x7] %vm364_vm7, %v363_v55   ;;  %368 = vst.msk [vmem:[#allocation0 + $0x55] sm:$0x8] %vm364_vm7, %v363_v55   ;;  %v425_v8 = vpop.permute.xlu1 %424   ;;  %s3504_s4 = smov 45  }
  0x9b   :  { %1561 = vrot.lane.b32.xlu0 %v1560_v53, %s3494_s30  ;;  %428 = vst.msk [vmem:[#allocation0 + $0x40] ss:$-24 sm:$0x7] %vm426_vm10, %v425_v8   ;;  %430 = vst.msk [vmem:[#allocation0 + $0x55] sm:$0x8] %vm426_vm10, %v425_v8   ;;  %v1725_v53 = vsel %vm13_vm2, %v3099_v42, %v1721_v41  ;;  %vm612_vm6 = vcmask 851752  }
  0x9c   :  { %1623 = vrot.lane.b32.xlu1 %v1622_v6, %s3497_s20  ;;  %v3121_v2 = vld [vmem:[%s5618_s0 + $0xe2] sm:$0x2]   ;;  %v3124_v3 = vld [vmem:[%s5618_s0 + $0xb8] sm:$0x1]   ;;  %v1787_v6 = vsel %vm13_vm2, %v3111_v60, %v1783_v59  ;;  %v3115_v10 = vld [vmem:[%s5618_s0 + $0x136] sm:$0x8]  }
  0x9d   :  { %v405_v7 = vpop.permute.xlu0 %404   ;;  %v3125_v4 = vld [vmem:[%s5618_s0 + $0x37] sm:$0x2]   ;;  %v3119_v12 = vld [vmem:[%s5618_s0 + $0x8b] sm:$0x8]   ;;  %v3122_v13 = vld [vmem:[%s5618_s0 + $0x61] sm:$0x4]   ;;  %v1841_v14 = vsel %vm5_vm0, %v3121_v2, %v3120_v1 }
  0x9e   :  { %407 = vst.msk [vmem:[#allocation0] ss:$72 sm:$0x3] %vm406_vm9, %v405_v7   ;;  %409 = vst.msk [vmem:[#allocation0 + $0x60] ss:$-24 sm:$0xc] %vm406_vm9, %v405_v7   ;;  %v467_v24 = vpop.permute.xlu1 %466   ;;  %v1862_v15 = vsel %vm5_vm0, %v3125_v4, %v3124_v3  ;;  %v1845_v25 = vsel %vm9_vm1, %v3122_v13, %v1841_v14 }
  0x9f   :  { %1602 = vrot.lane.b32.xlu0 %v1601_v5, %s3496_s19  ;;  %469 = vst.msk [vmem:[#allocation0] ss:$72 sm:$0x3] %vm468_vm12, %v467_v24   ;;  %471 = vst.msk [vmem:[#allocation0 + $0x60] ss:$-24 sm:$0xc] %vm468_vm12, %v467_v24   ;;  %v1767_v5 = vsel %vm13_vm2, %v3107_v58, %v1763_v57 }
  0xa0   :  { %1664 = vrot.lane.b32.xlu1 %v1663_v22, %s3499_s9  ;;  %v3126_v16 = vld [vmem:[%s5618_s0 + $0x1b6] sm:$0x4]   ;;  %v3128_v17 = vld [vmem:[%s5618_s0 + $0xd] sm:$0x1]   ;;  %s3505_s5 = smov 44   ;;  %vm633_vm7 = vcmask 843552   ;;  %v1829_v22 = vsel %vm13_vm2, %v3119_v12, %v1825_v11 }
  0xa1   :  { %v446_v23 = vpop.permute.xlu0 %445   ;;  %v3129_v18 = vld [vmem:[%s5618_s0 + $0x18c] sm:$0x2]   ;;  %v3132_v19 = vld [vmem:[%s5618_s0 + $0x162] sm:$0x1]   ;;  %v3123_v26 = vld [vmem:[%s5618_s0 + $0x1e0] sm:$0x8]   ;;  %v1866_v27 = vsel %vm9_vm1, %v3126_v16, %v1862_v15 }
  0xa2   :  { %449 = vst.msk [vmem:[#allocation0 + $0x20] ss:$-24 sm:$0x3] %vm447_vm11, %v446_v23   ;;  %451 = vst.msk [vmem:[#allocation0 + $0x80] ss:$-24 sm:$0xc] %vm447_vm11, %v446_v23   ;;  %v508_v40 = vpop.permute.xlu1 %507   ;;  %v1883_v30 = vsel %vm5_vm0, %v3129_v18, %v3128_v17 }
  0xa3   :  { %1644 = vrot.lane.b32.xlu0 %v1643_v21, %s3498_s8  ;;  %511 = vst.msk [vmem:[#allocation0 + $0x20] ss:$-24 sm:$0x3] %vm509_vm14, %v508_v40   ;;  %513 = vst.msk [vmem:[#allocation0 + $0x80] ss:$-24 sm:$0xc] %vm509_vm14, %v508_v40   ;;  %v1808_v21 = vsel %vm13_vm2, %v3115_v10, %v1804_v9 }
  0xa4   :  { %1706 = vrot.lane.b32.xlu1 %v1705_v38, %s3501_s27  ;;  %v3133_v20 = vld [vmem:[%s5618_s0 + $0xe1] sm:$0x2]   ;;  %v3127_v28 = vld [vmem:[%s5618_s0 + $0x135] sm:$0x8]   ;;  %v3130_v29 = vld [vmem:[%s5618_s0 + $0x10b] sm:$0x4]  }
  0xa5   :  { %v487_v39 = vpop.permute.xlu0 %486   ;;  %v1903_v31 = vsel %vm5_vm0, %v3133_v20, %v3132_v19  ;;  %v3134_v32 = vld [vmem:[%s5618_s0 + $0x60] sm:$0x4]   ;;  %v3136_v33 = vld [vmem:[%s5618_s0 + $0xb7] sm:$0x1]   ;;  %s3506_s22 = smov 43   ;;  %vm654_vm8 = vcmask 835352   ;;  %v1870_v38 = vsel %vm13_vm2, %v3127_v28, %v1866_v27  ;;  %v1887_v41 = vsel %vm9_vm1, %v3130_v29, %v1883_v30 }
  0xa6   :  { %490 = vst.msk [vmem:[#allocation0 + $0x40] ss:$-24 sm:$0x7] %vm488_vm13, %v487_v39   ;;  %492 = vst.msk [vmem:[#allocation0 + $0x55] sm:$0x8] %vm488_vm13, %v487_v39   ;;  %v549_v56 = vpop.permute.xlu1 %548   ;;  %s3507_s23 = smov 42   ;;  %v1907_v43 = vsel %vm9_vm1, %v3134_v32, %v1903_v31 }
  0xa7   :  { %1685 = vrot.lane.b32.xlu0 %v1684_v37, %s3500_s26  ;;  %552 = vst.msk [vmem:[#allocation0 + $0x40] ss:$-24 sm:$0x7] %vm550_vm3, %v549_v56   ;;  %554 = vst.msk [vmem:[#allocation0 + $0x55] sm:$0x8] %vm550_vm3, %v549_v56   ;;  %vm674_vm9 = vcmask 827152   ;;  %v1849_v37 = vsel %vm13_vm2, %v3123_v26, %v1845_v25 }
  0xa8   :  { %1747 = vrot.lane.b32.xlu1 %v1746_v54, %s3503_s16  ;;  %v3137_v34 = vld [vmem:[%s5618_s0 + $0x36] sm:$0x2]   ;;  %v3140_v35 = vld [vmem:[%s5618_s0 + $0xc] sm:$0x1]   ;;  %v3131_v42 = vld [vmem:[%s5618_s0 + $0x8a] sm:$0x8]  }
  0xa9   :  { %v529_v55 = vpop.permute.xlu0 %528   ;;  %v3141_v36 = vld [vmem:[%s5618_s0 + $0x18b] sm:$0x2]   ;;  %v3135_v44 = vld [vmem:[%s5618_s0 + $0x1df] sm:$0x8]   ;;  %v3138_v45 = vld [vmem:[%s5618_s0 + $0x1b5] sm:$0x4]   ;;  %v1924_v46 = vsel %vm5_vm0, %v3137_v34, %v3136_v33 }
  0xaa   :  { %531 = vst.msk [vmem:[#allocation0] ss:$72 sm:$0x3] %vm530_vm15, %v529_v55   ;;  %533 = vst.msk [vmem:[#allocation0 + $0x60] ss:$-24 sm:$0xc] %vm530_vm15, %v529_v55   ;;  %v591_v8 = vpop.permute.xlu1 %590   ;;  %v1945_v47 = vsel %vm5_vm0, %v3141_v36, %v3140_v35  ;;  %v1911_v54 = vsel %vm13_vm2, %v3135_v44, %v1907_v43  ;;  %v1928_v57 = vsel %vm9_vm1, %v3138_v45, %v1924_v46 }
  0xab   :  { %1726 = vrot.lane.b32.xlu0 %v1725_v53, %s3502_s15  ;;  %593 = vst.msk [vmem:[#allocation0] ss:$72 sm:$0x3] %vm592_vm5, %v591_v8   ;;  %595 = vst.msk [vmem:[#allocation0 + $0x60] ss:$-24 sm:$0xc] %vm592_vm5, %v591_v8   ;;  %v1891_v53 = vsel %vm13_vm2, %v3131_v42, %v1887_v41 }
  0xac   :  { %1788 = vrot.lane.b32.xlu1 %v1787_v6, %s3505_s5  ;;  %v3142_v48 = vld [vmem:[%s5618_s0 + $0x10a] sm:$0x4]   ;;  %v3144_v49 = vld [vmem:[%s5618_s0 + $0x161] sm:$0x1]   ;;  %s3508_s11 = smov 41   ;;  %vm695_vm10 = vcmask 818952  }
  0xad   :  { %v570_v7 = vpop.permute.xlu0 %569   ;;  %v3145_v50 = vld [vmem:[%s5618_s0 + $0xe0] sm:$0x2]   ;;  %s3509_s12 = smov 40   ;;  %vm716_vm11 = vcmask 810752   ;;  %v3148_v51 = vld [vmem:[%s5618_s0 + $0xb6] sm:$0x1]   ;;  %v1949_v59 = vsel %vm9_vm1, %v3142_v48, %v1945_v47 }
  0xae   :  { %573 = vst.msk [vmem:[#allocation0 + $0x20] ss:$-24 sm:$0x3] %vm571_vm4, %v570_v7   ;;  %575 = vst.msk [vmem:[#allocation0 + $0x80] ss:$-24 sm:$0xc] %vm571_vm4, %v570_v7   ;;  %v632_v24 = vpop.permute.xlu1 %631   ;;  %v1965_v62 = vsel %vm5_vm0, %v3145_v50, %v3144_v49 }
  0xaf   :  { %1768 = vrot.lane.b32.xlu0 %v1767_v5, %s3504_s4  ;;  %635 = vst.msk [vmem:[#allocation0 + $0x20] ss:$-24 sm:$0x3] %vm633_vm7, %v632_v24   ;;  %637 = vst.msk [vmem:[#allocation0 + $0x80] ss:$-24 sm:$0xc] %vm633_vm7, %v632_v24  }
  0xb0   :  { %1830 = vrot.lane.b32.xlu1 %v1829_v22, %s3507_s23  ;;  %v3149_v52 = vld [vmem:[%s5618_s0 + $0x35] sm:$0x2]   ;;  %v3139_v58 = vld [vmem:[%s5618_s0 + $0x134] sm:$0x8]   ;;  %v3143_v60 = vld [vmem:[%s5618_s0 + $0x89] sm:$0x8]  }
  0xb1   :  { %v611_v23 = vpop.permute.xlu0 %610   ;;  %v3146_v61 = vld [vmem:[%s5618_s0 + $0x5f] sm:$0x4]   ;;  %v1986_v63 = vsel %vm5_vm0, %v3149_v52, %v3148_v51  ;;  %v3150_v0 = vld [vmem:[%s5618_s0 + $0x1b4] sm:$0x4]   ;;  %v3152_v1 = vld [vmem:[%s5618_s0 + $0xb] sm:$0x1]   ;;  %v1932_v5 = vsel %vm13_vm2, %v3139_v58, %v1928_v57  ;;  %v1953_v6 = vsel %vm13_vm2, %v3143_v60, %v1949_v59 }
  0xb2   :  { %614 = vst.msk [vmem:[#allocation0 + $0x40] ss:$-24 sm:$0x7] %vm612_vm6, %v611_v23   ;;  %616 = vst.msk [vmem:[#allocation0 + $0x55] sm:$0x8] %vm612_vm6, %v611_v23   ;;  %v673_v40 = vpop.permute.xlu1 %672   ;;  %s3510_s29 = smov 39   ;;  %v1969_v9 = vsel %vm9_vm1, %v3146_v61, %v1965_v62  ;;  %v1990_v11 = vsel %vm9_vm1, %v3150_v0, %v1986_v63 }
  0xb3   :  { %1809 = vrot.lane.b32.xlu0 %v1808_v21, %s3506_s22  ;;  %676 = vst.msk [vmem:[#allocation0 + $0x40] ss:$-24 sm:$0x7] %vm674_vm9, %v673_v40   ;;  %678 = vst.msk [vmem:[#allocation0 + $0x55] sm:$0x8] %vm674_vm9, %v673_v40   ;;  %vm736_vm12 = vcmask 802552  }
  0xb4   :  { %1871 = vrot.lane.b32.xlu1 %v1870_v38, %s3509_s12  ;;  %v3153_v2 = vld [vmem:[%s5618_s0 + $0x18a] sm:$0x2]   ;;  %s3511_s30 = smov 38   ;;  %vm757_vm13 = vcmask 794352   ;;  %v3156_v3 = vld [vmem:[%s5618_s0 + $0x160] sm:$0x1]  }
  0xb5   :  { %v653_v39 = vpop.permute.xlu0 %652   ;;  %v3157_v4 = vld [vmem:[%s5618_s0 + $0xdf] sm:$0x2]   ;;  %v3147_v10 = vld [vmem:[%s5618_s0 + $0x1de] sm:$0x8]   ;;  %v3151_v12 = vld [vmem:[%s5618_s0 + $0x133] sm:$0x8]   ;;  %v2007_v14 = vsel %vm5_vm0, %v3153_v2, %v3152_v1 }
  0xb6   :  { %655 = vst.msk [vmem:[#allocation0] ss:$72 sm:$0x3] %vm654_vm8, %v653_v39   ;;  %657 = vst.msk [vmem:[#allocation0 + $0x60] ss:$-24 sm:$0xc] %vm654_vm8, %v653_v39   ;;  %v715_v56 = vpop.permute.xlu1 %714   ;;  %v2027_v15 = vsel %vm5_vm0, %v3157_v4, %v3156_v3  ;;  %v1973_v21 = vsel %vm13_vm2, %v3147_v10, %v1969_v9  ;;  %v1994_v22 = vsel %vm13_vm2, %v3151_v12, %v1990_v11 }
  0xb7   :  { %1850 = vrot.lane.b32.xlu0 %v1849_v37, %s3508_s11  ;;  %717 = vst.msk [vmem:[#allocation0] ss:$72 sm:$0x3] %vm716_vm11, %v715_v56   ;;  %719 = vst.msk [vmem:[#allocation0 + $0x60] ss:$-24 sm:$0xc] %vm716_vm11, %v715_v56  }
  0xb8   :  { %1912 = vrot.lane.b32.xlu1 %v1911_v54, %s3511_s30  ;;  %v3154_v13 = vld [vmem:[%s5618_s0 + $0x109] sm:$0x4]   ;;  %v3158_v16 = vld [vmem:[%s5618_s0 + $0x5e] sm:$0x4]   ;;  %v3160_v17 = vld [vmem:[%s5618_s0 + $0xb5] sm:$0x1]  }
  0xb9   :  { %v694_v55 = vpop.permute.xlu0 %693   ;;  %v3161_v18 = vld [vmem:[%s5618_s0 + $0x34] sm:$0x2]   ;;  %s3512_s18 = smov 37   ;;  %vm778_vm14 = vcmask 786152   ;;  %s3513_s19 = smov 36   ;;  %vm798_vm15 = vcmask 777952   ;;  %v2011_v25 = vsel %vm9_vm1, %v3154_v13, %v2007_v14  ;;  %v2031_v27 = vsel %vm9_vm1, %v3158_v16, %v2027_v15 }
  0xba   :  { %697 = vst.msk [vmem:[#allocation0 + $0x20] ss:$-24 sm:$0x3] %vm695_vm10, %v694_v55   ;;  %699 = vst.msk [vmem:[#allocation0 + $0x80] ss:$-24 sm:$0xc] %vm695_vm10, %v694_v55   ;;  %v756_v8 = vpop.permute.xlu1 %755   ;;  %v2048_v30 = vsel %vm5_vm0, %v3161_v18, %v3160_v17 }
  0xbb   :  { %1892 = vrot.lane.b32.xlu0 %v1891_v53, %s3510_s29  ;;  %759 = vst.msk [vmem:[#allocation0 + $0x20] ss:$-24 sm:$0x3] %vm757_vm13, %v756_v8   ;;  %761 = vst.msk [vmem:[#allocation0 + $0x80] ss:$-24 sm:$0xc] %vm757_vm13, %v756_v8  }
  0xbc   :  { %1954 = vrot.lane.b32.xlu1 %v1953_v6, %s3513_s19  ;;  %v3164_v19 = vld [vmem:[%s5618_s0 + $0xa] sm:$0x1]   ;;  %v3155_v26 = vld [vmem:[%s5618_s0 + $0x88] sm:$0x8]   ;;  %v3159_v28 = vld [vmem:[%s5618_s0 + $0x1dd] sm:$0x8]  }
  0xbd   :  { %v735_v7 = vpop.permute.xlu0 %734   ;;  %v3165_v20 = vld [vmem:[%s5618_s0 + $0x189] sm:$0x2]   ;;  %v3162_v29 = vld [vmem:[%s5618_s0 + $0x1b3] sm:$0x4]   ;;  %v3168_v33 = vld [vmem:[%s5618_s0 + $0x15f] sm:$0x1]   ;;  %v2015_v37 = vsel %vm13_vm2, %v3155_v26, %v2011_v25  ;;  %v2035_v38 = vsel %vm13_vm2, %v3159_v28, %v2031_v27 }
  0xbe   :  { %738 = vst.msk [vmem:[#allocation0 + $0x40] ss:$-24 sm:$0x7] %vm736_vm12, %v735_v7   ;;  %740 = vst.msk [vmem:[#allocation0 + $0x55] sm:$0x8] %vm736_vm12, %v735_v7   ;;  %v797_v24 = vpop.permute.xlu1 %796   ;;  %v2069_v31 = vsel %vm5_vm0, %v3165_v20, %v3164_v19  ;;  %s3514_s7 = smov 35   ;;  %v2052_v41 = vsel %vm9_vm1, %v3162_v29, %v2048_v30 }
  0xbf   :  { %1933 = vrot.lane.b32.xlu0 %v1932_v5, %s3512_s18  ;;  %800 = vst.msk [vmem:[#allocation0 + $0x40] ss:$-24 sm:$0x7] %vm798_vm15, %v797_v24   ;;  %802 = vst.msk [vmem:[#allocation0 + $0x55] sm:$0x8] %vm798_vm15, %v797_v24   ;;  %vm819_vm3 = vcmask 769752  }
  0xc0   :  { %v3166_v32 = vld [vmem:[%s5618_s0 + $0x108] sm:$0x4]   ;;  %v3169_v34 = vld [vmem:[%s5618_s0 + $0xde] sm:$0x2]   ;;  %s3515_s8 = smov 34   ;;  %vm840_vm4 = vcmask 761552  }
  0xc1   :  { %v777_v23 = vpop.permute.xlu0 %776   ;;  %1995 = vrot.lane.b32.xlu1 %v1994_v22, %s3515_s8  ;;  %v3172_v35 = vld [vmem:[%s5618_s0 + $0xb4] sm:$0x1]   ;;  %v3163_v42 = vld [vmem:[%s5618_s0 + $0x132] sm:$0x8]   ;;  %v2073_v43 = vsel %vm9_vm1, %v3166_v32, %v2069_v31  ;;  %v3167_v44 = vld [vmem:[%s5618_s0 + $0x87] sm:$0x8]   ;;  %v2089_v46 = vsel %vm5_vm0, %v3169_v34, %v3168_v33 }
  0xc2   :  { %779 = vst.msk [vmem:[#allocation0] ss:$72 sm:$0x3] %vm778_vm14, %v777_v23   ;;  %781 = vst.msk [vmem:[#allocation0 + $0x60] ss:$-24 sm:$0xc] %vm778_vm14, %v777_v23   ;;  %v839_v40 = vpop.permute.xlu1 %838   ;;  %v2056_v53 = vsel %vm13_vm2, %v3163_v42, %v2052_v41  ;;  %v2077_v54 = vsel %vm13_vm2, %v3167_v44, %v2073_v43 }
  0xc3   :  { %1974 = vrot.lane.b32.xlu0 %v1973_v21, %s3514_s7  ;;  %v3173_v36 = vld [vmem:[%s5618_s0 + $0x33] sm:$0x2]   ;;  %v3170_v45 = vld [vmem:[%s5618_s0 + $0x5d] sm:$0x4]   ;;  %v3176_v49 = vld [vmem:[%s5618_s0 + $0x9] sm:$0x1]  }
  0xc4   :  { %841 = vst.msk [vmem:[#allocation0] ss:$72 sm:$0x3] %vm840_vm4, %v839_v40   ;;  %843 = vst.msk [vmem:[#allocation0 + $0x60] ss:$-24 sm:$0xc] %vm840_vm4, %v839_v40   ;;  %v2110_v47 = vsel %vm5_vm0, %v3173_v36, %v3172_v35  ;;  %v2093_v57 = vsel %vm9_vm1, %v3170_v45, %v2089_v46 }
  0xc5   :  { %v818_v39 = vpop.permute.xlu0 %817   ;;  %v3174_v48 = vld [vmem:[%s5618_s0 + $0x1b2] sm:$0x4]   ;;  %v3177_v50 = vld [vmem:[%s5618_s0 + $0x188] sm:$0x2]   ;;  %s3516_s25 = smov 33   ;;  %vm860_vm5 = vcmask 753352  }
  0xc6   :  { %821 = vst.msk [vmem:[#allocation0 + $0x20] ss:$-24 sm:$0x3] %vm819_vm3, %v818_v39   ;;  %823 = vst.msk [vmem:[#allocation0 + $0x80] ss:$-24 sm:$0xc] %vm819_vm3, %v818_v39   ;;  %v880_v56 = vpop.permute.xlu1 %879   ;;  %v2114_v59 = vsel %vm9_vm1, %v3174_v48, %v2110_v47  ;;  %v2131_v62 = vsel %vm5_vm0, %v3177_v50, %v3176_v49 }
  0xc7   :  { %2016 = vrot.lane.b32.xlu0 %v2015_v37, %s3516_s25  ;;  %s3517_s26 = smov 32   ;;  %vm881_vm6 = vcmask 745152   ;;  %v3180_v51 = vld [vmem:[%s5618_s0 + $0x15e] sm:$0x1]   ;;  %v3171_v58 = vld [vmem:[%s5618_s0 + $0x1dc] sm:$0x8]  }
  0xc8   :  { %2036 = vrot.lane.b32.xlu1 %v2035_v38, %s3517_s26  ;;  %v3181_v52 = vld [vmem:[%s5618_s0 + $0xdd] sm:$0x2]   ;;  %v3175_v60 = vld [vmem:[%s5618_s0 + $0x131] sm:$0x8]   ;;  %v3178_v61 = vld [vmem:[%s5618_s0 + $0x107] sm:$0x4]   ;;  %v2097_v5 = vsel %vm13_vm2, %v3171_v58, %v2093_v57 }
  0xc9   :  { %v859_v55 = vpop.permute.xlu0 %858   ;;  %883 = vst.msk [vmem:[#allocation0 + $0x20] ss:$-24 sm:$0x3] %vm881_vm6, %v880_v56   ;;  %885 = vst.msk [vmem:[#allocation0 + $0x80] ss:$-24 sm:$0xc] %vm881_vm6, %v880_v56   ;;  %v2151_v63 = vsel %vm5_vm0, %v3181_v52, %v3180_v51  ;;  %v2118_v6 = vsel %vm13_vm2, %v3175_v60, %v2114_v59  ;;  %v2135_v9 = vsel %vm9_vm1, %v3178_v61, %v2131_v62 }
  0xca   :  { %862 = vst.msk [vmem:[#allocation0 + $0x40] ss:$-24 sm:$0x7] %vm860_vm5, %v859_v55   ;;  %864 = vst.msk [vmem:[#allocation0 + $0x55] sm:$0x8] %vm860_vm5, %v859_v55   ;;  %s3518_s14 = smov 31   ;;  %v921_v8 = vpop.permute.xlu1 %920  }
  0xcb   :  { %v3182_v0 = vld [vmem:[%s5618_s0 + $0x5c] sm:$0x4]   ;;  %v3184_v1 = vld [vmem:[%s5618_s0 + $0xb3] sm:$0x1]   ;;  %2057 = vrot.lane.b32.xlu0 %v2056_v53, %s3518_s14  ;;  %vm902_vm7 = vcmask 736952   ;;  %s3519_s15 = smov 30  }
  0xcc   :  { %v3185_v2 = vld [vmem:[%s5618_s0 + $0x32] sm:$0x2]   ;;  %2078 = vrot.lane.b32.xlu1 %v2077_v54, %s3519_s15  ;;  %vm922_vm8 = vcmask 728752   ;;  %v3188_v3 = vld [vmem:[%s5618_s0 + $0x8] sm:$0x1]   ;;  %v2155_v11 = vsel %vm9_vm1, %v3182_v0, %v2151_v63  ;;  %s3520_s3 = smov 29  }
  0xcd   :  { %v3189_v4 = vld [vmem:[%s5618_s0 + $0x187] sm:$0x2]   ;;  %v901_v7 = vpop.permute.xlu0 %900   ;;  %v3179_v10 = vld [vmem:[%s5618_s0 + $0x86] sm:$0x8]   ;;  %v3183_v12 = vld [vmem:[%s5618_s0 + $0x1db] sm:$0x8]   ;;  %v2172_v14 = vsel %vm5_vm0, %v3185_v2, %v3184_v1 }
  0xce   :  { %v3186_v13 = vld [vmem:[%s5618_s0 + $0x1b1] sm:$0x4]   ;;  %903 = vst.msk [vmem:[#allocation0] ss:$72 sm:$0x3] %vm902_vm7, %v901_v7   ;;  %v2193_v15 = vsel %vm5_vm0, %v3189_v4, %v3188_v3  ;;  %vm943_vm9 = vcmask 720552   ;;  %v2139_v21 = vsel %vm13_vm2, %v3179_v10, %v2135_v9  ;;  %v2159_v22 = vsel %vm13_vm2, %v3183_v12, %v2155_v11  ;;  %v963_v24 = vpop.permute.xlu1 %962  }
  0xcf   :  { %905 = vst.msk [vmem:[#allocation0 + $0x60] ss:$-24 sm:$0xc] %vm902_vm7, %v901_v7   ;;  %v3190_v16 = vld [vmem:[%s5618_s0 + $0x106] sm:$0x4]   ;;  %2098 = vrot.lane.b32.xlu0 %v2097_v5, %s3520_s3  ;;  %s3521_s4 = smov 28   ;;  %v2176_v25 = vsel %vm9_vm1, %v3186_v13, %v2172_v14 }
  0xd0   :  { %924 = vst.msk [vmem:[#allocation0 + $0x40] ss:$-24 sm:$0x7] %vm922_vm8, %v921_v8   ;;  %926 = vst.msk [vmem:[#allocation0 + $0x55] sm:$0x8] %vm922_vm8, %v921_v8   ;;  %2119 = vrot.lane.b32.xlu1 %v2118_v6, %s3521_s4  ;;  %vm964_vm10 = vcmask 712352   ;;  %v2197_v27 = vsel %vm9_vm1, %v3190_v16, %v2193_v15 }
  0xd1   :  { %v3192_v17 = vld [vmem:[%s5618_s0 + $0x15d] sm:$0x1]   ;;  %v3196_v19 = vld [vmem:[%s5618_s0 + $0xb2] sm:$0x1]   ;;  %v942_v23 = vpop.permute.xlu0 %941   ;;  %v3187_v26 = vld [vmem:[%s5618_s0 + $0x130] sm:$0x8]  }
  0xd2   :  { %v3193_v18 = vld [vmem:[%s5618_s0 + $0xdc] sm:$0x2]   ;;  %v3197_v20 = vld [vmem:[%s5618_s0 + $0x31] sm:$0x2]   ;;  %v3191_v28 = vld [vmem:[%s5618_s0 + $0x85] sm:$0x8]   ;;  %v2180_v37 = vsel %vm13_vm2, %v3187_v26, %v2176_v25  ;;  %v1004_v40 = vpop.permute.xlu1 %1003  }
  0xd3   :  { %v3194_v29 = vld [vmem:[%s5618_s0 + $0x5b] sm:$0x4]   ;;  %945 = vst.msk [vmem:[#allocation0 + $0x20] ss:$-24 sm:$0x3] %vm943_vm9, %v942_v23   ;;  %v2213_v30 = vsel %vm5_vm0, %v3193_v18, %v3192_v17  ;;  %v2234_v31 = vsel %vm5_vm0, %v3197_v20, %v3196_v19  ;;  %s3522_s21 = smov 27   ;;  %v2201_v38 = vsel %vm13_vm2, %v3191_v28, %v2197_v27 }
  0xd4   :  { %947 = vst.msk [vmem:[#allocation0 + $0x80] ss:$-24 sm:$0xc] %vm943_vm9, %v942_v23   ;;  %v3198_v32 = vld [vmem:[%s5618_s0 + $0x1b0] sm:$0x4]   ;;  %2140 = vrot.lane.b32.xlu0 %v2139_v21, %s3522_s21  ;;  %vm984_vm11 = vcmask 704152   ;;  %v2217_v41 = vsel %vm9_vm1, %v3194_v29, %v2213_v30 }
  0xd5   :  { %965 = vst.msk [vmem:[#allocation0] ss:$72 sm:$0x3] %vm964_vm10, %v963_v24   ;;  %967 = vst.msk [vmem:[#allocation0 + $0x60] ss:$-24 sm:$0xc] %vm964_vm10, %v963_v24   ;;  %v983_v39 = vpop.permute.xlu0 %982   ;;  %v2238_v43 = vsel %vm9_vm1, %v3198_v32, %v2234_v31 }
  0xd6   :  { %v3200_v33 = vld [vmem:[%s5618_s0 + $0x7] sm:$0x1]   ;;  %s3523_s22 = smov 26   ;;  %vm1005_vm12 = vcmask 695952   ;;  %v3204_v35 = vld [vmem:[%s5618_s0 + $0x15c] sm:$0x1]   ;;  %v1045_v56 = vpop.permute.xlu1 %1044  }
  0xd7   :  { %v3201_v34 = vld [vmem:[%s5618_s0 + $0x186] sm:$0x2]   ;;  %2160 = vrot.lane.b32.xlu1 %v2159_v22, %s3523_s22  ;;  %v3205_v36 = vld [vmem:[%s5618_s0 + $0xdb] sm:$0x2]   ;;  %v3195_v42 = vld [vmem:[%s5618_s0 + $0x1da] sm:$0x8]  }
  0xd8   :  { %v3199_v44 = vld [vmem:[%s5618_s0 + $0x12f] sm:$0x8]   ;;  %v3202_v45 = vld [vmem:[%s5618_s0 + $0x105] sm:$0x4]   ;;  %988 = vst.msk [vmem:[#allocation0 + $0x55] sm:$0x8] %vm984_vm11, %v983_v39   ;;  %v2255_v46 = vsel %vm5_vm0, %v3201_v34, %v3200_v33  ;;  %v2275_v47 = vsel %vm5_vm0, %v3205_v36, %v3204_v35  ;;  %v2221_v53 = vsel %vm13_vm2, %v3195_v42, %v2217_v41 }
  0xd9   :  { %986 = vst.msk [vmem:[#allocation0 + $0x40] ss:$-24 sm:$0x7] %vm984_vm11, %v983_v39   ;;  %v3206_v48 = vld [vmem:[%s5618_s0 + $0x5a] sm:$0x4]   ;;  %s3524_s10 = smov 25   ;;  %v2242_v54 = vsel %vm13_vm2, %v3199_v44, %v2238_v43  ;;  %v1025_v55 = vpop.permute.xlu0 %1024   ;;  %v2259_v57 = vsel %vm9_vm1, %v3202_v45, %v2255_v46 }
  0xda   :  { %1007 = vst.msk [vmem:[#allocation0 + $0x20] ss:$-24 sm:$0x3] %vm1005_vm12, %v1004_v40   ;;  %1009 = vst.msk [vmem:[#allocation0 + $0x80] ss:$-24 sm:$0xc] %vm1005_vm12, %v1004_v40   ;;  %2181 = vrot.lane.b32.xlu0 %v2180_v37, %s3524_s10  ;;  %v2279_v59 = vsel %vm9_vm1, %v3206_v48, %v2275_v47  ;;  %v1087_v8 = vpop.permute.xlu1 %1086  }
  0xdb   :  { %v3208_v49 = vld [vmem:[%s5618_s0 + $0xb1] sm:$0x1]   ;;  %vm1026_vm13 = vcmask 687752   ;;  %s3525_s11 = smov 24   ;;  %vm1046_vm14 = vcmask 679552   ;;  %s3526_s28 = smov 23  }
  0xdc   :  { %v3209_v50 = vld [vmem:[%s5618_s0 + $0x30] sm:$0x2]   ;;  %2202 = vrot.lane.b32.xlu1 %v2201_v38, %s3525_s11  ;;  %v3212_v51 = vld [vmem:[%s5618_s0 + $0x6] sm:$0x1]   ;;  %v3203_v58 = vld [vmem:[%s5618_s0 + $0x84] sm:$0x8]  }
  0xdd   :  { %v3213_v52 = vld [vmem:[%s5618_s0 + $0x185] sm:$0x2]   ;;  %v3207_v60 = vld [vmem:[%s5618_s0 + $0x1d9] sm:$0x8]   ;;  %v3210_v61 = vld [vmem:[%s5618_s0 + $0x1af] sm:$0x4]   ;;  %v2296_v62 = vsel %vm5_vm0, %v3209_v50, %v3208_v49  ;;  %v2263_v5 = vsel %vm13_vm2, %v3203_v58, %v2259_v57  ;;  %v1066_v7 = vpop.permute.xlu0 %1065  }
  0xde   :  { %1027 = vst.msk [vmem:[#allocation0] ss:$72 sm:$0x3] %vm1026_vm13, %v1025_v55   ;;  %1029 = vst.msk [vmem:[#allocation0 + $0x60] ss:$-24 sm:$0xc] %vm1026_vm13, %v1025_v55   ;;  %v2317_v63 = vsel %vm5_vm0, %v3213_v52, %v3212_v51  ;;  %2222 = vrot.lane.b32.xlu0 %v2221_v53, %s3526_s28  ;;  %v2283_v6 = vsel %vm13_vm2, %v3207_v60, %v2279_v59  ;;  %v2300_v9 = vsel %vm9_vm1, %v3210_v61, %v2296_v62  ;;  %v1128_v24 = vpop.permute.xlu1 %1127  }
  0xdf   :  { %1048 = vst.msk [vmem:[#allocation0 + $0x40] ss:$-24 sm:$0x7] %vm1046_vm14, %v1045_v56   ;;  %1050 = vst.msk [vmem:[#allocation0 + $0x55] sm:$0x8] %vm1046_vm14, %v1045_v56   ;;  %vm1067_vm15 = vcmask 671352  }
  0xe0   :  { %v3214_v0 = vld [vmem:[%s5618_s0 + $0x104] sm:$0x4]   ;;  %v3216_v1 = vld [vmem:[%s5618_s0 + $0x15b] sm:$0x1]   ;;  %s3527_s29 = smov 22   ;;  %vm1088_vm3 = vcmask 663152  }
  0xe1   :  { %v3217_v2 = vld [vmem:[%s5618_s0 + $0xda] sm:$0x2]   ;;  %2243 = vrot.lane.b32.xlu1 %v2242_v54, %s3527_s29  ;;  %v3220_v3 = vld [vmem:[%s5618_s0 + $0xb0] sm:$0x1]   ;;  %v3211_v10 = vld [vmem:[%s5618_s0 + $0x12e] sm:$0x8]   ;;  %v2321_v11 = vsel %vm9_vm1, %v3214_v0, %v2317_v63  ;;  %v1107_v23 = vpop.permute.xlu0 %1106  }
  0xe2   :  { %v3221_v4 = vld [vmem:[%s5618_s0 + $0x2f] sm:$0x2]   ;;  %v3215_v12 = vld [vmem:[%s5618_s0 + $0x83] sm:$0x8]   ;;  %v3218_v13 = vld [vmem:[%s5618_s0 + $0x59] sm:$0x4]   ;;  %v2337_v14 = vsel %vm5_vm0, %v3217_v2, %v3216_v1  ;;  %v2304_v21 = vsel %vm13_vm2, %v3211_v10, %v2300_v9  ;;  %v1169_v40 = vpop.permute.xlu1 %1168  }
  0xe3   :  { %1069 = vst.msk [vmem:[#allocation0 + $0x20] ss:$-24 sm:$0x3] %vm1067_vm15, %v1066_v7   ;;  %1071 = vst.msk [vmem:[#allocation0 + $0x80] ss:$-24 sm:$0xc] %vm1067_vm15, %v1066_v7   ;;  %v2358_v15 = vsel %vm5_vm0, %v3221_v4, %v3220_v3  ;;  %v2325_v22 = vsel %vm13_vm2, %v3215_v12, %v2321_v11  ;;  %v2341_v25 = vsel %vm9_vm1, %v3218_v13, %v2337_v14 }
  0xe4   :  { %1089 = vst.msk [vmem:[#allocation0] ss:$72 sm:$0x3] %vm1088_vm3, %v1087_v8   ;;  %1091 = vst.msk [vmem:[#allocation0 + $0x60] ss:$-24 sm:$0xc] %vm1088_vm3, %v1087_v8  }
  0xe5   :  { %v3222_v16 = vld [vmem:[%s5618_s0 + $0x1ae] sm:$0x4]   ;;  %v3224_v17 = vld [vmem:[%s5618_s0 + $0x5] sm:$0x1]   ;;  %s3528_s17 = smov 21   ;;  %vm1108_vm4 = vcmask 654952   ;;  %v1149_v39 = vpop.permute.xlu0 %1148  }
  0xe6   :  { %v3225_v18 = vld [vmem:[%s5618_s0 + $0x184] sm:$0x2]   ;;  %2264 = vrot.lane.b32.xlu0 %v2263_v5, %s3528_s17  ;;  %s3529_s18 = smov 20   ;;  %vm1129_vm5 = vcmask 646752   ;;  %v3228_v19 = vld [vmem:[%s5618_s0 + $0x15a] sm:$0x1]   ;;  %v2362_v27 = vsel %vm9_vm1, %v3222_v16, %v2358_v15  ;;  %v1211_v56 = vpop.permute.xlu1 %1210  }
  0xe7   :  { %2284 = vrot.lane.b32.xlu1 %v2283_v6, %s3529_s18  ;;  %v3229_v20 = vld [vmem:[%s5618_s0 + $0xd9] sm:$0x2]   ;;  %v3219_v26 = vld [vmem:[%s5618_s0 + $0x1d8] sm:$0x8]   ;;  %v3223_v28 = vld [vmem:[%s5618_s0 + $0x12d] sm:$0x8]   ;;  %v2379_v30 = vsel %vm5_vm0, %v3225_v18, %v3224_v17 }
  0xe8   :  { %v3226_v29 = vld [vmem:[%s5618_s0 + $0x103] sm:$0x4]   ;;  %1110 = vst.msk [vmem:[#allocation0 + $0x40] ss:$-24 sm:$0x7] %vm1108_vm4, %v1107_v23   ;;  %v2399_v31 = vsel %vm5_vm0, %v3229_v20, %v3228_v19  ;;  %s3530_s6 = smov 19   ;;  %v2345_v37 = vsel %vm13_vm2, %v3219_v26, %v2341_v25  ;;  %v2366_v38 = vsel %vm13_vm2, %v3223_v28, %v2362_v27 }
  0xe9   :  { %1112 = vst.msk [vmem:[#allocation0 + $0x55] sm:$0x8] %vm1108_vm4, %v1107_v23   ;;  %v3230_v32 = vld [vmem:[%s5618_s0 + $0x58] sm:$0x4]   ;;  %v3232_v33 = vld [vmem:[%s5618_s0 + $0xaf] sm:$0x1]   ;;  %v2383_v41 = vsel %vm9_vm1, %v3226_v29, %v2379_v30  ;;  %v1190_v55 = vpop.permute.xlu0 %1189  }
  0xea   :  { %1131 = vst.msk [vmem:[#allocation0 + $0x20] ss:$-24 sm:$0x3] %vm1129_vm5, %v1128_v24   ;;  %1133 = vst.msk [vmem:[#allocation0 + $0x80] ss:$-24 sm:$0xc] %vm1129_vm5, %v1128_v24   ;;  %2305 = vrot.lane.b32.xlu0 %v2304_v21, %s3530_s6  ;;  %v2403_v43 = vsel %vm9_vm1, %v3230_v32, %v2399_v31  ;;  %v1252_v8 = vpop.permute.xlu1 %1251  }
  0xeb   :  { %v3233_v34 = vld [vmem:[%s5618_s0 + $0x2e] sm:$0x2]   ;;  %vm1150_vm6 = vcmask 638552   ;;  %s3531_s7 = smov 18   ;;  %vm1170_vm7 = vcmask 630352   ;;  %s3532_s24 = smov 17  }
  0xec   :  { %2326 = vrot.lane.b32.xlu1 %v2325_v22, %s3531_s7  ;;  %v3236_v35 = vld [vmem:[%s5618_s0 + $0x4] sm:$0x1]   ;;  %v3227_v42 = vld [vmem:[%s5618_s0 + $0x82] sm:$0x8]   ;;  %v3231_v44 = vld [vmem:[%s5618_s0 + $0x1d7] sm:$0x8]   ;;  %v2420_v46 = vsel %vm5_vm0, %v3233_v34, %v3232_v33 }
  0xed   :  { %v3237_v36 = vld [vmem:[%s5618_s0 + $0x183] sm:$0x2]   ;;  %v3234_v45 = vld [vmem:[%s5618_s0 + $0x1ad] sm:$0x4]   ;;  %1174 = vst.msk [vmem:[#allocation0 + $0x55] sm:$0x8] %vm1170_vm7, %v1169_v40   ;;  %v2387_v53 = vsel %vm13_vm2, %v3227_v42, %v2383_v41  ;;  %v2407_v54 = vsel %vm13_vm2, %v3231_v44, %v2403_v43  ;;  %v1231_v7 = vpop.permute.xlu0 %1230  }
  0xee   :  { %1151 = vst.msk [vmem:[#allocation0] ss:$72 sm:$0x3] %vm1150_vm6, %v1149_v39   ;;  %1153 = vst.msk [vmem:[#allocation0 + $0x60] ss:$-24 sm:$0xc] %vm1150_vm6, %v1149_v39   ;;  %v2441_v47 = vsel %vm5_vm0, %v3237_v36, %v3236_v35  ;;  %2346 = vrot.lane.b32.xlu0 %v2345_v37, %s3532_s24  ;;  %v2424_v57 = vsel %vm9_vm1, %v3234_v45, %v2420_v46  ;;  %v1293_v24 = vpop.permute.xlu1 %1292  }
  0xef   :  { %1172 = vst.msk [vmem:[#allocation0 + $0x40] ss:$-24 sm:$0x7] %vm1170_vm7, %v1169_v40   ;;  %v3238_v48 = vld [vmem:[%s5618_s0 + $0x102] sm:$0x4]   ;;  %vm1191_vm8 = vcmask 622152  }
  0xf0   :  { %v3240_v49 = vld [vmem:[%s5618_s0 + $0x159] sm:$0x1]   ;;  %s3533_s25 = smov 16   ;;  %vm1212_vm9 = vcmask 613952   ;;  %v3244_v51 = vld [vmem:[%s5618_s0 + $0xae] sm:$0x1]   ;;  %v2445_v59 = vsel %vm9_vm1, %v3238_v48, %v2441_v47 }
  0xf1   :  { %v3241_v50 = vld [vmem:[%s5618_s0 + $0xd8] sm:$0x2]   ;;  %2367 = vrot.lane.b32.xlu1 %v2366_v38, %s3533_s25  ;;  %v3245_v52 = vld [vmem:[%s5618_s0 + $0x2d] sm:$0x2]   ;;  %v3235_v58 = vld [vmem:[%s5618_s0 + $0x12c] sm:$0x8]   ;;  %v1273_v23 = vpop.permute.xlu0 %1272  }
  0xf2   :  { %v3239_v60 = vld [vmem:[%s5618_s0 + $0x81] sm:$0x8]   ;;  %v3242_v61 = vld [vmem:[%s5618_s0 + $0x57] sm:$0x4]   ;;  %v2461_v62 = vsel %vm5_vm0, %v3241_v50, %v3240_v49  ;;  %v2482_v63 = vsel %vm5_vm0, %v3245_v52, %v3244_v51  ;;  %v3246_v0 = vld [vmem:[%s5618_s0 + $0x1ac] sm:$0x4]   ;;  %v2428_v5 = vsel %vm13_vm2, %v3235_v58, %v2424_v57  ;;  %v1335_v40 = vpop.permute.xlu1 %1334  }
  0xf3   :  { %1193 = vst.msk [vmem:[#allocation0 + $0x20] ss:$-24 sm:$0x3] %vm1191_vm8, %v1190_v55   ;;  %1195 = vst.msk [vmem:[#allocation0 + $0x80] ss:$-24 sm:$0xc] %vm1191_vm8, %v1190_v55   ;;  %v2449_v6 = vsel %vm13_vm2, %v3239_v60, %v2445_v59  ;;  %v2465_v9 = vsel %vm9_vm1, %v3242_v61, %v2461_v62  ;;  %v2486_v11 = vsel %vm9_vm1, %v3246_v0, %v2482_v63 }
  0xf4   :  { %1213 = vst.msk [vmem:[#allocation0] ss:$72 sm:$0x3] %vm1212_vm9, %v1211_v56   ;;  %1215 = vst.msk [vmem:[#allocation0 + $0x60] ss:$-24 sm:$0xc] %vm1212_vm9, %v1211_v56  }
  0xf5   :  { %v3248_v1 = vld [vmem:[%s5618_s0 + $0x3] sm:$0x1]   ;;  %s3534_s13 = smov 15   ;;  %vm1232_vm10 = vcmask 605752   ;;  %s3535_s14 = smov 14   ;;  %vm1253_vm11 = vcmask 597552   ;;  %v1314_v39 = vpop.permute.xlu0 %1313  }
  0xf6   :  { %v3249_v2 = vld [vmem:[%s5618_s0 + $0x182] sm:$0x2]   ;;  %2388 = vrot.lane.b32.xlu0 %v2387_v53, %s3534_s13  ;;  %2408 = vrot.lane.b32.xlu1 %v2407_v54, %s3535_s14  ;;  %v3252_v3 = vld [vmem:[%s5618_s0 + $0x158] sm:$0x1]   ;;  %1236 = vst.msk [vmem:[#allocation0 + $0x55] sm:$0x8] %vm1232_vm10, %v1231_v7   ;;  %v1376_v56 = vpop.permute.xlu1 %1375  }
  0xf7   :  { %v3253_v4 = vld [vmem:[%s5618_s0 + $0xd7] sm:$0x2]   ;;  %v3243_v10 = vld [vmem:[%s5618_s0 + $0x1d6] sm:$0x8]   ;;  %v3247_v12 = vld [vmem:[%s5618_s0 + $0x12b] sm:$0x8]   ;;  %v2503_v14 = vsel %vm5_vm0, %v3249_v2, %v3248_v1 }
  0xf8   :  { %v3250_v13 = vld [vmem:[%s5618_s0 + $0x101] sm:$0x4]   ;;  %1234 = vst.msk [vmem:[#allocation0 + $0x40] ss:$-24 sm:$0x7] %vm1232_vm10, %v1231_v7   ;;  %v2523_v15 = vsel %vm5_vm0, %v3253_v4, %v3252_v3  ;;  %s3536_s2 = smov 13   ;;  %v2469_v21 = vsel %vm13_vm2, %v3243_v10, %v2465_v9  ;;  %v2490_v22 = vsel %vm13_vm2, %v3247_v12, %v2486_v11 }
  0xf9   :  { %1255 = vst.msk [vmem:[#allocation0 + $0x20] ss:$-24 sm:$0x3] %vm1253_vm11, %v1252_v8   ;;  %1257 = vst.msk [vmem:[#allocation0 + $0x80] ss:$-24 sm:$0xc] %vm1253_vm11, %v1252_v8   ;;  %v2507_v25 = vsel %vm9_vm1, %v3250_v13, %v2503_v14  ;;  %v1355_v55 = vpop.permute.xlu0 %1354  }
  0xfa   :  { %v3254_v16 = vld [vmem:[%s5618_s0 + $0x56] sm:$0x4]   ;;  %v3256_v17 = vld [vmem:[%s5618_s0 + $0xad] sm:$0x1]   ;;  %2429 = vrot.lane.b32.xlu0 %v2428_v5, %s3536_s2  ;;  %vm1274_vm12 = vcmask 589352   ;;  %s3537_s3 = smov 12  }
  0xfb   :  { %v3257_v18 = vld [vmem:[%s5618_s0 + $0x2c] sm:$0x2]   ;;  %2450 = vrot.lane.b32.xlu1 %v2449_v6, %s3537_s3  ;;  %vm1294_vm13 = vcmask 581152   ;;  %v3260_v19 = vld [vmem:[%s5618_s0 + $0x2] sm:$0x1]   ;;  %v2527_v27 = vsel %vm9_vm1, %v3254_v16, %v2523_v15  ;;  %s3538_s20 = smov 11   ;;  %v1417_v6 = vpop.permute.xlu1 %1416  }
  0xfc   :  { %v3261_v20 = vld [vmem:[%s5618_s0 + $0x181] sm:$0x2]   ;;  %v3251_v26 = vld [vmem:[%s5618_s0 + $0x80] sm:$0x8]   ;;  %v3255_v28 = vld [vmem:[%s5618_s0 + $0x1d5] sm:$0x8]   ;;  %v2544_v30 = vsel %vm5_vm0, %v3257_v18, %v3256_v17 }
  0xfd   :  { %v3258_v29 = vld [vmem:[%s5618_s0 + $0x1ab] sm:$0x4]   ;;  %1275 = vst.msk [vmem:[#allocation0] ss:$72 sm:$0x3] %vm1274_vm12, %v1273_v23   ;;  %v2565_v31 = vsel %vm5_vm0, %v3261_v20, %v3260_v19  ;;  %vm1315_vm14 = vcmask 572952   ;;  %v2511_v37 = vsel %vm13_vm2, %v3251_v26, %v2507_v25  ;;  %v2531_v38 = vsel %vm13_vm2, %v3255_v28, %v2527_v27  ;;  %v1397_v5 = vpop.permute.xlu0 %1396  }
  0xfe   :  { %1277 = vst.msk [vmem:[#allocation0 + $0x60] ss:$-24 sm:$0xc] %vm1274_vm12, %v1273_v23   ;;  %v3262_v32 = vld [vmem:[%s5618_s0 + $0x100] sm:$0x4]   ;;  %2470 = vrot.lane.b32.xlu0 %v2469_v21, %s3538_s20  ;;  %s3539_s21 = smov 10   ;;  %v2548_v41 = vsel %vm9_vm1, %v3258_v29, %v2544_v30 }
  0xff   :  { %1296 = vst.msk [vmem:[#allocation0 + $0x40] ss:$-24 sm:$0x7] %vm1294_vm13, %v1293_v24   ;;  %1298 = vst.msk [vmem:[#allocation0 + $0x55] sm:$0x8] %vm1294_vm13, %v1293_v24   ;;  %2491 = vrot.lane.b32.xlu1 %v2490_v22, %s3539_s21  ;;  %vm1336_vm15 = vcmask 564752   ;;  %v2569_v43 = vsel %vm9_vm1, %v3262_v32, %v2565_v31  ;;  %v1459_v16 = vpop.permute.xlu1 %1458  }
 0x100   :  { %v3264_v33 = vld [vmem:[%s5618_s0 + $0x157] sm:$0x1]   ;;  %v3268_v35 = vld [vmem:[%s5618_s0 + $0xac] sm:$0x1]   ;;  %v3259_v42 = vld [vmem:[%s5618_s0 + $0x12a] sm:$0x8]  }
 0x101   :  { %v3265_v34 = vld [vmem:[%s5618_s0 + $0xd6] sm:$0x2]   ;;  %v3269_v36 = vld [vmem:[%s5618_s0 + $0x2b] sm:$0x2]   ;;  %v3263_v44 = vld [vmem:[%s5618_s0 + $0x7f] sm:$0x8]   ;;  %v2552_v53 = vsel %vm13_vm2, %v3259_v42, %v2548_v41  ;;  %v1438_v15 = vpop.permute.xlu0 %1437  }
 0x102   :  { %v3266_v45 = vld [vmem:[%s5618_s0 + $0x55] sm:$0x4]   ;;  %1317 = vst.msk [vmem:[#allocation0 + $0x20] ss:$-24 sm:$0x3] %vm1315_vm14, %v1314_v39   ;;  %v2585_v46 = vsel %vm5_vm0, %v3265_v34, %v3264_v33  ;;  %v2606_v47 = vsel %vm5_vm0, %v3269_v36, %v3268_v35  ;;  %s3540_s9 = smov 9   ;;  %v2573_v54 = vsel %vm13_vm2, %v3263_v44, %v2569_v43 }
 0x103   :  { %1319 = vst.msk [vmem:[#allocation0 + $0x80] ss:$-24 sm:$0xc] %vm1315_vm14, %v1314_v39   ;;  %v3270_v48 = vld [vmem:[%s5618_s0 + $0x1aa] sm:$0x4]   ;;  %2512 = vrot.lane.b32.xlu0 %v2511_v37, %s3540_s9  ;;  %vm1356_vm3 = vcmask 556552   ;;  %v2589_v57 = vsel %vm9_vm1, %v3266_v45, %v2585_v46  ;;  %v1500_v21 = vpop.permute.xlu1 %1499  }
 0x104   :  { %1337 = vst.msk [vmem:[#allocation0] ss:$72 sm:$0x3] %vm1336_vm15, %v1335_v40   ;;  %1339 = vst.msk [vmem:[#allocation0 + $0x60] ss:$-24 sm:$0xc] %vm1336_vm15, %v1335_v40   ;;  %v2610_v59 = vsel %vm9_vm1, %v3270_v48, %v2606_v47 }
 0x105   :  { %v3272_v49 = vld [vmem:[%s5618_s0 + $0x1] sm:$0x1]   ;;  %s3541_s10 = smov 8   ;;  %vm1377_vm4 = vcmask 548352   ;;  %v3276_v51 = vld [vmem:[%s5618_s0 + $0x156] sm:$0x1]   ;;  %v1479_v20 = vpop.permute.xlu0 %1478  }
 0x106   :  { %v3273_v50 = vld [vmem:[%s5618_s0 + $0x180] sm:$0x2]   ;;  %2532 = vrot.lane.b32.xlu1 %v2531_v38, %s3541_s10  ;;  %v3277_v52 = vld [vmem:[%s5618_s0 + $0xd5] sm:$0x2]   ;;  %v3267_v58 = vld [vmem:[%s5618_s0 + $0x1d4] sm:$0x8]  }
 0x107   :  { %v3271_v60 = vld [vmem:[%s5618_s0 + $0x129] sm:$0x8]   ;;  %1358 = vst.msk [vmem:[#allocation0 + $0x40] ss:$-24 sm:$0x7] %vm1356_vm3, %v1355_v55   ;;  %v2627_v61 = vsel %vm5_vm0, %v3273_v50, %v3272_v49  ;;  %v2647_v63 = vsel %vm5_vm0, %v3277_v52, %v3276_v51  ;;  %s3542_s23 = smov 7   ;;  %v2593_v3 = vsel %vm13_vm2, %v3267_v58, %v2589_v57  ;;  %v1541_v23 = vpop.permute.xlu1 %1540  }
 0x108   :  { %1360 = vst.msk [vmem:[#allocation0 + $0x55] sm:$0x8] %vm1356_vm3, %v1355_v55   ;;  %v3274_v62 = vld [vmem:[%s5618_s0 + $0xff] sm:$0x4]   ;;  %v3278_v0 = vld [vmem:[%s5618_s0 + $0x54] sm:$0x4]   ;;  %2553 = vrot.lane.b32.xlu0 %v2552_v53, %s3542_s23  ;;  %v2614_v4 = vsel %vm13_vm2, %v3271_v60, %v2610_v59 }
 0x109   :  { %1379 = vst.msk [vmem:[#allocation0 + $0x20] ss:$-24 sm:$0x3] %vm1377_vm4, %v1376_v56   ;;  %1381 = vst.msk [vmem:[#allocation0 + $0x80] ss:$-24 sm:$0xc] %vm1377_vm4, %v1376_v56   ;;  %v2631_v7 = vsel %vm9_vm1, %v3274_v62, %v2627_v61  ;;  %v2651_v9 = vsel %vm9_vm1, %v3278_v0, %v2647_v63  ;;  %v1521_v22 = vpop.permute.xlu0 %1520  }
 0x10a   :  { %vm1398_vm5 = vcmask 540152   ;;  %s3543_s24 = smov 6   ;;  %vm1418_vm6 = vcmask 531952   ;;  %v3280_v1 = vld [vmem:[%s5618_s0 + $0xab] sm:$0x1]   ;;  %s3544_s6 = smov 5  }
 0x10b   :  { %2574 = vrot.lane.b32.xlu1 %v2573_v54, %s3543_s24  ;;  %v3281_v2 = vld [vmem:[%s5618_s0 + $0x2a] sm:$0x2]   ;;  %v3275_v8 = vld [vmem:[%s5618_s0 + $0x7e] sm:$0x8]   ;;  %v3279_v10 = vld [vmem:[%s5618_s0 + $0x1d3] sm:$0x8]   ;;  %v1583_v25 = vpop.permute.xlu1 %1582  }
 0x10c   :  { %1399 = vst.msk [vmem:[#allocation0] ss:$72 sm:$0x3] %vm1398_vm5, %v1397_v5   ;;  %1401 = vst.msk [vmem:[#allocation0 + $0x60] ss:$-24 sm:$0xc] %vm1398_vm5, %v1397_v5   ;;  %v2668_v11 = vsel %vm5_vm0, %v3281_v2, %v3280_v1  ;;  %2594 = vrot.lane.b32.xlu0 %v2593_v3, %s3544_s6  ;;  %v2635_v13 = vsel %vm13_vm2, %v3275_v8, %v2631_v7  ;;  %v2655_v14 = vsel %vm13_vm2, %v3279_v10, %v2651_v9 }
 0x10d   :  { %1420 = vst.msk [vmem:[#allocation0 + $0x40] ss:$-24 sm:$0x7] %vm1418_vm6, %v1417_v6   ;;  %1422 = vst.msk [vmem:[#allocation0 + $0x55] sm:$0x8] %vm1418_vm6, %v1417_v6   ;;  %vm1439_vm0 = vcmask 523752   ;;  %v1562_v24 = vpop.permute.xlu0 %1561  }
 0x10e   :  { %v3282_v12 = vld [vmem:[%s5618_s0 + $0x1a9] sm:$0x4]   ;;  %s3545_s7 = smov 4   ;;  %vm1460_vm7 = vcmask 515552   ;;  %s3547_s10 = smov 2   ;;  %vm1501_vm8 = vcmask 499152  }
 0x10f   :  { %2615 = vrot.lane.b32.xlu1 %v2614_v4, %s3545_s7  ;;  %v2672_v17 = vsel %vm9_vm1, %v3282_v12, %v2668_v11  ;;  %v3283_v18 = vld [vmem:[%s5618_s0 + $0x128] sm:$0x8]   ;;  %1441 = vst.msk [vmem:[#allocation0 + $0x20] ss:$-24 sm:$0x3] %vm1439_vm0, %v1438_v15   ;;  %s3546_s0 = smov 3   ;;  %v1624_v27 = vpop.permute.xlu1 %1623  }
 0x110   :  { %1443 = vst.msk [vmem:[#allocation0 + $0x80] ss:$-24 sm:$0xc] %vm1439_vm0, %v1438_v15   ;;  %2636 = vrot.lane.b32.xlu0 %v2635_v13, %s3546_s0  ;;  %vm1480_vm1 = vcmask 507352   ;;  %v2676_v19 = vsel %vm13_vm2, %v3283_v18, %v2672_v17  ;;  %s3548_s11 = smov 1   ;;  %vm1522_vm2 = vcmask 490952  }
 0x111   :  { %1461 = vst.msk [vmem:[#allocation0] ss:$72 sm:$0x3] %vm1460_vm7, %v1459_v16   ;;  %1463 = vst.msk [vmem:[#allocation0 + $0x60] ss:$-24 sm:$0xc] %vm1460_vm7, %v1459_v16   ;;  %v1603_v26 = vpop.permute.xlu0 %1602  }
 0x112   :  { %1482 = vst.msk [vmem:[#allocation0 + $0x40] ss:$-24 sm:$0x7] %vm1480_vm1, %v1479_v20   ;;  %1484 = vst.msk [vmem:[#allocation0 + $0x55] sm:$0x8] %vm1480_vm1, %v1479_v20   ;;  %vm1542_vm9 = vcmask 482752  }
 0x113   :  { %2656 = vrot.lane.b32.xlu1 %v2655_v14, %s3547_s10  ;;  %1503 = vst.msk [vmem:[#allocation0 + $0x20] ss:$-24 sm:$0x3] %vm1501_vm8, %v1500_v21   ;;  %1505 = vst.msk [vmem:[#allocation0 + $0x80] ss:$-24 sm:$0xc] %vm1501_vm8, %v1500_v21   ;;  %v1665_v29 = vpop.permute.xlu1 %1664  }
 0x114   :  { %2677 = vrot.lane.b32.xlu0 %v2676_v19, %s3548_s11  ;;  %1523 = vst.msk [vmem:[#allocation0] ss:$72 sm:$0x3] %vm1522_vm2, %v1521_v22   ;;  %1525 = vst.msk [vmem:[#allocation0 + $0x60] ss:$-24 sm:$0xc] %vm1522_vm2, %v1521_v22  }
 0x115   :  { %1544 = vst.msk [vmem:[#allocation0 + $0x40] ss:$-24 sm:$0x7] %vm1542_vm9, %v1541_v23   ;;  %1546 = vst.msk [vmem:[#allocation0 + $0x55] sm:$0x8] %vm1542_vm9, %v1541_v23   ;;  %vm1563_vm10 = vcmask 474552   ;;  %v1645_v28 = vpop.permute.xlu0 %1644  }
 0x116   :  { %vm1584_vm11 = vcmask 466352   ;;  %1565 = vst.msk [vmem:[#allocation0 + $0x20] ss:$-24 sm:$0x3] %vm1563_vm10, %v1562_v24   ;;  %vm1604_vm12 = vcmask 458152   ;;  %vm1625_vm13 = vcmask 449952  }
 0x117   :  { %1567 = vst.msk [vmem:[#allocation0 + $0x80] ss:$-24 sm:$0xc] %vm1563_vm10, %v1562_v24   ;;  %vm1646_vm14 = vcmask 441752   ;;  %vm1666_vm15 = vcmask 433552   ;;  %vm1687_vm3 = vcmask 425352   ;;  %v1707_v31 = vpop.permute.xlu1 %1706  }
 0x118   :  { %1585 = vst.msk [vmem:[#allocation0] ss:$72 sm:$0x3] %vm1584_vm11, %v1583_v25   ;;  %1587 = vst.msk [vmem:[#allocation0 + $0x60] ss:$-24 sm:$0xc] %vm1584_vm11, %v1583_v25  }
 0x119   :  { %1606 = vst.msk [vmem:[#allocation0 + $0x40] ss:$-24 sm:$0x7] %vm1604_vm12, %v1603_v26   ;;  %1608 = vst.msk [vmem:[#allocation0 + $0x55] sm:$0x8] %vm1604_vm12, %v1603_v26   ;;  %vm1708_vm4 = vcmask 417152   ;;  %v1686_v30 = vpop.permute.xlu0 %1685  }
 0x11a   :  { %1627 = vst.msk [vmem:[#allocation0 + $0x20] ss:$-24 sm:$0x3] %vm1625_vm13, %v1624_v27   ;;  %1629 = vst.msk [vmem:[#allocation0 + $0x80] ss:$-24 sm:$0xc] %vm1625_vm13, %v1624_v27  }
 0x11b   :  { %1647 = vst.msk [vmem:[#allocation0] ss:$72 sm:$0x3] %vm1646_vm14, %v1645_v28   ;;  %1649 = vst.msk [vmem:[#allocation0 + $0x60] ss:$-24 sm:$0xc] %vm1646_vm14, %v1645_v28   ;;  %v1748_v33 = vpop.permute.xlu1 %1747  }
 0x11c   :  { %1668 = vst.msk [vmem:[#allocation0 + $0x40] ss:$-24 sm:$0x7] %vm1666_vm15, %v1665_v29   ;;  %1670 = vst.msk [vmem:[#allocation0 + $0x55] sm:$0x8] %vm1666_vm15, %v1665_v29   ;;  %vm1728_vm5 = vcmask 408952  }
 0x11d   :  { %1689 = vst.msk [vmem:[#allocation0 + $0x20] ss:$-24 sm:$0x3] %vm1687_vm3, %v1686_v30   ;;  %1691 = vst.msk [vmem:[#allocation0 + $0x80] ss:$-24 sm:$0xc] %vm1687_vm3, %v1686_v30   ;;  %v1727_v32 = vpop.permute.xlu0 %1726  }
 0x11e   :  { %1709 = vst.msk [vmem:[#allocation0] ss:$72 sm:$0x3] %vm1708_vm4, %v1707_v31   ;;  %1711 = vst.msk [vmem:[#allocation0 + $0x60] ss:$-24 sm:$0xc] %vm1708_vm4, %v1707_v31  }
 0x11f   :  { %vm1749_vm6 = vcmask 400752   ;;  %1730 = vst.msk [vmem:[#allocation0 + $0x40] ss:$-24 sm:$0x7] %vm1728_vm5, %v1727_v32   ;;  %1732 = vst.msk [vmem:[#allocation0 + $0x55] sm:$0x8] %vm1728_vm5, %v1727_v32   ;;  %v1789_v35 = vpop.permute.xlu1 %1788  }
 0x120   :  { %1751 = vst.msk [vmem:[#allocation0 + $0x20] ss:$-24 sm:$0x3] %vm1749_vm6, %v1748_v33   ;;  %1753 = vst.msk [vmem:[#allocation0 + $0x80] ss:$-24 sm:$0xc] %vm1749_vm6, %v1748_v33  }
 0x121   :  { %vm1770_vm0 = vcmask 392552   ;;  %vm1790_vm7 = vcmask 384352   ;;  %v1769_v34 = vpop.permute.xlu0 %1768   ;;  %vm1811_vm1 = vcmask 376152   ;;  %vm1832_vm8 = vcmask 367952  }
 0x122   :  { %1771 = vst.msk [vmem:[#allocation0] ss:$72 sm:$0x3] %vm1770_vm0, %v1769_v34   ;;  %1773 = vst.msk [vmem:[#allocation0 + $0x60] ss:$-24 sm:$0xc] %vm1770_vm0, %v1769_v34  }
 0x123   :  { %1792 = vst.msk [vmem:[#allocation0 + $0x40] ss:$-24 sm:$0x7] %vm1790_vm7, %v1789_v35   ;;  %1794 = vst.msk [vmem:[#allocation0 + $0x55] sm:$0x8] %vm1790_vm7, %v1789_v35   ;;  %v1831_v37 = vpop.permute.xlu1 %1830   ;;  %vm1852_vm2 = vcmask 359752  }
 0x124   :  { %1833 = vst.msk [vmem:[#allocation0] ss:$72 sm:$0x3] %vm1832_vm8, %v1831_v37   ;;  %1835 = vst.msk [vmem:[#allocation0 + $0x60] ss:$-24 sm:$0xc] %vm1832_vm8, %v1831_v37  }
 0x125   :  { %v1810_v36 = vpop.permute.xlu0 %1809   ;;  %vm1873_vm9 = vcmask 351552   ;;  %vm1894_vm10 = vcmask 343352   ;;  %vm1914_vm11 = vcmask 335152   ;;  %vm1935_vm12 = vcmask 326952  }
 0x126   :  { %1813 = vst.msk [vmem:[#allocation0 + $0x20] ss:$-24 sm:$0x3] %vm1811_vm1, %v1810_v36   ;;  %1815 = vst.msk [vmem:[#allocation0 + $0x80] ss:$-24 sm:$0xc] %vm1811_vm1, %v1810_v36  }
 0x127   :  { %v1872_v39 = vpop.permute.xlu1 %1871   ;;  %vm1956_vm13 = vcmask 318752   ;;  %vm1976_vm14 = vcmask 310552   ;;  %vm1997_vm15 = vcmask 302352   ;;  %vm2018_vm3 = vcmask 294152  }
 0x128   :  { %1875 = vst.msk [vmem:[#allocation0 + $0x20] ss:$-24 sm:$0x3] %vm1873_vm9, %v1872_v39   ;;  %1877 = vst.msk [vmem:[#allocation0 + $0x80] ss:$-24 sm:$0xc] %vm1873_vm9, %v1872_v39  }
 0x129   :  { %v1851_v38 = vpop.permute.xlu0 %1850   ;;  %vm2038_vm4 = vcmask 285952   ;;  %vm2059_vm5 = vcmask 277752   ;;  %vm2080_vm6 = vcmask 269552   ;;  %vm2100_vm0 = vcmask 261352  }
 0x12a   :  { %1854 = vst.msk [vmem:[#allocation0 + $0x40] ss:$-24 sm:$0x7] %vm1852_vm2, %v1851_v38   ;;  %1856 = vst.msk [vmem:[#allocation0 + $0x55] sm:$0x8] %vm1852_vm2, %v1851_v38   ;;  %vm2121_vm7 = vcmask 253152  }
 0x12b   :  { %v1913_v41 = vpop.permute.xlu1 %1912   ;;  %vm2142_vm1 = vcmask 244952   ;;  %vm2162_vm8 = vcmask 236752   ;;  %vm2183_vm2 = vcmask 228552   ;;  %vm2204_vm9 = vcmask 220352  }
 0x12c   :  { %1916 = vst.msk [vmem:[#allocation0 + $0x40] ss:$-24 sm:$0x7] %vm1914_vm11, %v1913_v41   ;;  %1918 = vst.msk [vmem:[#allocation0 + $0x55] sm:$0x8] %vm1914_vm11, %v1913_v41   ;;  %vm2245_vm11 = vcmask 203952  }
 0x12d   :  { %v1893_v40 = vpop.permute.xlu0 %1892  }
 0x12e   :  { %1895 = vst.msk [vmem:[#allocation0] ss:$72 sm:$0x3] %vm1894_vm10, %v1893_v40   ;;  %1897 = vst.msk [vmem:[#allocation0 + $0x60] ss:$-24 sm:$0xc] %vm1894_vm10, %v1893_v40  }
 0x12f   :  { %v1955_v43 = vpop.permute.xlu1 %1954   ;;  %vm2224_vm10 = vcmask 212152  }
 0x130   :  { %1957 = vst.msk [vmem:[#allocation0] ss:$72 sm:$0x3] %vm1956_vm13, %v1955_v43   ;;  %1959 = vst.msk [vmem:[#allocation0 + $0x60] ss:$-24 sm:$0xc] %vm1956_vm13, %v1955_v43  }
 0x131   :  { %v1934_v42 = vpop.permute.xlu0 %1933   ;;  %vm2286_vm13 = vcmask 187552  }
 0x132   :  { %1937 = vst.msk [vmem:[#allocation0 + $0x20] ss:$-24 sm:$0x3] %vm1935_vm12, %v1934_v42   ;;  %1939 = vst.msk [vmem:[#allocation0 + $0x80] ss:$-24 sm:$0xc] %vm1935_vm12, %v1934_v42  }
 0x133   :  { %v1996_v45 = vpop.permute.xlu1 %1995   ;;  %vm2266_vm12 = vcmask 195752  }
 0x134   :  { %1999 = vst.msk [vmem:[#allocation0 + $0x20] ss:$-24 sm:$0x3] %vm1997_vm15, %v1996_v45   ;;  %2001 = vst.msk [vmem:[#allocation0 + $0x80] ss:$-24 sm:$0xc] %vm1997_vm15, %v1996_v45  }
 0x135   :  { %v1975_v44 = vpop.permute.xlu0 %1974   ;;  %vm2328_vm15 = vcmask 171152  }
 0x136   :  { %1978 = vst.msk [vmem:[#allocation0 + $0x40] ss:$-24 sm:$0x7] %vm1976_vm14, %v1975_v44   ;;  %1980 = vst.msk [vmem:[#allocation0 + $0x55] sm:$0x8] %vm1976_vm14, %v1975_v44   ;;  %vm2307_vm14 = vcmask 179352  }
 0x139   :  { %v2017_v46 = vpop.permute.xlu0 %2016  }
 0x13a   :  { %v2037_v47 = vpop.permute.xlu1 %2036   ;;  %2019 = vst.msk [vmem:[#allocation0] ss:$72 sm:$0x3] %vm2018_vm3, %v2017_v46   ;;  %2021 = vst.msk [vmem:[#allocation0 + $0x60] ss:$-24 sm:$0xc] %vm2018_vm3, %v2017_v46  }
 0x13b   :  { %2040 = vst.msk [vmem:[#allocation0 + $0x40] ss:$-24 sm:$0x7] %vm2038_vm4, %v2037_v47   ;;  %2042 = vst.msk [vmem:[#allocation0 + $0x55] sm:$0x8] %vm2038_vm4, %v2037_v47   ;;  %vm2348_vm3 = vcmask 162952  }
 0x13c   :  { %vm2369_vm4 = vcmask 154752  }
 0x13d   :  { %v2058_v48 = vpop.permute.xlu0 %2057  }
 0x13e   :  { %v2079_v49 = vpop.permute.xlu1 %2078   ;;  %2061 = vst.msk [vmem:[#allocation0 + $0x20] ss:$-24 sm:$0x3] %vm2059_vm5, %v2058_v48   ;;  %2063 = vst.msk [vmem:[#allocation0 + $0x80] ss:$-24 sm:$0xc] %vm2059_vm5, %v2058_v48  }
 0x13f   :  { %2081 = vst.msk [vmem:[#allocation0] ss:$72 sm:$0x3] %vm2080_vm6, %v2079_v49   ;;  %2083 = vst.msk [vmem:[#allocation0 + $0x60] ss:$-24 sm:$0xc] %vm2080_vm6, %v2079_v49  }
 0x140   :  { %vm2390_vm5 = vcmask 146552   ;;  %vm2410_vm6 = vcmask 138352  }
 0x141   :  { %v2099_v50 = vpop.permute.xlu0 %2098  }
 0x142   :  { %v2120_v51 = vpop.permute.xlu1 %2119   ;;  %2102 = vst.msk [vmem:[#allocation0 + $0x40] ss:$-24 sm:$0x7] %vm2100_vm0, %v2099_v50   ;;  %2104 = vst.msk [vmem:[#allocation0 + $0x55] sm:$0x8] %vm2100_vm0, %v2099_v50   ;;  %vm2431_vm0 = vcmask 130152  }
 0x143   :  { %2123 = vst.msk [vmem:[#allocation0 + $0x20] ss:$-24 sm:$0x3] %vm2121_vm7, %v2120_v51   ;;  %2125 = vst.msk [vmem:[#allocation0 + $0x80] ss:$-24 sm:$0xc] %vm2121_vm7, %v2120_v51  }
 0x144   :  { %vm2452_vm7 = vcmask 121952  }
 0x146   :  { %v2141_v52 = vpop.permute.xlu0 %2140  }
 0x147   :  { %2143 = vst.msk [vmem:[#allocation0] ss:$72 sm:$0x3] %vm2142_vm1, %v2141_v52   ;;  %2145 = vst.msk [vmem:[#allocation0 + $0x60] ss:$-24 sm:$0xc] %vm2142_vm1, %v2141_v52  }
 0x148   :  { %vm2472_vm1 = vcmask 113752  }
 0x149   :  { %v2161_v53 = vpop.permute.xlu1 %2160  }
 0x14a   :  { %2164 = vst.msk [vmem:[#allocation0 + $0x40] ss:$-24 sm:$0x7] %vm2162_vm8, %v2161_v53   ;;  %2166 = vst.msk [vmem:[#allocation0 + $0x55] sm:$0x8] %vm2162_vm8, %v2161_v53   ;;  %vm2493_vm8 = vcmask 105552  }
 0x14c   :  { %v2182_v54 = vpop.permute.xlu0 %2181  }
 0x14d   :  { %2185 = vst.msk [vmem:[#allocation0 + $0x20] ss:$-24 sm:$0x3] %vm2183_vm2, %v2182_v54   ;;  %2187 = vst.msk [vmem:[#allocation0 + $0x80] ss:$-24 sm:$0xc] %vm2183_vm2, %v2182_v54  }
 0x14e   :  { %v2203_v55 = vpop.permute.xlu1 %2202   ;;  %vm2514_vm2 = vcmask 97352  }
 0x14f   :  { %2205 = vst.msk [vmem:[#allocation0] ss:$72 sm:$0x3] %vm2204_vm9, %v2203_v55   ;;  %2207 = vst.msk [vmem:[#allocation0 + $0x60] ss:$-24 sm:$0xc] %vm2204_vm9, %v2203_v55  }
 0x150   :  { %v2223_v56 = vpop.permute.xlu0 %2222   ;;  %vm2534_vm9 = vcmask 89152  }
 0x151   :  { %2226 = vst.msk [vmem:[#allocation0 + $0x40] ss:$-24 sm:$0x7] %vm2224_vm10, %v2223_v56   ;;  %2228 = vst.msk [vmem:[#allocation0 + $0x55] sm:$0x8] %vm2224_vm10, %v2223_v56   ;;  %vm2555_vm10 = vcmask 80952  }
 0x153   :  { %v2244_v57 = vpop.permute.xlu1 %2243  }
 0x154   :  { %2247 = vst.msk [vmem:[#allocation0 + $0x20] ss:$-24 sm:$0x3] %vm2245_vm11, %v2244_v57   ;;  %2249 = vst.msk [vmem:[#allocation0 + $0x80] ss:$-24 sm:$0xc] %vm2245_vm11, %v2244_v57  }
 0x155   :  { %vm2576_vm11 = vcmask 72752  }
 0x158   :  { %v2265_v58 = vpop.permute.xlu0 %2264  }
 0x159   :  { %v2285_v59 = vpop.permute.xlu1 %2284   ;;  %2267 = vst.msk [vmem:[#allocation0] ss:$72 sm:$0x3] %vm2266_vm12, %v2265_v58   ;;  %2269 = vst.msk [vmem:[#allocation0 + $0x60] ss:$-24 sm:$0xc] %vm2266_vm12, %v2265_v58  }
 0x15a   :  { %2288 = vst.msk [vmem:[#allocation0 + $0x40] ss:$-24 sm:$0x7] %vm2286_vm13, %v2285_v59   ;;  %2290 = vst.msk [vmem:[#allocation0 + $0x55] sm:$0x8] %vm2286_vm13, %v2285_v59   ;;  %vm2596_vm12 = vcmask 64552  }
 0x15b   :  { %vm2617_vm13 = vcmask 56352  }
 0x15c   :  { %v2306_v60 = vpop.permute.xlu0 %2305  }
 0x15d   :  { %2309 = vst.msk [vmem:[#allocation0 + $0x20] ss:$-24 sm:$0x3] %vm2307_vm14, %v2306_v60   ;;  %2311 = vst.msk [vmem:[#allocation0 + $0x80] ss:$-24 sm:$0xc] %vm2307_vm14, %v2306_v60  }
 0x15e   :  { %v2327_v61 = vpop.permute.xlu1 %2326   ;;  %vm2638_vm14 = vcmask 48152  }
 0x15f   :  { %2329 = vst.msk [vmem:[#allocation0] ss:$72 sm:$0x3] %vm2328_vm15, %v2327_v61   ;;  %2331 = vst.msk [vmem:[#allocation0 + $0x60] ss:$-24 sm:$0xc] %vm2328_vm15, %v2327_v61  }
 0x160   :  { %v2347_v62 = vpop.permute.xlu0 %2346   ;;  %vm2658_vm15 = vcmask 39952  }
 0x161   :  { %2350 = vst.msk [vmem:[#allocation0 + $0x40] ss:$-24 sm:$0x7] %vm2348_vm3, %v2347_v62   ;;  %2352 = vst.msk [vmem:[#allocation0 + $0x55] sm:$0x8] %vm2348_vm3, %v2347_v62   ;;  %vm2679_vm3 = vcmask 31752  }
 0x163   :  { %v2368_v63 = vpop.permute.xlu1 %2367  }
 0x164   :  { %2371 = vst.msk [vmem:[#allocation0 + $0x20] ss:$-24 sm:$0x3] %vm2369_vm4, %v2368_v63   ;;  %2373 = vst.msk [vmem:[#allocation0 + $0x80] ss:$-24 sm:$0xc] %vm2369_vm4, %v2368_v63  }
 0x168   :  { %v2389_v0 = vpop.permute.xlu0 %2388   ;;  %v2409_v1 = vpop.permute.xlu1 %2408  }
 0x169   :  { %2391 = vst.msk [vmem:[#allocation0] ss:$72 sm:$0x3] %vm2390_vm5, %v2389_v0   ;;  %2393 = vst.msk [vmem:[#allocation0 + $0x60] ss:$-24 sm:$0xc] %vm2390_vm5, %v2389_v0  }
 0x16a   :  { %2412 = vst.msk [vmem:[#allocation0 + $0x40] ss:$-24 sm:$0x7] %vm2410_vm6, %v2409_v1   ;;  %2414 = vst.msk [vmem:[#allocation0 + $0x55] sm:$0x8] %vm2410_vm6, %v2409_v1  }
 0x16c   :  { %v2430_v2 = vpop.permute.xlu0 %2429  }
 0x16d   :  { %v2451_v3 = vpop.permute.xlu1 %2450   ;;  %2433 = vst.msk [vmem:[#allocation0 + $0x20] ss:$-24 sm:$0x3] %vm2431_vm0, %v2430_v2   ;;  %2435 = vst.msk [vmem:[#allocation0 + $0x80] ss:$-24 sm:$0xc] %vm2431_vm0, %v2430_v2  }
 0x16e   :  { %2453 = vst.msk [vmem:[#allocation0] ss:$72 sm:$0x3] %vm2452_vm7, %v2451_v3   ;;  %2455 = vst.msk [vmem:[#allocation0 + $0x60] ss:$-24 sm:$0xc] %vm2452_vm7, %v2451_v3  }
 0x170   :  { %v2471_v4 = vpop.permute.xlu0 %2470  }
 0x171   :  { %v2492_v5 = vpop.permute.xlu1 %2491   ;;  %2474 = vst.msk [vmem:[#allocation0 + $0x40] ss:$-24 sm:$0x7] %vm2472_vm1, %v2471_v4   ;;  %2476 = vst.msk [vmem:[#allocation0 + $0x55] sm:$0x8] %vm2472_vm1, %v2471_v4  }
 0x172   :  { %2495 = vst.msk [vmem:[#allocation0 + $0x20] ss:$-24 sm:$0x3] %vm2493_vm8, %v2492_v5   ;;  %2497 = vst.msk [vmem:[#allocation0 + $0x80] ss:$-24 sm:$0xc] %vm2493_vm8, %v2492_v5  }
 0x175   :  { %v2513_v6 = vpop.permute.xlu0 %2512  }
 0x176   :  { %2515 = vst.msk [vmem:[#allocation0] ss:$72 sm:$0x3] %vm2514_vm2, %v2513_v6   ;;  %2517 = vst.msk [vmem:[#allocation0 + $0x60] ss:$-24 sm:$0xc] %vm2514_vm2, %v2513_v6  }
 0x178   :  { %v2533_v7 = vpop.permute.xlu1 %2532  }
 0x179   :  { %2536 = vst.msk [vmem:[#allocation0 + $0x40] ss:$-24 sm:$0x7] %vm2534_vm9, %v2533_v7   ;;  %2538 = vst.msk [vmem:[#allocation0 + $0x55] sm:$0x8] %vm2534_vm9, %v2533_v7  }
 0x17a   :  { %v2554_v8 = vpop.permute.xlu0 %2553  }
 0x17b   :  { %2557 = vst.msk [vmem:[#allocation0 + $0x20] ss:$-24 sm:$0x3] %vm2555_vm10, %v2554_v8   ;;  %2559 = vst.msk [vmem:[#allocation0 + $0x80] ss:$-24 sm:$0xc] %vm2555_vm10, %v2554_v8  }
 0x17d   :  { %v2575_v9 = vpop.permute.xlu1 %2574  }
 0x17e   :  { %2577 = vst.msk [vmem:[#allocation0] ss:$72 sm:$0x3] %vm2576_vm11, %v2575_v9   ;;  %2579 = vst.msk [vmem:[#allocation0 + $0x60] ss:$-24 sm:$0xc] %vm2576_vm11, %v2575_v9   ;;  %v2595_v10 = vpop.permute.xlu0 %2594  }
 0x17f   :  { %2598 = vst.msk [vmem:[#allocation0 + $0x40] ss:$-24 sm:$0x7] %vm2596_vm12, %v2595_v10   ;;  %2600 = vst.msk [vmem:[#allocation0 + $0x55] sm:$0x8] %vm2596_vm12, %v2595_v10  }
 0x181   :  { %v2616_v11 = vpop.permute.xlu1 %2615  }
 0x182   :  { %2619 = vst.msk [vmem:[#allocation0 + $0x20] ss:$-24 sm:$0x3] %vm2617_vm13, %v2616_v11   ;;  %2621 = vst.msk [vmem:[#allocation0 + $0x80] ss:$-24 sm:$0xc] %vm2617_vm13, %v2616_v11   ;;  %v2637_v12 = vpop.permute.xlu0 %2636  }
 0x183   :  { %2639 = vst.msk [vmem:[#allocation0] ss:$72 sm:$0x3] %vm2638_vm14, %v2637_v12   ;;  %2641 = vst.msk [vmem:[#allocation0 + $0x60] ss:$-24 sm:$0xc] %vm2638_vm14, %v2637_v12  }
 0x185   :  { %v2657_v13 = vpop.permute.xlu1 %2656  }
 0x186   :  { %2660 = vst.msk [vmem:[#allocation0 + $0x40] ss:$-24 sm:$0x7] %vm2658_vm15, %v2657_v13   ;;  %2662 = vst.msk [vmem:[#allocation0 + $0x55] sm:$0x8] %vm2658_vm15, %v2657_v13   ;;  %v2678_v14 = vpop.permute.xlu0 %2677  }
 0x187   :  { %2681 = vst.msk [vmem:[#allocation0 + $0x20] ss:$-24 sm:$0x3] %vm2679_vm3, %v2678_v14   ;;  %2683 = vst.msk [vmem:[#allocation0 + $0x80] ss:$-24 sm:$0xc] %vm2679_vm3, %v2678_v14  }
 0x18a   :  { %v2687_v15 = vld [vmem:[#allocation0] sm:$0x1]  ;;  %v2702_v16 = vld [vmem:[#allocation0 + $0x18] sm:$0x1]  ;;  %v2720_v17 = vld [vmem:[#allocation0 + $0x30] sm:$0x1] }
 0x18b   :  { %2689 = vst [vmem:[%s5619_s1] sm:$0x1] %v2687_v15  ;;  %3286 = vst [vmem:[%s5619_s1 + $0x3] sm:$0x1] %v2702_v16  ;;  %v2738_v18 = vld [vmem:[#allocation0 + $0x48] sm:$0x1] }
 0x18c   :  { %3289 = vst [vmem:[%s5619_s1 + $0x6] sm:$0x1] %v2720_v17  ;;  %3292 = vst [vmem:[%s5619_s1 + $0x9] sm:$0x1] %v2738_v18 }
 0x18d   :  { %v2696_v19 = vld [vmem:[#allocation0 + $0x10] sm:$0x1]  ;;  %v2714_v20 = vld [vmem:[#allocation0 + $0x28] sm:$0x1]  ;;  %v2732_v21 = vld [vmem:[#allocation0 + $0x40] sm:$0x1] }
 0x18e   :  { %3285 = vst [vmem:[%s5619_s1 + $0x2] sm:$0x1] %v2696_v19  ;;  %3288 = vst [vmem:[%s5619_s1 + $0x5] sm:$0x1] %v2714_v20  ;;  %v2750_v22 = vld [vmem:[#allocation0 + $0x58] sm:$0x1] }
 0x18f   :  { %3291 = vst [vmem:[%s5619_s1 + $0x8] sm:$0x1] %v2732_v21  ;;  %3294 = vst [vmem:[%s5619_s1 + $0xb] sm:$0x1] %v2750_v22  ;;  %v2691_v23 = vld [vmem:[#allocation0 + $0x8] sm:$0x1] }
 0x190   :  { %v2708_v24 = vld [vmem:[#allocation0 + $0x20] sm:$0x1]  ;;  %v2726_v25 = vld [vmem:[#allocation0 + $0x38] sm:$0x1]  ;;  %3284 = vst [vmem:[%s5619_s1 + $0x1] sm:$0x1] %v2691_v23 }
 0x191   :  { %3287 = vst [vmem:[%s5619_s1 + $0x4] sm:$0x1] %v2708_v24  ;;  %3290 = vst [vmem:[%s5619_s1 + $0x7] sm:$0x1] %v2726_v25  ;;  %v2744_v26 = vld [vmem:[#allocation0 + $0x50] sm:$0x1] }
 0x192   :  { %3293 = vst [vmem:[%s5619_s1 + $0xa] sm:$0x1] %v2744_v26 }

// kernel: _lambda_.19
= control target key start
LH: loop header
LB: loop body
LE: loop exit
PB: predicated region body
PF: predicated region fallthrough
CT: control target
= control target key end

     0   :  { %v39_v0 = vlaneseq  ;;  %s408_s1 = inlined_call_operand.vmem [shape: f32[1,1536], index: 1, kind: input, shape index: {}]   ;;  %s409_s0 = inlined_call_operand.vmem [shape: f32[16,1536], index: 0, kind: input, shape index: {}]   ;;  %s410_s2 = inlined_call_operand.vmem [shape: f32[16,1536], index: 2, kind: output, shape index: {}]  }
   0x1   :  { %v35_v2 = vld [vmem:[%s408_s1] sm:$0xff]  ;;  %v12_v8 = vld [vmem:[%s409_s0 + $0x8] sm:$0xff]  ;;  %v13_v9 = vld [vmem:[%s409_s0 + $0x10] sm:$0xff] }
   0x2   :  { %v40_v1 = vshrl.u32 %v39_v0, 7  ;;  %v11_v3 = vld [vmem:[%s409_s0] sm:$0xff]  ;;  %v14_v17 = vld [vmem:[%s409_s0 + $0x18] sm:$0xff]  ;;  %v36_v22 = vld [vmem:[%s408_s1 + $0x8] sm:$0xf] }
   0x3   :  { %v15_v19 = vld [vmem:[%s409_s0 + $0x20] sm:$0xff]  ;;  %v16_v26 = vld [vmem:[%s409_s0 + $0x28] sm:$0xff]  ;;  %v17_v29 = vld [vmem:[%s409_s0 + $0x30] sm:$0xff] }
   0x4   :  { %v41_v4 = vsub.s32 0, %v40_v1  ;;  %v45_v5 = vsub.s32 1, %v40_v1  ;;  %v49_v6 = vsub.s32 2, %v40_v1  ;;  %v53_v7 = vsub.s32 3, %v40_v1  ;;  %v18_v32 = vld [vmem:[%s409_s0 + $0x38] sm:$0xff]  ;;  %v19_v35 = vld [vmem:[%s409_s0 + $0x40] sm:$0xff] }
   0x5   :  { %v57_v10 = vsub.s32 4, %v40_v1  ;;  %v61_v11 = vsub.s32 5, %v40_v1  ;;  %v65_v12 = vsub.s32 6, %v40_v1  ;;  %v69_v13 = vsub.s32 7, %v40_v1  ;;  %v20_v38 = vld [vmem:[%s409_s0 + $0x48] sm:$0xff]  ;;  %v21_v41 = vld [vmem:[%s409_s0 + $0x50] sm:$0xff] }
   0x6   :  { %v42_v14 = vrot.slane %v35_v2, %v41_v4  ;;  %v46_v15 = vrot.slane %v35_v2, %v45_v5  ;;  %v50_v16 = vrot.slane %v35_v2, %v49_v6  ;;  %v54_v18 = vrot.slane %v35_v2, %v53_v7  ;;  %v22_v44 = vld [vmem:[%s409_s0 + $0x58] sm:$0xff]  ;;  %v23_v46 = vld [vmem:[%s409_s0 + $0x60] sm:$0xff]  ;;  %v24_v48 = vld [vmem:[%s409_s0 + $0x68] sm:$0xff] }
   0x7   :  { %v58_v20 = vrot.slane %v35_v2, %v57_v10  ;;  %v62_v21 = vrot.slane %v35_v2, %v61_v11  ;;  %v66_v27 = vrot.slane %v35_v2, %v65_v12  ;;  %v265_v30 = vrot.slane %v35_v2, %v69_v13  ;;  %v25_v50 = vld [vmem:[%s409_s0 + $0x70] sm:$0xff]  ;;  %v26_v52 = vld [vmem:[%s409_s0 + $0x78] sm:$0xff]  ;;  %v27_v54 = vld [vmem:[%s409_s0 + $0x80] sm:$0xff] }
   0x8   :  { %v99_v23 = vadd.f32 %v42_v14, %v11_v3  ;;  %v100_v24 = vadd.f32 %v46_v15, %v12_v8  ;;  %v101_v25 = vadd.f32 %v50_v16, %v13_v9  ;;  %v102_v28 = vadd.f32 %v54_v18, %v14_v17  ;;  %v28_v57 = vld [vmem:[%s409_s0 + $0x88] sm:$0xff]  ;;  %v29_v60 = vld [vmem:[%s409_s0 + $0x90] sm:$0xff]  ;;  %v30_v63 = vld [vmem:[%s409_s0 + $0x98] sm:$0xff] }
   0x9   :  { %v103_v31 = vadd.f32 %v58_v20, %v15_v19  ;;  %v270_v33 = vrot.slane %v36_v22, %v41_v4  ;;  %v104_v34 = vadd.f32 %v62_v21, %v16_v26  ;;  %v275_v36 = vrot.slane %v36_v22, %v45_v5  ;;  %v31_v2 = vld [vmem:[%s409_s0 + $0xa0] sm:$0xff]  ;;  %v32_v5 = vld [vmem:[%s409_s0 + $0xa8] sm:$0xff]  ;;  %v33_v8 = vld [vmem:[%s409_s0 + $0xb0] sm:$0xff] }
   0xa   :  { %175 = vtanh.f32 %v99_v23  ;;  %v105_v37 = vadd.f32 %v66_v27, %v17_v29  ;;  %v280_v39 = vrot.slane %v36_v22, %v49_v6  ;;  %v106_v40 = vadd.f32 %v265_v30, %v18_v32  ;;  %v34_v11 = vld [vmem:[%s409_s0 + $0xb8] sm:$0xff] }
   0xb   :  { %177 = vtanh.f32 %v100_v24  ;;  %v286_v42 = vrot.slane %v36_v22, %v53_v7  ;;  %v107_v43 = vadd.f32 %v270_v33, %v19_v35  ;;  %v108_v45 = vadd.f32 %v275_v36, %v20_v38 }
   0xc   :  { %179 = vtanh.f32 %v101_v25  ;;  %v109_v47 = vadd.f32 %v280_v39, %v21_v41  ;;  %v111_v51 = vadd.f32 %v42_v14, %v23_v46  ;;  %v112_v53 = vadd.f32 %v46_v15, %v24_v48 }
   0xd   :  { %181 = vtanh.f32 %v102_v28  ;;  %v110_v49 = vadd.f32 %v286_v42, %v22_v44  ;;  %v113_v56 = vadd.f32 %v50_v16, %v25_v50  ;;  %v114_v59 = vadd.f32 %v54_v18, %v26_v52 }
   0xe   :  { %183 = vtanh.f32 %v103_v31  ;;  %v115_v62 = vadd.f32 %v58_v20, %v27_v54  ;;  %v116_v1 = vadd.f32 %v62_v21, %v28_v57  ;;  %v117_v4 = vadd.f32 %v66_v27, %v29_v60 }
   0xf   :  { %185 = vtanh.f32 %v104_v34  ;;  %v118_v7 = vadd.f32 %v265_v30, %v30_v63  ;;  %v119_v10 = vadd.f32 %v270_v33, %v31_v2  ;;  %v120_v13 = vadd.f32 %v275_v36, %v32_v5 }
  0x10   :  { %187 = vtanh.f32 %v105_v37  ;;  %v121_v15 = vadd.f32 %v280_v39, %v33_v8  ;;  %v122_v17 = vadd.f32 %v286_v42, %v34_v11 }
  0x11   :  { %189 = vtanh.f32 %v106_v40 }
  0x12   :  { %191 = vtanh.f32 %v107_v43 }
  0x13   :  { %193 = vtanh.f32 %v108_v45 }
  0x14   :  { %v176_v55 = vpop.eup %175  ;;  %195 = vtanh.f32 %v109_v47 }
  0x15   :  { %v178_v58 = vpop.eup %177  ;;  %147 = vst [vmem:[%s410_s2] sm:$0xff] %v176_v55  ;;  %197 = vtanh.f32 %v110_v49 }
  0x16   :  { %v180_v61 = vpop.eup %179  ;;  %148 = vst [vmem:[%s410_s2 + $0x8] sm:$0xff] %v178_v58  ;;  %199 = vtanh.f32 %v111_v51 }
  0x17   :  { %v182_v0 = vpop.eup %181  ;;  %149 = vst [vmem:[%s410_s2 + $0x10] sm:$0xff] %v180_v61  ;;  %201 = vtanh.f32 %v112_v53 }
  0x18   :  { %v184_v3 = vpop.eup %183  ;;  %150 = vst [vmem:[%s410_s2 + $0x18] sm:$0xff] %v182_v0  ;;  %203 = vtanh.f32 %v113_v56 }
  0x19   :  { %v186_v6 = vpop.eup %185  ;;  %151 = vst [vmem:[%s410_s2 + $0x20] sm:$0xff] %v184_v3  ;;  %205 = vtanh.f32 %v114_v59 }
  0x1a   :  { %v188_v9 = vpop.eup %187  ;;  %152 = vst [vmem:[%s410_s2 + $0x28] sm:$0xff] %v186_v6  ;;  %207 = vtanh.f32 %v115_v62 }
  0x1b   :  { %v190_v12 = vpop.eup %189  ;;  %153 = vst [vmem:[%s410_s2 + $0x30] sm:$0xff] %v188_v9  ;;  %209 = vtanh.f32 %v116_v1 }
  0x1c   :  { %v192_v14 = vpop.eup %191  ;;  %154 = vst [vmem:[%s410_s2 + $0x38] sm:$0xff] %v190_v12  ;;  %211 = vtanh.f32 %v117_v4 }
  0x1d   :  { %v194_v16 = vpop.eup %193  ;;  %155 = vst [vmem:[%s410_s2 + $0x40] sm:$0xff] %v192_v14  ;;  %213 = vtanh.f32 %v118_v7 }
  0x1e   :  { %v196_v18 = vpop.eup %195  ;;  %156 = vst [vmem:[%s410_s2 + $0x48] sm:$0xff] %v194_v16  ;;  %215 = vtanh.f32 %v119_v10 }
  0x1f   :  { %v198_v19 = vpop.eup %197  ;;  %157 = vst [vmem:[%s410_s2 + $0x50] sm:$0xff] %v196_v18  ;;  %217 = vtanh.f32 %v120_v13 }
  0x20   :  { %v200_v20 = vpop.eup %199  ;;  %158 = vst [vmem:[%s410_s2 + $0x58] sm:$0xff] %v198_v19  ;;  %219 = vtanh.f32 %v121_v15 }
  0x21   :  { %v202_v21 = vpop.eup %201  ;;  %159 = vst [vmem:[%s410_s2 + $0x60] sm:$0xff] %v200_v20  ;;  %221 = vtanh.f32 %v122_v17 }
  0x22   :  { %v204_v22 = vpop.eup %203  ;;  %160 = vst [vmem:[%s410_s2 + $0x68] sm:$0xff] %v202_v21 }
  0x23   :  { %v206_v23 = vpop.eup %205  ;;  %161 = vst [vmem:[%s410_s2 + $0x70] sm:$0xff] %v204_v22 }
  0x24   :  { %v208_v24 = vpop.eup %207  ;;  %162 = vst [vmem:[%s410_s2 + $0x78] sm:$0xff] %v206_v23 }
  0x25   :  { %v210_v25 = vpop.eup %209  ;;  %163 = vst [vmem:[%s410_s2 + $0x80] sm:$0xff] %v208_v24 }
  0x26   :  { %v212_v26 = vpop.eup %211  ;;  %164 = vst [vmem:[%s410_s2 + $0x88] sm:$0xff] %v210_v25 }
  0x27   :  { %v214_v27 = vpop.eup %213  ;;  %165 = vst [vmem:[%s410_s2 + $0x90] sm:$0xff] %v212_v26 }
  0x28   :  { %v216_v28 = vpop.eup %215  ;;  %166 = vst [vmem:[%s410_s2 + $0x98] sm:$0xff] %v214_v27 }
  0x29   :  { %v218_v29 = vpop.eup %217  ;;  %167 = vst [vmem:[%s410_s2 + $0xa0] sm:$0xff] %v216_v28 }
  0x2a   :  { %v220_v30 = vpop.eup %219  ;;  %168 = vst [vmem:[%s410_s2 + $0xa8] sm:$0xff] %v218_v29 }
  0x2b   :  { %v222_v31 = vpop.eup %221  ;;  %169 = vst [vmem:[%s410_s2 + $0xb0] sm:$0xff] %v220_v30 }
  0x2c   :  { %170 = vst [vmem:[%s410_s2 + $0xb8] sm:$0xff] %v222_v31 }

</bundles_post_ra>
